<compile_context>
chip_gen: v5e
topology: v5e:2x2
jax: 0.10.0
libtpu: 0.0.40
codegen_flags: <defaults>
</compile_context>

<pallas_src>
import functools

import jax
import jax.numpy as jnp
from jax.experimental import pallas as pl
from jax.experimental.pallas import tpu as pltpu


# Raised scoped-VMEM limit: large row tiles exceed v5e's 16 MiB default; 48 MiB
# still leaves headroom under v7x's 64 MiB physical VMEM per TensorCore.
_VMEM_LIMIT_BYTES = 48 * 1024 * 1024


def _row_tile(H, cap):
    """Largest row tile <= cap that divides H."""
    for t in (64, 32, 16, 8, 4, 2):
        if t <= cap and H % t == 0:
            return t
    return H


# ---------------------------------------------------------------------------
# In-kernel helpers
# ---------------------------------------------------------------------------
def _assemble_halo(top, mid, bot, r, n_r):
    """(1,W,C) + (TH,W,C) + (1,W,C) row groups -> zero-padded (TH+2, W+2, C)."""
    top = top * (r > 0).astype(top.dtype)          # zero at the true image top
    bot = bot * (r < n_r - 1).astype(bot.dtype)    # zero at the true image bottom
    xm = jnp.concatenate([top, mid, bot], axis=0)  # (TH+2, W, C)
    zc = jnp.zeros((xm.shape[0], 1, xm.shape[2]), xm.dtype)
    return jnp.concatenate([zc, xm, zc], axis=1)   # (TH+2, W+2, C)


def _conv3x3_im2col(xp, w9, TH, W):
    """3x3 'same' conv with all 9 taps folded into one MXU contraction.

    xp: (TH+2, W+2, Cin) bf16, w9: (9*Cin, Cout) bf16 -> (TH*W, Cout) f32.
    Channel order of the patch is (dy, dx, cin), matching w.reshape(9*Cin, Cout)
    of an HWIO (3,3,Cin,Cout) weight.
    """
    cin = xp.shape[-1]
    # dx fold first (3 sublane-shifted copies), then cheap leading-dim dy fold.
    xdx = jnp.concatenate(
        [xp[:, 0:W, :], xp[:, 1:W + 1, :], xp[:, 2:W + 2, :]], axis=-1)   # (TH+2, W, 3*Cin)
    patch = jnp.concatenate(
        [xdx[0:TH], xdx[1:TH + 1], xdx[2:TH + 2]], axis=-1)               # (TH, W, 9*Cin)
    patch = patch.reshape(TH * W, 9 * cin)
    return jnp.dot(patch, w9, preferred_element_type=jnp.float32)


# ---------------------------------------------------------------------------
# Kernel 1: [optional BN+ReLU prologue] -> 3x3 conv (no bias; BN follows)
#           -> y (bf16) + per-tile BN partial stats
# ---------------------------------------------------------------------------
def _conv_bn_kernel(top_ref, mid_ref, bot_ref, w_ref, scale_ref, shift_ref,
                    y_ref, stats_ref, *, TH, W, prologue, add_ones):
    r = pl.program_id(1)
    n_r = pl.num_programs(1)

    if prologue:
        scale = scale_ref[...]
        shift = shift_ref[...]

        def act(ref):
            v = jnp.maximum(ref[0].astype(jnp.float32) * scale + shift, 0.0)
            return v.astype(jnp.bfloat16)
    else:
        def act(ref):
            return ref[0].astype(jnp.bfloat16)

    top, mid, bot = act(top_ref), act(mid_ref), act(bot_ref)
    if add_ones:
        # In-bounds ones channel (the message fold target).  _assemble_halo's
        # border masking / zero columns make it exactly the padding indicator.
        def cat1(x):
            return jnp.concatenate(
                [x, jnp.ones(x.shape[:-1] + (1,), x.dtype)], axis=-1)
        top, mid, bot = cat1(top), cat1(mid), cat1(bot)

    xp = _assemble_halo(top, mid, bot, r, n_r)
    y = _conv3x3_im2col(xp, w_ref[0], TH, W)              # (TH*W, Cout) f32

    # Per-tile BN partials: sum and tile-centered sum of squares (stable).
    cout = y.shape[-1]
    inv_n = 1.0 / float(TH * W)
    s = jnp.sum(y, axis=0, keepdims=True)                 # (1, Cout)
    mu = s * inv_n
    q = jnp.sum(jnp.square(y - mu), axis=0, keepdims=True)
    stats_ref[...] = jnp.concatenate([s, q], axis=0).reshape(1, 1, 2, cout)
    y_ref[...] = y.reshape(1, TH, W, cout).astype(y_ref.dtype)


# ---------------------------------------------------------------------------
# Kernel 2: [BN+ReLU(x) ++ image] -> before_output 3x3 conv (single merged
#           contraction) -> fused 1x1 output_layer epilogue
# ---------------------------------------------------------------------------
def _conv_final_kernel(x_top, x_mid, x_bot, i_top, i_mid, i_bot,
                       w_ref, b_ref, scale_ref, shift_ref, w1_ref, b1_ref,
                       o_ref, *, TH, W):
    r = pl.program_id(1)
    n_r = pl.num_programs(1)
    scale = scale_ref[...]
    shift = shift_ref[...]

    def act(ref):
        v = jnp.maximum(ref[0].astype(jnp.float32) * scale + shift, 0.0)
        return v.astype(jnp.bfloat16)

    def cat(xr, ir):  # [BN+ReLU(x) (64ch), image (3ch)] per row group
        return jnp.concatenate([act(xr), ir[0].astype(jnp.bfloat16)], axis=-1)

    xp = _assemble_halo(cat(x_top, i_top), cat(x_mid, i_mid),
                        cat(x_bot, i_bot), r, n_r)                      # (TH+2, W+2, 67)
    h = _conv3x3_im2col(xp, w_ref[0], TH, W) + b_ref[...].astype(jnp.float32)  # (TH*W, 64)

    # Fused output_layer 1x1 conv (f32, K=64, N=3 -> negligible cost).
    out = jnp.dot(h, w1_ref[0], preferred_element_type=jnp.float32) + b1_ref[...]
    o_ref[...] = out.reshape(1, TH, W, out.shape[-1]).astype(o_ref.dtype)


# ---------------------------------------------------------------------------
# pallas_call wrappers
# ---------------------------------------------------------------------------
def _halo_specs(TH, W, C, H):
    """Center block + clamped 1-row halo blocks for a (B, H, W, C) array."""
    top = pl.BlockSpec((1, 1, W, C),
                       lambda b, r: (b, jnp.maximum(r * TH - 1, 0), 0, 0))
    mid = pl.BlockSpec((1, TH, W, C), lambda b, r: (b, r, 0, 0))
    bot = pl.BlockSpec((1, 1, W, C),
                       lambda b, r: (b, jnp.minimum(r * TH + TH, H - 1), 0, 0))
    return [top, mid, bot]


def conv3x3_bn_stats(x, w9, scale, shift, *, prologue, add_ones, TH):
    """[BN+ReLU prologue] -> 3x3 conv (bias-free); bf16 output + BN partials."""
    B, H, W, Cin = x.shape
    assert H % TH == 0
    nR = H // TH
    Cout = w9.shape[-1]
    w_map = (lambda b, r: (b, 0, 0)) if w9.shape[0] != 1 else (lambda b, r: (0, 0, 0))

    kernel = functools.partial(_conv_bn_kernel, TH=TH, W=W,
                               prologue=prologue, add_ones=add_ones)
    y, stats = pl.pallas_call(
        kernel,
        out_shape=(jax.ShapeDtypeStruct((B, H, W, Cout), jnp.bfloat16),
                   jax.ShapeDtypeStruct((B, nR, 2, Cout), jnp.float32)),
        grid_spec=pltpu.PrefetchScalarGridSpec(
            num_scalar_prefetch=0,
            grid=(B, nR),
            in_specs=_halo_specs(TH, W, Cin, H) + [
                pl.BlockSpec((1,) + w9.shape[1:], w_map),
                pl.BlockSpec((1, scale.shape[-1]), lambda b, r: (0, 0)),
                pl.BlockSpec((1, shift.shape[-1]), lambda b, r: (0, 0)),
            ],
            out_specs=(
                pl.BlockSpec((1, TH, W, Cout), lambda b, r: (b, r, 0, 0)),
                pl.BlockSpec((1, 1, 2, Cout), lambda b, r: (b, r, 0, 0)),
            ),
        ),
        compiler_params=pltpu.CompilerParams(
            dimension_semantics=("parallel", "parallel"),
            vmem_limit_bytes=_VMEM_LIMIT_BYTES),
    )(x, x, x, w9, scale, shift)
    return y, stats


def conv_final(x, image, w9, b, scale, shift, w1, b1, *, TH):
    """[BN+ReLU(x) ++ image] -> before_output conv3x3 -> output_layer conv1x1."""
    B, H, W, Cx = x.shape
    nc = image.shape[-1]
    nout = w1.shape[-1]
    assert H % TH == 0
    nR = H // TH

    kernel = functools.partial(_conv_final_kernel, TH=TH, W=W)
    return pl.pallas_call(
        kernel,
        out_shape=jax.ShapeDtypeStruct((B, H, W, nout), jnp.float32),
        grid_spec=pltpu.PrefetchScalarGridSpec(
            num_scalar_prefetch=0,
            grid=(B, nR),
            in_specs=(_halo_specs(TH, W, Cx, H)
                      + _halo_specs(TH, W, nc, H)
                      + [
                          pl.BlockSpec((1,) + w9.shape[1:], lambda b, r: (0, 0, 0)),
                          pl.BlockSpec((1, Cx), lambda b, r: (0, 0)),
                          pl.BlockSpec((1, Cx), lambda b, r: (0, 0)),
                          pl.BlockSpec((1, Cx), lambda b, r: (0, 0)),
                          pl.BlockSpec((1, Cx, nout), lambda b, r: (0, 0, 0)),
                          pl.BlockSpec((1, nout), lambda b, r: (0, 0)),
                      ]),
            out_specs=pl.BlockSpec((1, TH, W, nout), lambda b, r: (b, r, 0, 0)),
        ),
        compiler_params=pltpu.CompilerParams(
            dimension_semantics=("parallel", "parallel"),
            vmem_limit_bytes=_VMEM_LIMIT_BYTES),
    )(x, x, x, image, image, image, w9, b, scale, shift, w1, b1)


# ---------------------------------------------------------------------------
# BN bookkeeping (tiny host-side glue on per-tile partials; Chan combination)
# ---------------------------------------------------------------------------
def _bn_scale_shift(stats, gamma, beta, n_tile, eps=1e-5):
    s = stats[:, :, 0, :]                       # (B, nR, C) per-tile sums
    q = stats[:, :, 1, :]                       # per-tile centered sum-of-squares
    n_tiles = s.shape[0] * s.shape[1]
    count = n_tiles * n_tile
    mean_t = s / n_tile
    mean = jnp.sum(s, axis=(0, 1)) / count
    m2 = (jnp.sum(q, axis=(0, 1))
          + n_tile * jnp.sum(jnp.square(mean_t - mean), axis=(0, 1)))
    var = m2 / count                            # biased variance (PyTorch BN)
    scale = gamma * jax.lax.rsqrt(var + eps)
    shift = beta - mean * scale
    return scale.reshape(1, -1), shift.reshape(1, -1)


# ---------------------------------------------------------------------------
# Parameters (deterministic, PyTorch Conv2d/BN shapes)
# ---------------------------------------------------------------------------
def _init_conv(key, k, cin, cout):
    kw, kb = jax.random.split(key)
    bound = 1.0 / float((cin * k * k) ** 0.5)
    w = jax.random.uniform(kw, (k, k, cin, cout), jnp.float32, -bound, bound)
    b = jax.random.uniform(kb, (cout,), jnp.float32, -bound, bound)
    return w, b


def init_encoder_params(key, msg_len=30, nc=3, conv_channel=64):
    keys = jax.random.split(key, 8)
    params = {}
    # Layer 1: conv over cat([message(30), image(3)]).  Keep the two weight
    # halves separate so the spatially-constant message can be folded per batch.
    w1, b1 = _init_conv(keys[0], 3, msg_len + nc, conv_channel)
    params["l1_w_msg"] = w1[:, :, :msg_len, :]        # (3,3,30,64)
    params["l1_w_img"] = w1[:, :, msg_len:, :]        # (3,3,3,64)
    params["l1_b"] = b1
    params["l1_gamma"] = jnp.ones((conv_channel,), jnp.float32)
    params["l1_beta"] = jnp.zeros((conv_channel,), jnp.float32)
    # Layers 2-4 of input_image + after_concat (all conv3x3 64->64 with BN/ReLU).
    mids = []
    for i in range(4):
        w, b = _init_conv(keys[1 + i], 3, conv_channel, conv_channel)
        mids.append({"w": w, "b": b,
                     "gamma": jnp.ones((conv_channel,), jnp.float32),
                     "beta": jnp.zeros((conv_channel,), jnp.float32)})
    params["mid"] = mids
    params["before_w"], params["before_b"] = _init_conv(keys[5], 3, conv_channel + nc, conv_channel)
    params["out_w"], params["out_b"] = _init_conv(keys[6], 1, conv_channel, nc)
    return params


# ---------------------------------------------------------------------------
# Encoder forward pass
# ---------------------------------------------------------------------------
def encoder_forward(params, image, message):
    """image: (B,H,W,3) f32, message: (B, msg_len) f32 -> (B,H,W,3) f32."""
    f32 = jnp.float32
    B, H, W, nc = image.shape
    cc = params["l1_gamma"].shape[0]
    TH = _row_tile(H, 64)      # conv+BN layers (small working set per step)
    THf = _row_tile(H, 32)     # fused final layer (67-ch contraction, f32 out)
    n_tile = float(TH * W)

    image_bf = image.astype(jnp.bfloat16)

    # ---- layer 1: message folded into a per-batch weight column that acts on
    #      an in-kernel-synthesized "in-bounds ones" channel (no bias; BN follows)
    v = jnp.einsum("bm,yxmo->byxo", message.astype(f32), params["l1_w_msg"])  # (B,3,3,cc)
    w1 = jnp.concatenate(
        [jnp.broadcast_to(params["l1_w_img"][None], (B, 3, 3, nc, cc)),
         v[:, :, :, None, :]], axis=3)                                        # (B,3,3,nc+1,cc)
    w1 = w1.reshape(B, 9 * (nc + 1), cc).astype(jnp.bfloat16)
    dummy = jnp.zeros((1, nc), f32)                                           # unused (no prologue)

    x, stats = conv3x3_bn_stats(image_bf, w1, dummy, dummy,
                                prologue=False, add_ones=True, TH=TH)
    scale, shift = _bn_scale_shift(stats, params["l1_gamma"], params["l1_beta"], n_tile)

    # ---- layers 2-4 (input_image) + after_concat: BN+ReLU prologue fused into conv
    for lyr in params["mid"]:
        w9 = lyr["w"].reshape(1, 9 * cc, cc).astype(jnp.bfloat16)
        x, stats = conv3x3_bn_stats(x, w9, scale, shift,
                                    prologue=True, add_ones=False, TH=TH)
        scale, shift = _bn_scale_shift(stats, lyr["gamma"], lyr["beta"], n_tile)

    # ---- before_output (x ++ image merged into one contraction) + fused 1x1 output
    wb9 = params["before_w"].reshape(1, 9 * (cc + nc), cc).astype(jnp.bfloat16)
    w1x1 = params["out_w"].reshape(1, cc, nc)                                 # f32
    out = conv_final(x, image_bf, wb9, params["before_b"].reshape(1, cc),
                     scale, shift, w1x1, params["out_b"].reshape(1, nc), TH=THf)
    return out


# ---------------------------------------------------------------------------
# Pure-JAX reference (f32, un-fused) for validation
# ---------------------------------------------------------------------------
def encoder_reference(params, image, message):
    B, H, W, nc = image.shape

    def conv(x, w, b):
        y = jax.lax.conv_general_dilated(
            x, w, window_strides=(1, 1), padding="SAME",
            dimension_numbers=("NHWC", "HWIO", "NHWC"))
        return y + b

    def bn_relu(x, gamma, beta, eps=1e-5):
        mean = jnp.mean(x, axis=(0, 1, 2))
        var = jnp.mean(jnp.square(x - mean), axis=(0, 1, 2))
        y = (x - mean) * jax.lax.rsqrt(var + eps) * gamma + beta
        return jnp.maximum(y, 0.0)

    msgmap = jnp.broadcast_to(message[:, None, None, :], (B, H, W, message.shape[-1]))
    x = jnp.concatenate([msgmap, image], axis=-1)
    w1 = jnp.concatenate([params["l1_w_msg"], params["l1_w_img"]], axis=2)
    x = bn_relu(conv(x, w1, params["l1_b"]), params["l1_gamma"], params["l1_beta"])
    for lyr in params["mid"]:
        x = bn_relu(conv(x, lyr["w"], lyr["b"]), lyr["gamma"], lyr["beta"])
    x = jnp.concatenate([x, image], axis=-1)
    x = conv(x, params["before_w"], params["before_b"])
    x = conv(x, params["out_w"], params["out_b"])
    return x


if __name__ == "__main__":
    # Small shapes for the self-test (module hard-codes H=W=128; same math at 16).
    # NOTE: halo masking / TH=64,32 tiling should be re-validated at H=W=128
    # before trusting deployment-shape numbers.
    B, H, W = 2, 16, 16
    MSG_LEN, NC = 30, 3

    key = jax.random.PRNGKey(0)
    k_param, k_img, k_msg = jax.random.split(key, 3)

    params = init_encoder_params(k_param, msg_len=MSG_LEN, nc=NC, conv_channel=64)
    image = jax.random.normal(k_img, (B, H, W, NC), jnp.float32)
    message = jax.random.bernoulli(k_msg, 0.5, (B, MSG_LEN)).astype(jnp.float32)

    out = jax.jit(encoder_forward)(params, image, message)
    out = jax.block_until_ready(out)

    assert out.shape == (B, H, W, NC), out.shape
    assert out.dtype == jnp.float32
    assert bool(jnp.all(jnp.isfinite(out)))

    # Loose check vs. the f32 reference (kernel uses bf16 matmul inputs / activations).
    ref = encoder_reference(params, image, message)
    err = float(jnp.max(jnp.abs(out - ref)))
    tol = 0.05 + 0.05 * float(jnp.max(jnp.abs(ref)))
    assert err < tol, (err, tol)

    print("KERNEL_OK")
</pallas_src>

<mosaic_0001>
module attributes {stable_mosaic.version = 11 : i64} {
  func.func @_conv_bn_kernel(%arg0: i32, %arg1: i32, %arg2: memref<1x1x16x3xbf16, #tpu.memory_space<vmem>>, %arg3: memref<1x16x16x3xbf16, #tpu.memory_space<vmem>>, %arg4: memref<1x1x16x3xbf16, #tpu.memory_space<vmem>>, %arg5: memref<1x36x64xbf16, #tpu.memory_space<vmem>>, %arg6: memref<1x3xf32, #tpu.memory_space<vmem>>, %arg7: memref<1x3xf32, #tpu.memory_space<vmem>>, %arg8: memref<1x16x16x64xbf16, #tpu.memory_space<vmem>>, %arg9: memref<1x1x2x64xf32, #tpu.memory_space<vmem>>) attributes {dimension_semantics = [#tpu.dimension_semantics<parallel>, #tpu.dimension_semantics<parallel>], iteration_bounds = array<i64: 2, 1>, scalar_prefetch = 0 : i64, scratch_operands = 0 : i64, tpu.core_type = #tpu.core_type<tc>, window_params = [{transform_indices = @transform_0, window_bounds = array<i64: 1, 1, 16, 3>}, {transform_indices = @transform_1, window_bounds = array<i64: 1, 16, 16, 3>}, {transform_indices = @transform_2, window_bounds = array<i64: 1, 1, 16, 3>}, {transform_indices = @transform_3, window_bounds = array<i64: 1, 36, 64>}, {pipeline_mode = #tpu.pipeline_mode<synchronous>, transform_indices = @transform_4, window_bounds = array<i64: 1, 3>}, {pipeline_mode = #tpu.pipeline_mode<synchronous>, transform_indices = @transform_5, window_bounds = array<i64: 1, 3>}, {transform_indices = @transform_6, window_bounds = array<i64: 1, 16, 16, 64>}, {transform_indices = @transform_7, window_bounds = array<i64: 1, 1, 2, 64>}]} {
    %c0 = arith.constant 0 : index
    %c0_0 = arith.constant 0 : index
    %c0_1 = arith.constant 0 : index
    %c0_2 = arith.constant 0 : index
    %0 = vector.load %arg2[%c0, %c0_0, %c0_1, %c0_2] : memref<1x1x16x3xbf16, #tpu.memory_space<vmem>>, vector<1x1x16x3xbf16>
    %1 = vector.shape_cast %0 : vector<1x1x16x3xbf16> to vector<1x16x3xbf16>
    %c0_3 = arith.constant 0 : index
    %c0_4 = arith.constant 0 : index
    %c0_5 = arith.constant 0 : index
    %c0_6 = arith.constant 0 : index
    %2 = vector.load %arg3[%c0_3, %c0_4, %c0_5, %c0_6] : memref<1x16x16x3xbf16, #tpu.memory_space<vmem>>, vector<1x16x16x3xbf16>
    %3 = vector.shape_cast %2 : vector<1x16x16x3xbf16> to vector<16x16x3xbf16>
    %c0_7 = arith.constant 0 : index
    %c0_8 = arith.constant 0 : index
    %c0_9 = arith.constant 0 : index
    %c0_10 = arith.constant 0 : index
    %4 = vector.load %arg4[%c0_7, %c0_8, %c0_9, %c0_10] : memref<1x1x16x3xbf16, #tpu.memory_space<vmem>>, vector<1x1x16x3xbf16>
    %5 = vector.shape_cast %4 : vector<1x1x16x3xbf16> to vector<1x16x3xbf16>
    %cst = arith.constant 1.000000e+00 : bf16
    %6 = vector.broadcast %cst : bf16 to vector<1x16x1xbf16>
    %7 = tpu.concatenate %1, %6 in 2 : vector<1x16x3xbf16>, vector<1x16x1xbf16> -> vector<1x16x4xbf16>
    %cst_11 = arith.constant 1.000000e+00 : bf16
    %8 = vector.broadcast %cst_11 : bf16 to vector<16x16x1xbf16>
    %9 = tpu.concatenate %3, %8 in 2 : vector<16x16x3xbf16>, vector<16x16x1xbf16> -> vector<16x16x4xbf16>
    %cst_12 = arith.constant 1.000000e+00 : bf16
    %10 = vector.broadcast %cst_12 : bf16 to vector<1x16x1xbf16>
    %11 = tpu.concatenate %5, %10 in 2 : vector<1x16x3xbf16>, vector<1x16x1xbf16> -> vector<1x16x4xbf16>
    %c0_i32 = arith.constant 0 : i32
    %12 = arith.cmpi sgt, %arg1, %c0_i32 : i32
    %13 = arith.extui %12 : i1 to i32
    %14 = arith.sitofp %13 : i32 to f32
    %15 = arith.truncf %14 : f32 to bf16
    %16 = vector.broadcast %15 : bf16 to vector<1x16x4xbf16>
    %17 = arith.mulf %7, %16 : vector<1x16x4xbf16>
    %c0_i32_13 = arith.constant 0 : i32
    %18 = arith.cmpi slt, %arg1, %c0_i32_13 : i32
    %19 = arith.extui %18 : i1 to i32
    %20 = arith.sitofp %19 : i32 to f32
    %21 = arith.truncf %20 : f32 to bf16
    %22 = vector.broadcast %21 : bf16 to vector<1x16x4xbf16>
    %23 = arith.mulf %11, %22 : vector<1x16x4xbf16>
    %24 = tpu.concatenate %17, %9, %23 in 0 : vector<1x16x4xbf16>, vector<16x16x4xbf16>, vector<1x16x4xbf16> -> vector<18x16x4xbf16>
    %cst_14 = arith.constant 0.000000e+00 : bf16
    %25 = vector.broadcast %cst_14 : bf16 to vector<18x1x4xbf16>
    %26 = tpu.concatenate %25, %24, %25 in 1 : vector<18x1x4xbf16>, vector<18x16x4xbf16>, vector<18x1x4xbf16> -> vector<18x18x4xbf16>
    %c0_15 = arith.constant 0 : index
    %c0_16 = arith.constant 0 : index
    %c0_17 = arith.constant 0 : index
    %27 = vector.load %arg5[%c0_15, %c0_16, %c0_17] : memref<1x36x64xbf16, #tpu.memory_space<vmem>>, vector<1x36x64xbf16>
    %28 = vector.shape_cast %27 : vector<1x36x64xbf16> to vector<36x64xbf16>
    %29 = vector.extract_strided_slice %26 {offsets = [0, 0, 0], sizes = [18, 16, 4], strides = [1, 1, 1]} : vector<18x18x4xbf16> to vector<18x16x4xbf16>
    %30 = vector.extract_strided_slice %26 {offsets = [0, 1, 0], sizes = [18, 16, 4], strides = [1, 1, 1]} : vector<18x18x4xbf16> to vector<18x16x4xbf16>
    %31 = vector.extract_strided_slice %26 {offsets = [0, 2, 0], sizes = [18, 16, 4], strides = [1, 1, 1]} : vector<18x18x4xbf16> to vector<18x16x4xbf16>
    %32 = tpu.concatenate %29, %30, %31 in 2 : vector<18x16x4xbf16>, vector<18x16x4xbf16>, vector<18x16x4xbf16> -> vector<18x16x12xbf16>
    %33 = vector.extract_strided_slice %32 {offsets = [0, 0, 0], sizes = [16, 16, 12], strides = [1, 1, 1]} : vector<18x16x12xbf16> to vector<16x16x12xbf16>
    %34 = vector.extract_strided_slice %32 {offsets = [1, 0, 0], sizes = [16, 16, 12], strides = [1, 1, 1]} : vector<18x16x12xbf16> to vector<16x16x12xbf16>
    %35 = vector.extract_strided_slice %32 {offsets = [2, 0, 0], sizes = [16, 16, 12], strides = [1, 1, 1]} : vector<18x16x12xbf16> to vector<16x16x12xbf16>
    %36 = tpu.concatenate %33, %34, %35 in 2 : vector<16x16x12xbf16>, vector<16x16x12xbf16>, vector<16x16x12xbf16> -> vector<16x16x36xbf16>
    %37 = vector.shape_cast %36 : vector<16x16x36xbf16> to vector<256x36xbf16>
    %cst_18 = arith.constant dense<0.000000e+00> : vector<256x64xf32>
    %38 = tpu.matmul %37, %28, %cst_18 {dimension_numbers = #tpu.dot_dimension_numbers<[1], [0], [0], [1], [0, 0, 1, 1], [], []>} : vector<256x36xbf16>, vector<36x64xbf16>, vector<256x64xf32> -> vector<256x64xf32>
    %cst_19 = arith.constant dense<0.000000e+00> : vector<64xf32>
    %39 = vector.multi_reduction <add>, %38, %cst_19 [0] : vector<256x64xf32> to vector<64xf32>
    %40 = vector.shape_cast %39 : vector<64xf32> to vector<1x64xf32>
    %cst_20 = arith.constant 3.906250e-03 : f32
    %41 = vector.broadcast %cst_20 : f32 to vector<1x64xf32>
    %42 = arith.mulf %40, %41 : vector<1x64xf32>
    %43 = vector.broadcast %42 : vector<1x64xf32> to vector<256x64xf32>
    %44 = arith.subf %38, %43 : vector<256x64xf32>
    %45 = arith.mulf %44, %44 : vector<256x64xf32>
    %cst_21 = arith.constant dense<0.000000e+00> : vector<64xf32>
    %46 = vector.multi_reduction <add>, %45, %cst_21 [0] : vector<256x64xf32> to vector<64xf32>
    %47 = vector.shape_cast %46 : vector<64xf32> to vector<1x64xf32>
    %48 = tpu.concatenate %40, %47 in 0 : vector<1x64xf32>, vector<1x64xf32> -> vector<2x64xf32>
    %49 = vector.shape_cast %48 : vector<2x64xf32> to vector<1x1x2x64xf32>
    %c0_22 = arith.constant 0 : index
    %c0_23 = arith.constant 0 : index
    %c0_24 = arith.constant 0 : index
    %c0_25 = arith.constant 0 : index
    %50 = vector.load %arg9[%c0_22, %c0_23, %c0_24, %c0_25] : memref<1x1x2x64xf32, #tpu.memory_space<vmem>>, vector<1x1x2x64xf32>
    tpu.vector_store %arg9[%c0_22, %c0_23, %c0_24, %c0_25], %49 {strides = array<i32>} : memref<1x1x2x64xf32, #tpu.memory_space<vmem>>, vector<1x1x2x64xf32>,
    %51 = vector.shape_cast %38 : vector<256x64xf32> to vector<1x16x16x64xf32>
    %52 = arith.truncf %51 : vector<1x16x16x64xf32> to vector<1x16x16x64xbf16>
    %c0_26 = arith.constant 0 : index
    %c0_27 = arith.constant 0 : index
    %c0_28 = arith.constant 0 : index
    %c0_29 = arith.constant 0 : index
    %53 = vector.load %arg8[%c0_26, %c0_27, %c0_28, %c0_29] : memref<1x16x16x64xbf16, #tpu.memory_space<vmem>>, vector<1x16x16x64xbf16>
    tpu.vector_store %arg8[%c0_26, %c0_27, %c0_28, %c0_29], %52 {strides = array<i32>} : memref<1x16x16x64xbf16, #tpu.memory_space<vmem>>, vector<1x16x16x64xbf16>,
    return
  }
  func.func @transform_0(%arg0: i32, %arg1: i32) -> (i32, i32, i32, i32) {
    %c16_i32 = arith.constant 16 : i32
    %0 = arith.muli %arg1, %c16_i32 : i32
    %c1_i32 = arith.constant 1 : i32
    %1 = arith.subi %0, %c1_i32 : i32
    %c0_i32 = arith.constant 0 : i32
    %2 = arith.maxsi %1, %c0_i32 : i32
    %c0_i32_0 = arith.constant 0 : i32
    %c0_i32_1 = arith.constant 0 : i32
    %c0_i32_2 = arith.constant 0 : i32
    return %arg0, %2, %c0_i32_0, %c0_i32_1 : i32, i32, i32, i32
  }
  func.func @transform_1(%arg0: i32, %arg1: i32) -> (i32, i32, i32, i32) {
    %c0_i32 = arith.constant 0 : i32
    %c0_i32_0 = arith.constant 0 : i32
    %c0_i32_1 = arith.constant 0 : i32
    return %arg0, %arg1, %c0_i32, %c0_i32_0 : i32, i32, i32, i32
  }
  func.func @transform_2(%arg0: i32, %arg1: i32) -> (i32, i32, i32, i32) {
    %c16_i32 = arith.constant 16 : i32
    %0 = arith.muli %arg1, %c16_i32 : i32
    %c16_i32_0 = arith.constant 16 : i32
    %1 = arith.addi %0, %c16_i32_0 : i32
    %c15_i32 = arith.constant 15 : i32
    %2 = arith.minsi %1, %c15_i32 : i32
    %c0_i32 = arith.constant 0 : i32
    %c0_i32_1 = arith.constant 0 : i32
    %c0_i32_2 = arith.constant 0 : i32
    return %arg0, %2, %c0_i32, %c0_i32_1 : i32, i32, i32, i32
  }
  func.func @transform_3(%arg0: i32, %arg1: i32) -> (i32, i32, i32) {
    %c0_i32 = arith.constant 0 : i32
    %c0_i32_0 = arith.constant 0 : i32
    %c0_i32_1 = arith.constant 0 : i32
    return %arg0, %c0_i32, %c0_i32_0 : i32, i32, i32
  }
  func.func @transform_4(%arg0: i32, %arg1: i32) -> (i32, i32) {
    %c0_i32 = arith.constant 0 : i32
    %c0_i32_0 = arith.constant 0 : i32
    %c0_i32_1 = arith.constant 0 : i32
    return %c0_i32, %c0_i32_0 : i32, i32
  }
  func.func @transform_5(%arg0: i32, %arg1: i32) -> (i32, i32) {
    %c0_i32 = arith.constant 0 : i32
    %c0_i32_0 = arith.constant 0 : i32
    %c0_i32_1 = arith.constant 0 : i32
    return %c0_i32, %c0_i32_0 : i32, i32
  }
  func.func @transform_6(%arg0: i32, %arg1: i32) -> (i32, i32, i32, i32) {
    %c0_i32 = arith.constant 0 : i32
    %c0_i32_0 = arith.constant 0 : i32
    %c0_i32_1 = arith.constant 0 : i32
    return %arg0, %arg1, %c0_i32, %c0_i32_0 : i32, i32, i32, i32
  }
  func.func @transform_7(%arg0: i32, %arg1: i32) -> (i32, i32, i32, i32) {
    %c0_i32 = arith.constant 0 : i32
    %c0_i32_0 = arith.constant 0 : i32
    %c0_i32_1 = arith.constant 0 : i32
    return %arg0, %arg1, %c0_i32, %c0_i32_0 : i32, i32, i32, i32
  }
}

module attributes {stable_mosaic.version = 11 : i64} {
  func.func @_conv_bn_kernel(%arg0: i32, %arg1: i32, %arg2: memref<1x1x16x64xbf16, #tpu.memory_space<vmem>>, %arg3: memref<1x16x16x64xbf16, #tpu.memory_space<vmem>>, %arg4: memref<1x1x16x64xbf16, #tpu.memory_space<vmem>>, %arg5: memref<1x576x64xbf16, #tpu.memory_space<vmem>>, %arg6: memref<1x64xf32, #tpu.memory_space<vmem>>, %arg7: memref<1x64xf32, #tpu.memory_space<vmem>>, %arg8: memref<1x16x16x64xbf16, #tpu.memory_space<vmem>>, %arg9: memref<1x1x2x64xf32, #tpu.memory_space<vmem>>) attributes {dimension_semantics = [#tpu.dimension_semantics<parallel>, #tpu.dimension_semantics<parallel>], iteration_bounds = array<i64: 2, 1>, scalar_prefetch = 0 : i64, scratch_operands = 0 : i64, tpu.core_type = #tpu.core_type<tc>, window_params = [{transform_indices = @transform_0, window_bounds = array<i64: 1, 1, 16, 64>}, {transform_indices = @transform_1, window_bounds = array<i64: 1, 16, 16, 64>}, {transform_indices = @transform_2, window_bounds = array<i64: 1, 1, 16, 64>}, {pipeline_mode = #tpu.pipeline_mode<synchronous>, transform_indices = @transform_3, window_bounds = array<i64: 1, 576, 64>}, {pipeline_mode = #tpu.pipeline_mode<synchronous>, transform_indices = @transform_4, window_bounds = array<i64: 1, 64>}, {pipeline_mode = #tpu.pipeline_mode<synchronous>, transform_indices = @transform_5, window_bounds = array<i64: 1, 64>}, {transform_indices = @transform_6, window_bounds = array<i64: 1, 16, 16, 64>}, {transform_indices = @transform_7, window_bounds = array<i64: 1, 1, 2, 64>}]} {
    %c0 = arith.constant 0 : index
    %c0_0 = arith.constant 0 : index
    %0 = vector.load %arg6[%c0, %c0_0] : memref<1x64xf32, #tpu.memory_space<vmem>>, vector<1x64xf32>
    %c0_1 = arith.constant 0 : index
    %c0_2 = arith.constant 0 : index
    %1 = vector.load %arg7[%c0_1, %c0_2] : memref<1x64xf32, #tpu.memory_space<vmem>>, vector<1x64xf32>
    %c0_3 = arith.constant 0 : index
    %c0_4 = arith.constant 0 : index
    %c0_5 = arith.constant 0 : index
    %c0_6 = arith.constant 0 : index
    %2 = vector.load %arg2[%c0_3, %c0_4, %c0_5, %c0_6] : memref<1x1x16x64xbf16, #tpu.memory_space<vmem>>, vector<1x1x16x64xbf16>
    %3 = vector.shape_cast %2 : vector<1x1x16x64xbf16> to vector<1x16x64xbf16>
    %4 = arith.extf %3 : vector<1x16x64xbf16> to vector<1x16x64xf32>
    %5 = vector.shape_cast %0 : vector<1x64xf32> to vector<1x1x64xf32>
    %6 = vector.broadcast %5 : vector<1x1x64xf32> to vector<1x16x64xf32>
    %7 = arith.mulf %4, %6 : vector<1x16x64xf32>
    %8 = vector.shape_cast %1 : vector<1x64xf32> to vector<1x1x64xf32>
    %9 = vector.broadcast %8 : vector<1x1x64xf32> to vector<1x16x64xf32>
    %10 = arith.addf %7, %9 : vector<1x16x64xf32>
    %cst = arith.constant 0.000000e+00 : f32
    %11 = vector.broadcast %cst : f32 to vector<1x16x64xf32>
    %12 = arith.maximumf %10, %11 : vector<1x16x64xf32>
    %13 = arith.truncf %12 : vector<1x16x64xf32> to vector<1x16x64xbf16>
    %c0_7 = arith.constant 0 : index
    %c0_8 = arith.constant 0 : index
    %c0_9 = arith.constant 0 : index
    %c0_10 = arith.constant 0 : index
    %14 = vector.load %arg3[%c0_7, %c0_8, %c0_9, %c0_10] : memref<1x16x16x64xbf16, #tpu.memory_space<vmem>>, vector<1x16x16x64xbf16>
    %15 = vector.shape_cast %14 : vector<1x16x16x64xbf16> to vector<16x16x64xbf16>
    %16 = arith.extf %15 : vector<16x16x64xbf16> to vector<16x16x64xf32>
    %17 = vector.shape_cast %0 : vector<1x64xf32> to vector<1x1x64xf32>
    %18 = vector.broadcast %17 : vector<1x1x64xf32> to vector<16x16x64xf32>
    %19 = arith.mulf %16, %18 : vector<16x16x64xf32>
    %20 = vector.shape_cast %1 : vector<1x64xf32> to vector<1x1x64xf32>
    %21 = vector.broadcast %20 : vector<1x1x64xf32> to vector<16x16x64xf32>
    %22 = arith.addf %19, %21 : vector<16x16x64xf32>
    %cst_11 = arith.constant 0.000000e+00 : f32
    %23 = vector.broadcast %cst_11 : f32 to vector<16x16x64xf32>
    %24 = arith.maximumf %22, %23 : vector<16x16x64xf32>
    %25 = arith.truncf %24 : vector<16x16x64xf32> to vector<16x16x64xbf16>
    %c0_12 = arith.constant 0 : index
    %c0_13 = arith.constant 0 : index
    %c0_14 = arith.constant 0 : index
    %c0_15 = arith.constant 0 : index
    %26 = vector.load %arg4[%c0_12, %c0_13, %c0_14, %c0_15] : memref<1x1x16x64xbf16, #tpu.memory_space<vmem>>, vector<1x1x16x64xbf16>
    %27 = vector.shape_cast %26 : vector<1x1x16x64xbf16> to vector<1x16x64xbf16>
    %28 = arith.extf %27 : vector<1x16x64xbf16> to vector<1x16x64xf32>
    %29 = vector.shape_cast %0 : vector<1x64xf32> to vector<1x1x64xf32>
    %30 = vector.broadcast %29 : vector<1x1x64xf32> to vector<1x16x64xf32>
    %31 = arith.mulf %28, %30 : vector<1x16x64xf32>
    %32 = vector.shape_cast %1 : vector<1x64xf32> to vector<1x1x64xf32>
    %33 = vector.broadcast %32 : vector<1x1x64xf32> to vector<1x16x64xf32>
    %34 = arith.addf %31, %33 : vector<1x16x64xf32>
    %cst_16 = arith.constant 0.000000e+00 : f32
    %35 = vector.broadcast %cst_16 : f32 to vector<1x16x64xf32>
    %36 = arith.maximumf %34, %35 : vector<1x16x64xf32>
    %37 = arith.truncf %36 : vector<1x16x64xf32> to vector<1x16x64xbf16>
    %c0_i32 = arith.constant 0 : i32
    %38 = arith.cmpi sgt, %arg1, %c0_i32 : i32
    %39 = arith.extui %38 : i1 to i32
    %40 = arith.sitofp %39 : i32 to f32
    %41 = arith.truncf %40 : f32 to bf16
    %42 = vector.broadcast %41 : bf16 to vector<1x16x64xbf16>
    %43 = arith.mulf %13, %42 : vector<1x16x64xbf16>
    %c0_i32_17 = arith.constant 0 : i32
    %44 = arith.cmpi slt, %arg1, %c0_i32_17 : i32
    %45 = arith.extui %44 : i1 to i32
    %46 = arith.sitofp %45 : i32 to f32
    %47 = arith.truncf %46 : f32 to bf16
    %48 = vector.broadcast %47 : bf16 to vector<1x16x64xbf16>
    %49 = arith.mulf %37, %48 : vector<1x16x64xbf16>
    %50 = tpu.concatenate %43, %25, %49 in 0 : vector<1x16x64xbf16>, vector<16x16x64xbf16>, vector<1x16x64xbf16> -> vector<18x16x64xbf16>
    %cst_18 = arith.constant 0.000000e+00 : bf16
    %51 = vector.broadcast %cst_18 : bf16 to vector<18x1x64xbf16>
    %52 = tpu.concatenate %51, %50, %51 in 1 : vector<18x1x64xbf16>, vector<18x16x64xbf16>, vector<18x1x64xbf16> -> vector<18x18x64xbf16>
    %c0_19 = arith.constant 0 : index
    %c0_20 = arith.constant 0 : index
    %c0_21 = arith.constant 0 : index
    %53 = vector.load %arg5[%c0_19, %c0_20, %c0_21] : memref<1x576x64xbf16, #tpu.memory_space<vmem>>, vector<1x576x64xbf16>
    %54 = vector.shape_cast %53 : vector<1x576x64xbf16> to vector<576x64xbf16>
    %55 = vector.extract_strided_slice %52 {offsets = [0, 0, 0], sizes = [18, 16, 64], strides = [1, 1, 1]} : vector<18x18x64xbf16> to vector<18x16x64xbf16>
    %56 = vector.extract_strided_slice %52 {offsets = [0, 1, 0], sizes = [18, 16, 64], strides = [1, 1, 1]} : vector<18x18x64xbf16> to vector<18x16x64xbf16>
    %57 = vector.extract_strided_slice %52 {offsets = [0, 2, 0], sizes = [18, 16, 64], strides = [1, 1, 1]} : vector<18x18x64xbf16> to vector<18x16x64xbf16>
    %58 = tpu.concatenate %55, %56, %57 in 2 : vector<18x16x64xbf16>, vector<18x16x64xbf16>, vector<18x16x64xbf16> -> vector<18x16x192xbf16>
    %59 = vector.extract_strided_slice %58 {offsets = [0, 0, 0], sizes = [16, 16, 192], strides = [1, 1, 1]} : vector<18x16x192xbf16> to vector<16x16x192xbf16>
    %60 = vector.extract_strided_slice %58 {offsets = [1, 0, 0], sizes = [16, 16, 192], strides = [1, 1, 1]} : vector<18x16x192xbf16> to vector<16x16x192xbf16>
    %61 = vector.extract_strided_slice %58 {offsets = [2, 0, 0], sizes = [16, 16, 192], strides = [1, 1, 1]} : vector<18x16x192xbf16> to vector<16x16x192xbf16>
    %62 = tpu.concatenate %59, %60, %61 in 2 : vector<16x16x192xbf16>, vector<16x16x192xbf16>, vector<16x16x192xbf16> -> vector<16x16x576xbf16>
    %63 = vector.shape_cast %62 : vector<16x16x576xbf16> to vector<256x576xbf16>
    %cst_22 = arith.constant dense<0.000000e+00> : vector<256x64xf32>
    %64 = tpu.matmul %63, %54, %cst_22 {dimension_numbers = #tpu.dot_dimension_numbers<[1], [0], [0], [1], [0, 0, 1, 1], [], []>} : vector<256x576xbf16>, vector<576x64xbf16>, vector<256x64xf32> -> vector<256x64xf32>
    %cst_23 = arith.constant dense<0.000000e+00> : vector<64xf32>
    %65 = vector.multi_reduction <add>, %64, %cst_23 [0] : vector<256x64xf32> to vector<64xf32>
    %66 = vector.shape_cast %65 : vector<64xf32> to vector<1x64xf32>
    %cst_24 = arith.constant 3.906250e-03 : f32
    %67 = vector.broadcast %cst_24 : f32 to vector<1x64xf32>
    %68 = arith.mulf %66, %67 : vector<1x64xf32>
    %69 = vector.broadcast %68 : vector<1x64xf32> to vector<256x64xf32>
    %70 = arith.subf %64, %69 : vector<256x64xf32>
    %71 = arith.mulf %70, %70 : vector<256x64xf32>
    %cst_25 = arith.constant dense<0.000000e+00> : vector<64xf32>
    %72 = vector.multi_reduction <add>, %71, %cst_25 [0] : vector<256x64xf32> to vector<64xf32>
    %73 = vector.shape_cast %72 : vector<64xf32> to vector<1x64xf32>
    %74 = tpu.concatenate %66, %73 in 0 : vector<1x64xf32>, vector<1x64xf32> -> vector<2x64xf32>
    %75 = vector.shape_cast %74 : vector<2x64xf32> to vector<1x1x2x64xf32>
    %c0_26 = arith.constant 0 : index
    %c0_27 = arith.constant 0 : index
    %c0_28 = arith.constant 0 : index
    %c0_29 = arith.constant 0 : index
    %76 = vector.load %arg9[%c0_26, %c0_27, %c0_28, %c0_29] : memref<1x1x2x64xf32, #tpu.memory_space<vmem>>, vector<1x1x2x64xf32>
    tpu.vector_store %arg9[%c0_26, %c0_27, %c0_28, %c0_29], %75 {strides = array<i32>} : memref<1x1x2x64xf32, #tpu.memory_space<vmem>>, vector<1x1x2x64xf32>,
    %77 = vector.shape_cast %64 : vector<256x64xf32> to vector<1x16x16x64xf32>
    %78 = arith.truncf %77 : vector<1x16x16x64xf32> to vector<1x16x16x64xbf16>
    %c0_30 = arith.constant 0 : index
    %c0_31 = arith.constant 0 : index
    %c0_32 = arith.constant 0 : index
    %c0_33 = arith.constant 0 : index
    %79 = vector.load %arg8[%c0_30, %c0_31, %c0_32, %c0_33] : memref<1x16x16x64xbf16, #tpu.memory_space<vmem>>, vector<1x16x16x64xbf16>
    tpu.vector_store %arg8[%c0_30, %c0_31, %c0_32, %c0_33], %78 {strides = array<i32>} : memref<1x16x16x64xbf16, #tpu.memory_space<vmem>>, vector<1x16x16x64xbf16>,
    return
  }
  func.func @transform_0(%arg0: i32, %arg1: i32) -> (i32, i32, i32, i32) {
    %c16_i32 = arith.constant 16 : i32
    %0 = arith.muli %arg1, %c16_i32 : i32
    %c1_i32 = arith.constant 1 : i32
    %1 = arith.subi %0, %c1_i32 : i32
    %c0_i32 = arith.constant 0 : i32
    %2 = arith.maxsi %1, %c0_i32 : i32
    %c0_i32_0 = arith.constant 0 : i32
    %c0_i32_1 = arith.constant 0 : i32
    %c0_i32_2 = arith.constant 0 : i32
    return %arg0, %2, %c0_i32_0, %c0_i32_1 : i32, i32, i32, i32
  }
  func.func @transform_1(%arg0: i32, %arg1: i32) -> (i32, i32, i32, i32) {
    %c0_i32 = arith.constant 0 : i32
    %c0_i32_0 = arith.constant 0 : i32
    %c0_i32_1 = arith.constant 0 : i32
    return %arg0, %arg1, %c0_i32, %c0_i32_0 : i32, i32, i32, i32
  }
  func.func @transform_2(%arg0: i32, %arg1: i32) -> (i32, i32, i32, i32) {
    %c16_i32 = arith.constant 16 : i32
    %0 = arith.muli %arg1, %c16_i32 : i32
    %c16_i32_0 = arith.constant 16 : i32
    %1 = arith.addi %0, %c16_i32_0 : i32
    %c15_i32 = arith.constant 15 : i32
    %2 = arith.minsi %1, %c15_i32 : i32
    %c0_i32 = arith.constant 0 : i32
    %c0_i32_1 = arith.constant 0 : i32
    %c0_i32_2 = arith.constant 0 : i32
    return %arg0, %2, %c0_i32, %c0_i32_1 : i32, i32, i32, i32
  }
  func.func @transform_3(%arg0: i32, %arg1: i32) -> (i32, i32, i32) {
    %c0_i32 = arith.constant 0 : i32
    %c0_i32_0 = arith.constant 0 : i32
    %c0_i32_1 = arith.constant 0 : i32
    %c0_i32_2 = arith.constant 0 : i32
    return %c0_i32, %c0_i32_0, %c0_i32_1 : i32, i32, i32
  }
  func.func @transform_4(%arg0: i32, %arg1: i32) -> (i32, i32) {
    %c0_i32 = arith.constant 0 : i32
    %c0_i32_0 = arith.constant 0 : i32
    %c0_i32_1 = arith.constant 0 : i32
    return %c0_i32, %c0_i32_0 : i32, i32
  }
  func.func @transform_5(%arg0: i32, %arg1: i32) -> (i32, i32) {
    %c0_i32 = arith.constant 0 : i32
    %c0_i32_0 = arith.constant 0 : i32
    %c0_i32_1 = arith.constant 0 : i32
    return %c0_i32, %c0_i32_0 : i32, i32
  }
  func.func @transform_6(%arg0: i32, %arg1: i32) -> (i32, i32, i32, i32) {
    %c0_i32 = arith.constant 0 : i32
    %c0_i32_0 = arith.constant 0 : i32
    %c0_i32_1 = arith.constant 0 : i32
    return %arg0, %arg1, %c0_i32, %c0_i32_0 : i32, i32, i32, i32
  }
  func.func @transform_7(%arg0: i32, %arg1: i32) -> (i32, i32, i32, i32) {
    %c0_i32 = arith.constant 0 : i32
    %c0_i32_0 = arith.constant 0 : i32
    %c0_i32_1 = arith.constant 0 : i32
    return %arg0, %arg1, %c0_i32, %c0_i32_0 : i32, i32, i32, i32
  }
}

module attributes {stable_mosaic.version = 11 : i64} {
  func.func @_conv_final_kernel(%arg0: i32, %arg1: i32, %arg2: memref<1x1x16x64xbf16, #tpu.memory_space<vmem>>, %arg3: memref<1x16x16x64xbf16, #tpu.memory_space<vmem>>, %arg4: memref<1x1x16x64xbf16, #tpu.memory_space<vmem>>, %arg5: memref<1x1x16x3xbf16, #tpu.memory_space<vmem>>, %arg6: memref<1x16x16x3xbf16, #tpu.memory_space<vmem>>, %arg7: memref<1x1x16x3xbf16, #tpu.memory_space<vmem>>, %arg8: memref<1x603x64xbf16, #tpu.memory_space<vmem>>, %arg9: memref<1x64xf32, #tpu.memory_space<vmem>>, %arg10: memref<1x64xf32, #tpu.memory_space<vmem>>, %arg11: memref<1x64xf32, #tpu.memory_space<vmem>>, %arg12: memref<1x64x3xf32, #tpu.memory_space<vmem>>, %arg13: memref<1x3xf32, #tpu.memory_space<vmem>>, %arg14: memref<1x16x16x3xf32, #tpu.memory_space<vmem>>) attributes {dimension_semantics = [#tpu.dimension_semantics<parallel>, #tpu.dimension_semantics<parallel>], iteration_bounds = array<i64: 2, 1>, scalar_prefetch = 0 : i64, scratch_operands = 0 : i64, tpu.core_type = #tpu.core_type<tc>, window_params = [{transform_indices = @transform_0, window_bounds = array<i64: 1, 1, 16, 64>}, {transform_indices = @transform_1, window_bounds = array<i64: 1, 16, 16, 64>}, {transform_indices = @transform_2, window_bounds = array<i64: 1, 1, 16, 64>}, {transform_indices = @transform_3, window_bounds = array<i64: 1, 1, 16, 3>}, {transform_indices = @transform_4, window_bounds = array<i64: 1, 16, 16, 3>}, {transform_indices = @transform_5, window_bounds = array<i64: 1, 1, 16, 3>}, {pipeline_mode = #tpu.pipeline_mode<synchronous>, transform_indices = @transform_6, window_bounds = array<i64: 1, 603, 64>}, {pipeline_mode = #tpu.pipeline_mode<synchronous>, transform_indices = @transform_7, window_bounds = array<i64: 1, 64>}, {pipeline_mode = #tpu.pipeline_mode<synchronous>, transform_indices = @transform_8, window_bounds = array<i64: 1, 64>}, {pipeline_mode = #tpu.pipeline_mode<synchronous>, transform_indices = @transform_9, window_bounds = array<i64: 1, 64>}, {pipeline_mode = #tpu.pipeline_mode<synchronous>, transform_indices = @transform_10, window_bounds = array<i64: 1, 64, 3>}, {pipeline_mode = #tpu.pipeline_mode<synchronous>, transform_indices = @transform_11, window_bounds = array<i64: 1, 3>}, {transform_indices = @transform_12, window_bounds = array<i64: 1, 16, 16, 3>}]} {
    %c0 = arith.constant 0 : index
    %c0_0 = arith.constant 0 : index
    %0 = vector.load %arg10[%c0, %c0_0] : memref<1x64xf32, #tpu.memory_space<vmem>>, vector<1x64xf32>
    %c0_1 = arith.constant 0 : index
    %c0_2 = arith.constant 0 : index
    %1 = vector.load %arg11[%c0_1, %c0_2] : memref<1x64xf32, #tpu.memory_space<vmem>>, vector<1x64xf32>
    %c0_3 = arith.constant 0 : index
    %c0_4 = arith.constant 0 : index
    %c0_5 = arith.constant 0 : index
    %c0_6 = arith.constant 0 : index
    %2 = vector.load %arg2[%c0_3, %c0_4, %c0_5, %c0_6] : memref<1x1x16x64xbf16, #tpu.memory_space<vmem>>, vector<1x1x16x64xbf16>
    %3 = vector.shape_cast %2 : vector<1x1x16x64xbf16> to vector<1x16x64xbf16>
    %4 = arith.extf %3 : vector<1x16x64xbf16> to vector<1x16x64xf32>
    %5 = vector.shape_cast %0 : vector<1x64xf32> to vector<1x1x64xf32>
    %6 = vector.broadcast %5 : vector<1x1x64xf32> to vector<1x16x64xf32>
    %7 = arith.mulf %4, %6 : vector<1x16x64xf32>
    %8 = vector.shape_cast %1 : vector<1x64xf32> to vector<1x1x64xf32>
    %9 = vector.broadcast %8 : vector<1x1x64xf32> to vector<1x16x64xf32>
    %10 = arith.addf %7, %9 : vector<1x16x64xf32>
    %cst = arith.constant 0.000000e+00 : f32
    %11 = vector.broadcast %cst : f32 to vector<1x16x64xf32>
    %12 = arith.maximumf %10, %11 : vector<1x16x64xf32>
    %13 = arith.truncf %12 : vector<1x16x64xf32> to vector<1x16x64xbf16>
    %c0_7 = arith.constant 0 : index
    %c0_8 = arith.constant 0 : index
    %c0_9 = arith.constant 0 : index
    %c0_10 = arith.constant 0 : index
    %14 = vector.load %arg5[%c0_7, %c0_8, %c0_9, %c0_10] : memref<1x1x16x3xbf16, #tpu.memory_space<vmem>>, vector<1x1x16x3xbf16>
    %15 = vector.shape_cast %14 : vector<1x1x16x3xbf16> to vector<1x16x3xbf16>
    %16 = tpu.concatenate %13, %15 in 2 : vector<1x16x64xbf16>, vector<1x16x3xbf16> -> vector<1x16x67xbf16>
    %c0_11 = arith.constant 0 : index
    %c0_12 = arith.constant 0 : index
    %c0_13 = arith.constant 0 : index
    %c0_14 = arith.constant 0 : index
    %17 = vector.load %arg3[%c0_11, %c0_12, %c0_13, %c0_14] : memref<1x16x16x64xbf16, #tpu.memory_space<vmem>>, vector<1x16x16x64xbf16>
    %18 = vector.shape_cast %17 : vector<1x16x16x64xbf16> to vector<16x16x64xbf16>
    %19 = arith.extf %18 : vector<16x16x64xbf16> to vector<16x16x64xf32>
    %20 = vector.shape_cast %0 : vector<1x64xf32> to vector<1x1x64xf32>
    %21 = vector.broadcast %20 : vector<1x1x64xf32> to vector<16x16x64xf32>
    %22 = arith.mulf %19, %21 : vector<16x16x64xf32>
    %23 = vector.shape_cast %1 : vector<1x64xf32> to vector<1x1x64xf32>
    %24 = vector.broadcast %23 : vector<1x1x64xf32> to vector<16x16x64xf32>
    %25 = arith.addf %22, %24 : vector<16x16x64xf32>
    %cst_15 = arith.constant 0.000000e+00 : f32
    %26 = vector.broadcast %cst_15 : f32 to vector<16x16x64xf32>
    %27 = arith.maximumf %25, %26 : vector<16x16x64xf32>
    %28 = arith.truncf %27 : vector<16x16x64xf32> to vector<16x16x64xbf16>
    %c0_16 = arith.constant 0 : index
    %c0_17 = arith.constant 0 : index
    %c0_18 = arith.constant 0 : index
    %c0_19 = arith.constant 0 : index
    %29 = vector.load %arg6[%c0_16, %c0_17, %c0_18, %c0_19] : memref<1x16x16x3xbf16, #tpu.memory_space<vmem>>, vector<1x16x16x3xbf16>
    %30 = vector.shape_cast %29 : vector<1x16x16x3xbf16> to vector<16x16x3xbf16>
    %31 = tpu.concatenate %28, %30 in 2 : vector<16x16x64xbf16>, vector<16x16x3xbf16> -> vector<16x16x67xbf16>
    %c0_20 = arith.constant 0 : index
    %c0_21 = arith.constant 0 : index
    %c0_22 = arith.constant 0 : index
    %c0_23 = arith.constant 0 : index
    %32 = vector.load %arg4[%c0_20, %c0_21, %c0_22, %c0_23] : memref<1x1x16x64xbf16, #tpu.memory_space<vmem>>, vector<1x1x16x64xbf16>
    %33 = vector.shape_cast %32 : vector<1x1x16x64xbf16> to vector<1x16x64xbf16>
    %34 = arith.extf %33 : vector<1x16x64xbf16> to vector<1x16x64xf32>
    %35 = vector.shape_cast %0 : vector<1x64xf32> to vector<1x1x64xf32>
    %36 = vector.broadcast %35 : vector<1x1x64xf32> to vector<1x16x64xf32>
    %37 = arith.mulf %34, %36 : vector<1x16x64xf32>
    %38 = vector.shape_cast %1 : vector<1x64xf32> to vector<1x1x64xf32>
    %39 = vector.broadcast %38 : vector<1x1x64xf32> to vector<1x16x64xf32>
    %40 = arith.addf %37, %39 : vector<1x16x64xf32>
    %cst_24 = arith.constant 0.000000e+00 : f32
    %41 = vector.broadcast %cst_24 : f32 to vector<1x16x64xf32>
    %42 = arith.maximumf %40, %41 : vector<1x16x64xf32>
    %43 = arith.truncf %42 : vector<1x16x64xf32> to vector<1x16x64xbf16>
    %c0_25 = arith.constant 0 : index
    %c0_26 = arith.constant 0 : index
    %c0_27 = arith.constant 0 : index
    %c0_28 = arith.constant 0 : index
    %44 = vector.load %arg7[%c0_25, %c0_26, %c0_27, %c0_28] : memref<1x1x16x3xbf16, #tpu.memory_space<vmem>>, vector<1x1x16x3xbf16>
    %45 = vector.shape_cast %44 : vector<1x1x16x3xbf16> to vector<1x16x3xbf16>
    %46 = tpu.concatenate %43, %45 in 2 : vector<1x16x64xbf16>, vector<1x16x3xbf16> -> vector<1x16x67xbf16>
    %c0_i32 = arith.constant 0 : i32
    %47 = arith.cmpi sgt, %arg1, %c0_i32 : i32
    %48 = arith.extui %47 : i1 to i32
    %49 = arith.sitofp %48 : i32 to f32
    %50 = arith.truncf %49 : f32 to bf16
    %51 = vector.broadcast %50 : bf16 to vector<1x16x67xbf16>
    %52 = arith.mulf %16, %51 : vector<1x16x67xbf16>
    %c0_i32_29 = arith.constant 0 : i32
    %53 = arith.cmpi slt, %arg1, %c0_i32_29 : i32
    %54 = arith.extui %53 : i1 to i32
    %55 = arith.sitofp %54 : i32 to f32
    %56 = arith.truncf %55 : f32 to bf16
    %57 = vector.broadcast %56 : bf16 to vector<1x16x67xbf16>
    %58 = arith.mulf %46, %57 : vector<1x16x67xbf16>
    %59 = tpu.concatenate %52, %31, %58 in 0 : vector<1x16x67xbf16>, vector<16x16x67xbf16>, vector<1x16x67xbf16> -> vector<18x16x67xbf16>
    %cst_30 = arith.constant 0.000000e+00 : bf16
    %60 = vector.broadcast %cst_30 : bf16 to vector<18x1x67xbf16>
    %61 = tpu.concatenate %60, %59, %60 in 1 : vector<18x1x67xbf16>, vector<18x16x67xbf16>, vector<18x1x67xbf16> -> vector<18x18x67xbf16>
    %c0_31 = arith.constant 0 : index
    %c0_32 = arith.constant 0 : index
    %c0_33 = arith.constant 0 : index
    %62 = vector.load %arg8[%c0_31, %c0_32, %c0_33] : memref<1x603x64xbf16, #tpu.memory_space<vmem>>, vector<1x603x64xbf16>
    %63 = vector.shape_cast %62 : vector<1x603x64xbf16> to vector<603x64xbf16>
    %64 = vector.extract_strided_slice %61 {offsets = [0, 0, 0], sizes = [18, 16, 67], strides = [1, 1, 1]} : vector<18x18x67xbf16> to vector<18x16x67xbf16>
    %65 = vector.extract_strided_slice %61 {offsets = [0, 1, 0], sizes = [18, 16, 67], strides = [1, 1, 1]} : vector<18x18x67xbf16> to vector<18x16x67xbf16>
    %66 = vector.extract_strided_slice %61 {offsets = [0, 2, 0], sizes = [18, 16, 67], strides = [1, 1, 1]} : vector<18x18x67xbf16> to vector<18x16x67xbf16>
    %67 = tpu.concatenate %64, %65, %66 in 2 : vector<18x16x67xbf16>, vector<18x16x67xbf16>, vector<18x16x67xbf16> -> vector<18x16x201xbf16>
    %68 = vector.extract_strided_slice %67 {offsets = [0, 0, 0], sizes = [16, 16, 201], strides = [1, 1, 1]} : vector<18x16x201xbf16> to vector<16x16x201xbf16>
    %69 = vector.extract_strided_slice %67 {offsets = [1, 0, 0], sizes = [16, 16, 201], strides = [1, 1, 1]} : vector<18x16x201xbf16> to vector<16x16x201xbf16>
    %70 = vector.extract_strided_slice %67 {offsets = [2, 0, 0], sizes = [16, 16, 201], strides = [1, 1, 1]} : vector<18x16x201xbf16> to vector<16x16x201xbf16>
    %71 = tpu.concatenate %68, %69, %70 in 2 : vector<16x16x201xbf16>, vector<16x16x201xbf16>, vector<16x16x201xbf16> -> vector<16x16x603xbf16>
    %72 = vector.shape_cast %71 : vector<16x16x603xbf16> to vector<256x603xbf16>
    %cst_34 = arith.constant dense<0.000000e+00> : vector<256x64xf32>
    %73 = tpu.matmul %72, %63, %cst_34 {dimension_numbers = #tpu.dot_dimension_numbers<[1], [0], [0], [1], [0, 0, 1, 1], [], []>} : vector<256x603xbf16>, vector<603x64xbf16>, vector<256x64xf32> -> vector<256x64xf32>
    %c0_35 = arith.constant 0 : index
    %c0_36 = arith.constant 0 : index
    %74 = vector.load %arg9[%c0_35, %c0_36] : memref<1x64xf32, #tpu.memory_space<vmem>>, vector<1x64xf32>
    %75 = vector.broadcast %74 : vector<1x64xf32> to vector<256x64xf32>
    %76 = arith.addf %73, %75 : vector<256x64xf32>
    %c0_37 = arith.constant 0 : index
    %c0_38 = arith.constant 0 : index
    %c0_39 = arith.constant 0 : index
    %77 = vector.load %arg12[%c0_37, %c0_38, %c0_39] : memref<1x64x3xf32, #tpu.memory_space<vmem>>, vector<1x64x3xf32>
    %78 = vector.shape_cast %77 : vector<1x64x3xf32> to vector<64x3xf32>
    %cst_40 = arith.constant dense<0.000000e+00> : vector<256x3xf32>
    %79 = tpu.matmul %76, %78, %cst_40 {dimension_numbers = #tpu.dot_dimension_numbers<[1], [0], [0], [1], [0, 0, 1, 1], [], []>} : vector<256x64xf32>, vector<64x3xf32>, vector<256x3xf32> -> vector<256x3xf32>
    %c0_41 = arith.constant 0 : index
    %c0_42 = arith.constant 0 : index
    %80 = vector.load %arg13[%c0_41, %c0_42] : memref<1x3xf32, #tpu.memory_space<vmem>>, vector<1x3xf32>
    %81 = vector.broadcast %80 : vector<1x3xf32> to vector<256x3xf32>
    %82 = arith.addf %79, %81 : vector<256x3xf32>
    %83 = vector.shape_cast %82 : vector<256x3xf32> to vector<1x16x16x3xf32>
    %c0_43 = arith.constant 0 : index
    %c0_44 = arith.constant 0 : index
    %c0_45 = arith.constant 0 : index
    %c0_46 = arith.constant 0 : index
    %84 = vector.load %arg14[%c0_43, %c0_44, %c0_45, %c0_46] : memref<1x16x16x3xf32, #tpu.memory_space<vmem>>, vector<1x16x16x3xf32>
    tpu.vector_store %arg14[%c0_43, %c0_44, %c0_45, %c0_46], %83 {strides = array<i32>} : memref<1x16x16x3xf32, #tpu.memory_space<vmem>>, vector<1x16x16x3xf32>,
    return
  }
  func.func @transform_0(%arg0: i32, %arg1: i32) -> (i32, i32, i32, i32) {
    %c16_i32 = arith.constant 16 : i32
    %0 = arith.muli %arg1, %c16_i32 : i32
    %c1_i32 = arith.constant 1 : i32
    %1 = arith.subi %0, %c1_i32 : i32
    %c0_i32 = arith.constant 0 : i32
    %2 = arith.maxsi %1, %c0_i32 : i32
    %c0_i32_0 = arith.constant 0 : i32
    %c0_i32_1 = arith.constant 0 : i32
    %c0_i32_2 = arith.constant 0 : i32
    return %arg0, %2, %c0_i32_0, %c0_i32_1 : i32, i32, i32, i32
  }
  func.func @transform_1(%arg0: i32, %arg1: i32) -> (i32, i32, i32, i32) {
    %c0_i32 = arith.constant 0 : i32
    %c0_i32_0 = arith.constant 0 : i32
    %c0_i32_1 = arith.constant 0 : i32
    return %arg0, %arg1, %c0_i32, %c0_i32_0 : i32, i32, i32, i32
  }
  func.func @transform_2(%arg0: i32, %arg1: i32) -> (i32, i32, i32, i32) {
    %c16_i32 = arith.constant 16 : i32
    %0 = arith.muli %arg1, %c16_i32 : i32
    %c16_i32_0 = arith.constant 16 : i32
    %1 = arith.addi %0, %c16_i32_0 : i32
    %c15_i32 = arith.constant 15 : i32
    %2 = arith.minsi %1, %c15_i32 : i32
    %c0_i32 = arith.constant 0 : i32
    %c0_i32_1 = arith.constant 0 : i32
    %c0_i32_2 = arith.constant 0 : i32
    return %arg0, %2, %c0_i32, %c0_i32_1 : i32, i32, i32, i32
  }
  func.func @transform_3(%arg0: i32, %arg1: i32) -> (i32, i32, i32, i32) {
    %c16_i32 = arith.constant 16 : i32
    %0 = arith.muli %arg1, %c16_i32 : i32
    %c1_i32 = arith.constant 1 : i32
    %1 = arith.subi %0, %c1_i32 : i32
    %c0_i32 = arith.constant 0 : i32
    %2 = arith.maxsi %1, %c0_i32 : i32
    %c0_i32_0 = arith.constant 0 : i32
    %c0_i32_1 = arith.constant 0 : i32
    %c0_i32_2 = arith.constant 0 : i32
    return %arg0, %2, %c0_i32_0, %c0_i32_1 : i32, i32, i32, i32
  }
  func.func @transform_4(%arg0: i32, %arg1: i32) -> (i32, i32, i32, i32) {
    %c0_i32 = arith.constant 0 : i32
    %c0_i32_0 = arith.constant 0 : i32
    %c0_i32_1 = arith.constant 0 : i32
    return %arg0, %arg1, %c0_i32, %c0_i32_0 : i32, i32, i32, i32
  }
  func.func @transform_5(%arg0: i32, %arg1: i32) -> (i32, i32, i32, i32) {
    %c16_i32 = arith.constant 16 : i32
    %0 = arith.muli %arg1, %c16_i32 : i32
    %c16_i32_0 = arith.constant 16 : i32
    %1 = arith.addi %0, %c16_i32_0 : i32
    %c15_i32 = arith.constant 15 : i32
    %2 = arith.minsi %1, %c15_i32 : i32
    %c0_i32 = arith.constant 0 : i32
    %c0_i32_1 = arith.constant 0 : i32
    %c0_i32_2 = arith.constant 0 : i32
    return %arg0, %2, %c0_i32, %c0_i32_1 : i32, i32, i32, i32
  }
  func.func @transform_6(%arg0: i32, %arg1: i32) -> (i32, i32, i32) {
    %c0_i32 = arith.constant 0 : i32
    %c0_i32_0 = arith.constant 0 : i32
    %c0_i32_1 = arith.constant 0 : i32
    %c0_i32_2 = arith.constant 0 : i32
    return %c0_i32, %c0_i32_0, %c0_i32_1 : i32, i32, i32
  }
  func.func @transform_7(%arg0: i32, %arg1: i32) -> (i32, i32) {
    %c0_i32 = arith.constant 0 : i32
    %c0_i32_0 = arith.constant 0 : i32
    %c0_i32_1 = arith.constant 0 : i32
    return %c0_i32, %c0_i32_0 : i32, i32
  }
  func.func @transform_8(%arg0: i32, %arg1: i32) -> (i32, i32) {
    %c0_i32 = arith.constant 0 : i32
    %c0_i32_0 = arith.constant 0 : i32
    %c0_i32_1 = arith.constant 0 : i32
    return %c0_i32, %c0_i32_0 : i32, i32
  }
  func.func @transform_9(%arg0: i32, %arg1: i32) -> (i32, i32) {
    %c0_i32 = arith.constant 0 : i32
    %c0_i32_0 = arith.constant 0 : i32
    %c0_i32_1 = arith.constant 0 : i32
    return %c0_i32, %c0_i32_0 : i32, i32
  }
  func.func @transform_10(%arg0: i32, %arg1: i32) -> (i32, i32, i32) {
    %c0_i32 = arith.constant 0 : i32
    %c0_i32_0 = arith.constant 0 : i32
    %c0_i32_1 = arith.constant 0 : i32
    %c0_i32_2 = arith.constant 0 : i32
    return %c0_i32, %c0_i32_0, %c0_i32_1 : i32, i32, i32
  }
  func.func @transform_11(%arg0: i32, %arg1: i32) -> (i32, i32) {
    %c0_i32 = arith.constant 0 : i32
    %c0_i32_0 = arith.constant 0 : i32
    %c0_i32_1 = arith.constant 0 : i32
    return %c0_i32, %c0_i32_0 : i32, i32
  }
  func.func @transform_12(%arg0: i32, %arg1: i32) -> (i32, i32, i32, i32) {
    %c0_i32 = arith.constant 0 : i32
    %c0_i32_0 = arith.constant 0 : i32
    %c0_i32_1 = arith.constant 0 : i32
    return %arg0, %arg1, %c0_i32, %c0_i32_0 : i32, i32, i32, i32
  }
}

</mosaic_0001>

<bundles_post_ra>
// kernel: encoder_forward.6
= control target key start
LH: loop header
LB: loop body
LE: loop exit
PB: predicated region body
PF: predicated region fallthrough
CT: control target
= control target key end

     0   :  { %s2435_s24 = smov 0   ;;  %s2437_s25 = smov 0   ;;  %s3359_s0 = inlined_call_operand.vmem [shape: bf16[2,16,16,3], index: 0, kind: input, shape index: {}, may-alias: {0,1,2}]   ;;  %s3360_s1 = inlined_call_operand.vmem [shape: bf16[2,16,16,3], index: 1, kind: input, shape index: {}, may-alias: {0,1,2}]   ;;  %s3361_s2 = inlined_call_operand.vmem [shape: bf16[2,16,16,3], index: 2, kind: input, shape index: {}, may-alias: {0,1,2}]   ;;  %s3362_s3 = inlined_call_operand.vmem [shape: bf16[2,36,64], index: 3, kind: input, shape index: {}]   ;;  %s3363_s4 = inlined_call_operand.vmem [shape: f32[1,3], index: 4, kind: input, shape index: {}, may-alias: {4,5}]   ;;  %s3364_s5 = inlined_call_operand.vmem [shape: f32[1,3], index: 5, kind: input, shape index: {}, may-alias: {4,5}]   ;;  %s3365_s6 = inlined_call_operand.vmem [shape: bf16[2,16,16,64], index: 6, kind: output, shape index: {0}]   ;;  %s3366_s7 = inlined_call_operand.vmem [shape: f32[2,1,2,64], index: 7, kind: output, shape index: {1}]  }
   0x1   :  { %s2439_s26 = smov 0  }
   0x2 LB: > { %s30_s4 = sadd.s32 1, %s2384_s25  ;;  %p2192_p0 = scmp.ge.s32.totalorder %s2388_s26, 1  ;;  %s2388_s26 = sphi %s2439_s26, %s18_s26   ;;  %s2384_s25 = sphi %s2437_s25, %s3370_s25   ;;  %s2380_s24 = sphi %s2435_s24, %s3369_s24  }
   0x3   : > { %p32_p1 = scmp.ge.s32.totalorder %s30_s4, 2  ;;  %p338_p2 = scmp.lt.s32.totalorder %s2388_s26, 3 }
   0x5   : > { %s3372_s4 = smov (%p32_p1, %s30_s4), 0  ;;  %p339_p3 = pnand %p2192_p0, %p338_p2 }
   0x6   : > { %p422_p4 = scmp.lt.s32.totalorder (!%p339_p3), %s2380_s24, 1  ;;  %s2390_s30 = smov (!%p339_p3), 8  }
   0x7   : > { %342 = sbr.rel (%p339_p3) target bundleno = 701 (0x2bd), region = 44  ;;  %s2391_s8 = smov (!%p339_p3), 4  }
   0x8   : > { %s2393_s16 = smov (!%p339_p3), 12   ;;  %s2394_s17 = smov (!%p339_p3), 24  }
   0xc   : > { %s3374_s24 = smov (!%p422_p4, %s2380_s24), 1  ;;  %vm529_vm0 = vcmask 23552   ;;  %vm938_vm1 = vcmask 1040384   ;;  %vm939_vm2 = vsmask.f32 256  ;;  %vm1271_vm4 = vcmask 1046528  }
   0xd   : > { %s2456_s5 = sshll.u32 %s3374_s24, 7  ;;  %vm2473_vm3 = vmand %vm938_vm1, %vm939_vm2  ;;  %vm982_vm5 = vsmask.f32 7424  ;;  %vm1362_vm6 = vcmask 31744   ;;  %vm1399_vm7 = vcmask 64512   ;;  %s2336_s18 = smul.u32 20, %s3374_s24 }
   0xe   : > { %s2462_s29 = scalar_lea.vmem %s3360_s1, %s2456_s5  ;;  %s430_s11 = scalar_lea.vmem %s3359_s0, %s2456_s5  ;;  %vm1631_vm8 = vcmask 1041408   ;;  %vm1517_vm9 = vcmask 97280   ;;  %vm1550_vm10 = vcmask 195584   ;;  %vm1598_vm11 = vcmask 293888  }
   0xf   : > { %v2312_v0 = vld [vmem:[%s2462_s29 + $0x28] sm:$0xff]  ;;  %v2307_v1 = vld [vmem:[%s2462_s29] sm:$0xff]  ;;  %v2309_v3 = vld [vmem:[%s2462_s29 + $0x10] sm:$0xff]  ;;  %s2304_s12 = sadd.s32 120, %s2456_s5  ;;  %s467_s21 = scalar_lea.vmem %s3362_s3, %s2336_s18  ;;  %vm1964_vm12 = vcmask 519168   ;;  %vm1724_vm13 = vcmask 523264  }
  0x10   : > { %v2308_v2 = vld [vmem:[%s2462_s29 + $0x8] sm:$0xff]  ;;  %v2311_v4 = vld [vmem:[%s2462_s29 + $0x20] sm:$0xff]  ;;  %v625_v5 = vsel %vm529_vm0, %v2312_v0, 1065369472  ;;  %v615_v6 = vsel %vm529_vm0, %v2307_v1, 1065369472  ;;  %s458_s15 = scalar_lea.vmem %s3361_s2, %s2304_s12  ;;  %s2981_s27 = scalar_lea.vmem %s3365_s6, %s2456_s5 }
  0x11   : > { %v617_v7 = vsel %vm529_vm0, %v2308_v2, 1065369472  ;;  %v819_v8 = vshrl.u32 %v625_v5, 16  ;;  %v822_v9 = vshll.u32 %v625_v5, 16  ;;  %v784_v10 = vshrl.u32 %v615_v6, 16  ;;  %v2315_v43 = vld [vmem:[%s2462_s29 + $0x40] sm:$0xff] }
  0x12   : > { %v787_v11 = vshll.u32 %v615_v6, 16  ;;  %v791_v13 = vshrl.u32 %v617_v7, 16  ;;  %v794_v14 = vshll.u32 %v617_v7, 16  ;;  %v619_v15 = vsel %vm529_vm0, %v2309_v3, 1065369472  ;;  %s2202_s5 = sshll.u32 %s3374_s24, 1 }
  0x13   : > { %v623_v16 = vsel %vm529_vm0, %v2311_v4, 1065369472  ;;  %v821_v17 = vrot.slane %v819_v8, 7  ;;  %v786_v18 = vrot.slane %v784_v10, 7  ;;  %v798_v19 = vshrl.u32 %v619_v15, 16 }
  0x14   : > { %v793_v20 = vrot.slane %v791_v13, 7  ;;  %v801_v21 = vshll.u32 %v619_v15, 16  ;;  %v812_v22 = vshrl.u32 %v623_v16, 16  ;;  %v815_v42 = vshll.u32 %v623_v16, 16 }
  0x15   : > { %v824_v23 = vor.u32 %v822_v9, %v821_v17  ;;  %v2481_v24 = vsel %vm2473_vm3, %v821_v17, 0  ;;  %v789_v25 = vor.u32 %v787_v11, %v786_v18  ;;  %v960_v26 = vsel %vm2473_vm3, %v786_v18, 0  ;;  %v2316_v11 = vld [vmem:[%s2462_s29 + $0x48] sm:$0xff] }
  0x16   : > { %v1291_v27 = vrot.slane %v2481_v24, 1  ;;  %v1276_v28 = vrot.slane %v960_v26, 1  ;;  %v1003_v29 = vshll.u32 %v960_v26, 16  ;;  %v796_v30 = vor.u32 %v794_v14, %v793_v20  ;;  %v2313_v26 = vld [vmem:[%s2462_s29 + $0x30] sm:$0xff] }
  0x17   : > { %v2488_v31 = vsel %vm2473_vm3, 0, %v824_v23  ;;  %v2492_v32 = vsel %vm2473_vm3, 0, %v789_v25  ;;  %v961_v33 = vsel %vm2473_vm3, %v793_v20, 0  ;;  %v800_v34 = vrot.slane %v798_v19, 7 }
  0x18   : > { %v1290_v35 = vrot.slane %v2488_v31, 1  ;;  %v1275_v36 = vrot.slane %v2492_v32, 1  ;;  %v996_v37 = vshrl.u32 %v2492_v32, 16  ;;  %v998_v38 = vshll.u32 %v2492_v32, 16 }
  0x19   : > { %v1005_v39 = vrot.slane %v1003_v29, 1  ;;  %v2502_v40 = vsel %vm2473_vm3, 0, %v796_v30  ;;  %v1279_v41 = vrot.slane %v961_v33, 1  ;;  %v1015_v47 = vshll.u32 %v961_v33, 16 }
  0x1a   : > { %v1292_v44 = vsel %vm1271_vm4, %v1290_v35, %v1291_v27  ;;  %v1277_v45 = vsel %vm1271_vm4, %v1275_v36, %v1276_v28  ;;  %v1000_v46 = vrot.slane %v998_v38, 1  ;;  %v1278_v48 = vrot.slane %v2502_v40, 1  ;;  %v2310_v27 = vld [vmem:[%s2462_s29 + $0x18] sm:$0xff] }
  0x1b   : > { %1338 = vrot.lane.b32.xlu0 %v1292_v44, %s2390_s30  ;;  %1328 = vrot.lane.b32.xlu1 %v1277_v45, %s2390_s30  ;;  %v1008_v49 = vshrl.u32 %v2502_v40, 16  ;;  %v1010_v50 = vshll.u32 %v2502_v40, 16  ;;  %v803_v51 = vor.u32 %v801_v21, %v800_v34  ;;  %v962_v53 = vsel %vm2473_vm3, %v800_v34, 0 }
  0x1c   : > { %v1001_v52 = vor.u32 %v1000_v46, %v996_v37  ;;  %v814_v54 = vrot.slane %v812_v22, 7  ;;  %v1282_v57 = vrot.slane %v962_v53, 1  ;;  %v631_v58 = vsel %vm529_vm0, %v2315_v43, 1065369472 }
  0x1d   : > { %v1012_v55 = vrot.slane %v1010_v50, 1  ;;  %v2516_v56 = vsel %vm2473_vm3, 0, %v803_v51  ;;  %v1017_v59 = vrot.slane %v1015_v47, 1  ;;  %v1280_v63 = vsel %vm1271_vm4, %v1278_v48, %v1279_v41 }
  0x1e   : > { %v1281_v60 = vrot.slane %v2516_v56, 1  ;;  %v817_v61 = vor.u32 %v815_v42, %v814_v54  ;;  %v1006_v62 = vsel %vm982_vm5, %v1001_v52, %v1005_v39  ;;  %v964_v1 = vsel %vm2473_vm3, %v814_v54, 0 }
  0x1f   : > { %v1013_v0 = vor.u32 %v1012_v55, %v1008_v49  ;;  %v1051_v4 = vshll.u32 %v964_v1, 16  ;;  %v840_v5 = vshrl.u32 %v631_v58, 16  ;;  %v1058_v6 = vshll.u32 %v2488_v31, 16 }
  0x20   : > { %v1283_v2 = vsel %vm1271_vm4, %v1281_v60, %v1282_v57  ;;  %v2527_v3 = vsel %vm2473_vm3, 0, %v817_v61  ;;  %v1056_v7 = vshrl.u32 %v2488_v31, 16  ;;  %v1288_v14 = vrot.slane %v964_v1, 1 }
  0x21   : > { %1332 = vrot.lane.b32.xlu2 %v1283_v2, %s2390_s30  ;;  %v1044_v8 = vshrl.u32 %v2527_v3, 16  ;;  %v1046_v9 = vshll.u32 %v2527_v3, 16  ;;  %v842_v10 = vrot.slane %v840_v5, 7  ;;  %v1287_v13 = vrot.slane %v2527_v3, 1 }
  0x22   : > { %v1063_v15 = vshll.u32 %v2481_v24, 16  ;;  %v843_v16 = vshll.u32 %v631_v58, 16  ;;  %v1018_v17 = vsel %vm982_vm5, %v1013_v0, %v1017_v59  ;;  %v1053_v19 = vrot.slane %v1051_v4, 1 }
  0x23   : > { %1201 = vrot.lane.b32.xlu0 %v1006_v62, %s2391_s8  ;;  %1330 = vrot.lane.b32.xlu1 %v1280_v63, %s2390_s30  ;;  %v1048_v18 = vrot.slane %v1046_v9, 1  ;;  %v1022_v20 = vshll.u32 %v2516_v56, 16  ;;  %v1060_v21 = vrot.slane %v1058_v6, 1  ;;  %v2543_v23 = vsel %vm2473_vm3, %v842_v10, 0 }
  0x24   : > { %v845_v22 = vor.u32 %v843_v16, %v842_v10  ;;  %v1027_v25 = vshll.u32 %v962_v53, 16  ;;  %v1020_v24 = vshrl.u32 %v2516_v56, 16  ;;  %v633_v30 = vsel %vm529_vm0, %v2316_v11, 1065369472  ;;  %v2306_v53 = vld [vmem:[%s430_s11] sm:$0xff] }
  0x25   : > { %v1049_v28 = vor.u32 %v1048_v18, %v1044_v8  ;;  %v1024_v29 = vrot.slane %v1022_v20, 1  ;;  %v1289_v33 = vsel %vm1271_vm4, %v1287_v13, %v1288_v14  ;;  %v847_v35 = vshrl.u32 %v633_v30, 16 }
  0x26   : > { %v2552_v34 = vsel %vm2473_vm3, 0, %v845_v22  ;;  %v850_v36 = vshll.u32 %v633_v30, 16  ;;  %v1099_v41 = vshll.u32 %v2543_v23, 16  ;;  %v1029_v42 = vrot.slane %v1027_v25, 1 }
  0x27   : > { %v1054_v37 = vsel %vm982_vm5, %v1049_v28, %v1053_v19  ;;  %v1092_v38 = vshrl.u32 %v2552_v34, 16  ;;  %v1094_v39 = vshll.u32 %v2552_v34, 16  ;;  %v849_v43 = vrot.slane %v847_v35, 7  ;;  %v2317_v35 = vld [vmem:[%s2462_s29 + $0x50] sm:$0xff] }
  0x28   : > { %v627_v44 = vsel %vm529_vm0, %v2313_v26, 1065369472  ;;  %v621_v45 = vsel %vm529_vm0, %v2310_v27, 1065369472  ;;  %v1025_v47 = vor.u32 %v1024_v29, %v1020_v24  ;;  %v1065_v50 = vrot.slane %v1063_v15, 1  ;;  %v2319_v15 = vld [vmem:[%s2462_s29 + $0x60] sm:$0xff] }
  0x29   : > { %1209 = vrot.lane.b32.xlu2 %v1054_v37, %s2391_s8  ;;  %v1096_v46 = vrot.slane %v1094_v39, 1  ;;  %v826_v48 = vshrl.u32 %v627_v44, 16  ;;  %v829_v49 = vshll.u32 %v627_v44, 16  ;;  %v852_v51 = vor.u32 %v850_v36, %v849_v43 }
  0x2a   : > { %v805_v52 = vshrl.u32 %v621_v45, 16  ;;  %v1061_v54 = vor.u32 %v1060_v21, %v1056_v7  ;;  %v1101_v57 = vrot.slane %v1099_v41, 1  ;;  %v969_v59 = vsel %vm2473_vm3, %v849_v43, 0 }
  0x2b   : > { %1203 = vrot.lane.b32.xlu0 %v1018_v17, %s2391_s8  ;;  %1336 = vrot.lane.b32.xlu1 %v1289_v33, %s2390_s30  ;;  %v1097_v55 = vor.u32 %v1096_v46, %v1092_v38  ;;  %v828_v58 = vrot.slane %v826_v48, 7  ;;  %v808_v61 = vshll.u32 %v621_v45, 16  ;;  %v1030_v62 = vsel %vm982_vm5, %v1025_v47, %v1029_v42  ;;  %v2320_v45 = vld [vmem:[%s2462_s29 + $0x68] sm:$0xff] }
  0x2c   : > { %v807_v60 = vrot.slane %v805_v52, 7  ;;  %v2572_v63 = vsel %vm2473_vm3, 0, %v852_v51  ;;  %v1111_v1 = vshll.u32 %v969_v59, 16  ;;  %v532_v5 = vsel %vm529_vm0, %v2306_v53, 1065369472 }
  0x2d   : > { %v831_v0 = vor.u32 %v829_v49, %v828_v58  ;;  %v1104_v2 = vshrl.u32 %v2572_v63, 16  ;;  %v1106_v4 = vshll.u32 %v2572_v63, 16  ;;  %v1066_v6 = vsel %vm982_vm5, %v1061_v54, %v1065_v50 }
  0x2e   : > { %v1102_v7 = vsel %vm982_vm5, %v1097_v55, %v1101_v57  ;;  %v810_v9 = vor.u32 %v808_v61, %v807_v60  ;;  %v1299_v10 = vrot.slane %v2552_v34, 1  ;;  %v1300_v11 = vrot.slane %v2543_v23, 1 }
  0x2f   : > { %v2581_v8 = vsel %vm2473_vm3, 0, %v831_v0  ;;  %v1303_v13 = vrot.slane %v969_v59, 1  ;;  %v1108_v14 = vrot.slane %v1106_v4, 1  ;;  %v1302_v16 = vrot.slane %v2572_v63, 1 }
  0x30   : > { %v1113_v17 = vrot.slane %v1111_v1, 1  ;;  %v671_v18 = vunpack.c.l.bf16 %v532_v5  ;;  %v672_v19 = vunpack.c.h.bf16 %v532_v5  ;;  %v1070_v20 = vshll.u32 %v2581_v8, 16 }
  0x31   : > { %1205 = vrot.lane.b32.xlu2 %v1030_v62, %s2391_s8  ;;  %v1109_v21 = vor.u32 %v1108_v14, %v1104_v2  ;;  %v2593_v22 = vsel %vm2473_vm3, 0, %v810_v9  ;;  %v2597_v23 = vsel %vm2473_vm3, %v828_v58, 0  ;;  %v963_v25 = vsel %vm2473_vm3, %v807_v60, 0  ;;  %v2314_v62 = vld [vmem:[%s2462_s29 + $0x38] sm:$0xff] }
  0x32   : > { %v2392_v26 = vmov 0.0   ;;  %v1034_v28 = vshll.u32 %v2593_v22, 16  ;;  %v1301_v24 = vsel %vm1271_vm4, %v1299_v10, %v1300_v11  ;;  %v1032_v29 = vshrl.u32 %v2593_v22, 16 }
  0x33   : > { %1211 = vrot.lane.b32.xlu0 %v1066_v6, %s2391_s8  ;;  %1217 = vrot.lane.b32.xlu1 %v1102_v7, %s2391_s8  ;;  %v2601_v27 = vunpack.c.l.bf16 %v2392_v26  ;;  %v1039_v30 = vshll.u32 %v963_v25, 16  ;;  %v639_v33 = vsel %vm529_vm0, %v2319_v15, 1065369472  ;;  %v1114_v36 = vsel %vm982_vm5, %v1109_v21, %v1113_v17 }
  0x34   : > { %v1036_v39 = vrot.slane %v1034_v28, 1  ;;  %v1068_v41 = vshrl.u32 %v2581_v8, 16  ;;  %v1072_v42 = vrot.slane %v1070_v20, 1  ;;  %v1075_v43 = vshll.u32 %v2597_v23, 16 }
  0x35   : > { %v674_v37 = vmul.f32 %v2601_v27, %v671_v18  ;;  %v675_v38 = vmul.f32 %v2601_v27, %v672_v19  ;;  %v868_v44 = vshrl.u32 %v639_v33, 16  ;;  %v1304_v46 = vsel %vm1271_vm4, %v1302_v16, %v1303_v13 }
  0x36   : > { %v871_v49 = vshll.u32 %v639_v33, 16  ;;  %v1284_v50 = vrot.slane %v2593_v22, 1  ;;  %v1285_v51 = vrot.slane %v963_v25, 1  ;;  %v635_v53 = vsel %vm529_vm0, %v2317_v35, 1065369472 }
  0x37   : > { %v676_v47 = vpack.c.bf16 %v674_v37, %v674_v37  ;;  %v677_v48 = vpack.c.bf16 %v675_v38, %v675_v38  ;;  %v870_v52 = vrot.slane %v868_v44, 7  ;;  %v1037_v57 = vor.u32 %v1036_v39, %v1032_v29 }
  0x38   : > { %v1041_v58 = vrot.slane %v1039_v30, 1  ;;  %v1073_v59 = vor.u32 %v1072_v42, %v1068_v41  ;;  %v1077_v60 = vrot.slane %v1075_v43, 1  ;;  %v641_v61 = vsel %vm529_vm0, %v2320_v45, 1065369472 }
  0x39   : > { %1219 = vrot.lane.b32.xlu2 %v1114_v36, %s2391_s8  ;;  %v754_v54 = vunpack.c.l.b16 %v676_v47  ;;  %v755_v55 = vunpack.c.l.b16 %v677_v48  ;;  %v873_v1 = vor.u32 %v871_v49, %v870_v52  ;;  %v854_v2 = vshrl.u32 %v635_v53, 16 }
  0x3a   : > { %v1286_v4 = vsel %vm1271_vm4, %v1284_v50, %v1285_v51  ;;  %v1042_v7 = vsel %vm982_vm5, %v1037_v57, %v1041_v58  ;;  %v875_v9 = vshrl.u32 %v641_v61, 16  ;;  %v1078_v10 = vsel %vm982_vm5, %v1073_v59, %v1077_v60 }
  0x3b   : > { %1344 = vrot.lane.b32.xlu0 %v1301_v24, %s2390_s30  ;;  %1346 = vrot.lane.b32.xlu1 %v1304_v46, %s2390_s30  ;;  %v758_v0 = vpack.c.b16 %v755_v55, %v754_v54  ;;  %v1293_v11 = vrot.slane %v2581_v8, 1  ;;  %v1294_v13 = vrot.slane %v2597_v23, 1  ;;  %v629_v14 = vsel %vm529_vm0, %v2314_v62, 1065369472  ;;  %v2318_v55 = vld [vmem:[%s2462_s29 + $0x58] sm:$0xff] }
  0x3c   : > { %v2630_v16 = vsel %vm2473_vm3, 0, %v873_v1  ;;  %v856_v17 = vrot.slane %v854_v2, 7  ;;  %v857_v18 = vshll.u32 %v635_v53, 16  ;;  %v972_v19 = vsel %vm2473_vm3, %v870_v52, 0 }
  0x3d   : > { %v777_v5 = vshrl.u32 %v758_v0, 16  ;;  %v780_v6 = vshll.u32 %v758_v0, 16  ;;  %v878_v20 = vshll.u32 %v641_v61, 16  ;;  %v877_v23 = vrot.slane %v875_v9, 7  ;;  %v2321_v0 = vld [vmem:[%s2462_s29 + $0x70] sm:$0xff] }
  0x3e   : > { %v833_v26 = vshrl.u32 %v629_v14, 16  ;;  %v1142_v24 = vshll.u32 %v2630_v16, 16  ;;  %v1295_v29 = vsel %vm1271_vm4, %v1293_v11, %v1294_v13  ;;  %v836_v30 = vshll.u32 %v629_v14, 16 }
  0x3f   : > { %v779_v15 = vrot.slane %v777_v5, 7  ;;  %v859_v36 = vor.u32 %v857_v18, %v856_v17  ;;  %v2647_v37 = vsel %vm2473_vm3, %v856_v17, 0  ;;  %v1147_v42 = vshll.u32 %v972_v19, 16 }
  0x40   : > { %v880_v43 = vor.u32 %v878_v20, %v877_v23  ;;  %v1123_v45 = vshll.u32 %v2647_v37, 16  ;;  %v835_v46 = vrot.slane %v833_v26, 7  ;;  %v1140_v52 = vshrl.u32 %v2630_v16, 16 }
  0x41   : > { %1207 = vrot.lane.b32.xlu2 %v1042_v7, %s2391_s8  ;;  %v782_v21 = vor.u32 %v780_v6, %v779_v15  ;;  %v959_v25 = vsel %vm2473_vm3, %v779_v15, 0  ;;  %v2654_v44 = vsel %vm2473_vm3, 0, %v859_v36  ;;  %v1144_v53 = vrot.slane %v1142_v24, 1 }
  0x42   : > { %v991_v28 = vshll.u32 %v959_v25, 16  ;;  %v1273_v35 = vrot.slane %v959_v25, 1  ;;  %v1116_v49 = vshrl.u32 %v2654_v44, 16  ;;  %v1118_v50 = vshll.u32 %v2654_v44, 16 }
  0x43   : > { %1213 = vrot.lane.b32.xlu0 %v1078_v10, %s2391_s8  ;;  %1334 = vrot.lane.b32.xlu1 %v1286_v4, %s2390_s30  ;;  %v2643_v33 = vsel %vm2473_vm3, 0, %v782_v21  ;;  %v838_v54 = vor.u32 %v836_v30, %v835_v46  ;;  %v1312_v59 = vrot.slane %v972_v19, 1  ;;  %v2665_v60 = vsel %vm2473_vm3, 0, %v880_v43 }
  0x44   : > { %v984_v38 = vshrl.u32 %v2643_v33, 16  ;;  %v986_v39 = vshll.u32 %v2643_v33, 16  ;;  %v1272_v41 = vrot.slane %v2643_v33, 1  ;;  %v993_v48 = vrot.slane %v991_v28, 1 }
  0x45   : > { %v1120_v58 = vrot.slane %v1118_v50, 1  ;;  %v1125_v61 = vrot.slane %v1123_v45, 1  ;;  %v2669_v62 = vsel %vm2473_vm3, 0, %v838_v54  ;;  %v1149_v2 = vrot.slane %v1147_v42, 1 }
  0x46   : > { %v988_v47 = vrot.slane %v986_v39, 1  ;;  %v1274_v51 = vsel %vm1271_vm4, %v1272_v41, %v1273_v35  ;;  %v1311_v4 = vrot.slane %v2630_v16, 1  ;;  %v1145_v6 = vor.u32 %v1144_v53, %v1140_v52 }
  0x47   : > { %v1121_v5 = vor.u32 %v1120_v58, %v1116_v49  ;;  %v2678_v7 = vsel %vm2473_vm3, %v877_v23, 0  ;;  %v1082_v9 = vshll.u32 %v2669_v62, 16  ;;  %v637_v10 = vsel %vm529_vm0, %v2318_v55, 1065369472 }
  0x48   : > { %v989_v57 = vor.u32 %v988_v47, %v984_v38  ;;  %v1154_v11 = vshll.u32 %v2665_v60, 16  ;;  %v967_v13 = vsel %vm2473_vm3, %v835_v46, 0  ;;  %v861_v14 = vshrl.u32 %v637_v10, 16 }
  0x49   : > { %1340 = vrot.lane.b32.xlu2 %v1295_v29, %s2390_s30  ;;  %v864_v15 = vshll.u32 %v637_v10, 16  ;;  %v1126_v17 = vsel %vm982_vm5, %v1121_v5, %v1125_v61  ;;  %v643_v18 = vsel %vm529_vm0, %v2321_v0, 1065369472  ;;  %v1159_v19 = vshll.u32 %v2678_v7, 16 }
  0x4a   : > { %v994_v1 = vsel %vm982_vm5, %v989_v57, %v993_v48  ;;  %v863_v20 = vrot.slane %v861_v14, 7  ;;  %v882_v21 = vshrl.u32 %v643_v18, 16  ;;  %v1313_v25 = vsel %vm1271_vm4, %v1311_v4, %v1312_v59 }
  0x4b   : > { %1326 = vrot.lane.b32.xlu1 %v1274_v51, %s2390_s30  ;;  %1199 = vrot.lane.b32.xlu0 %v994_v1, %s2391_s8  ;;  %v1080_v23 = vshrl.u32 %v2669_v62, 16  ;;  %v1084_v26 = vrot.slane %v1082_v9, 1  ;;  %v1087_v28 = vshll.u32 %v967_v13, 16  ;;  %v1150_v24 = vsel %vm982_vm5, %v1145_v6, %v1149_v2  ;;  %v2322_v51 = vld [vmem:[%s2462_s29 + $0x78] sm:$0xff] }
  0x4c   : > { %v1152_v29 = vshrl.u32 %v2665_v60, 16  ;;  %v1156_v30 = vrot.slane %v1154_v11, 1  ;;  %v866_v35 = vor.u32 %v864_v15, %v863_v20  ;;  %v1305_v36 = vrot.slane %v2654_v44, 1 }
  0x4d   : > { %v1306_v38 = vrot.slane %v2647_v37, 1  ;;  %v884_v39 = vrot.slane %v882_v21, 7  ;;  %v885_v41 = vshll.u32 %v643_v18, 16  ;;  %v1085_v43 = vor.u32 %v1084_v26, %v1080_v23 }
  0x4e   : > { %v2698_v42 = vsel %vm2473_vm3, 0, %v866_v35  ;;  %v1089_v45 = vrot.slane %v1087_v28, 1  ;;  %v1157_v47 = vor.u32 %v1156_v30, %v1152_v29  ;;  %v1161_v48 = vrot.slane %v1159_v19, 1 }
  0x4f   : > { %v1130_v46 = vshll.u32 %v2698_v42, 16  ;;  %v971_v49 = vsel %vm2473_vm3, %v863_v20, 0  ;;  %v1307_v37 = vsel %vm1271_vm4, %v1305_v36, %v1306_v38  ;;  %v887_v50 = vor.u32 %v885_v41, %v884_v39 }
  0x50   : > { %v1090_v52 = vsel %vm982_vm5, %v1085_v43, %v1089_v45  ;;  %v1128_v53 = vshrl.u32 %v2698_v42, 16  ;;  %v1135_v55 = vshll.u32 %v971_v49, 16  ;;  %v1162_v57 = vsel %vm982_vm5, %v1157_v47, %v1161_v48 }
  0x51   : > { %1221 = vrot.lane.b32.xlu2 %v1126_v17, %s2391_s8  ;;  %v1132_v54 = vrot.slane %v1130_v46, 1  ;;  %v2712_v58 = vsel %vm2473_vm3, 0, %v887_v50  ;;  %v1296_v59 = vrot.slane %v2669_v62, 1  ;;  %v1297_v61 = vrot.slane %v967_v13, 1 }
  0x52   : > { %v645_v0 = vsel %vm529_vm0, %v2322_v51, 1065369472  ;;  %v1166_v1 = vshll.u32 %v2712_v58, 16  ;;  %v1137_v4 = vrot.slane %v1135_v55, 1  ;;  %v1314_v5 = vrot.slane %v2665_v60, 1 }
  0x53   : > { %1352 = vrot.lane.b32.xlu1 %v1313_v25, %s2390_s30  ;;  %1225 = vrot.lane.b32.xlu0 %v1150_v24, %s2391_s8  ;;  %v1133_v2 = vor.u32 %v1132_v54, %v1128_v53  ;;  %v1315_v6 = vrot.slane %v2678_v7, 1  ;;  %v974_v9 = vsel %vm2473_vm3, %v884_v39, 0  ;;  %v889_v10 = vshrl.u32 %v645_v0, 16 }
  0x54   : > { %v1298_v11 = vsel %vm1271_vm4, %v1296_v59, %v1297_v61  ;;  %v1164_v13 = vshrl.u32 %v2712_v58, 16  ;;  %v1168_v14 = vrot.slane %v1166_v1, 1  ;;  %v1171_v15 = vshll.u32 %v974_v9, 16 }
  0x55   : > { %v1138_v17 = vsel %vm982_vm5, %v1133_v2, %v1137_v4  ;;  %v1316_v18 = vsel %vm1271_vm4, %v1314_v5, %v1315_v6  ;;  %v891_v19 = vrot.slane %v889_v10, 7  ;;  %v892_v20 = vshll.u32 %v645_v0, 16  ;;  %v2323_v2 = vld [vmem:[%s458_s15] sm:$0xff] }
  0x56   : > { %v1169_v21 = vor.u32 %v1168_v14, %v1164_v13  ;;  %v1173_v7 = vrot.slane %v1171_v15, 1  ;;  %v1317_v25 = vrot.slane %v2712_v58, 1  ;;  %v1318_v23 = vrot.slane %v974_v9, 1 }
  0x57   : > { %v1308_v26 = vrot.slane %v2698_v42, 1  ;;  %v1309_v28 = vrot.slane %v971_v49, 1  ;;  %v894_v24 = vor.u32 %v892_v20, %v891_v19  ;;  %v975_v38 = vsel %vm2473_vm3, %v891_v19, 0 }
  0x58   : > { %v1174_v29 = vsel %vm982_vm5, %v1169_v21, %v1173_v7  ;;  %v1319_v30 = vsel %vm1271_vm4, %v1317_v25, %v1318_v23  ;;  %v1183_v45 = vshll.u32 %v975_v38, 16  ;;  %v1321_v47 = vrot.slane %v975_v38, 1 }
  0x59   : > { %1348 = vrot.lane.b32.xlu2 %v1307_v37, %s2390_s30  ;;  %v1310_v35 = vsel %vm1271_vm4, %v1308_v26, %v1309_v28  ;;  %v2737_v36 = vsel %vm2473_vm3, 0, %v894_v24  ;;  %v652_v6 = vsel %vm529_vm0, %v2323_v2, 1065369472  ;;  %vm1930_vm14 = vcmask 517120  }
  0x5a   : > { %v1178_v39 = vshll.u32 %v2737_v36, 16  ;;  %v1176_v41 = vshrl.u32 %v2737_v36, 16  ;;  %v1320_v46 = vrot.slane %v2737_v36, 1  ;;  %v1185_v49 = vrot.slane %v1183_v45, 1 }
  0x5b   : > { %1215 = vrot.lane.b32.xlu1 %v1090_v52, %s2391_s8  ;;  %1227 = vrot.lane.b32.xlu0 %v1162_v57, %s2391_s8  ;;  %v695_v14 = vunpack.c.l.bf16 %v652_v6  ;;  %v696_v15 = vunpack.c.h.bf16 %v652_v6 }
  0x5c   : > { %v1180_v43 = vrot.slane %v1178_v39, 1  ;;  %v1322_v50 = vsel %vm1271_vm4, %v1320_v46, %v1321_v47 }
  0x5e   : > { %v1181_v48 = vor.u32 %v1180_v43, %v1176_v41 }
  0x60   : > { %v1186_v37 = vsel %vm982_vm5, %v1181_v48, %v1185_v49 }
  0x61   : > { %1342 = vrot.lane.b32.xlu2 %v1298_v11, %s2390_s30 }
  0x63   : > { %1223 = vrot.lane.b32.xlu1 %v1138_v17, %s2391_s8  ;;  %1354 = vrot.lane.b32.xlu0 %v1316_v18, %s2390_s30  ;;  %v699_v17 = vmul.f32 %v696_v15, %v2601_v27 }
  0x65   : > { %v701_v26 = vpack.c.bf16 %v699_v17, %v699_v17 }
  0x69   : > { %1229 = vrot.lane.b32.xlu2 %v1174_v29, %s2391_s8 }
  0x6b   : > { %1356 = vrot.lane.b32.xlu1 %v1319_v30, %s2390_s30  ;;  %1350 = vrot.lane.b32.xlu0 %v1310_v35, %s2390_s30 }
  0x71   : > { %1231 = vrot.lane.b32.xlu2 %v1186_v37, %s2391_s8 }
  0x73   : > { %1358 = vrot.lane.b32.xlu0 %v1322_v50, %s2390_s30 }
  0x7b   : > { %v1333_v51 = vpop.permute.xlu2 %1332 }
  0x83   : > { %v1210_v52 = vpop.permute.xlu2 %1209 }
  0x8b   : > { %v1206_v53 = vpop.permute.xlu2 %1205 }
  0x8c   : > { %v1370_v4 = vsel %vm1362_vm6, %v2516_v56, %v1206_v53  ;;  %v698_v56 = vmul.f32 %v695_v14, %v2601_v27 }
  0x8d   : > { %v1339_v54 = vpop.permute.xlu0 %1338  ;;  %v1329_v55 = vpop.permute.xlu1 %1328 }
  0x8e   : > { %v700_v23 = vpack.c.bf16 %v698_v56, %v698_v56 }
  0x90   : > { %v756_v28 = vunpack.c.l.b16 %v700_v23 }
  0x93   : > { %v1220_v57 = vpop.permute.xlu2 %1219 }
  0x95   : > { %v1202_v59 = vpop.permute.xlu0 %1201  ;;  %v1331_v61 = vpop.permute.xlu1 %1330 }
  0x96   : > { %v1366_v0 = vsel %vm1362_vm6, %v2492_v32, %v1202_v59  ;;  %v2768_v32 = vsel %vm1399_vm7, %v1370_v4, %v1333_v51 }
  0x97   : > { %v2758_v1 = vsel %vm1399_vm7, %v1366_v0, %v1329_v55 }
  0x98   : > { %1452 = vrot.lane.b32.xlu2 %v2758_v1, %s2393_s16 }
  0x9b   : > { %v1208_v5 = vpop.permute.xlu2 %1207 }
  0x9d   : > { %v1204_v9 = vpop.permute.xlu0 %1203  ;;  %v1337_v10 = vpop.permute.xlu1 %1336 }
  0x9e   : > { %v1368_v11 = vsel %vm1362_vm6, %v2502_v40, %v1204_v9  ;;  %v1374_v40 = vsel %vm1362_vm6, %v2527_v3, %v1210_v52  ;;  %v1384_v3 = vsel %vm1362_vm6, %v2572_v63, %v1220_v57  ;;  %v1372_v63 = vsel %vm1362_vm6, %v2593_v22, %v1208_v5 }
  0x9f   : > { %v2771_v13 = vsel %vm1399_vm7, %v1368_v11, %v1331_v61  ;;  %v2784_v20 = vsel %vm1399_vm7, %v1374_v40, %v1337_v10 }
  0xa0   : > { %1487 = vrot.lane.b32.xlu2 %v2768_v32, %s2394_s17  ;;  %1485 = vrot.lane.b32.xlu1 %v2771_v13, %s2394_s17 }
  0xa1   : > { %1454 = vrot.lane.b32.xlu0 %v2771_v13, %s2393_s16 }
  0xa3   : > { %v1341_v25 = vpop.permute.xlu2 %1340 }
  0xa5   : > { %v1212_v18 = vpop.permute.xlu0 %1211  ;;  %v1218_v19 = vpop.permute.xlu1 %1217 }
  0xa6   : > { %v1376_v21 = vsel %vm1362_vm6, %v2488_v31, %v1212_v18  ;;  %v1382_v27 = vsel %vm1362_vm6, %v2552_v34, %v1218_v19  ;;  %v757_v31 = vunpack.c.l.b16 %v701_v26  ;;  %v981_v18 = vld [vmem:[%s467_s21 + $0x10] sm:$0x3] }
  0xa7   : > { %v2789_v7 = vsel %vm1399_vm7, %v1376_v21, %v1339_v54  ;;  %v1592_v23 = vunpack.c.l.b16 %v981_v18 }
  0xa8   : > { %1460 = vrot.lane.b32.xlu1 %v2784_v20, %s2393_s16  ;;  %v775_v38 = vpack.c.b16 %v757_v31, %v756_v28 }
  0xa9   : > { %1493 = vrot.lane.b32.xlu0 %v2789_v7, %s2394_s17 }
  0xaa   : > { %v896_v39 = vshrl.u32 %v775_v38, 16  ;;  %v899_v49 = vshll.u32 %v775_v38, 16  ;;  %v2325_v38 = vld [vmem:[%s467_s21 + $0x8] sm:$0xff] }
  0xab   : > { %v1222_v34 = vpop.permute.xlu2 %1221 }
  0xac   : > { %v898_v48 = vrot.slane %v896_v39, 7  ;;  %v2324_v39 = vld [vmem:[%s467_s21] sm:$0xff] }
  0xad   : > { %v1345_v24 = vpop.permute.xlu0 %1344  ;;  %v1347_v29 = vpop.permute.xlu1 %1346 }
  0xae   : > { %v2800_v30 = vsel %vm1399_vm7, %v1382_v27, %v1345_v24  ;;  %v2803_v35 = vsel %vm1399_vm7, %v1384_v3, %v1347_v29  ;;  %v901_v37 = vor.u32 %v899_v49, %v898_v48  ;;  %v976_v57 = vsel %vm2473_vm3, %v898_v48, 0 }
  0xaf   : > { %1468 = vrot.lane.b32.xlu2 %v2800_v30, %s2393_s16  ;;  %v1195_v2 = vshll.u32 %v976_v57, 16  ;;  %v1595_v27 = vpack.c.b16 %v1592_v23, %v1592_v23 }
  0xb0   : > { %1456 = vrot.lane.b32.xlu1 %v2768_v32, %s2393_s16  ;;  %v2836_v54 = vsel %vm2473_vm3, 0, %v901_v37 }
  0xb1   : > { %1501 = vrot.lane.b32.xlu0 %v2803_v35, %s2394_s17  ;;  %v1188_v61 = vshrl.u32 %v2836_v54, 16  ;;  %v1197_v6 = vrot.slane %v1195_v2, 1  ;;  %v1323_v21 = vrot.slane %v2836_v54, 1  ;;  %v1633_v31 = vsel %vm1631_vm8, %v1595_v27, 0 }
  0xb2   : > { %1640 = vmatpush.bf16.msra.mxu0 %v1633_v31  ;;  %2327 = vmatpush.bf16.msra.mxu1 %v1633_v31 }
  0xb3   : > { %v1349_v22 = vpop.permute.xlu2 %1348  ;;  %2328 = vmatpush.bf16.msra.mxu2 %v1633_v31  ;;  %2329 = vmatpush.bf16.msra.mxu3 %v1633_v31 }
  0xb5   : > { %v1214_v41 = vpop.permute.xlu0 %1213  ;;  %v1335_v43 = vpop.permute.xlu1 %1334 }
  0xb6   : > { %v1378_v45 = vsel %vm1362_vm6, %v2581_v8, %v1214_v41  ;;  %v2816_v46 = vsel %vm1399_vm7, %v1372_v63, %v1335_v43  ;;  %v1386_v8 = vsel %vm1362_vm6, %v2654_v44, %v1222_v34  ;;  %v1190_v44 = vshll.u32 %v2836_v54, 16  ;;  %1641 = vmatpush.bf16.msra.mxu0 %v2325_v38  ;;  %2330 = vmatpush.bf16.msra.mxu1 %v2325_v38 }
  0xb7   : > { %1462 = vrot.lane.b32.xlu2 %v2789_v7, %s2393_s16  ;;  %v2821_v47 = vsel %vm1399_vm7, %v1378_v45, %v1341_v25  ;;  %v2830_v52 = vsel %vm1399_vm7, %v1386_v8, %v1349_v22  ;;  %v1324_v25 = vrot.slane %v976_v57, 1  ;;  %2331 = vmatpush.bf16.msra.mxu2 %v2325_v38 }
  0xb8   : > { %1495 = vrot.lane.b32.xlu1 %v2821_v47, %s2394_s17  ;;  %v1192_v0 = vrot.slane %v1190_v44, 1  ;;  %2332 = vmatpush.bf16.msra.mxu3 %v2325_v38 }
  0xb9   : > { %1489 = vrot.lane.b32.xlu0 %v2816_v46, %s2394_s17  ;;  %v1325_v28 = vsel %vm1271_vm4, %v1323_v21, %v1324_v25 }
  0xba   : > { %v1193_v12 = vor.u32 %v1192_v0, %v1188_v61  ;;  %1642 = vmatpush.bf16.msra.mxu0 %v2324_v39  ;;  %2333 = vmatpush.bf16.msra.mxu1 %v2324_v39 }
  0xbb   : > { %v1343_v14 = vpop.permute.xlu2 %1342  ;;  %2334 = vmatpush.bf16.msra.mxu2 %v2324_v39 }
  0xbc   : > { %v1198_v10 = vsel %vm982_vm5, %v1193_v12, %v1197_v6  ;;  %2335 = vmatpush.bf16.msra.mxu3 %v2324_v39 }
  0xbd   : > { %v1327_v50 = vpop.permute.xlu1 %1326  ;;  %v1200_v51 = vpop.permute.xlu0 %1199 }
  0xbe   : > { %v1364_v53 = vsel %vm1362_vm6, %v2643_v33, %v1200_v51 }
  0xbf   : > { %v2839_v55 = vsel %vm1399_vm7, %v1364_v53, %v1327_v50 }
  0xc0   : > { %1470 = vrot.lane.b32.xlu1 %v2803_v35, %s2393_s16 }
  0xc1   : > { %1503 = vrot.lane.b32.xlu0 %v2830_v52, %s2394_s17 }
  0xc5   : > { %v1353_v59 = vpop.permute.xlu1 %1352  ;;  %v1226_v33 = vpop.permute.xlu0 %1225 }
  0xc6   : > { %v1390_v4 = vsel %vm1362_vm6, %v2630_v16, %v1226_v33 }
  0xc7   : > { %v2852_v5 = vsel %vm1399_vm7, %v1390_v4, %v1353_v59 }
  0xc8   : > { %1476 = vrot.lane.b32.xlu2 %v2852_v5, %s2393_s16 }
  0xc9   : > { %1464 = vrot.lane.b32.xlu0 %v2821_v47, %s2393_s16 }
  0xcd   : > { %v1228_v9 = vpop.permute.xlu0 %1227  ;;  %v1216_v11 = vpop.permute.xlu1 %1215 }
  0xce   : > { %v1380_v16 = vsel %vm1362_vm6, %v2669_v62, %v1216_v11  ;;  %v1392_v15 = vsel %vm1362_vm6, %v2665_v60, %v1228_v9  ;;  %v1230_v60 = vpop.permute.xlu2 %1229 }
  0xcf   : > { %v2867_v56 = vsel %vm1399_vm7, %v1380_v16, %v1343_v14  ;;  %v1394_v26 = vsel %vm1362_vm6, %v2712_v58, %v1230_v60 }
  0xd0   : > { %1458 = vrot.lane.b32.xlu2 %v2816_v46, %s2393_s16 }
  0xd1   : > { %1233 = vrot.lane.b32.xlu0 %v1198_v10, %s2391_s8 }
  0xd5   : > { %v1355_v40 = vpop.permute.xlu0 %1354  ;;  %v1224_v62 = vpop.permute.xlu1 %1223 }
  0xd6   : > { %v2870_v17 = vsel %vm1399_vm7, %v1392_v15, %v1355_v40  ;;  %v1388_v58 = vsel %vm1362_vm6, %v2698_v42, %v1224_v62  ;;  %v1232_v29 = vpop.permute.xlu2 %1231 }
  0xd7   : > { %1509 = vrot.lane.b32.xlu1 %v2870_v17, %s2394_s17  ;;  %v1396_v34 = vsel %vm1362_vm6, %v2737_v36, %v1232_v29 }
  0xd8   : > { %1497 = vrot.lane.b32.xlu2 %v2867_v56, %s2394_s17 }
  0xd9   : > { %1478 = vrot.lane.b32.xlu0 %v2870_v17, %s2393_s16 }
  0xdd   : > { %v1351_v19 = vpop.permute.xlu0 %1350  ;;  %v1357_v3 = vpop.permute.xlu1 %1356 }
  0xde   : > { %v2893_v24 = vsel %vm1399_vm7, %v1394_v26, %v1357_v3  ;;  %v1425_v41 = vsel %vm1399_vm7, %v1388_v58, %v1351_v19 }
  0xdf   : > { %1491 = vrot.lane.b32.xlu1 %v2784_v20, %s2394_s17 }
  0xe0   : > { %1472 = vrot.lane.b32.xlu2 %v2830_v52, %s2393_s16 }
  0xe1   : > { %1466 = vrot.lane.b32.xlu0 %v2867_v56, %s2393_s16 }
  0xe5   : > { %v1359_v63 = vpop.permute.xlu0 %1358 }
  0xe6   : > { %v1433_v43 = vsel %vm1399_vm7, %v1396_v34, %v1359_v63 }
  0xe7   : > { %1360 = vrot.lane.b32.xlu1 %v1325_v28, %s2390_s30  ;;  %s485_s30 = scalar_lea.vmem %s3366_s7, %s2202_s5 }
  0xe8   : > { %1511 = vrot.lane.b32.xlu2 %v2893_v24, %s2394_s17 }
  0xe9   : > { %1480 = vrot.lane.b32.xlu0 %v2893_v24, %s2393_s16 }
  0xef   : > { %1505 = vrot.lane.b32.xlu1 %v1425_v41, %s2394_s17 }
  0xf0   : > { %1474 = vrot.lane.b32.xlu2 %v1425_v41, %s2393_s16 }
  0xf1   : > { %1482 = vrot.lane.b32.xlu0 %v1433_v43, %s2393_s16 }
  0xf2   : > { %v1453_v42 = vpop.permute.xlu2 %1452 }
  0xf3   : > { %v1519_v45 = vsel %vm1517_vm9, %v2839_v55, %v1453_v42 }
  0xf7   : > { %1499 = vrot.lane.b32.xlu1 %v2800_v30, %s2394_s17 }
  0xf8   : > { %1513 = vrot.lane.b32.xlu2 %v1433_v43, %s2394_s17 }
  0xfa   : > { %v1488_v36 = vpop.permute.xlu2 %1487 }
  0xff   : > { %1507 = vrot.lane.b32.xlu1 %v2852_v5, %s2394_s17 }
 0x109   : > { %v1469_v22 = vpop.permute.xlu2 %1468 }
 0x10a   : > { %v1535_v59 = vsel %vm1517_vm9, %v2867_v56, %v1469_v22 }
 0x111   : > { %v1463_v44 = vpop.permute.xlu2 %1462 }
 0x112   : > { %v1486_v48 = vpop.permute.xlu1 %1485  ;;  %v1529_v2 = vsel %vm1517_vm9, %v2784_v20, %v1463_v44 }
 0x113   : > { %v1455_v49 = vpop.permute.xlu0 %1454  ;;  %v1552_v8 = vsel %vm1550_vm10, %v1519_v45, %v1486_v48 }
 0x114   : > { %2283 = vmatmul.msk.bf16.vlgmr.msra.gmra.mxu0 %vm1598_vm11, %v1552_v8  ;;  %v1521_v55 = vsel %vm1517_vm9, %v2758_v1, %v1455_v49 }
 0x115   : > { %v1554_v61 = vsel %vm1550_vm10, %v1521_v55, %v1488_v36 }
 0x11a   : > { %v1461_v37 = vpop.permute.xlu1 %1460 }
 0x11b   : > { %v1527_v50 = vsel %vm1517_vm9, %v2816_v46, %v1461_v37  ;;  %v1494_v51 = vpop.permute.xlu0 %1493 }
 0x11c   : > { %v1560_v53 = vsel %vm1550_vm10, %v1527_v50, %v1494_v51 }
 0x11d   : > { %2287 = vmatmul.msk.bf16.vlgmr.msra.gmra.mxu1 %vm1598_vm11, %v1560_v53 }
 0x122   : > { %v1457_v57 = vpop.permute.xlu1 %1456  ;;  %v1477_v0 = vpop.permute.xlu2 %1476 }
 0x123   : > { %v1502_v33 = vpop.permute.xlu0 %1501  ;;  %v1523_v6 = vsel %vm1517_vm9, %v2771_v13, %v1457_v57 }
 0x124   : > { %2284 = vmatmul.msk.bf16.gmra.mxu0 %vm1598_vm11, %v1554_v61  ;;  %v1568_v46 = vsel %vm1550_vm10, %v1535_v59, %v1502_v33 }
 0x125   : > { %2291 = vmatmul.msk.bf16.vlgmr.msra.gmra.mxu2 %vm1598_vm11, %v1568_v46 }
 0x12a   : > { %v1496_v4 = vpop.permute.xlu1 %1495  ;;  %v1459_v9 = vpop.permute.xlu2 %1458 }
 0x12b   : > { %v1490_v12 = vpop.permute.xlu0 %1489  ;;  %v1562_v1 = vsel %vm1550_vm10, %v1529_v2, %v1496_v4  ;;  %v1525_v25 = vsel %vm1517_vm9, %v2768_v32, %v1459_v9 }
 0x12c   : > { %v1556_v14 = vsel %vm1550_vm10, %v1523_v6, %v1490_v12 }
 0x12d   : > { %2288 = vmatmul.msk.bf16.gmra.mxu1 %vm1598_vm11, %v1562_v1 }
 0x132   : > { %v1471_v10 = vpop.permute.xlu1 %1470  ;;  %v1498_v40 = vpop.permute.xlu2 %1497 }
 0x133   : > { %v1537_v11 = vsel %vm1517_vm9, %v2800_v30, %v1471_v10  ;;  %v1504_v16 = vpop.permute.xlu0 %1503  ;;  %v1543_v30 = vsel %vm1517_vm9, %v1425_v41, %v1477_v0 }
 0x134   : > { %2285 = vmatmul.msk.bf16.gmra.mxu0 %vm1598_vm11, %v1556_v14  ;;  %v1570_v20 = vsel %vm1550_vm10, %v1537_v11, %v1504_v16 }
 0x135   : > { %2292 = vmatmul.msk.bf16.gmra.mxu2 %vm1598_vm11, %v1570_v20 }
 0x13a   : > { %v1473_v19 = vpop.permute.xlu2 %1472 }
 0x13b   : > { %v1465_v15 = vpop.permute.xlu0 %1464  ;;  %v1539_v38 = vsel %vm1517_vm9, %v2803_v35, %v1473_v19 }
 0x13c   : > { %v1531_v56 = vsel %vm1517_vm9, %v2789_v7, %v1465_v15 }
 0x13d   : > { %v1564_v13 = vsel %vm1550_vm10, %v1531_v56, %v1498_v40 }
 0x13e   : > { %2289 = vmatmul.msk.bf16.gmra.mxu1 %vm1598_vm11, %v1564_v13 }
 0x142   : > { %v1512_v26 = vpop.permute.xlu2 %1511 }
 0x143   : > { %v1234_v62 = vpop.permute.xlu0 %1233 }
 0x144   : > { %v1398_v3 = vsel %vm1362_vm6, %v2836_v54, %v1234_v62 }
 0x149   : > { %v1510_v60 = vpop.permute.xlu1 %1509 }
 0x14a   : > { %v1576_v18 = vsel %vm1550_vm10, %v1543_v30, %v1510_v60  ;;  %v1475_v32 = vpop.permute.xlu2 %1474 }
 0x14b   : > { %2295 = vmatmul.msk.bf16.vlgmr.msra.gmra.mxu3 %vm1598_vm11, %v1576_v18  ;;  %v1479_v21 = vpop.permute.xlu0 %1478  ;;  %v1541_v35 = vsel %vm1517_vm9, %v2830_v52, %v1475_v32 }
 0x14c   : > { %v1545_v27 = vsel %vm1517_vm9, %v2852_v5, %v1479_v21 }
 0x14d   : > { %v1578_v29 = vsel %vm1550_vm10, %v1545_v27, %v1512_v26 }
 0x151   : > { %v1492_v23 = vpop.permute.xlu1 %1491 }
 0x152   : > { %v1558_v7 = vsel %vm1550_vm10, %v1525_v25, %v1492_v23  ;;  %v1514_v39 = vpop.permute.xlu2 %1513 }
 0x153   : > { %2286 = vmatmul.msk.bf16.gmra.mxu0 %vm1598_vm11, %v1558_v7  ;;  %v1467_v31 = vpop.permute.xlu0 %1466 }
 0x154   : > { %v1533_v41 = vsel %vm1517_vm9, %v2821_v47, %v1467_v31 }
 0x159   : > { %v1361_v28 = vpop.permute.xlu1 %1360 }
 0x15a   : > { %v1435_v58 = vsel %vm1399_vm7, %v1398_v3, %v1361_v28 }
 0x15b   : > { %1515 = vrot.lane.b32.xlu1 %v1435_v58, %s2394_s17  ;;  %2296 = vmatmul.msk.bf16.gmra.mxu3 %vm1598_vm11, %v1578_v29  ;;  %v1481_v5 = vpop.permute.xlu0 %1480 }
 0x15c   : > { %v1547_v63 = vsel %vm1517_vm9, %v2870_v17, %v1481_v5 }
 0x15d   : > { %v1580_v36 = vsel %vm1550_vm10, %v1547_v63, %v1514_v39 }
 0x161   : > { %v1506_v34 = vpop.permute.xlu1 %1505 }
 0x162   : > { %v1572_v54 = vsel %vm1550_vm10, %v1539_v38, %v1506_v34 }
 0x163   : > { %2293 = vmatmul.msk.bf16.gmra.mxu2 %vm1598_vm11, %v1572_v54  ;;  %v1483_v13 = vpop.permute.xlu0 %1482 }
 0x164   : > { %v1549_v62 = vsel %vm1517_vm9, %v2893_v24, %v1483_v13 }
 0x169   : > { %v1500_v43 = vpop.permute.xlu1 %1499 }
 0x16a   : > { %v1566_v42 = vsel %vm1550_vm10, %v1533_v41, %v1500_v43 }
 0x16b   : > { %2290 = vmatmul.msk.bf16.gmra.mxu1 %vm1598_vm11, %v1566_v42  ;;  %2297 = vmatmul.msk.bf16.gmra.mxu3 %vm1598_vm11, %v1580_v36 }
 0x171   : > { %v1508_v45 = vpop.permute.xlu1 %1507 }
 0x172   : > { %v1574_v48 = vsel %vm1550_vm10, %v1541_v35, %v1508_v45 }
 0x173   : > { %2294 = vmatmul.msk.bf16.gmra.mxu2 %vm1598_vm11, %v1574_v48 }
 0x191   : > { %v2983_v47 = vpop.f32.mrf.mxu0 }
 0x192   : > { %v1932_v52 = vpack.c.bf16 %v2983_v47, %v2983_v47  ;;  %v1725_v35 = vsel %vm1724_vm13, %v2983_v47, 0.0 }
 0x194   : > { %1965 = vst.msk [vmem:[%s2981_s27] sm:$0xf] %vm1964_vm12, %v1932_v52 }
 0x199   : > { %v2989_v17 = vpop.f32.mrf.mxu0 }
 0x19a   : > { %v1933_v49 = vpack.c.bf16 %v2989_v17, %v2989_v17  ;;  %v2993_v8 = vpop.f32.mrf.mxu1  ;;  %v1726_v43 = vsel %vm1724_vm13, %v2989_v17, 0.0 }
 0x19b   : > { %v1940_v22 = vpack.c.bf16 %v2993_v8, %v2993_v8 }
 0x19c   : > { %1966 = vst.msk [vmem:[%s2981_s27 + $0x4] sm:$0xf] %vm1964_vm12, %v1933_v49  ;;  %v1727_v49 = vadd.f32 %v1726_v43, %v1725_v35 }
 0x19d   : > { %1973 = vst.msk [vmem:[%s2981_s27 + $0x20] sm:$0xf] %vm1964_vm12, %v1940_v22 }
 0x1a1   : > { %v3001_v37 = vpop.f32.mrf.mxu0 }
 0x1a2   : > { %v1934_v50 = vpack.c.bf16 %v3001_v37, %v3001_v37  ;;  %v3005_v51 = vpop.f32.mrf.mxu1  ;;  %v1728_v45 = vsel %vm1724_vm13, %v3001_v37, 0.0 }
 0x1a3   : > { %v1941_v53 = vpack.c.bf16 %v3005_v51, %v3005_v51 }
 0x1a4   : > { %1967 = vst.msk [vmem:[%s2981_s27 + $0x8] sm:$0xf] %vm1964_vm12, %v1934_v50  ;;  %v1729_v50 = vadd.f32 %v1728_v45, %v1727_v49 }
 0x1a5   : > { %1974 = vst.msk [vmem:[%s2981_s27 + $0x24] sm:$0xf] %vm1964_vm12, %v1941_v53 }
 0x1a8   : > { %v3013_v44 = vpop.f32.mrf.mxu2 }
 0x1a9   : > { %v1948_v55 = vpack.c.bf16 %v3013_v44, %v3013_v44  ;;  %v3017_v57 = vpop.f32.mrf.mxu0  ;;  %v1756_v43 = vsel %vm1724_vm13, %v3013_v44, 0.0 }
 0x1aa   : > { %v1935_v59 = vpack.c.bf16 %v3017_v57, %v3017_v57  ;;  %v3021_v33 = vpop.f32.mrf.mxu1  ;;  %v1730_v22 = vsel %vm1724_vm13, %v3017_v57, 0.0 }
 0x1ab   : > { %1981 = vst.msk [vmem:[%s2981_s27 + $0x40] sm:$0xf] %vm1964_vm12, %v1948_v55  ;;  %v1942_v61 = vpack.c.bf16 %v3021_v33, %v3021_v33  ;;  %v1731_v55 = vadd.f32 %v1730_v22, %v1729_v50 }
 0x1ac   : > { %1968 = vst.msk [vmem:[%s2981_s27 + $0xc] sm:$0xf] %vm1964_vm12, %v1935_v59 }
 0x1ad   : > { %1975 = vst.msk [vmem:[%s2981_s27 + $0x28] sm:$0xf] %vm1964_vm12, %v1942_v61 }
 0x1b0   : > { %v3031_v46 = vpop.f32.mrf.mxu2 }
 0x1b1   : > { %v1949_v0 = vpack.c.bf16 %v3031_v46, %v3031_v46  ;;  %v3035_v2 = vpop.f32.mrf.mxu0  ;;  %v1758_v45 = vsel %vm1724_vm13, %v3031_v46, 0.0 }
 0x1b2   : > { %v1936_v4 = vpack.c.bf16 %v3035_v2, %v3035_v2  ;;  %v3039_v12 = vpop.f32.mrf.mxu1  ;;  %v1732_v53 = vsel %vm1724_vm13, %v3035_v2, 0.0 }
 0x1b3   : > { %1982 = vst.msk [vmem:[%s2981_s27 + $0x44] sm:$0xf] %vm1964_vm12, %v1949_v0  ;;  %v1943_v1 = vpack.c.bf16 %v3039_v12, %v3039_v12  ;;  %v1733_v61 = vadd.f32 %v1732_v53, %v1731_v55 }
 0x1b4   : > { %1969 = vst.msk [vmem:[%s2981_s27 + $0x10] sm:$0xf] %vm1964_vm12, %v1936_v4 }
 0x1b5   : > { %1976 = vst.msk [vmem:[%s2981_s27 + $0x2c] sm:$0xf] %vm1964_vm12, %v1943_v1 }
 0x1b8   : > { %v3049_v6 = vpop.f32.mrf.mxu2 }
 0x1b9   : > { %v1950_v9 = vpack.c.bf16 %v3049_v6, %v3049_v6  ;;  %v3053_v10 = vpop.f32.mrf.mxu0 }
 0x1ba   : > { %v1937_v11 = vpack.c.bf16 %v3053_v10, %v3053_v10  ;;  %v1734_v59 = vsel %vm1724_vm13, %v3053_v10, 0.0 }
 0x1bb   : > { %1983 = vst.msk [vmem:[%s2981_s27 + $0x48] sm:$0xf] %vm1964_vm12, %v1950_v9  ;;  %v3059_v16 = vpop.f32.mrf.mxu1  ;;  %v1735_v9 = vadd.f32 %v1734_v59, %v1733_v61 }
 0x1bc   : > { %1970 = vst.msk [vmem:[%s2981_s27 + $0x14] sm:$0xf] %vm1964_vm12, %v1937_v11  ;;  %v1944_v14 = vpack.c.bf16 %v3059_v16, %v3059_v16 }
 0x1be   : > { %1977 = vst.msk [vmem:[%s2981_s27 + $0x30] sm:$0xf] %vm1964_vm12, %v1944_v14 }
 0x1c0   : > { %v3067_v20 = vpop.f32.mrf.mxu2 }
 0x1c1   : > { %v1951_v15 = vpack.c.bf16 %v3067_v20, %v3067_v20  ;;  %v1762_v22 = vsel %vm1724_vm13, %v3067_v20, 0.0 }
 0x1c3   : > { %1984 = vst.msk [vmem:[%s2981_s27 + $0x4c] sm:$0xf] %vm1964_vm12, %v1951_v15  ;;  %v3073_v40 = vpop.f32.mrf.mxu1 }
 0x1c4   : > { %v1945_v56 = vpack.c.bf16 %v3073_v40, %v3073_v40 }
 0x1c6   : > { %1978 = vst.msk [vmem:[%s2981_s27 + $0x34] sm:$0xf] %vm1964_vm12, %v1945_v56  ;;  %v1740_v56 = vsel %vm1724_vm13, %v2993_v8, 0.0 }
 0x1cd   : > { %v1516_v30 = vpop.permute.xlu1 %1515 }
 0x1ce   : > { %v3081_v60 = vpop.f32.mrf.mxu3  ;;  %v1582_v18 = vsel %vm1550_vm10, %v1549_v62, %v1516_v30  ;;  %v1742_v62 = vsel %vm1724_vm13, %v3005_v51, 0.0 }
 0x1cf   : > { %v1956_v19 = vpack.c.bf16 %v3081_v60, %v3081_v60  ;;  %2298 = vmatmul.msk.bf16.gmra.mxu3 %vm1598_vm11, %v1582_v18  ;;  %v1744_v18 = vsel %vm1724_vm13, %v3021_v33, 0.0 }
 0x1d0   : > { %v3087_v21 = vpop.f32.mrf.mxu0 }
 0x1d1   : > { %1989 = vst.msk [vmem:[%s2981_s27 + $0x60] sm:$0xf] %vm1964_vm12, %v1956_v19  ;;  %v1938_v25 = vpack.c.bf16 %v3087_v21, %v3087_v21  ;;  %v1736_v4 = vsel %vm1724_vm13, %v3087_v21, 0.0 }
 0x1d2   : > { %v1737_v14 = vadd.f32 %v1736_v4, %v1735_v9 }
 0x1d3   : > { %1971 = vst.msk [vmem:[%s2981_s27 + $0x18] sm:$0xf] %vm1964_vm12, %v1938_v25  ;;  %v1746_v25 = vsel %vm1724_vm13, %v3039_v12, 0.0 }
 0x1d6   : > { %v3095_v24 = vpop.f32.mrf.mxu3 }
 0x1d7   : > { %v1957_v23 = vpack.c.bf16 %v3095_v24, %v3095_v24 }
 0x1d8   : > { %v3099_v7 = vpop.f32.mrf.mxu0 }
 0x1d9   : > { %1990 = vst.msk [vmem:[%s2981_s27 + $0x64] sm:$0xf] %vm1964_vm12, %v1957_v23  ;;  %v1939_v26 = vpack.c.bf16 %v3099_v7, %v3099_v7  ;;  %v1738_v11 = vsel %vm1724_vm13, %v3099_v7, 0.0 }
 0x1da   : > { %v1739_v15 = vadd.f32 %v1738_v11, %v1737_v14  ;;  %v1772_v14 = vsel %vm1724_vm13, %v3081_v60, 0.0 }
 0x1db   : > { %1972 = vst.msk [vmem:[%s2981_s27 + $0x1c] sm:$0xf] %vm1964_vm12, %v1939_v26  ;;  %v1748_v26 = vsel %vm1724_vm13, %v3059_v16, 0.0 }
 0x1dc   : > { %v1741_v13 = vadd.f32 %v1740_v56, %v1739_v15  ;;  %v1774_v56 = vsel %vm1724_vm13, %v3095_v24, 0.0 }
 0x1de   : > { %v3107_v3 = vpop.f32.mrf.mxu3  ;;  %v1743_v30 = vadd.f32 %v1742_v62, %v1741_v13 }
 0x1df   : > { %v1958_v27 = vpack.c.bf16 %v3107_v3, %v3107_v3  ;;  %v1776_v62 = vsel %vm1724_vm13, %v3107_v3, 0.0 }
 0x1e0   : > { %v1745_v19 = vadd.f32 %v1744_v18, %v1743_v30 }
 0x1e1   : > { %1991 = vst.msk [vmem:[%s2981_s27 + $0x68] sm:$0xf] %vm1964_vm12, %v1958_v27 }
 0x1e2   : > { %v1747_v23 = vadd.f32 %v1746_v25, %v1745_v19 }
 0x1e4   : > { %v1749_v27 = vadd.f32 %v1748_v26, %v1747_v23 }
 0x1e6   : > { %v3113_v28 = vpop.f32.mrf.mxu2  ;;  %v3115_v31 = vpop.f32.mrf.mxu3 }
 0x1e7   : > { %v1952_v58 = vpack.c.bf16 %v3113_v28, %v3113_v28  ;;  %v1959_v29 = vpack.c.bf16 %v3115_v31, %v3115_v31  ;;  %v1764_v53 = vsel %vm1724_vm13, %v3113_v28, 0.0  ;;  %v1778_v18 = vsel %vm1724_vm13, %v3115_v31, 0.0 }
 0x1e8   : > { %v3121_v32 = vpop.f32.mrf.mxu1 }
 0x1e9   : > { %1985 = vst.msk [vmem:[%s2981_s27 + $0x50] sm:$0xf] %vm1964_vm12, %v1952_v58  ;;  %v1946_v38 = vpack.c.bf16 %v3121_v32, %v3121_v32  ;;  %v1750_v58 = vsel %vm1724_vm13, %v3073_v40, 0.0 }
 0x1ea   : > { %1992 = vst.msk [vmem:[%s2981_s27 + $0x6c] sm:$0xf] %vm1964_vm12, %v1959_v29  ;;  %v1752_v29 = vsel %vm1724_vm13, %v3121_v32, 0.0 }
 0x1eb   : > { %1979 = vst.msk [vmem:[%s2981_s27 + $0x38] sm:$0xf] %vm1964_vm12, %v1946_v38  ;;  %v1751_v38 = vadd.f32 %v1750_v58, %v1749_v27 }
 0x1ee   : > { %v3131_v34 = vpop.f32.mrf.mxu2  ;;  %v3133_v54 = vpop.f32.mrf.mxu3 }
 0x1ef   : > { %v1953_v5 = vpack.c.bf16 %v3131_v34, %v3131_v34  ;;  %v1960_v63 = vpack.c.bf16 %v3133_v54, %v3133_v54  ;;  %v1766_v59 = vsel %vm1724_vm13, %v3131_v34, 0.0  ;;  %v1780_v23 = vsel %vm1724_vm13, %v3133_v54, 0.0 }
 0x1f0   : > { %v3139_v39 = vpop.f32.mrf.mxu1 }
 0x1f1   : > { %1986 = vst.msk [vmem:[%s2981_s27 + $0x54] sm:$0xf] %vm1964_vm12, %v1953_v5  ;;  %v1947_v41 = vpack.c.bf16 %v3139_v39, %v3139_v39  ;;  %v1754_v5 = vsel %vm1724_vm13, %v3139_v39, 0.0 }
 0x1f2   : > { %1993 = vst.msk [vmem:[%s2981_s27 + $0x70] sm:$0xf] %vm1964_vm12, %v1960_v63  ;;  %v1753_v63 = vadd.f32 %v1752_v29, %v1751_v38 }
 0x1f3   : > { %1980 = vst.msk [vmem:[%s2981_s27 + $0x3c] sm:$0xf] %vm1964_vm12, %v1947_v41 }
 0x1f4   : > { %v1755_v41 = vadd.f32 %v1754_v5, %v1753_v63 }
 0x1f6   : > { %v3151_v42 = vpop.f32.mrf.mxu2  ;;  %v3153_v36 = vpop.f32.mrf.mxu3  ;;  %v1757_v35 = vadd.f32 %v1756_v43, %v1755_v41 }
 0x1f7   : > { %v1954_v48 = vpack.c.bf16 %v3151_v42, %v3151_v42  ;;  %v1961_v52 = vpack.c.bf16 %v3153_v36, %v3153_v36  ;;  %v1768_v4 = vsel %vm1724_vm13, %v3151_v42, 0.0  ;;  %v1782_v58 = vsel %vm1724_vm13, %v3153_v36, 0.0 }
 0x1f9   : > { %1987 = vst.msk [vmem:[%s2981_s27 + $0x58] sm:$0xf] %vm1964_vm12, %v1954_v48  ;;  %v1759_v48 = vadd.f32 %v1758_v45, %v1757_v35 }
 0x1fa   : > { %1994 = vst.msk [vmem:[%s2981_s27 + $0x74] sm:$0xf] %vm1964_vm12, %v1961_v52  ;;  %v1760_v52 = vsel %vm1724_vm13, %v3049_v6, 0.0 }
 0x1fb   : > { %v1761_v49 = vadd.f32 %v1760_v52, %v1759_v48 }
 0x1fd   : > { %v1763_v50 = vadd.f32 %v1762_v22, %v1761_v49 }
 0x1fe   : > { %v3173_v0 = vpop.f32.mrf.mxu2 }
 0x1ff   : > { %v1955_v1 = vpack.c.bf16 %v3173_v0, %v3173_v0  ;;  %v1765_v55 = vadd.f32 %v1764_v53, %v1763_v50  ;;  %v1770_v9 = vsel %vm1724_vm13, %v3173_v0, 0.0 }
 0x201   : > { %1988 = vst.msk [vmem:[%s2981_s27 + $0x5c] sm:$0xf] %vm1964_vm12, %v1955_v1  ;;  %v1767_v61 = vadd.f32 %v1766_v59, %v1765_v55 }
 0x203   : > { %v1769_v1 = vadd.f32 %v1768_v4, %v1767_v61 }
 0x205   : > { %v1771_v11 = vadd.f32 %v1770_v9, %v1769_v1 }
 0x207   : > { %v1773_v15 = vadd.f32 %v1772_v14, %v1771_v11 }
 0x209   : > { %v1775_v13 = vadd.f32 %v1774_v56, %v1773_v15 }
 0x20b   : > { %v1777_v30 = vadd.f32 %v1776_v62, %v1775_v13 }
 0x20d   : > { %v1779_v19 = vadd.f32 %v1778_v18, %v1777_v30 }
 0x20f   : > { %v1781_v27 = vadd.f32 %v1780_v23, %v1779_v19 }
 0x211   : > { %v1783_v38 = vadd.f32 %v1782_v58, %v1781_v27 }
 0x252   : > { %v3223_v25 = vpop.f32.mrf.mxu3 }
 0x253   : > { %v1962_v26 = vpack.c.bf16 %v3223_v25, %v3223_v25  ;;  %v1784_v29 = vsel %vm1724_vm13, %v3223_v25, 0.0 }
 0x254   : > { %v1785_v5 = vadd.f32 %v1784_v29, %v1783_v38 }
 0x255   : > { %1995 = vst.msk [vmem:[%s2981_s27 + $0x78] sm:$0xf] %vm1964_vm12, %v1962_v26 }
 0x25a   : > { %v3235_v63 = vpop.f32.mrf.mxu3 }
 0x25b   : > { %v1786_v41 = vsel %vm1724_vm13, %v3235_v63, 0.0  ;;  %v1963_v43 = vpack.c.bf16 %v3235_v63, %v3235_v63 }
 0x25c   : > { %v1787_v35 = vadd.f32 %v1786_v41, %v1785_v5 }
 0x25d   : > { %1996 = vst.msk [vmem:[%s2981_s27 + $0x7c] sm:$0xf] %vm1964_vm12, %v1963_v43 }
 0x25e   : > { %v1788_v45 = vrot.slane %v1787_v35, 4 }
 0x260   : > { %v1789_v48 = vadd.f32 %v1788_v45, %v1787_v35 }
 0x262   : > { %v1790_v52 = vrot.slane %v1789_v48, 2 }
 0x264   : > { %v1791_v49 = vadd.f32 %v1790_v52, %v1789_v48 }
 0x266   : > { %v1792_v22 = vrot.slane %v1791_v49, 1 }
 0x268   : > { %v3243_v50 = vadd.f32 %v1792_v22, %v1791_v49 }
 0x26a   : > { %v3246_v53 = vmul.f32 0.00390625, %v3243_v50 }
 0x26c   : > { %v1795_v55 = vsub.f32 %v2983_v47, %v3246_v53  ;;  %v1796_v59 = vsub.f32 %v2989_v17, %v3246_v53  ;;  %v1797_v61 = vsub.f32 %v3001_v37, %v3246_v53  ;;  %v1798_v4 = vsub.f32 %v3017_v57, %v3246_v53 }
 0x26d   : > { %v1799_v11 = vsub.f32 %v3035_v2, %v3246_v53  ;;  %v1800_v15 = vsub.f32 %v3053_v10, %v3246_v53  ;;  %v1801_v37 = vsub.f32 %v3087_v21, %v3246_v53  ;;  %v1802_v2 = vsub.f32 %v3099_v7, %v3246_v53 }
 0x26e   : > { %v1827_v1 = vmul.f32 %v1795_v55, %v1795_v55  ;;  %v1828_v9 = vmul.f32 %v1796_v59, %v1796_v59  ;;  %v1829_v14 = vmul.f32 %v1797_v61, %v1797_v61  ;;  %v1830_v56 = vmul.f32 %v1798_v4, %v1798_v4 }
 0x26f   : > { %v1831_v62 = vmul.f32 %v1799_v11, %v1799_v11  ;;  %v1832_v18 = vmul.f32 %v1800_v15, %v1800_v15  ;;  %v1803_v23 = vsub.f32 %v2993_v8, %v3246_v53  ;;  %v1833_v26 = vmul.f32 %v1801_v37, %v1801_v37 }
 0x270   : > { %v1859_v47 = vsel %vm1724_vm13, %v1827_v1, 0.0  ;;  %v1860_v17 = vsel %vm1724_vm13, %v1828_v9, 0.0  ;;  %v1862_v57 = vsel %vm1724_vm13, %v1829_v14, 0.0  ;;  %v1864_v19 = vsel %vm1724_vm13, %v1830_v56, 0.0 }
 0x271   : > { %v1861_v13 = vadd.f32 %v1860_v17, %v1859_v47  ;;  %v1866_v27 = vsel %vm1724_vm13, %v1831_v62, 0.0  ;;  %v1804_v21 = vsub.f32 %v3005_v51, %v3246_v53  ;;  %v1834_v29 = vmul.f32 %v1802_v2, %v1802_v2 }
 0x272   : > { %v1868_v38 = vsel %vm1724_vm13, %v1832_v18, 0.0  ;;  %v1805_v7 = vsub.f32 %v3021_v33, %v3246_v53  ;;  %v1835_v41 = vmul.f32 %v1803_v23, %v1803_v23  ;;  %v1870_v43 = vsel %vm1724_vm13, %v1833_v26, 0.0 }
 0x273   : > { %v1863_v30 = vadd.f32 %v1862_v57, %v1861_v13  ;;  %v1806_v8 = vsub.f32 %v3039_v12, %v3246_v53  ;;  %v1836_v45 = vmul.f32 %v1804_v21, %v1804_v21  ;;  %v1872_v48 = vsel %vm1724_vm13, %v1834_v29, 0.0 }
 0x274   : > { %v1807_v51 = vsub.f32 %v3059_v16, %v3246_v53  ;;  %v1837_v49 = vmul.f32 %v1805_v7, %v1805_v7  ;;  %v1874_v22 = vsel %vm1724_vm13, %v1835_v41, 0.0  ;;  %v1808_v33 = vsub.f32 %v3073_v40, %v3246_v53 }
 0x275   : > { %v1865_v10 = vadd.f32 %v1864_v19, %v1863_v30  ;;  %v1838_v59 = vmul.f32 %v1806_v8, %v1806_v8  ;;  %v1876_v61 = vsel %vm1724_vm13, %v1836_v45, 0.0  ;;  %v1809_v12 = vsub.f32 %v3121_v32, %v3246_v53 }
 0x276   : > { %v1839_v1 = vmul.f32 %v1807_v51, %v1807_v51  ;;  %v1878_v9 = vsel %vm1724_vm13, %v1837_v49, 0.0  ;;  %v1810_v16 = vsub.f32 %v3139_v39, %v3246_v53  ;;  %v1840_v14 = vmul.f32 %v1808_v33, %v1808_v33 }
 0x277   : > { %v1867_v58 = vadd.f32 %v1866_v27, %v1865_v10  ;;  %v1880_v15 = vsel %vm1724_vm13, %v1838_v59, 0.0  ;;  %v1811_v40 = vsub.f32 %v3013_v44, %v3246_v53  ;;  %v1841_v47 = vmul.f32 %v1809_v12, %v1809_v12 }
 0x278   : > { %v1882_v17 = vsel %vm1724_vm13, %v1839_v1, 0.0  ;;  %v1812_v32 = vsub.f32 %v3031_v46, %v3246_v53  ;;  %v1842_v37 = vmul.f32 %v1810_v16, %v1810_v16  ;;  %v1884_v62 = vsel %vm1724_vm13, %v1840_v14, 0.0 }
 0x279   : > { %v1869_v5 = vadd.f32 %v1868_v38, %v1867_v58  ;;  %v1813_v39 = vsub.f32 %v3049_v6, %v3246_v53  ;;  %v1843_v30 = vmul.f32 %v1811_v40, %v1811_v40  ;;  %v1886_v2 = vsel %vm1724_vm13, %v1841_v47, 0.0 }
 0x27a   : > { %v1814_v44 = vsub.f32 %v3067_v20, %v3246_v53  ;;  %v1844_v19 = vmul.f32 %v1812_v32, %v1812_v32  ;;  %v1888_v10 = vsel %vm1724_vm13, %v1842_v37, 0.0  ;;  %v1815_v46 = vsub.f32 %v3113_v28, %v3246_v53 }
 0x27b   : > { %v1871_v35 = vadd.f32 %v1870_v43, %v1869_v5  ;;  %v1845_v26 = vmul.f32 %v1813_v39, %v1813_v39  ;;  %v1890_v27 = vsel %vm1724_vm13, %v1843_v30, 0.0  ;;  %v1816_v6 = vsub.f32 %v3131_v34, %v3246_v53 }
 0x27c   : > { %v1846_v21 = vmul.f32 %v1814_v44, %v1814_v44  ;;  %v1892_v29 = vsel %vm1724_vm13, %v1844_v19, 0.0  ;;  %v1817_v20 = vsub.f32 %v3151_v42, %v3246_v53  ;;  %v1847_v5 = vmul.f32 %v1815_v46, %v1815_v46 }
 0x27d   : > { %v1873_v52 = vadd.f32 %v1872_v48, %v1871_v35  ;;  %v1894_v7 = vsel %vm1724_vm13, %v1845_v26, 0.0  ;;  %v1818_v28 = vsub.f32 %v3173_v0, %v3246_v53  ;;  %v1848_v43 = vmul.f32 %v1816_v6, %v1816_v6 }
 0x27e   : > { %v1896_v35 = vsel %vm1724_vm13, %v1846_v21, 0.0  ;;  %v1819_v34 = vsub.f32 %v3081_v60, %v3246_v53  ;;  %v1849_v45 = vmul.f32 %v1817_v20, %v1817_v20  ;;  %v1898_v48 = vsel %vm1724_vm13, %v1847_v5, 0.0 }
 0x27f   : > { %v1875_v55 = vadd.f32 %v1874_v22, %v1873_v52  ;;  %v1820_v42 = vsub.f32 %v3095_v24, %v3246_v53  ;;  %v1850_v51 = vmul.f32 %v1818_v28, %v1818_v28  ;;  %v1900_v49 = vsel %vm1724_vm13, %v1848_v43, 0.0 }
 0x280   : > { %v1821_v0 = vsub.f32 %v3107_v3, %v3246_v53  ;;  %v1902_v33 = vsel %vm1724_vm13, %v1849_v45, 0.0  ;;  %v1822_v60 = vsub.f32 %v3115_v31, %v3246_v53  ;;  %v1823_v24 = vsub.f32 %v3133_v54, %v3246_v53 }
 0x281   : > { %v1877_v4 = vadd.f32 %v1876_v61, %v1875_v55  ;;  %v1851_v55 = vmul.f32 %v1819_v34, %v1819_v34  ;;  %v1852_v61 = vmul.f32 %v1820_v42, %v1820_v42  ;;  %v1824_v3 = vsub.f32 %v3153_v36, %v3246_v53 }
 0x282   : > { %v1853_v1 = vmul.f32 %v1821_v0, %v1821_v0  ;;  %v1854_v16 = vmul.f32 %v1822_v60, %v1822_v60  ;;  %v1825_v31 = vsub.f32 %v3223_v25, %v3246_v53  ;;  %v1826_v54 = vsub.f32 %v3235_v63, %v3246_v53 }
 0x283   : > { %v1879_v11 = vadd.f32 %v1878_v9, %v1877_v4  ;;  %v1904_v4 = vsel %vm1724_vm13, %v1850_v51, 0.0  ;;  %v1906_v9 = vsel %vm1724_vm13, %v1851_v55, 0.0  ;;  %v1908_v14 = vsel %vm1724_vm13, %v1852_v61, 0.0 }
 0x284   : > { %v1910_v40 = vsel %vm1724_vm13, %v1853_v1, 0.0  ;;  %v1857_v36 = vmul.f32 %v1825_v31, %v1825_v31 }
 0x285   : > { %v1881_v56 = vadd.f32 %v1880_v15, %v1879_v11 }
 0x286   : > { %v1918_v30 = vsel %vm1724_vm13, %v1857_v36, 0.0 }
 0x287   : > { %v1883_v13 = vadd.f32 %v1882_v17, %v1881_v56  ;;  %v1855_v56 = vmul.f32 %v1823_v24, %v1823_v24  ;;  %v1856_v17 = vmul.f32 %v1824_v3, %v1824_v3 }
 0x289   : > { %v1885_v57 = vadd.f32 %v1884_v62, %v1883_v13  ;;  %v1912_v13 = vsel %vm1724_vm13, %v1854_v16, 0.0  ;;  %v1914_v37 = vsel %vm1724_vm13, %v1855_v56, 0.0  ;;  %v1916_v39 = vsel %vm1724_vm13, %v1856_v17, 0.0 }
 0x28b   : > { %v1887_v18 = vadd.f32 %v1886_v2, %v1885_v57  ;;  %v1858_v57 = vmul.f32 %v1826_v54, %v1826_v54 }
 0x28d   : > { %v1889_v23 = vadd.f32 %v1888_v10, %v1887_v18  ;;  %v1920_v18 = vsel %vm1724_vm13, %v1858_v57, 0.0 }
 0x28f   : > { %v1891_v58 = vadd.f32 %v1890_v27, %v1889_v23 }
 0x291   : > { %v1893_v38 = vadd.f32 %v1892_v29, %v1891_v58 }
 0x293   : > { %v1895_v41 = vadd.f32 %v1894_v7, %v1893_v38 }
 0x295   : > { %v1897_v8 = vadd.f32 %v1896_v35, %v1895_v41 }
 0x297   : > { %v1899_v52 = vadd.f32 %v1898_v48, %v1897_v8 }
 0x299   : > { %v1901_v22 = vadd.f32 %v1900_v49, %v1899_v52 }
 0x29b   : > { %v1903_v59 = vadd.f32 %v1902_v33, %v1901_v22 }
 0x29d   : > { %v1905_v12 = vadd.f32 %v1904_v4, %v1903_v59 }
 0x29f   : > { %v1907_v11 = vadd.f32 %v1906_v9, %v1905_v12 }
 0x2a1   : > { %v1909_v15 = vadd.f32 %v1908_v14, %v1907_v11 }
 0x2a3   : > { %v1911_v47 = vadd.f32 %v1910_v40, %v1909_v15 }
 0x2a5   : > { %v1913_v32 = vadd.f32 %v1912_v13, %v1911_v47 }
 0x2a7   : > { %v1915_v62 = vadd.f32 %v1914_v37, %v1913_v32 }
 0x2a9   : > { %v1917_v25 = vadd.f32 %v1916_v39, %v1915_v62 }
 0x2ab   : > { %v1919_v2 = vadd.f32 %v1918_v30, %v1917_v25 }
 0x2ad   : > { %v1921_v44 = vadd.f32 %v1920_v18, %v1919_v2 }
 0x2af   : > { %v1922_v63 = vrot.slane %v1921_v44, 4 }
 0x2b1   : > { %v1923_v53 = vadd.f32 %v1922_v63, %v1921_v44 }
 0x2b3   : > { %v1924_v19 = vrot.slane %v1923_v53, 2 }
 0x2b5   : > { %v1925_v10 = vadd.f32 %v1924_v19, %v1923_v53 }
 0x2b7   : > { %v1926_v23 = vrot.slane %v1925_v10, 1 }
 0x2b9   : > { %v1927_v46 = vadd.f32 %v1926_v23, %v1925_v10 }
 0x2bb   : > { %v1929_v26 = vsel %vm938_vm1, %v3243_v50, %v1927_v46 }
 0x2bc   : > { %1931 = vst.msk [vmem:[%s485_s30] sm:$0x3] %vm1930_vm14, %v1929_v26 }
 0x2bd PF: > { %s18_s26 = sadd.s32 1, %s2388_s26   ;;  %s3369_s24 = smov %s2384_s25 }
 0x2be   : > { %p15_p5 = scmp.ge.s32.totalorder %s18_s26, 4   ;;  %s3370_s25 = smov %s3372_s4 }
 0x2c0   :  { %17 = sbr.rel (!%p15_p5) target bundleno = 2 (0x2), region = 95 }

// kernel: encoder_forward.7
= control target key start
LH: loop header
LB: loop body
LE: loop exit
PB: predicated region body
PF: predicated region fallthrough
CT: control target
= control target key end

     0   :  { %s3249_s24 = smov 0   ;;  %s3251_s25 = smov 0   ;;  %s4599_s0 = inlined_call_operand.vmem [shape: bf16[2,16,16,64], index: 0, kind: input, shape index: {}, may-alias: {0,1,2}]   ;;  %s4600_s1 = inlined_call_operand.vmem [shape: bf16[2,16,16,64], index: 1, kind: input, shape index: {}, may-alias: {0,1,2}]   ;;  %s4601_s2 = inlined_call_operand.vmem [shape: bf16[2,16,16,64], index: 2, kind: input, shape index: {}, may-alias: {0,1,2}]   ;;  %s4602_s3 = inlined_call_operand.vmem [shape: bf16[1,576,64], index: 3, kind: input, shape index: {}]   ;;  %s4603_s4 = inlined_call_operand.vmem [shape: f32[1,64], index: 4, kind: input, shape index: {}]   ;;  %s4604_s5 = inlined_call_operand.vmem [shape: f32[1,64], index: 5, kind: input, shape index: {}]   ;;  %s4605_s6 = inlined_call_operand.vmem [shape: bf16[2,16,16,64], index: 6, kind: output, shape index: {0}]   ;;  %s4606_s7 = inlined_call_operand.vmem [shape: f32[2,1,2,64], index: 7, kind: output, shape index: {1}]  }
   0x1   :  { %s3253_s26 = smov 0  }
   0x2 LB: > { %s30_s27 = sadd.s32 1, %s3201_s25  ;;  %p2828_p0 = scmp.ge.s32.totalorder %s3205_s26, 1  ;;  %s3205_s26 = sphi %s3253_s26, %s18_s26   ;;  %s3201_s25 = sphi %s3251_s25, %s4622_s25   ;;  %s3197_s24 = sphi %s3249_s24, %s4621_s24  }
   0x3   : > { %p32_p1 = scmp.ge.s32.totalorder %s30_s27, 2  ;;  %p328_p2 = scmp.lt.s32.totalorder %s3205_s26, 3 }
   0x5   : > { %s4624_s27 = smov (%p32_p1, %s30_s27), 0  ;;  %p329_p3 = pnand %p2828_p0, %p328_p2 }
   0x7   : > { %332 = sbr.rel (%p329_p3) target bundleno = 807 (0x327), region = 44 }
   0xc   : > { %p407_p4 = scmp.lt.s32.totalorder %s3197_s24, 1  ;;  %v3281_v0 = vld [vmem:[%s4603_s4] ss:$0 sm:$0xff]  ;;  %vm991_vm0 = vcmask 1040384   ;;  %vm992_vm1 = vsmask.f32 256 }
   0xd   : > { %v3289_v4 = vld [vmem:[%s4604_s5] ss:$0 sm:$0xff]  ;;  %vm1102_vm2 = vsmask.f32 7424  ;;  %vm3317_vm3 = vmand %vm991_vm0, %vm992_vm1  ;;  %s3207_s16 = smov 64   ;;  %vm1446_vm4 = vcmask 523264  }
   0xe   : > { %s4626_s24 = smov (!%p407_p4, %s3197_s24), 1  ;;  %vm1391_vm5 = vcmask 1046528   ;;  %vm2612_vm6 = vcmask 519168   ;;  %vm2578_vm7 = vcmask 517120  }
   0xf   : > { %s3270_s28 = sshll.u32 %s4626_s24, 7 }
  0x10   : > { %s3276_s8 = scalar_lea.vmem %s4600_s1, %s3270_s28  ;;  %s415_s15 = scalar_lea.vmem %s4599_s0, %s3270_s28 }
  0x11   : > { %v3121_v1 = vld [vmem:[%s3276_s8 + $0x40] sm:$0xff]   ;;  %v3120_v2 = vld [vmem:[%s3276_s8 + $0x38] sm:$0xff]   ;;  %s3003_s10 = sadd.s32 120, %s3270_s28  ;;  %s4123_s14 = scalar_lea.vmem %s4605_s6, %s3270_s28 }
  0x12   : > { %v3116_v3 = vld [vmem:[%s3276_s8 + $0x18] sm:$0xff]   ;;  %v3079_v5 = vunpack.c.l.bf16 %v3121_v1  ;;  %v3080_v6 = vunpack.c.h.bf16 %v3121_v1  ;;  %v3075_v7 = vunpack.c.l.bf16 %v3120_v2  ;;  %v3076_v8 = vunpack.c.h.bf16 %v3120_v2  ;;  %v3125_v9 = vld [vmem:[%s3276_s8 + $0x60] sm:$0xff]   ;;  %s443_s13 = scalar_lea.vmem %s4601_s2, %s3003_s10  ;;  %s2837_s28 = sshll.u32 %s4626_s24, 1 }
  0x13   : > { %v3059_v10 = vunpack.c.l.bf16 %v3116_v3  ;;  %v3060_v11 = vunpack.c.h.bf16 %v3116_v3  ;;  %v3095_v12 = vunpack.c.l.bf16 %v3125_v9  ;;  %v3096_v13 = vunpack.c.h.bf16 %v3125_v9  ;;  %v3124_v46 = vld [vmem:[%s3276_s8 + $0x58] sm:$0xff]   ;;  %v3042_v51 = vld [vmem:[%s415_s15] sm:$0xff]   ;;  %s465_s18 = scalar_lea.vmem %s4606_s7, %s2837_s28 }
  0x14   : > { %v567_v14 = vmul.f32 %v3281_v0, %v3079_v5  ;;  %v568_v15 = vmul.f32 %v3281_v0, %v3080_v6  ;;  %v565_v16 = vmul.f32 %v3281_v0, %v3075_v7  ;;  %v566_v17 = vmul.f32 %v3281_v0, %v3076_v8 }
  0x15   : > { %v557_v18 = vmul.f32 %v3281_v0, %v3059_v10  ;;  %v558_v19 = vmul.f32 %v3281_v0, %v3060_v11  ;;  %v575_v20 = vmul.f32 %v3281_v0, %v3095_v12  ;;  %v576_v21 = vmul.f32 %v3281_v0, %v3096_v13 }
  0x16   : > { %v599_v22 = vadd.f32 %v3289_v4, %v567_v14  ;;  %v600_v23 = vadd.f32 %v3289_v4, %v568_v15  ;;  %v597_v24 = vadd.f32 %v3289_v4, %v565_v16  ;;  %v598_v25 = vadd.f32 %v3289_v4, %v566_v17 }
  0x17   : > { %v589_v26 = vadd.f32 %v3289_v4, %v557_v18  ;;  %v590_v27 = vadd.f32 %v3289_v4, %v558_v19  ;;  %v607_v28 = vadd.f32 %v3289_v4, %v575_v20  ;;  %v608_v29 = vadd.f32 %v3289_v4, %v576_v21 }
  0x18   : > { %v631_v30 = vmax.f32 %v599_v22, 0.0  ;;  %v632_v31 = vmax.f32 %v600_v23, 0.0  ;;  %v629_v32 = vmax.f32 %v597_v24, 0.0  ;;  %v630_v33 = vmax.f32 %v598_v25, 0.0 }
  0x19   : > { %v621_v34 = vmax.f32 %v589_v26, 0.0  ;;  %v622_v35 = vmax.f32 %v590_v27, 0.0  ;;  %v639_v36 = vmax.f32 %v607_v28, 0.0  ;;  %v640_v37 = vmax.f32 %v608_v29, 0.0 }
  0x1a   : > { %v663_v38 = vpack.c.bf16 %v631_v30, %v631_v30  ;;  %v664_v39 = vpack.c.bf16 %v632_v31, %v632_v31  ;;  %v661_v40 = vpack.c.bf16 %v629_v32, %v629_v32  ;;  %v662_v41 = vpack.c.bf16 %v630_v33, %v630_v33 }
  0x1b   : > { %v653_v42 = vpack.c.bf16 %v621_v34, %v621_v34  ;;  %v654_v43 = vpack.c.bf16 %v622_v35, %v622_v35  ;;  %v671_v44 = vpack.c.bf16 %v639_v36, %v639_v36  ;;  %v672_v45 = vpack.c.bf16 %v640_v37, %v640_v37 }
  0x1c   : > { %v793_v47 = vunpack.c.l.b16 %v663_v38  ;;  %v794_v48 = vunpack.c.l.b16 %v664_v39  ;;  %v791_v49 = vunpack.c.l.b16 %v661_v40  ;;  %v792_v50 = vunpack.c.l.b16 %v662_v41 }
  0x1d   : > { %v783_v52 = vunpack.c.l.b16 %v653_v42  ;;  %v784_v53 = vunpack.c.l.b16 %v654_v43  ;;  %v801_v54 = vunpack.c.l.b16 %v671_v44  ;;  %v802_v55 = vunpack.c.l.b16 %v672_v45 }
  0x1e   : > { %v820_v56 = vpack.c.b16 %v794_v48, %v793_v47  ;;  %v819_v57 = vpack.c.b16 %v792_v50, %v791_v49  ;;  %v3091_v58 = vunpack.c.l.bf16 %v3124_v46  ;;  %v3092_v59 = vunpack.c.h.bf16 %v3124_v46 }
  0x1f   : > { %v815_v60 = vpack.c.b16 %v784_v53, %v783_v52  ;;  %v824_v61 = vpack.c.b16 %v802_v55, %v801_v54  ;;  %v3043_v62 = vunpack.c.l.bf16 %v3042_v51  ;;  %v3044_v63 = vunpack.c.h.bf16 %v3042_v51 }
  0x20   : > { %v893_v1 = vshrl.u32 %v820_v56, 16  ;;  %v896_v2 = vshll.u32 %v820_v56, 16  ;;  %v886_v3 = vshrl.u32 %v819_v57, 16  ;;  %v889_v5 = vshll.u32 %v819_v57, 16 }
  0x21   : > { %v858_v6 = vshrl.u32 %v815_v60, 16  ;;  %v861_v7 = vshll.u32 %v815_v60, 16  ;;  %v921_v8 = vshrl.u32 %v824_v61, 16  ;;  %v924_v9 = vshll.u32 %v824_v61, 16 }
  0x22   : > { %v895_v10 = vrot.slane %v893_v1, 7  ;;  %v888_v11 = vrot.slane %v886_v3, 7  ;;  %v573_v12 = vmul.f32 %v3281_v0, %v3091_v58  ;;  %v574_v13 = vmul.f32 %v3281_v0, %v3092_v59 }
  0x23   : > { %v860_v15 = vrot.slane %v858_v6, 7  ;;  %v923_v16 = vrot.slane %v921_v8, 7  ;;  %v476_v17 = vmul.f32 %v3281_v0, %v3043_v62  ;;  %v477_v18 = vmul.f32 %v3281_v0, %v3044_v63  ;;  %v3122_v63 = vld [vmem:[%s3276_s8 + $0x48] sm:$0xff]  }
  0x24   : > { %v898_v19 = vor.u32 %v896_v2, %v895_v10  ;;  %v3325_v20 = vsel %vm3317_vm3, %v895_v10, 0  ;;  %v891_v21 = vor.u32 %v889_v5, %v888_v11  ;;  %v3329_v22 = vsel %vm3317_vm3, %v888_v11, 0  ;;  %v3117_v5 = vld [vmem:[%s3276_s8 + $0x20] sm:$0xff]  }
  0x25   : > { %v1219_v23 = vshll.u32 %v3325_v20, 16  ;;  %v1207_v24 = vshll.u32 %v3329_v22, 16  ;;  %v863_v25 = vor.u32 %v861_v7, %v860_v15  ;;  %v3335_v26 = vsel %vm3317_vm3, %v860_v15, 0  ;;  %v3046_v11 = vld [vmem:[%s3276_s8] sm:$0xff]  }
  0x26   : > { %v3339_v27 = vsel %vm3317_vm3, 0, %v898_v19  ;;  %v3343_v28 = vsel %vm3317_vm3, 0, %v891_v21  ;;  %v1159_v29 = vshll.u32 %v3335_v26, 16  ;;  %v926_v30 = vor.u32 %v924_v9, %v923_v16 }
  0x27   : > { %v1212_v31 = vshrl.u32 %v3339_v27, 16  ;;  %v1214_v32 = vshll.u32 %v3339_v27, 16  ;;  %v1221_v33 = vrot.slane %v1219_v23, 1  ;;  %v1200_v34 = vshrl.u32 %v3343_v28, 16 }
  0x28   : > { %v1202_v35 = vshll.u32 %v3343_v28, 16  ;;  %v1209_v36 = vrot.slane %v1207_v24, 1  ;;  %v3352_v37 = vsel %vm3317_vm3, 0, %v863_v25  ;;  %v1161_v38 = vrot.slane %v1159_v29, 1 }
  0x29   : > { %v1216_v39 = vrot.slane %v1214_v32, 1  ;;  %v1152_v40 = vshrl.u32 %v3352_v37, 16  ;;  %v1154_v41 = vshll.u32 %v3352_v37, 16  ;;  %v3358_v42 = vsel %vm3317_vm3, 0, %v926_v30 }
  0x2a   : > { %v1204_v43 = vrot.slane %v1202_v35, 1  ;;  %v3362_v44 = vsel %vm3317_vm3, %v923_v16, 0  ;;  %v1260_v45 = vshrl.u32 %v3358_v42, 16  ;;  %v1262_v46 = vshll.u32 %v3358_v42, 16 }
  0x2b   : > { %v1217_v47 = vor.u32 %v1216_v39, %v1212_v31  ;;  %v1156_v48 = vrot.slane %v1154_v41, 1  ;;  %v1267_v49 = vshll.u32 %v3362_v44, 16  ;;  %v605_v50 = vadd.f32 %v3289_v4, %v573_v12 }
  0x2c   : > { %v1205_v51 = vor.u32 %v1204_v43, %v1200_v34  ;;  %v1264_v52 = vrot.slane %v1262_v46, 1  ;;  %v606_v53 = vadd.f32 %v3289_v4, %v574_v13  ;;  %v481_v54 = vadd.f32 %v3289_v4, %v476_v17 }
  0x2d   : > { %v1222_v55 = vsel %vm1102_vm2, %v1217_v47, %v1221_v33  ;;  %v1157_v56 = vor.u32 %v1156_v48, %v1152_v40  ;;  %v1269_v57 = vrot.slane %v1267_v49, 1  ;;  %v637_v58 = vmax.f32 %v605_v50, 0.0 }
  0x2e   : > { %1337 = vrot.lane.b32.xlu2 %v1222_v55, %s3207_s16  ;;  %v1210_v59 = vsel %vm1102_vm2, %v1205_v51, %v1209_v36  ;;  %v1265_v60 = vor.u32 %v1264_v52, %v1260_v45  ;;  %v638_v61 = vmax.f32 %v606_v53, 0.0  ;;  %v482_v62 = vadd.f32 %v3289_v4, %v477_v18 }
  0x2f   : > { %1335 = vrot.lane.b32.xlu0 %v1210_v59, %s3207_s16  ;;  %v1162_v1 = vsel %vm1102_vm2, %v1157_v56, %v1161_v38  ;;  %v669_v2 = vpack.c.bf16 %v637_v58, %v637_v58  ;;  %v483_v3 = vmax.f32 %v481_v54, 0.0  ;;  %v3208_v9 = vmov 0.0  }
  0x30   : > { %1327 = vrot.lane.b32.xlu1 %v1162_v1, %s3207_s16  ;;  %v1270_v6 = vsel %vm1102_vm2, %v1265_v60, %v1269_v57  ;;  %v670_v7 = vpack.c.bf16 %v638_v61, %v638_v61  ;;  %v484_v8 = vmax.f32 %v482_v62, 0.0  ;;  %v3380_v10 = vunpack.c.l.bf16 %v3208_v9 }
  0x31   : > { %v799_v12 = vunpack.c.l.b16 %v669_v2  ;;  %v485_v13 = vpack.c.bf16 %v483_v3, %v483_v3  ;;  %v3083_v15 = vunpack.c.l.bf16 %v3122_v63  ;;  %v3084_v16 = vunpack.c.h.bf16 %v3122_v63 }
  0x32   : > { %v800_v17 = vunpack.c.l.b16 %v670_v7  ;;  %v486_v18 = vpack.c.bf16 %v484_v8, %v484_v8  ;;  %v3063_v19 = vunpack.c.l.bf16 %v3117_v5  ;;  %v3064_v21 = vunpack.c.h.bf16 %v3117_v5 }
  0x33   : > { %v708_v23 = vunpack.c.l.bf16 %v485_v13  ;;  %v569_v24 = vmul.f32 %v3281_v0, %v3083_v15  ;;  %v570_v25 = vmul.f32 %v3281_v0, %v3084_v16  ;;  %v3047_v29 = vunpack.c.l.bf16 %v3046_v11 }
  0x34   : > { %v823_v30 = vpack.c.b16 %v800_v17, %v799_v12  ;;  %v709_v31 = vunpack.c.l.bf16 %v486_v18  ;;  %v559_v32 = vmul.f32 %v3281_v0, %v3063_v19  ;;  %v560_v33 = vmul.f32 %v3281_v0, %v3064_v21  ;;  %v3126_v12 = vld [vmem:[%s3276_s8 + $0x68] sm:$0xff]  }
  0x35   : > { %v711_v34 = vmul.f32 %v3380_v10, %v708_v23  ;;  %v601_v35 = vadd.f32 %v3289_v4, %v569_v24  ;;  %v602_v36 = vadd.f32 %v3289_v4, %v570_v25  ;;  %v3048_v38 = vunpack.c.h.bf16 %v3046_v11 }
  0x36   : > { %1345 = vrot.lane.b32.xlu2 %v1270_v6, %s3207_s16  ;;  %v914_v39 = vshrl.u32 %v823_v30, 16  ;;  %v917_v40 = vshll.u32 %v823_v30, 16  ;;  %v712_v41 = vmul.f32 %v3380_v10, %v709_v31  ;;  %v591_v43 = vadd.f32 %v3289_v4, %v559_v32 }
  0x37   : > { %v713_v45 = vpack.c.bf16 %v711_v34, %v711_v34  ;;  %v633_v46 = vmax.f32 %v601_v35, 0.0  ;;  %v634_v47 = vmax.f32 %v602_v36, 0.0  ;;  %v592_v48 = vadd.f32 %v3289_v4, %v560_v33 }
  0x38   : > { %v916_v49 = vrot.slane %v914_v39, 7  ;;  %v714_v50 = vpack.c.bf16 %v712_v41, %v712_v41  ;;  %v623_v51 = vmax.f32 %v591_v43, 0.0  ;;  %v551_v52 = vmul.f32 %v3281_v0, %v3047_v29 }
  0x39   : > { %v775_v53 = vunpack.c.l.b16 %v713_v45  ;;  %v665_v54 = vpack.c.bf16 %v633_v46, %v633_v46  ;;  %v666_v55 = vpack.c.bf16 %v634_v47, %v634_v47  ;;  %v624_v56 = vmax.f32 %v592_v48, 0.0 }
  0x3a   : > { %v919_v57 = vor.u32 %v917_v40, %v916_v49  ;;  %v3397_v58 = vsel %vm3317_vm3, %v916_v49, 0  ;;  %v776_v59 = vunpack.c.l.b16 %v714_v50  ;;  %v655_v60 = vpack.c.bf16 %v623_v51, %v623_v51 }
  0x3b   : > { %v1255_v61 = vshll.u32 %v3397_v58, 16  ;;  %v795_v62 = vunpack.c.l.b16 %v665_v54  ;;  %v796_v63 = vunpack.c.l.b16 %v666_v55  ;;  %v656_v1 = vpack.c.bf16 %v624_v56, %v624_v56 }
  0x3c   : > { %v3402_v2 = vsel %vm3317_vm3, 0, %v919_v57  ;;  %v811_v3 = vpack.c.b16 %v776_v59, %v775_v53  ;;  %v785_v5 = vunpack.c.l.b16 %v655_v60  ;;  %v552_v6 = vmul.f32 %v3281_v0, %v3048_v38 }
  0x3d   : > { %v1248_v7 = vshrl.u32 %v3402_v2, 16  ;;  %v1250_v8 = vshll.u32 %v3402_v2, 16  ;;  %v1257_v9 = vrot.slane %v1255_v61, 1  ;;  %v821_v11 = vpack.c.b16 %v796_v63, %v795_v62 }
  0x3e   : > { %v830_v13 = vshrl.u32 %v811_v3, 16  ;;  %v833_v15 = vshll.u32 %v811_v3, 16  ;;  %v786_v16 = vunpack.c.l.b16 %v656_v1  ;;  %v583_v17 = vadd.f32 %v3289_v4, %v551_v52 }
  0x3f   : > { %v1252_v18 = vrot.slane %v1250_v8, 1  ;;  %v900_v19 = vshrl.u32 %v821_v11, 16  ;;  %v903_v21 = vshll.u32 %v821_v11, 16  ;;  %v584_v23 = vadd.f32 %v3289_v4, %v552_v6  ;;  %v3114_v6 = vld [vmem:[%s3276_s8 + $0x8] sm:$0xff]  }
  0x40   : > { %v832_v24 = vrot.slane %v830_v13, 7  ;;  %v816_v25 = vpack.c.b16 %v786_v16, %v785_v5  ;;  %v615_v29 = vmax.f32 %v583_v17, 0.0  ;;  %v3099_v30 = vunpack.c.l.bf16 %v3126_v12 }
  0x41   : > { %v1253_v31 = vor.u32 %v1252_v18, %v1248_v7  ;;  %v902_v32 = vrot.slane %v900_v19, 7  ;;  %v616_v33 = vmax.f32 %v584_v23, 0.0  ;;  %v3100_v34 = vunpack.c.h.bf16 %v3126_v12  ;;  %v3123_v23 = vld [vmem:[%s3276_s8 + $0x50] sm:$0xff]  }
  0x42   : > { %v835_v35 = vor.u32 %v833_v15, %v832_v24  ;;  %v3412_v36 = vsel %vm3317_vm3, %v832_v24, 0  ;;  %v865_v38 = vshrl.u32 %v816_v25, 16  ;;  %v868_v39 = vshll.u32 %v816_v25, 16 }
  0x43   : > { %v1258_v40 = vsel %vm1102_vm2, %v1253_v31, %v1257_v9  ;;  %v1111_v41 = vshll.u32 %v3412_v36, 16  ;;  %v905_v43 = vor.u32 %v903_v21, %v902_v32  ;;  %v3418_v45 = vsel %vm3317_vm3, %v902_v32, 0 }
  0x44   : > { %1343 = vrot.lane.b32.xlu0 %v1258_v40, %s3207_s16  ;;  %v3423_v46 = vsel %vm3317_vm3, 0, %v835_v35  ;;  %v1231_v47 = vshll.u32 %v3418_v45, 16  ;;  %v867_v48 = vrot.slane %v865_v38, 7  ;;  %v647_v49 = vpack.c.bf16 %v615_v29, %v615_v29 }
  0x45   : > { %v1104_v50 = vshrl.u32 %v3423_v46, 16  ;;  %v1106_v51 = vshll.u32 %v3423_v46, 16  ;;  %v1113_v52 = vrot.slane %v1111_v41, 1  ;;  %v3430_v53 = vsel %vm3317_vm3, 0, %v905_v43 }
  0x46   : > { %v1224_v54 = vshrl.u32 %v3430_v53, 16  ;;  %v1226_v55 = vshll.u32 %v3430_v53, 16  ;;  %v1233_v56 = vrot.slane %v1231_v47, 1  ;;  %v870_v57 = vor.u32 %v868_v39, %v867_v48 }
  0x47   : > { %v1108_v59 = vrot.slane %v1106_v51, 1  ;;  %v3436_v60 = vsel %vm3317_vm3, %v867_v48, 0  ;;  %v648_v61 = vpack.c.bf16 %v616_v33, %v616_v33  ;;  %v777_v62 = vunpack.c.l.b16 %v647_v49 }
  0x48   : > { %v1228_v63 = vrot.slane %v1226_v55, 1  ;;  %v3440_v1 = vsel %vm3317_vm3, 0, %v870_v57  ;;  %v1171_v3 = vshll.u32 %v3436_v60, 16  ;;  %v577_v5 = vmul.f32 %v3281_v0, %v3099_v30 }
  0x49   : > { %v1109_v7 = vor.u32 %v1108_v59, %v1104_v50  ;;  %v1164_v8 = vshrl.u32 %v3440_v1, 16  ;;  %v1166_v9 = vshll.u32 %v3440_v1, 16  ;;  %v778_v11 = vunpack.c.l.b16 %v648_v61 }
  0x4a   : > { %v1229_v12 = vor.u32 %v1228_v63, %v1224_v54  ;;  %v1173_v13 = vrot.slane %v1171_v3, 1  ;;  %v578_v15 = vmul.f32 %v3281_v0, %v3100_v34  ;;  %v609_v16 = vadd.f32 %v3289_v4, %v577_v5  ;;  %v3115_v54 = vld [vmem:[%s3276_s8 + $0x10] sm:$0xff]  }
  0x4b   : > { %v1114_v17 = vsel %vm1102_vm2, %v1109_v7, %v1113_v52  ;;  %v1168_v18 = vrot.slane %v1166_v9, 1  ;;  %v812_v19 = vpack.c.b16 %v778_v11, %v777_v62  ;;  %v3051_v21 = vunpack.c.l.bf16 %v3114_v6 }
  0x4c   : > { %1319 = vrot.lane.b32.xlu1 %v1114_v17, %s3207_s16  ;;  %v1234_v24 = vsel %vm1102_vm2, %v1229_v12, %v1233_v56  ;;  %v610_v25 = vadd.f32 %v3289_v4, %v578_v15  ;;  %v641_v29 = vmax.f32 %v609_v16, 0.0  ;;  %v3052_v30 = vunpack.c.h.bf16 %v3114_v6 }
  0x4d   : > { %1339 = vrot.lane.b32.xlu2 %v1234_v24, %s3207_s16  ;;  %v1169_v31 = vor.u32 %v1168_v18, %v1164_v8  ;;  %v837_v32 = vshrl.u32 %v812_v19, 16  ;;  %v840_v33 = vshll.u32 %v812_v19, 16  ;;  %v553_v34 = vmul.f32 %v3281_v0, %v3051_v21  ;;  %v3118_v19 = vld [vmem:[%s3276_s8 + $0x28] sm:$0xff]  }
  0x4e   : > { %v642_v35 = vmax.f32 %v610_v25, 0.0  ;;  %v673_v38 = vpack.c.bf16 %v641_v29, %v641_v29  ;;  %v554_v39 = vmul.f32 %v3281_v0, %v3052_v30  ;;  %v3087_v40 = vunpack.c.l.bf16 %v3123_v23 }
  0x4f   : > { %v1174_v41 = vsel %vm1102_vm2, %v1169_v31, %v1173_v13  ;;  %v839_v43 = vrot.slane %v837_v32, 7  ;;  %v585_v47 = vadd.f32 %v3289_v4, %v553_v34  ;;  %v3088_v48 = vunpack.c.h.bf16 %v3123_v23 }
  0x50   : > { %1329 = vrot.lane.b32.xlu0 %v1174_v41, %s3207_s16  ;;  %v674_v49 = vpack.c.bf16 %v642_v35, %v642_v35  ;;  %v803_v50 = vunpack.c.l.b16 %v673_v38  ;;  %v586_v51 = vadd.f32 %v3289_v4, %v554_v39  ;;  %v571_v52 = vmul.f32 %v3281_v0, %v3087_v40 }
  0x51   : > { %v842_v55 = vor.u32 %v840_v33, %v839_v43  ;;  %v3465_v56 = vsel %vm3317_vm3, %v839_v43, 0  ;;  %v617_v57 = vmax.f32 %v585_v47, 0.0  ;;  %v572_v59 = vmul.f32 %v3281_v0, %v3088_v48 }
  0x52   : > { %v1123_v61 = vshll.u32 %v3465_v56, 16  ;;  %v804_v62 = vunpack.c.l.b16 %v674_v49  ;;  %v618_v63 = vmax.f32 %v586_v51, 0.0  ;;  %v603_v3 = vadd.f32 %v3289_v4, %v571_v52 }
  0x53   : > { %v3472_v5 = vsel %vm3317_vm3, 0, %v842_v55  ;;  %v649_v6 = vpack.c.bf16 %v617_v57, %v617_v57  ;;  %v604_v7 = vadd.f32 %v3289_v4, %v572_v59  ;;  %v3055_v8 = vunpack.c.l.bf16 %v3115_v54 }
  0x54   : > { %v1116_v9 = vshrl.u32 %v3472_v5, 16  ;;  %v1118_v11 = vshll.u32 %v3472_v5, 16  ;;  %v1125_v12 = vrot.slane %v1123_v61, 1  ;;  %v825_v13 = vpack.c.b16 %v804_v62, %v803_v50 }
  0x55   : > { %v650_v15 = vpack.c.bf16 %v618_v63, %v618_v63  ;;  %v779_v16 = vunpack.c.l.b16 %v649_v6  ;;  %v635_v17 = vmax.f32 %v603_v3, 0.0  ;;  %v636_v18 = vmax.f32 %v604_v7, 0.0 }
  0x56   : > { %v1120_v21 = vrot.slane %v1118_v11, 1  ;;  %v928_v23 = vshrl.u32 %v825_v13, 16  ;;  %v931_v24 = vshll.u32 %v825_v13, 16  ;;  %v3056_v25 = vunpack.c.h.bf16 %v3115_v54 }
  0x57   : > { %v780_v29 = vunpack.c.l.b16 %v650_v15  ;;  %v667_v30 = vpack.c.bf16 %v635_v17, %v635_v17  ;;  %v668_v31 = vpack.c.bf16 %v636_v18, %v636_v18  ;;  %v555_v32 = vmul.f32 %v3281_v0, %v3055_v8 }
  0x58   : > { %v1121_v33 = vor.u32 %v1120_v21, %v1116_v9  ;;  %v930_v34 = vrot.slane %v928_v23, 7  ;;  %v556_v35 = vmul.f32 %v3281_v0, %v3056_v25  ;;  %v3067_v38 = vunpack.c.l.bf16 %v3118_v19 }
  0x59   : > { %v813_v39 = vpack.c.b16 %v780_v29, %v779_v16  ;;  %v797_v40 = vunpack.c.l.b16 %v667_v30  ;;  %v798_v41 = vunpack.c.l.b16 %v668_v31  ;;  %v587_v43 = vadd.f32 %v3289_v4, %v555_v32 }
  0x5a   : > { %v1126_v47 = vsel %vm1102_vm2, %v1121_v33, %v1125_v12  ;;  %v933_v48 = vor.u32 %v931_v24, %v930_v34  ;;  %v3484_v49 = vsel %vm3317_vm3, %v930_v34, 0  ;;  %v588_v50 = vadd.f32 %v3289_v4, %v556_v35 }
  0x5b   : > { %1321 = vrot.lane.b32.xlu1 %v1126_v47, %s3207_s16  ;;  %v1279_v51 = vshll.u32 %v3484_v49, 16  ;;  %v844_v52 = vshrl.u32 %v813_v39, 16  ;;  %v847_v54 = vshll.u32 %v813_v39, 16  ;;  %v822_v55 = vpack.c.b16 %v798_v41, %v797_v40 }
  0x5c   : > { %v3491_v57 = vsel %vm3317_vm3, 0, %v933_v48  ;;  %v619_v59 = vmax.f32 %v587_v43, 0.0  ;;  %v620_v61 = vmax.f32 %v588_v50, 0.0  ;;  %v3068_v62 = vunpack.c.h.bf16 %v3118_v19  ;;  %v3127_v50 = vld [vmem:[%s3276_s8 + $0x70] sm:$0xff]  }
  0x5d   : > { %v1272_v63 = vshrl.u32 %v3491_v57, 16  ;;  %v1274_v3 = vshll.u32 %v3491_v57, 16  ;;  %v1281_v6 = vrot.slane %v1279_v51, 1  ;;  %v846_v7 = vrot.slane %v844_v52, 7 }
  0x5e   : > { %v907_v8 = vshrl.u32 %v822_v55, 16  ;;  %v910_v9 = vshll.u32 %v822_v55, 16  ;;  %v651_v11 = vpack.c.bf16 %v619_v59, %v619_v59  ;;  %v652_v12 = vpack.c.bf16 %v620_v61, %v620_v61  ;;  %v3119_v59 = vld [vmem:[%s3276_s8 + $0x30] sm:$0xff]  }
  0x5f   : > { %v1276_v13 = vrot.slane %v1274_v3, 1  ;;  %v849_v15 = vor.u32 %v847_v54, %v846_v7  ;;  %v3497_v16 = vsel %vm3317_vm3, %v846_v7, 0  ;;  %v561_v17 = vmul.f32 %v3281_v0, %v3067_v38 }
  0x60   : > { %v1135_v18 = vshll.u32 %v3497_v16, 16  ;;  %v909_v19 = vrot.slane %v907_v8, 7  ;;  %v781_v21 = vunpack.c.l.b16 %v651_v11  ;;  %v782_v23 = vunpack.c.l.b16 %v652_v12 }
  0x61   : > { %v1277_v24 = vor.u32 %v1276_v13, %v1272_v63  ;;  %v3503_v25 = vsel %vm3317_vm3, 0, %v849_v15  ;;  %v562_v29 = vmul.f32 %v3281_v0, %v3068_v62  ;;  %v593_v30 = vadd.f32 %v3289_v4, %v561_v17  ;;  %v3012_v17 = vld [vmem:[%s4602_s3 + $0x38] sm:$0xff] }
  0x62   : > { %v1128_v31 = vshrl.u32 %v3503_v25, 16  ;;  %v1130_v32 = vshll.u32 %v3503_v25, 16  ;;  %v1137_v33 = vrot.slane %v1135_v18, 1  ;;  %v912_v34 = vor.u32 %v910_v9, %v909_v19  ;;  %3129 = vmatpush.bf16.msra.mxu1 %v3012_v17  ;;  %3130 = vmatpush.bf16.msra.mxu2 %v3012_v17 }
  0x63   : > { %v1282_v35 = vsel %vm1102_vm2, %v1277_v24, %v1281_v6  ;;  %v3512_v38 = vsel %vm3317_vm3, %v909_v19, 0  ;;  %v814_v39 = vpack.c.b16 %v782_v23, %v781_v21  ;;  %v594_v40 = vadd.f32 %v3289_v4, %v562_v29  ;;  %1928 = vmatpush.bf16.msra.mxu0 %v3012_v17  ;;  %3131 = vmatpush.bf16.msra.mxu3 %v3012_v17 }
  0x64   : > { %1347 = vrot.lane.b32.xlu0 %v1282_v35, %s3207_s16  ;;  %v1132_v41 = vrot.slane %v1130_v32, 1  ;;  %v3518_v43 = vsel %vm3317_vm3, 0, %v912_v34  ;;  %v1243_v47 = vshll.u32 %v3512_v38, 16  ;;  %v625_v48 = vmax.f32 %v593_v30, 0.0  ;;  %v3011_v32 = vld [vmem:[%s4602_s3 + $0x30] sm:$0xff] }
  0x65   : > { %v1236_v51 = vshrl.u32 %v3518_v43, 16  ;;  %v1238_v52 = vshll.u32 %v3518_v43, 16  ;;  %v851_v54 = vshrl.u32 %v814_v39, 16  ;;  %v854_v55 = vshll.u32 %v814_v39, 16 }
  0x66   : > { %v1133_v61 = vor.u32 %v1132_v41, %v1128_v31  ;;  %v1245_v62 = vrot.slane %v1243_v47, 1  ;;  %v626_v63 = vmax.f32 %v594_v40, 0.0  ;;  %v657_v3 = vpack.c.bf16 %v625_v48, %v625_v48  ;;  %3132 = vmatpush.bf16.msra.mxu1 %v3011_v32  ;;  %3133 = vmatpush.bf16.msra.mxu2 %v3011_v32 }
  0x67   : > { %v1240_v6 = vrot.slane %v1238_v52, 1  ;;  %v853_v7 = vrot.slane %v851_v54, 7  ;;  %v3103_v8 = vunpack.c.l.bf16 %v3127_v50  ;;  %v3104_v9 = vunpack.c.h.bf16 %v3127_v50  ;;  %1929 = vmatpush.bf16.msra.mxu0 %v3011_v32  ;;  %3134 = vmatpush.bf16.msra.mxu3 %v3011_v32 }
  0x68   : > { %v1138_v11 = vsel %vm1102_vm2, %v1133_v61, %v1137_v33  ;;  %v658_v12 = vpack.c.bf16 %v626_v63, %v626_v63  ;;  %v787_v13 = vunpack.c.l.b16 %v657_v3  ;;  %v3071_v15 = vunpack.c.l.bf16 %v3119_v59 }
  0x69   : > { %1323 = vrot.lane.b32.xlu2 %v1138_v11, %s3207_s16  ;;  %v1241_v18 = vor.u32 %v1240_v6, %v1236_v51  ;;  %v856_v19 = vor.u32 %v854_v55, %v853_v7  ;;  %v3532_v21 = vsel %vm3317_vm3, %v853_v7, 0  ;;  %v579_v23 = vmul.f32 %v3281_v0, %v3103_v8 }
  0x6a   : > { %v1147_v24 = vshll.u32 %v3532_v21, 16  ;;  %v788_v29 = vunpack.c.l.b16 %v658_v12  ;;  %v580_v30 = vmul.f32 %v3281_v0, %v3104_v9  ;;  %v3072_v31 = vunpack.c.h.bf16 %v3119_v59 }
  0x6b   : > { %v1246_v33 = vsel %vm1102_vm2, %v1241_v18, %v1245_v62  ;;  %v3543_v34 = vsel %vm3317_vm3, 0, %v856_v19  ;;  %v611_v35 = vadd.f32 %v3289_v4, %v579_v23  ;;  %v563_v39 = vmul.f32 %v3281_v0, %v3071_v15  ;;  %v3010_v62 = vld [vmem:[%s4602_s3 + $0x28] sm:$0xff] }
  0x6c   : > { %1341 = vrot.lane.b32.xlu0 %v1246_v33, %s3207_s16  ;;  %v1140_v40 = vshrl.u32 %v3543_v34, 16  ;;  %v1142_v41 = vshll.u32 %v3543_v34, 16  ;;  %v817_v47 = vpack.c.b16 %v788_v29, %v787_v13  ;;  %v612_v48 = vadd.f32 %v3289_v4, %v580_v30  ;;  %3135 = vmatpush.bf16.msra.mxu1 %v3010_v62 }
  0x6d   : > { %v643_v50 = vmax.f32 %v611_v35, 0.0  ;;  %v564_v51 = vmul.f32 %v3281_v0, %v3072_v31  ;;  %v595_v52 = vadd.f32 %v3289_v4, %v563_v39  ;;  %v1149_v55 = vrot.slane %v1147_v24, 1  ;;  %3136 = vmatpush.bf16.msra.mxu2 %v3010_v62  ;;  %1930 = vmatpush.bf16.msra.mxu0 %v3010_v62  ;;  %v3008_v39 = vld [vmem:[%s4602_s3 + $0x18] sm:$0xff] }
  0x6e   : > { %v1144_v54 = vrot.slane %v1142_v41, 1  ;;  %v872_v59 = vshrl.u32 %v817_v47, 16  ;;  %v875_v61 = vshll.u32 %v817_v47, 16  ;;  %v644_v63 = vmax.f32 %v612_v48, 0.0  ;;  %3137 = vmatpush.bf16.msra.mxu3 %v3010_v62 }
  0x6f   : > { %v675_v3 = vpack.c.bf16 %v643_v50, %v643_v50  ;;  %v596_v6 = vadd.f32 %v3289_v4, %v564_v51  ;;  %v627_v7 = vmax.f32 %v595_v52, 0.0  ;;  %v3009_v4 = vld [vmem:[%s4602_s3 + $0x20] sm:$0xff] }
  0x70   : > { %v1145_v0 = vor.u32 %v1144_v54, %v1140_v40  ;;  %v874_v8 = vrot.slane %v872_v59, 7  ;;  %v676_v9 = vpack.c.bf16 %v644_v63, %v644_v63  ;;  %3138 = vmatpush.bf16.msra.mxu1 %v3009_v4  ;;  %v3007_v59 = vld [vmem:[%s4602_s3 + $0x10] sm:$0xff] }
  0x71   : > { %v805_v11 = vunpack.c.l.b16 %v675_v3  ;;  %v628_v12 = vmax.f32 %v596_v6, 0.0  ;;  %v659_v13 = vpack.c.bf16 %v627_v7, %v627_v7  ;;  %3139 = vmatpush.bf16.msra.mxu2 %v3009_v4  ;;  %1931 = vmatpush.bf16.msra.mxu0 %v3009_v4 }
  0x72   : > { %v1150_v15 = vsel %vm1102_vm2, %v1145_v0, %v1149_v55  ;;  %v877_v17 = vor.u32 %v875_v61, %v874_v8  ;;  %v3560_v18 = vsel %vm3317_vm3, %v874_v8, 0  ;;  %v806_v23 = vunpack.c.l.b16 %v676_v9  ;;  %3140 = vmatpush.bf16.msra.mxu3 %v3009_v4 }
  0x73   : > { %v1183_v19 = vshll.u32 %v3560_v18, 16  ;;  %v660_v24 = vpack.c.bf16 %v628_v12, %v628_v12  ;;  %v789_v30 = vunpack.c.l.b16 %v659_v13 }
  0x74   : > { %1325 = vrot.lane.b32.xlu0 %v1150_v15, %s3207_s16  ;;  %v3569_v29 = vsel %vm3317_vm3, 0, %v877_v17  ;;  %v826_v33 = vpack.c.b16 %v806_v23, %v805_v11  ;;  %3141 = vmatpush.bf16.msra.mxu1 %v3008_v39 }
  0x75   : > { %v1176_v31 = vshrl.u32 %v3569_v29, 16  ;;  %v1178_v32 = vshll.u32 %v3569_v29, 16  ;;  %v790_v35 = vunpack.c.l.b16 %v660_v24  ;;  %v1185_v41 = vrot.slane %v1183_v19, 1  ;;  %3142 = vmatpush.bf16.msra.mxu2 %v3008_v39  ;;  %1932 = vmatpush.bf16.msra.mxu0 %v3008_v39 }
  0x76   : > { %v935_v47 = vshrl.u32 %v826_v33, 16  ;;  %v938_v48 = vshll.u32 %v826_v33, 16  ;;  %3143 = vmatpush.bf16.msra.mxu3 %v3008_v39  ;;  %v3005_v39 = vld [vmem:[%s4602_s3] sm:$0xff] }
  0x77   : > { %v1180_v40 = vrot.slane %v1178_v32, 1  ;;  %v818_v50 = vpack.c.b16 %v790_v35, %v789_v30  ;;  %v3006_v35 = vld [vmem:[%s4602_s3 + $0x8] sm:$0xff] }
  0x78   : > { %v937_v52 = vrot.slane %v935_v47, 7  ;;  %3144 = vmatpush.bf16.msra.mxu1 %v3007_v59 }
  0x79   : > { %v1181_v51 = vor.u32 %v1180_v40, %v1176_v31  ;;  %v879_v54 = vshrl.u32 %v818_v50, 16  ;;  %v882_v55 = vshll.u32 %v818_v50, 16  ;;  %3145 = vmatpush.bf16.msra.mxu2 %v3007_v59  ;;  %1933 = vmatpush.bf16.msra.mxu0 %v3007_v59 }
  0x7a   : > { %v940_v62 = vor.u32 %v938_v48, %v937_v52  ;;  %v3582_v63 = vsel %vm3317_vm3, %v937_v52, 0  ;;  %3146 = vmatpush.bf16.msra.mxu3 %v3007_v59 }
  0x7b   : > { %v1186_v61 = vsel %vm1102_vm2, %v1181_v51, %v1185_v41  ;;  %v1291_v3 = vshll.u32 %v3582_v63, 16  ;;  %v881_v6 = vrot.slane %v879_v54, 7 }
  0x7c   : > { %1331 = vrot.lane.b32.xlu1 %v1186_v61, %s3207_s16  ;;  %v3588_v7 = vsel %vm3317_vm3, 0, %v940_v62  ;;  %3147 = vmatpush.bf16.msra.mxu1 %v3006_v35 }
  0x7d   : > { %v1284_v0 = vshrl.u32 %v3588_v7, 16  ;;  %v1286_v8 = vshll.u32 %v3588_v7, 16  ;;  %v884_v9 = vor.u32 %v882_v55, %v881_v6  ;;  %v3594_v11 = vsel %vm3317_vm3, %v881_v6, 0  ;;  %3148 = vmatpush.bf16.msra.mxu2 %v3006_v35  ;;  %1934 = vmatpush.bf16.msra.mxu0 %v3006_v35 }
  0x7e   : > { %v1293_v13 = vrot.slane %v1291_v3, 1  ;;  %v1195_v17 = vshll.u32 %v3594_v11, 16  ;;  %3149 = vmatpush.bf16.msra.mxu3 %v3006_v35  ;;  %v1395_v6 = vrot.slane %v3472_v5, 1  ;;  %v3034_v35 = vld [vmem:[%s4602_s3 + $0xe8] sm:$0xff] }
  0x7f   : > { %v1288_v12 = vrot.slane %v1286_v8, 1  ;;  %v3598_v15 = vsel %vm3317_vm3, 0, %v884_v9 }
  0x80   : > { %v1188_v4 = vshrl.u32 %v3598_v15, 16  ;;  %v1190_v19 = vshll.u32 %v3598_v15, 16  ;;  %v1197_v30 = vrot.slane %v1195_v17, 1  ;;  %3150 = vmatpush.bf16.msra.mxu1 %v3005_v39 }
  0x81   : > { %v1289_v23 = vor.u32 %v1288_v12, %v1284_v0  ;;  %3151 = vmatpush.bf16.msra.mxu2 %v3005_v39  ;;  %1935 = vmatpush.bf16.msra.mxu0 %v3005_v39  ;;  %v1396_v0 = vrot.slane %v3465_v56, 1  ;;  %v1401_v56 = vrot.slane %v3543_v34, 1 }
  0x82   : > { %v1192_v24 = vrot.slane %v1190_v19, 1  ;;  %3152 = vmatpush.bf16.msra.mxu3 %v3005_v39  ;;  %v3033_v39 = vld [vmem:[%s4602_s3 + $0xe0] sm:$0xff] }
  0x83   : > { %v1294_v31 = vsel %vm1102_vm2, %v1289_v23, %v1293_v13  ;;  %v3650_v17 = vsel %vm1391_vm5, %v1395_v6, %v1396_v0  ;;  %v3036_v23 = vld [vmem:[%s4602_s3 + $0xf8] sm:$0xff] }
  0x84   : > { %1349 = vrot.lane.b32.xlu1 %v1294_v31, %s3207_s16  ;;  %v1193_v32 = vor.u32 %v1192_v24, %v1188_v4  ;;  %v1402_v4 = vrot.slane %v3532_v21, 1  ;;  %v3035_v21 = vld [vmem:[%s4602_s3 + $0xf0] sm:$0xff]  ;;  %v3028_v6 = vld [vmem:[%s4602_s3 + $0xb8] sm:$0xff] }
  0x85   : > { %v3020_v0 = vld [vmem:[%s4602_s3 + $0x78] sm:$0xff]  ;;  %2106 = vmatpush.bf16.msrb.mxu2 %v3028_v6  ;;  %v3039_v6 = vld [vmem:[%s4602_s3 + $0x110] sm:$0xff] }
  0x86   : > { %v1198_v33 = vsel %vm1102_vm2, %v1193_v32, %v1197_v30  ;;  %v3669_v24 = vsel %vm1391_vm5, %v1401_v56, %v1402_v4  ;;  %2195 = vmatpush.bf16.msrb.mxu3 %v3036_v23  ;;  %v1398_v32 = vrot.slane %v3503_v25, 1  ;;  %2017 = vmatpush.bf16.msrb.mxu1 %v3020_v0  ;;  %v1419_v56 = vrot.slane %v3339_v27, 1  ;;  %v3017_v0 = vld [vmem:[%s4602_s3 + $0x60] sm:$0xff] }
  0x87   : > { %1333 = vrot.lane.b32.xlu2 %v1198_v33, %s3207_s16  ;;  %v1399_v33 = vrot.slane %v3497_v16, 1  ;;  %v1411_v16 = vrot.slane %v3560_v18, 1  ;;  %v3031_v18 = vld [vmem:[%s4602_s3 + $0xd0] sm:$0xff]  ;;  %v1420_v4 = vrot.slane %v3325_v20, 1 }
  0x88   : > { %v1338_v50 = vpop.permute.xlu2 %1337  ;;  %v3027_v20 = vld [vmem:[%s4602_s3 + $0xb0] sm:$0xff] }
  0x89   : > { %v3625_v52 = vsel %vm1446_vm4, %v3339_v27, %v1338_v50  ;;  %v3032_v50 = vld [vmem:[%s4602_s3 + $0xd8] sm:$0xff]  ;;  %2107 = vmatpush.bf16.msrb.mxu2 %v3027_v20 }
  0x8a   : > { %2196 = vmatpush.bf16.msrb.mxu3 %v3035_v21  ;;  %v3040_v27 = vld [vmem:[%s4602_s3 + $0x118] sm:$0xff] }
  0x8b   : > { %2288 = vmatpush.bf16.msrb.mxu0 %v3040_v27 }
  0x8e   : > { %2197 = vmatpush.bf16.msrb.mxu3 %v3034_v35  ;;  %v1416_v35 = vrot.slane %v3343_v28, 1 }
  0x8f   : > { %1519 = vrot.lane.b32.xlu2 %v3650_v17, %s3207_s16  ;;  %2289 = vmatpush.bf16.msrb.mxu0 %v3039_v6 }
  0x90   : > { %v1346_v51 = vpop.permute.xlu2 %1345 }
  0x91   : > { %v3662_v19 = vsel %vm1446_vm4, %v3358_v42, %v1346_v51 }
  0x92   : > { %2198 = vmatpush.bf16.msrb.mxu3 %v3033_v39  ;;  %v1417_v39 = vrot.slane %v3329_v22, 1 }
  0x94   : > { %v3791_v22 = vsel %vm1391_vm5, %v1416_v35, %v1417_v39  ;;  %v1425_v39 = vrot.slane %v3518_v43, 1 }
  0x96   : > { %2199 = vmatpush.bf16.msrb.mxu3 %v3032_v50  ;;  %v3128_v50 = vld [vmem:[%s3276_s8 + $0x78] sm:$0xff]  }
  0x9a   : > { %2200 = vmatpush.bf16.msrb.mxu3 %v3031_v18 }
  0xa1   : > { %v1336_v40 = vpop.permute.xlu0 %1335 }
  0xa2   : > { %v1328_v41 = vpop.permute.xlu1 %1327  ;;  %v3619_v48 = vsel %vm1446_vm4, %v3343_v28, %v1336_v40  ;;  %v3688_v40 = vsel %vm1391_vm5, %v1398_v32, %v1399_v33  ;;  %v3761_v32 = vsel %vm1391_vm5, %v1419_v56, %v1420_v4  ;;  %v1428_v28 = vrot.slane %v3402_v2, 1  ;;  %v3024_v56 = vld [vmem:[%s4602_s3 + $0x98] sm:$0xff]  ;;  %v3834_v4 = vld [vmem:[%s4604_s5] ss:$0 sm:$0xff] }
  0xa3   : > { %v3615_v47 = vsel %vm1446_vm4, %v3352_v37, %v1328_v41  ;;  %1976 = vmatmul.bf16.vlgmr.msra.gmra.mxu2 %v3619_v48 }
  0xa4   : > { %1956 = vmatmul.bf16.vlgmr.msra.gmra.mxu1 %v3615_v47 }
  0xa7   : > { %v1340_v59 = vpop.permute.xlu2 %1339 }
  0xa8   : > { %v3647_v13 = vsel %vm1446_vm4, %v3430_v53, %v1340_v59 }
  0xb3   : > { %1981 = vmatmul.bf16.gmra.mxu2 %v3625_v52 }
  0xb6   : > { %v1344_v54 = vpop.permute.xlu0 %1343 }
  0xb7   : > { %v3630_v55 = vsel %vm1446_vm4, %v3402_v2, %v1344_v54  ;;  %v1413_v2 = vrot.slane %v3598_v15, 1 }
  0xb8   : > { %1996 = vmatmul.bf16.vlgmr.msra.gmra.mxu3 %v3630_v55 }
  0xbe   : > { %v1320_v61 = vpop.permute.xlu1 %1319 }
  0xbf   : > { %v1448_v62 = vsel %vm1446_vm4, %v3423_v46, %v1320_v61  ;;  %v1407_v61 = vrot.slane %v3440_v1, 1 }
  0xc0   : > { %1936 = vmatmul.bf16.vlgmr.msra.gmra.mxu0 %v1448_v62  ;;  %v1408_v62 = vrot.slane %v3436_v60, 1  ;;  %v3029_v60 = vld [vmem:[%s4602_s3 + $0xc0] sm:$0xff] }
  0xc2   : > { %v1330_v3 = vpop.permute.xlu0 %1329 }
  0xc3   : > { %v1324_v8 = vpop.permute.xlu2 %1323  ;;  %v3639_v9 = vsel %vm1446_vm4, %v3440_v1, %v1330_v3  ;;  %1986 = vmatmul.bf16.gmra.mxu2 %v3647_v13  ;;  %v3030_v3 = vld [vmem:[%s4602_s3 + $0xc8] sm:$0xff]  ;;  %v3735_v1 = vsel %vm1391_vm5, %v1407_v61, %v1408_v62  ;;  %v3108_v61 = vunpack.c.h.bf16 %v3128_v50 }
  0xc4   : > { %v3643_v12 = vsel %vm1446_vm4, %v3503_v25, %v1324_v8  ;;  %1961 = vmatmul.bf16.gmra.mxu1 %v3639_v9  ;;  %v1410_v25 = vrot.slane %v3569_v29, 1  ;;  %2201 = vmatpush.bf16.msrb.mxu3 %v3030_v3  ;;  %v3025_v3 = vld [vmem:[%s4602_s3 + $0xa0] sm:$0xff] }
  0xc5   : > { %1521 = vrot.lane.b32.xlu0 %v3643_v12, %s3207_s16 }
  0xc6   : > { %v3705_v51 = vsel %vm1391_vm5, %v1410_v25, %v1411_v16  ;;  %v3026_v25 = vld [vmem:[%s4602_s3 + $0xa8] sm:$0xff] }
  0xc7   : > { %v3018_v16 = vld [vmem:[%s4602_s3 + $0x68] sm:$0xff]  ;;  %2108 = vmatpush.bf16.msrb.mxu2 %v3026_v25  ;;  %v1426_v25 = vrot.slane %v3512_v38, 1  ;;  %v1422_v38 = vrot.slane %v3430_v53, 1 }
  0xc8   : > { %2001 = vmatmul.bf16.gmra.mxu3 %v3662_v19 }
  0xc9   : > { %2202 = vmatpush.bf16.msrb.mxu3 %v3029_v60  ;;  %v3821_v60 = vld [vmem:[%s4603_s4] ss:$0 sm:$0xff] }
  0xcb   : > { %2109 = vmatpush.bf16.msrb.mxu2 %v3025_v3 }
  0xcd   : > { %1527 = vrot.lane.b32.xlu0 %v3669_v24, %s3207_s16  ;;  %v1322_v30 = vpop.permute.xlu1 %1321 }
  0xce   : > { %v1451_v31 = vsel %vm1446_vm4, %v3472_v5, %v1322_v30  ;;  %v1404_v30 = vrot.slane %v3352_v37, 1 }
  0xcf   : > { %1517 = vrot.lane.b32.xlu1 %v1451_v31, %s3207_s16  ;;  %2110 = vmatpush.bf16.msrb.mxu2 %v3024_v56 }
  0xd0   : > { %1941 = vmatmul.bf16.gmra.mxu0 %v1451_v31  ;;  %v1405_v31 = vrot.slane %v3335_v26, 1 }
  0xd2   : > { %v3770_v37 = vsel %vm1391_vm5, %v1404_v30, %v1405_v31  ;;  %v3016_v31 = vld [vmem:[%s4602_s3 + $0x58] sm:$0xff] }
  0xd5   : > { %1533 = vrot.lane.b32.xlu0 %v3639_v9, %s3207_s16 }
  0xd6   : > { %v1348_v5 = vpop.permute.xlu0 %1347 }
  0xd7   : > { %1523 = vrot.lane.b32.xlu1 %v3688_v40, %s3207_s16  ;;  %v3698_v41 = vsel %vm1446_vm4, %v3491_v57, %v1348_v5 }
  0xd8   : > { %2006 = vmatmul.bf16.gmra.mxu3 %v3698_v41 }
  0xdd   : > { %1539 = vrot.lane.b32.xlu0 %v3705_v51, %s3207_s16 }
  0xde   : > { %v1342_v54 = vpop.permute.xlu0 %1341 }
  0xdf   : > { %1529 = vrot.lane.b32.xlu1 %v3615_v47, %s3207_s16  ;;  %v3716_v59 = vsel %vm1446_vm4, %v3518_v43, %v1342_v54  ;;  %v3107_v54 = vunpack.c.l.bf16 %v3128_v50  ;;  %v3854_v50 = vsel %vm1391_vm5, %v1425_v39, %v1426_v25  ;;  %v1423_v43 = vrot.slane %v3418_v45, 1 }
  0xe0   : > { %1946 = vmatmul.bf16.gmra.mxu0 %v3643_v12  ;;  %1991 = vmatmul.bf16.gmra.mxu2 %v3716_v59  ;;  %v1431_v39 = vrot.slane %v3358_v42, 1  ;;  %v1432_v25 = vrot.slane %v3362_v44, 1  ;;  %v3021_v42 = vld [vmem:[%s4602_s3 + $0x80] sm:$0xff] }
  0xe1   : > { %v1334_v21 = vpop.permute.xlu2 %1333  ;;  %v3037_v44 = vld [vmem:[%s4602_s3 + $0x100] sm:$0xff] }
  0xe2   : > { %v3765_v26 = vsel %vm1446_vm4, %v3598_v15, %v1334_v21  ;;  %v581_v15 = vmul.f32 %v3821_v60, %v3107_v54 }
  0xe4   : > { %v613_v21 = vadd.f32 %v3834_v4, %v581_v15 }
  0xe5   : > { %1545 = vrot.lane.b32.xlu0 %v3619_v48, %s3207_s16 }
  0xe6   : > { %v1326_v8 = vpop.permute.xlu0 %1325  ;;  %v645_v27 = vmax.f32 %v613_v21, 0.0 }
  0xe7   : > { %v3743_v23 = vsel %vm1446_vm4, %v3543_v34, %v1326_v8  ;;  %1535 = vrot.lane.b32.xlu1 %v3735_v1, %s3207_s16  ;;  %v3019_v34 = vld [vmem:[%s4602_s3 + $0x70] sm:$0xff] }
  0xe8   : > { %1525 = vrot.lane.b32.xlu2 %v3743_v23, %s3207_s16  ;;  %2018 = vmatpush.bf16.msrb.mxu1 %v3019_v34 }
  0xec   : > { %2019 = vmatpush.bf16.msrb.mxu1 %v3018_v16 }
  0xed   : > { %1551 = vrot.lane.b32.xlu0 %v3761_v32, %s3207_s16 }
  0xee   : > { %v1332_v33 = vpop.permute.xlu1 %1331 }
  0xef   : > { %1541 = vrot.lane.b32.xlu1 %v3765_v26, %s3207_s16  ;;  %v3780_v5 = vsel %vm1446_vm4, %v3569_v29, %v1332_v33  ;;  %v1429_v29 = vrot.slane %v3397_v58, 1  ;;  %v1414_v58 = vrot.slane %v3594_v11, 1  ;;  %v582_v11 = vmul.f32 %v3821_v60, %v3108_v61 }
  0xf0   : > { %1531 = vrot.lane.b32.xlu2 %v3770_v37, %s3207_s16  ;;  %1951 = vmatmul.bf16.gmra.mxu0 %v3743_v23  ;;  %v677_v33 = vpack.c.bf16 %v645_v27, %v645_v27  ;;  %v3022_v27 = vld [vmem:[%s4602_s3 + $0x88] sm:$0xff] }
  0xf1   : > { %1966 = vmatmul.bf16.gmra.mxu1 %v3780_v5  ;;  %v3826_v8 = vsel %vm1391_vm5, %v1428_v28, %v1429_v29  ;;  %v614_v30 = vadd.f32 %v3834_v4, %v582_v11  ;;  %v3844_v20 = vsel %vm1391_vm5, %v1413_v2, %v1414_v58  ;;  %v3023_v2 = vld [vmem:[%s4602_s3 + $0x90] sm:$0xff]  ;;  %v3038_v58 = vld [vmem:[%s4602_s3 + $0x108] sm:$0xff]  ;;  %v3884_v11 = vsel %vm1391_vm5, %v1422_v38, %v1423_v43 }
  0xf2   : > { %2020 = vmatpush.bf16.msrb.mxu1 %v3017_v0  ;;  %v807_v16 = vunpack.c.l.b16 %v677_v33  ;;  %2111 = vmatpush.bf16.msrb.mxu2 %v3023_v2  ;;  %v1437_v33 = vrot.slane %v3588_v7, 1 }
  0xf3   : > { %v646_v34 = vmax.f32 %v614_v30, 0.0  ;;  %2290 = vmatpush.bf16.msrb.mxu0 %v3038_v58 }
  0xf5   : > { %1557 = vrot.lane.b32.xlu0 %v3716_v59, %s3207_s16  ;;  %v678_v35 = vpack.c.bf16 %v646_v34, %v646_v34  ;;  %v3014_v34 = vld [vmem:[%s4602_s3 + $0x48] sm:$0xff] }
  0xf6   : > { %v1350_v18 = vpop.permute.xlu1 %1349  ;;  %2021 = vmatpush.bf16.msrb.mxu1 %v3016_v31  ;;  %2112 = vmatpush.bf16.msrb.mxu2 %v3022_v27 }
  0xf7   : > { %1547 = vrot.lane.b32.xlu1 %v3791_v22, %s3207_s16  ;;  %v3804_v62 = vsel %vm1446_vm4, %v3588_v7, %v1350_v18  ;;  %v808_v28 = vunpack.c.l.b16 %v678_v35  ;;  %v1438_v35 = vrot.slane %v3582_v63, 1  ;;  %v3013_v63 = vld [vmem:[%s4602_s3 + $0x40] sm:$0xff]  ;;  %v1434_v7 = vrot.slane %v3491_v57, 1  ;;  %2291 = vmatpush.bf16.msrb.mxu0 %v3037_v44 }
  0xf8   : > { %1537 = vrot.lane.b32.xlu2 %v3780_v5, %s3207_s16  ;;  %2011 = vmatmul.bf16.gmra.mxu3 %v3804_v62  ;;  %v1393_v57 = vrot.slane %v3412_v36, 1 }
  0xf9   : > { %v827_v29 = vpack.c.b16 %v808_v28, %v807_v16  ;;  %v3910_v16 = vsel %vm1391_vm5, %v1437_v33, %v1438_v35  ;;  %v3913_v28 = vsel %vm1391_vm5, %v1431_v39, %v1432_v25  ;;  %v3110_v39 = vld [vmem:[%s443_s13] sm:$0xff]  }
  0xfa   : > { %2113 = vmatpush.bf16.msrb.mxu2 %v3021_v42  ;;  %v3111_v25 = vunpack.c.l.bf16 %v3110_v39  ;;  %v3112_v42 = vunpack.c.h.bf16 %v3110_v39 }
  0xfb   : > { %v942_v18 = vshrl.u32 %v827_v29, 16  ;;  %v945_v61 = vshll.u32 %v827_v29, 16 }
  0xfc   : > { %v683_v44 = vmul.f32 %v3821_v60, %v3111_v25 }
  0xfd   : > { %1563 = vrot.lane.b32.xlu0 %v3826_v8, %s3207_s16  ;;  %v944_v54 = vrot.slane %v942_v18, 7 }
  0xff   : > { %1553 = vrot.lane.b32.xlu1 %v3647_v13, %s3207_s16  ;;  %v947_v3 = vor.u32 %v945_v61, %v944_v54  ;;  %v3871_v6 = vsel %vm3317_vm3, %v944_v54, 0  ;;  %v1520_v61 = vpop.permute.xlu2 %1519 }
 0x100   : > { %1543 = vrot.lane.b32.xlu2 %v3844_v20, %s3207_s16  ;;  %v1303_v53 = vshll.u32 %v3871_v6, 16  ;;  %2982 = vmatmul.msk.bf16.vlgmr.msrb.gmra.mxu0 %vm1446_vm4, %v3688_v40 }
 0x101   : > { %1971 = vmatmul.bf16.gmra.mxu1 %v3765_v26  ;;  %v3879_v45 = vsel %vm3317_vm3, 0, %v947_v3 }
 0x102   : > { %v1296_v0 = vshrl.u32 %v3879_v45, 16  ;;  %v1298_v15 = vshll.u32 %v3879_v45, 16  ;;  %v1305_v21 = vrot.slane %v1303_v53, 1 }
 0x104   : > { %v1300_v56 = vrot.slane %v1298_v15, 1 }
 0x106   : > { %v1301_v30 = vor.u32 %v1300_v56, %v1296_v0 }
 0x107   : > { %1559 = vrot.lane.b32.xlu1 %v3854_v50, %s3207_s16 }
 0x108   : > { %1549 = vrot.lane.b32.xlu2 %v3625_v52, %s3207_s16  ;;  %2203 = vmatmul.bf16.vlgmr.msrb.gmra.mxu3 %v3643_v12  ;;  %v3015_v12 = vld [vmem:[%s4602_s3 + $0x50] sm:$0xff]  ;;  %v1306_v31 = vsel %vm1102_vm2, %v1301_v30, %v1305_v21 }
 0x109   : > { %2022 = vmatpush.bf16.msrb.mxu1 %v3015_v12  ;;  %1351 = vrot.lane.b32.xlu0 %v1306_v31, %s3207_s16 }
 0x10d   : > { %2023 = vmatpush.bf16.msrb.mxu1 %v3014_v34 }
 0x10f   : > { %1565 = vrot.lane.b32.xlu1 %v3662_v19, %s3207_s16 }
 0x110   : > { %1555 = vrot.lane.b32.xlu2 %v3884_v11, %s3207_s16  ;;  %2983 = vmatmul.msk.bf16.gmra.mxu0 %vm1446_vm4, %v3669_v24 }
 0x111   : > { %1573 = vrot.lane.b32.xlu0 %v3804_v62, %s3207_s16  ;;  %2024 = vmatpush.bf16.msrb.mxu1 %v3013_v63  ;;  %v684_v63 = vmul.f32 %v3821_v60, %v3112_v42 }
 0x117   : > { %1569 = vrot.lane.b32.xlu1 %v3698_v41, %s3207_s16 }
 0x118   : > { %1561 = vrot.lane.b32.xlu2 %v3630_v55, %s3207_s16  ;;  %2208 = vmatmul.bf16.gmra.mxu3 %v3743_v23  ;;  %v1435_v23 = vrot.slane %v3484_v49, 1  ;;  %v1392_v49 = vrot.slane %v3423_v46, 1 }
 0x11a   : > { %v3933_v29 = vsel %vm1391_vm5, %v1434_v7, %v1435_v23  ;;  %v1394_v18 = vsel %vm1391_vm5, %v1392_v49, %v1393_v57  ;;  %v685_v57 = vadd.f32 %v3834_v4, %v683_v44 }
 0x11f   : > { %1575 = vrot.lane.b32.xlu1 %v3910_v16, %s3207_s16 }
 0x120   : > { %1567 = vrot.lane.b32.xlu2 %v3913_v28, %s3207_s16  ;;  %2984 = vmatmul.msk.bf16.gmra.mxu0 %vm1446_vm4, %v3770_v37 }
 0x121   : > { %v3984_v33 = vpop.f32.mrf.mxu1 }
 0x126   : > { %v3993_v35 = vpop.f32.mrf.mxu2 }
 0x128   : > { %1571 = vrot.lane.b32.xlu2 %v3933_v29, %s3207_s16  ;;  %2213 = vmatmul.bf16.gmra.mxu3 %v3615_v47 }
 0x129   : > { %v3999_v23 = vpop.f32.mrf.mxu1 }
 0x12e   : > { %v4008_v60 = vpop.f32.mrf.mxu2 }
 0x130   : > { %2985 = vmatmul.msk.bf16.gmra.mxu0 %vm1446_vm4, %v3735_v1 }
 0x136   : > { %v4023_v25 = vpop.f32.mrf.mxu2 }
 0x137   : > { %v1522_v36 = vpop.permute.xlu0 %1521 }
 0x138   : > { %2218 = vmatmul.bf16.gmra.mxu3 %v3639_v9  ;;  %v1620_v9 = vsel %vm1446_vm4, %v3650_v17, %v1522_v36 }
 0x13b   : > { %v3944_v54 = vpop.f32.mrf.mxu3 }
 0x13d   : > { %v3960_v12 = vpop.f32.mrf.mxu0 }
 0x13f   : > { %v1528_v53 = vpop.permute.xlu0 %1527 }
 0x140   : > { %2986 = vmatmul.msk.bf16.gmra.mxu0 %vm1446_vm4, %v3705_v51 }
 0x141   : > { %v1518_v38 = vpop.permute.xlu1 %1517 }
 0x142   : > { %v1616_v43 = vsel %vm1446_vm4, %v1394_v18, %v1518_v38  ;;  %v1582_v2 = vsel %vm1446_vm4, %v1518_v38, %v1520_v61  ;;  %v1526_v0 = vpop.permute.xlu2 %1525  ;;  %v686_v18 = vadd.f32 %v3834_v4, %v684_v63 }
 0x143   : > { %2025 = vmatmul.bf16.vlgmr.msrb.gmra.mxu1 %v1616_v43  ;;  %2114 = vmatmul.bf16.vlgmr.msrb.gmra.mxu2 %v1582_v2  ;;  %v3951_v46 = vpop.f32.mrf.mxu3  ;;  %v1624_v17 = vsel %vm1446_vm4, %v3688_v40, %v1526_v0  ;;  %v1584_v15 = vsel %vm1446_vm4, %v1526_v0, %v1528_v53  ;;  %v687_v43 = vmax.f32 %v685_v57, 0.0  ;;  %v4014_v53 = vpop.f32.mrf.mxu1 }
 0x144   : > { %v688_v2 = vmax.f32 %v686_v18, 0.0 }
 0x145   : > { %v3968_v56 = vpop.f32.mrf.mxu0 }
 0x147   : > { %v1534_v7 = vpop.permute.xlu0 %1533 }
 0x148   : > { %2223 = vmatmul.bf16.gmra.mxu3 %v3780_v5  ;;  %v1632_v61 = vsel %vm1446_vm4, %v3770_v37, %v1534_v7 }
 0x149   : > { %v1524_v47 = vpop.permute.xlu1 %1523 }
 0x14a   : > { %v1583_v58 = vsel %vm1446_vm4, %v1522_v36, %v1524_v47  ;;  %v1532_v31 = vpop.permute.xlu2 %1531  ;;  %v689_v47 = vpack.c.bf16 %v687_v43, %v687_v43 }
 0x14b   : > { %v3956_v3 = vpop.f32.mrf.mxu3 }
 0x14c   : > { %4609 = vst [vmem:[#allocation2_spill] sm:$0xff] %v3956_v3 }
 0x150   : > { %2987 = vmatmul.msk.bf16.gmra.mxu0 %vm1446_vm4, %v3844_v20 }
 0x151   : > { %v1530_v30 = vpop.permute.xlu1 %1529 }
 0x152   : > { %v1628_v40 = vsel %vm1446_vm4, %v3669_v24, %v1530_v30  ;;  %v1585_v34 = vsel %vm1446_vm4, %v1530_v30, %v1532_v31  ;;  %v1540_v31 = vpop.permute.xlu0 %1539  ;;  %v1538_v44 = vpop.permute.xlu2 %1537 }
 0x153   : > { %2030 = vmatmul.bf16.gmra.mxu1 %v1620_v9  ;;  %2119 = vmatmul.bf16.gmra.mxu2 %v1583_v58  ;;  %v3963_v5 = vpop.f32.mrf.mxu3  ;;  %v690_v9 = vpack.c.bf16 %v688_v2, %v688_v2  ;;  %v732_v58 = vunpack.c.l.bf16 %v689_v47 }
 0x154   : > { %4610 = vst [vmem:[#allocation3_spill] sm:$0xff] %v3963_v5 }
 0x155   : > { %v733_v4 = vunpack.c.l.bf16 %v690_v9  ;;  %v735_v37 = vmul.f32 %v732_v58, %v3380_v10 }
 0x157   : > { %v736_v0 = vmul.f32 %v733_v4, %v3380_v10  ;;  %v1587_v10 = vsel %vm1446_vm4, %v1538_v44, %v1540_v31  ;;  %v1440_v31 = vrot.slane %v3879_v45, 1 }
 0x158   : > { %2228 = vmatmul.bf16.gmra.mxu3 %v3765_v26  ;;  %v3975_v26 = vpop.f32.mrf.mxu0 }
 0x159   : > { %v1536_v49 = vpop.permute.xlu1 %1535  ;;  %v738_v30 = vpack.c.bf16 %v736_v0, %v736_v0 }
 0x15a   : > { %v1586_v38 = vsel %vm1446_vm4, %v1534_v7, %v1536_v49  ;;  %v4025_v7 = vpop.f32.mrf.mxu1  ;;  %v1546_v43 = vpop.permute.xlu0 %1545 }
 0x15b   : > { %v3972_v21 = vpop.f32.mrf.mxu3  ;;  %v810_v39 = vunpack.c.l.b16 %v738_v30 }
 0x15c   : > { %4611 = vst [vmem:[#allocation4_spill] sm:$0xff] %v3972_v21 }
 0x160   : > { %2988 = vmatmul.msk.bf16.gmra.mxu0 %vm1446_vm4, %v3791_v22 }
 0x163   : > { %2035 = vmatmul.bf16.gmra.mxu1 %v1624_v17  ;;  %2124 = vmatmul.bf16.gmra.mxu2 %v1584_v15  ;;  %v3977_v27 = vpop.f32.mrf.mxu3  ;;  %v737_v15 = vpack.c.bf16 %v735_v37, %v735_v37 }
 0x164   : > { %4612 = vst [vmem:[#allocation5_spill] sm:$0xff] %v3977_v27 }
 0x168   : > { %2233 = vmatmul.bf16.gmra.mxu3 %v3619_v48  ;;  %v3987_v48 = vpop.f32.mrf.mxu0 }
 0x16e   : > { %v4049_v4 = vpop.f32.mrf.mxu1 }
 0x170   : > { %2989 = vmatmul.msk.bf16.gmra.mxu0 %vm1446_vm4, %v3761_v32 }
 0x173   : > { %2040 = vmatmul.bf16.gmra.mxu1 %v1628_v40  ;;  %2129 = vmatmul.bf16.gmra.mxu2 %v1585_v34  ;;  %v809_v34 = vunpack.c.l.b16 %v737_v15 }
 0x175   : > { %v828_v42 = vpack.c.b16 %v810_v39, %v809_v34  ;;  %v1441_v34 = vrot.slane %v3871_v6, 1 }
 0x177   : > { %v949_v63 = vshrl.u32 %v828_v42, 16  ;;  %v952_v18 = vshll.u32 %v828_v42, 16  ;;  %v1552_v42 = vpop.permute.xlu0 %1551 }
 0x178   : > { %2238 = vmatmul.bf16.gmra.mxu3 %v3625_v52  ;;  %v4001_v52 = vpop.f32.mrf.mxu0 }
 0x179   : > { %v951_v57 = vrot.slane %v949_v63, 7  ;;  %v1542_v63 = vpop.permute.xlu1 %1541 }
 0x17a   : > { %v1640_v6 = vsel %vm1446_vm4, %v3705_v51, %v1542_v63 }
 0x17b   : > { %v3995_v24 = vpop.f32.mrf.mxu3  ;;  %v4046_v9 = vsel %vm3317_vm3, %v951_v57, 0 }
 0x17c   : > { %4613 = vst [vmem:[#allocation6_spill] sm:$0xff] %v3995_v24  ;;  %v1315_v0 = vshll.u32 %v4046_v9, 16 }
 0x17e   : > { %v1317_v30 = vrot.slane %v1315_v0, 1 }
 0x180   : > { %v4019_v17 = vpop.f32.mrf.mxu0  ;;  %2990 = vmatmul.msk.bf16.gmra.mxu0 %vm1446_vm4, %v3884_v11 }
 0x181   : > { %v1548_v0 = vpop.permute.xlu1 %1547 }
 0x183   : > { %2045 = vmatmul.bf16.gmra.mxu1 %v1632_v61  ;;  %2134 = vmatmul.bf16.gmra.mxu2 %v1586_v38  ;;  %v4010_v36 = vpop.f32.mrf.mxu3  ;;  %v954_v38 = vor.u32 %v952_v18, %v951_v57  ;;  %v4070_v18 = vpop.f32.mrf.mxu1 }
 0x184   : > { %4614 = vst [vmem:[#allocation7_spill] sm:$0xff] %v4010_v36 }
 0x185   : > { %v4038_v2 = vsel %vm3317_vm3, 0, %v954_v38 }
 0x186   : > { %v1310_v47 = vshll.u32 %v4038_v2, 16  ;;  %v1308_v58 = vshrl.u32 %v4038_v2, 16 }
 0x188   : > { %2243 = vmatmul.bf16.gmra.mxu3 %v3647_v13  ;;  %v1636_v13 = vsel %vm1446_vm4, %v3735_v1, %v1538_v44  ;;  %v4030_v49 = vpop.f32.mrf.mxu0  ;;  %v4040_v1 = vpop.f32.mrf.mxu2  ;;  %v1312_v37 = vrot.slane %v1310_v47, 1  ;;  %v4058_v44 = vsel %vm1391_vm5, %v1440_v31, %v1441_v34  ;;  %v1589_v31 = vsel %vm1446_vm4, %v1546_v43, %v1548_v0 }
 0x189   : > { %1579 = vrot.lane.b32.xlu0 %v4058_v44, %s3207_s16  ;;  %v4074_v47 = vpop.permute.xlu0 %1557 }
 0x18a   : > { %v1313_v15 = vor.u32 %v1312_v37, %v1308_v58 }
 0x18b   : > { %v4021_v40 = vpop.f32.mrf.mxu3  ;;  %v4081_v51 = vpop.f32.mrf.mxu1 }
 0x18c   : > { %v1318_v14 = vsel %vm1102_vm2, %v1313_v15, %v1317_v30  ;;  %v1644_v30 = vsel %vm1446_vm4, %v3844_v20, %v1546_v43 }
 0x18d   : > { %1353 = vrot.lane.b32.xlu1 %v1318_v14, %s3207_s16 }
 0x190   : > { %v4054_v39 = vpop.f32.mrf.mxu0  ;;  %v4068_v57 = vpop.f32.mrf.mxu2  ;;  %2991 = vmatmul.msk.bf16.gmra.mxu0 %vm1446_vm4, %v3854_v50 }
 0x191   : > { %v4086_v34 = vpop.permute.xlu0 %1563 }
 0x193   : > { %2050 = vmatmul.bf16.gmra.mxu1 %v1636_v13  ;;  %2139 = vmatmul.bf16.gmra.mxu2 %v1587_v10  ;;  %v4034_v61 = vpop.f32.mrf.mxu3 }
 0x198   : > { %2248 = vmatmul.bf16.gmra.mxu3 %v3716_v59  ;;  %v1544_v59 = vpop.permute.xlu2 %1543  ;;  %v2293_v38 = vpop.f32.mrf.mxu0 }
 0x199   : > { %v1588_v10 = vsel %vm1446_vm4, %v1542_v63, %v1544_v59  ;;  %v4079_v37 = vpop.f32.mrf.mxu2  ;;  %v4094_v63 = vpop.f32.mrf.mxu1 }
 0x19b   : > { %v4060_v13 = vpop.f32.mrf.mxu3 }
 0x1a0   : > { %v2295_v15 = vpop.f32.mrf.mxu0  ;;  %v1550_v0 = vpop.permute.xlu2 %1549  ;;  %2992 = vmatmul.msk.bf16.gmra.mxu0 %vm1446_vm4, %v3826_v8 }
 0x1a1   : > { %v4090_v14 = vpop.f32.mrf.mxu2  ;;  %v1648_v36 = vsel %vm1446_vm4, %v3791_v22, %v1550_v0 }
 0x1a3   : > { %2055 = vmatmul.bf16.gmra.mxu1 %v1640_v6  ;;  %2144 = vmatmul.bf16.gmra.mxu2 %v1588_v10  ;;  %v4076_v58 = vpop.f32.mrf.mxu3  ;;  %v1352_v6 = vpop.permute.xlu0 %1351 }
 0x1a4   : > { %v4099_v20 = vsel %vm1446_vm4, %v3879_v45, %v1352_v6 }
 0x1a5   : > { %1577 = vrot.lane.b32.xlu2 %v4099_v20, %s3207_s16 }
 0x1a8   : > { %2253 = vmatmul.bf16.gmra.mxu3 %v3630_v55  ;;  %v2298_v55 = vpop.f32.mrf.mxu0 }
 0x1a9   : > { %v4105_v10 = vpop.f32.mrf.mxu2 }
 0x1ab   : > { %v4088_v59 = vpop.f32.mrf.mxu3 }
 0x1b0   : > { %2993 = vmatmul.msk.bf16.gmra.mxu0 %vm1446_vm4, %v3913_v28 }
 0x1b3   : > { %2060 = vmatmul.bf16.gmra.mxu1 %v1644_v30  ;;  %2149 = vmatmul.bf16.gmra.mxu2 %v1589_v31  ;;  %v4101_v43 = vpop.f32.mrf.mxu3  ;;  %v2300_v30 = vpop.f32.mrf.mxu0 }
 0x1b8   : > { %2258 = vmatmul.bf16.gmra.mxu3 %v3662_v19  ;;  %v1590_v19 = vsel %vm1446_vm4, %v1550_v0, %v1552_v42  ;;  %v1554_v0 = vpop.permute.xlu1 %1553 }
 0x1bb   : > { %v4113_v24 = vpop.f32.mrf.mxu3  ;;  %v2303_v21 = vpop.f32.mrf.mxu0 }
 0x1c0   : > { %v2026_v31 = vpop.f32.mrf.mxu1  ;;  %2994 = vmatmul.msk.bf16.gmra.mxu0 %vm1446_vm4, %v3933_v29 }
 0x1c1   : > { %v2027_v45 = vadd.f32 %v2026_v31, %v3960_v12 }
 0x1c3   : > { %2065 = vmatmul.bf16.gmra.mxu1 %v1648_v36  ;;  %2154 = vmatmul.bf16.gmra.mxu2 %v1590_v19  ;;  %v1652_v19 = vsel %vm1446_vm4, %v3761_v32, %v1554_v0 }
 0x1c6   : > { %v2115_v6 = vpop.f32.mrf.mxu2 }
 0x1c7   : > { %v2116_v27 = vadd.f32 %v2115_v6, %v2027_v45 }
 0x1c8   : > { %v2028_v5 = vpop.f32.mrf.mxu1  ;;  %2263 = vmatmul.bf16.gmra.mxu3 %v3698_v41 }
 0x1c9   : > { %v2205_v3 = vadd.f32 %v4021_v40, %v2116_v27  ;;  %v2029_v36 = vadd.f32 %v2028_v5, %v3968_v56  ;;  %v1556_v40 = vpop.permute.xlu2 %1555 }
 0x1ca   : > { %v1591_v45 = vsel %vm1446_vm4, %v1554_v0, %v1556_v40 }
 0x1cb   : > { %v4117_v22 = vadd.f32 %v2293_v38, %v2205_v3  ;;  %v2305_v3 = vpop.f32.mrf.mxu0  ;;  %v4130_v38 = vpop.f32.mrf.mxu3 }
 0x1cd   : > { %v2580_v12 = vpack.c.bf16 %v4117_v22, %v4117_v22 }
 0x1ce   : > { %v2117_v42 = vpop.f32.mrf.mxu2 }
 0x1cf   : > { %2613 = vst.msk [vmem:[%s4123_s14] sm:$0xf] %vm2612_vm6, %v2580_v12  ;;  %v2118_v41 = vadd.f32 %v2117_v42, %v2029_v36 }
 0x1d0   : > { %v2031_v27 = vpop.f32.mrf.mxu1  ;;  %2995 = vmatmul.msk.bf16.gmra.mxu0 %vm1446_vm4, %v3910_v16 }
 0x1d1   : > { %v2207_v31 = vadd.f32 %v4034_v61, %v2118_v41  ;;  %v2032_v56 = vadd.f32 %v2031_v27, %v3975_v26  ;;  %v1560_v27 = vpop.permute.xlu1 %1559 }
 0x1d3   : > { %v4136_v6 = vadd.f32 %v2295_v15, %v2207_v31  ;;  %2070 = vmatmul.bf16.gmra.mxu1 %v1652_v19  ;;  %2159 = vmatmul.bf16.gmra.mxu2 %v1591_v45  ;;  %v2308_v32 = vpop.f32.mrf.mxu0  ;;  %v4147_v42 = vpop.f32.mrf.mxu3 }
 0x1d5   : > { %v2581_v5 = vpack.c.bf16 %v4136_v6, %v4136_v6 }
 0x1d6   : > { %v2120_v12 = vpop.f32.mrf.mxu2 }
 0x1d7   : > { %2614 = vst.msk [vmem:[%s4123_s14 + $0x4] sm:$0xf] %vm2612_vm6, %v2581_v5  ;;  %v2121_v61 = vadd.f32 %v2120_v12, %v2032_v56 }
 0x1d8   : > { %v2033_v36 = vpop.f32.mrf.mxu1  ;;  %2268 = vmatmul.bf16.gmra.mxu3 %v3804_v62  ;;  %v1656_v62 = vsel %vm1446_vm4, %v3884_v11, %v4074_v47 }
 0x1d9   : > { %v2210_v15 = vadd.f32 %v4060_v13, %v2121_v61  ;;  %v2034_v40 = vadd.f32 %v2033_v36, %v3987_v48 }
 0x1db   : > { %v4149_v0 = vadd.f32 %v2298_v55, %v2210_v15  ;;  %v2310_v19 = vpop.f32.mrf.mxu0  ;;  %v1592_v55 = vsel %vm1446_vm4, %v4074_v47, %v1560_v27  ;;  %v4166_v48 = vpop.f32.mrf.mxu3 }
 0x1dd   : > { %v2582_v41 = vpack.c.bf16 %v4149_v0, %v4149_v0 }
 0x1de   : > { %v2122_v26 = vpop.f32.mrf.mxu2 }
 0x1df   : > { %2615 = vst.msk [vmem:[%s4123_s14 + $0x8] sm:$0xf] %vm2612_vm6, %v2582_v41  ;;  %v2123_v31 = vadd.f32 %v2122_v26, %v2034_v40  ;;  %v1562_v40 = vpop.permute.xlu2 %1561 }
 0x1e0   : > { %v2036_v45 = vpop.f32.mrf.mxu1  ;;  %2996 = vmatmul.msk.bf16.gmra.mxu0 %vm1446_vm4, %v4058_v44 }
 0x1e1   : > { %v2212_v13 = vadd.f32 %v4076_v58, %v2123_v31  ;;  %v2037_v56 = vadd.f32 %v2036_v45, %v4001_v52 }
 0x1e3   : > { %v4162_v5 = vadd.f32 %v2300_v30, %v2212_v13  ;;  %2075 = vmatmul.bf16.gmra.mxu1 %v1656_v62  ;;  %2164 = vmatmul.bf16.gmra.mxu2 %v1592_v55  ;;  %v2313_v47 = vpop.f32.mrf.mxu0  ;;  %v4180_v52 = vpop.f32.mrf.mxu3 }
 0x1e4   : > { %v1566_v55 = vpop.permute.xlu1 %1565 }
 0x1e5   : > { %v2583_v58 = vpack.c.bf16 %v4162_v5, %v4162_v5 }
 0x1e6   : > { %v2125_v12 = vpop.f32.mrf.mxu2 }
 0x1e7   : > { %2616 = vst.msk [vmem:[%s4123_s14 + $0xc] sm:$0xf] %vm2612_vm6, %v2583_v58  ;;  %v2126_v11 = vadd.f32 %v2125_v12, %v2037_v56 }
 0x1e8   : > { %v2038_v30 = vpop.f32.mrf.mxu1  ;;  %2273 = vmatmul.bf16.gmra.mxu3 %v4099_v20  ;;  %v1593_v20 = vsel %vm1446_vm4, %v1562_v40, %v4086_v34 }
 0x1e9   : > { %v2215_v61 = vadd.f32 %v4088_v59, %v2126_v11  ;;  %v2039_v41 = vadd.f32 %v2038_v30, %v4019_v17 }
 0x1eb   : > { %v4175_v36 = vadd.f32 %v2303_v21, %v2215_v61  ;;  %v2315_v31 = vpop.f32.mrf.mxu0  ;;  %v1660_v21 = vsel %vm1446_vm4, %v3854_v50, %v1562_v40  ;;  %v1568_v61 = vpop.permute.xlu2 %1567 }
 0x1ed   : > { %v2584_v15 = vpack.c.bf16 %v4175_v36, %v4175_v36 }
 0x1ee   : > { %v2127_v26 = vpop.f32.mrf.mxu2 }
 0x1ef   : > { %2617 = vst.msk [vmem:[%s4123_s14 + $0x10] sm:$0xf] %vm2612_vm6, %v2584_v15  ;;  %v2128_v27 = vadd.f32 %v2127_v26, %v2039_v41  ;;  %v1570_v26 = vpop.permute.xlu1 %1569 }
 0x1f0   : > { %v2041_v45 = vpop.f32.mrf.mxu1 }
 0x1f1   : > { %v2217_v59 = vadd.f32 %v4101_v43, %v2128_v27  ;;  %v2042_v62 = vadd.f32 %v2041_v45, %v4030_v49 }
 0x1f3   : > { %v4189_v13 = vadd.f32 %v2305_v3, %v2217_v59  ;;  %2080 = vmatmul.bf16.gmra.mxu1 %v1660_v21  ;;  %2169 = vmatmul.bf16.gmra.mxu2 %v1593_v20  ;;  %v4198_v58 = vpop.f32.mrf.mxu0  ;;  %v4200_v3 = vpop.f32.mrf.mxu3 }
 0x1f5   : > { %v2585_v17 = vpack.c.bf16 %v4189_v13, %v4189_v13 }
 0x1f6   : > { %v2130_v43 = vpop.f32.mrf.mxu2 }
 0x1f7   : > { %2618 = vst.msk [vmem:[%s4123_s14 + $0x14] sm:$0xf] %vm2612_vm6, %v2585_v17  ;;  %v2131_v50 = vadd.f32 %v2130_v43, %v2042_v62  ;;  %v1576_v62 = vpop.permute.xlu1 %1575 }
 0x1f8   : > { %v2043_v34 = vpop.f32.mrf.mxu1 }
 0x1f9   : > { %v2220_v56 = vadd.f32 %v4113_v24, %v2131_v50  ;;  %v2044_v30 = vadd.f32 %v2043_v34, %v4054_v39  ;;  %v1664_v24 = vsel %vm1446_vm4, %v3826_v8, %v1566_v55 }
 0x1fb   : > { %v4203_v12 = vadd.f32 %v2308_v32, %v2220_v56  ;;  %v4210_v41 = vpop.f32.mrf.mxu0  ;;  %v1594_v32 = vsel %vm1446_vm4, %v1566_v55, %v1568_v61  ;;  %v4216_v45 = vpop.f32.mrf.mxu3 }
 0x1fd   : > { %v2586_v11 = vpack.c.bf16 %v4203_v12, %v4203_v12 }
 0x1fe   : > { %v2132_v49 = vpop.f32.mrf.mxu2 }
 0x1ff   : > { %2619 = vst.msk [vmem:[%s4123_s14 + $0x18] sm:$0xf] %vm2612_vm6, %v2586_v11  ;;  %v2133_v15 = vadd.f32 %v2132_v49, %v2044_v30 }
 0x200   : > { %v2046_v40 = vpop.f32.mrf.mxu1 }
 0x201   : > { %v2222_v27 = vadd.f32 %v4130_v38, %v2133_v15  ;;  %v2047_v38 = vadd.f32 %v2046_v40, %v3984_v33  ;;  %v1572_v33 = vpop.permute.xlu2 %1571 }
 0x202   : > { %v1595_v61 = vsel %vm1446_vm4, %v1570_v26, %v1572_v33 }
 0x203   : > { %v4218_v39 = vadd.f32 %v2310_v19, %v2222_v27  ;;  %2085 = vmatmul.bf16.gmra.mxu1 %v1664_v24  ;;  %2174 = vmatmul.bf16.gmra.mxu2 %v1594_v32  ;;  %v2323_v20 = vpop.f32.mrf.mxu0  ;;  %v4230_v55 = vpop.f32.mrf.mxu3  ;;  %v1444_v32 = vrot.slane %v4046_v9, 1 }
 0x205   : > { %v2587_v59 = vpack.c.bf16 %v4218_v39, %v4218_v39 }
 0x206   : > { %v2135_v21 = vpop.f32.mrf.mxu2 }
 0x207   : > { %2620 = vst.msk [vmem:[%s4123_s14 + $0x1c] sm:$0xf] %vm2612_vm6, %v2587_v59  ;;  %v2136_v8 = vadd.f32 %v2135_v21, %v2047_v38 }
 0x208   : > { %v2048_v17 = vpop.f32.mrf.mxu1 }
 0x209   : > { %v2225_v19 = vadd.f32 %v4147_v42, %v2136_v8  ;;  %v2049_v50 = vadd.f32 %v2048_v17, %v3999_v23  ;;  %v1354_v42 = vpop.permute.xlu1 %1353 }
 0x20a   : > { %v1499_v15 = vsel %vm1446_vm4, %v4038_v2, %v1354_v42 }
 0x20b   : > { %v4228_v43 = vadd.f32 %v2313_v47, %v2225_v19  ;;  %v2325_v11 = vpop.f32.mrf.mxu0  ;;  %v1668_v47 = vsel %vm1446_vm4, %v3913_v28, %v1570_v26  ;;  %2278 = vmatmul.bf16.gmra.mxu3 %v1499_v15  ;;  %v2239_v24 = vpop.f32.mrf.mxu3  ;;  %v1443_v26 = vrot.slane %v4038_v2, 1 }
 0x20c   : > { %v1574_v2 = vpop.permute.xlu0 %1573 }
 0x20d   : > { %v2588_v44 = vpack.c.bf16 %v4228_v43, %v4228_v43  ;;  %v1445_v21 = vsel %vm1391_vm5, %v1443_v26, %v1444_v32 }
 0x20e   : > { %v2137_v34 = vpop.f32.mrf.mxu2  ;;  %2997 = vmatmul.msk.bf16.gmra.mxu0 %vm1446_vm4, %v1445_v21 }
 0x20f   : > { %2621 = vst.msk [vmem:[%s4123_s14 + $0x20] sm:$0xf] %vm2612_vm6, %v2588_v44  ;;  %v2138_v56 = vadd.f32 %v2137_v34, %v2049_v50  ;;  %v1672_v34 = vsel %vm1446_vm4, %v3933_v29, %v1574_v2 }
 0x210   : > { %v2051_v30 = vpop.f32.mrf.mxu1 }
 0x211   : > { %v2227_v49 = vadd.f32 %v4166_v48, %v2138_v56  ;;  %v2052_v27 = vadd.f32 %v2051_v30, %v4014_v53 }
 0x213   : > { %v4243_v23 = vadd.f32 %v2315_v31, %v2227_v49  ;;  %2090 = vmatmul.bf16.gmra.mxu1 %v1668_v47  ;;  %2179 = vmatmul.bf16.gmra.mxu2 %v1595_v61  ;;  %v2328_v59 = vpop.f32.mrf.mxu0 }
 0x215   : > { %v2589_v40 = vpack.c.bf16 %v4243_v23, %v4243_v23 }
 0x216   : > { %v2140_v48 = vpop.f32.mrf.mxu2 }
 0x217   : > { %2622 = vst.msk [vmem:[%s4123_s14 + $0x24] sm:$0xf] %vm2612_vm6, %v2589_v40  ;;  %v2141_v28 = vadd.f32 %v2140_v48, %v2052_v27  ;;  %v1578_v40 = vpop.permute.xlu2 %1577  ;;  %v1580_v27 = vpop.permute.xlu0 %1579 }
 0x218   : > { %v2053_v31 = vpop.f32.mrf.mxu1 }
 0x219   : > { %v2230_v38 = vadd.f32 %v4180_v52, %v2141_v28  ;;  %v2054_v17 = vadd.f32 %v2053_v31, %v4025_v7  ;;  %v2241_v52 = vpop.f32.mrf.mxu3 }
 0x21b   : > { %v4256_v53 = vadd.f32 %v4198_v58, %v2230_v38  ;;  %v1596_v58 = vsel %vm1446_vm4, %v1574_v2, %v1576_v62  ;;  %v2330_v33 = vpop.f32.mrf.mxu0 }
 0x21d   : > { %v2590_v8 = vpack.c.bf16 %v4256_v53, %v4256_v53 }
 0x21e   : > { %v2142_v19 = vpop.f32.mrf.mxu2 }
 0x21f   : > { %2623 = vst.msk [vmem:[%s4123_s14 + $0x28] sm:$0xf] %vm2612_vm6, %v2590_v8  ;;  %v2143_v9 = vadd.f32 %v2142_v19, %v2054_v17 }
 0x220   : > { %v2056_v44 = vpop.f32.mrf.mxu1 }
 0x221   : > { %v2232_v50 = vadd.f32 %v4200_v3, %v2143_v9  ;;  %v2057_v30 = vadd.f32 %v2056_v44, %v4049_v4  ;;  %v2244_v62 = vpop.f32.mrf.mxu3 }
 0x223   : > { %v4268_v56 = vadd.f32 %v4210_v41, %v2232_v50  ;;  %2095 = vmatmul.bf16.gmra.mxu1 %v1672_v34  ;;  %2184 = vmatmul.bf16.gmra.mxu2 %v1596_v58  ;;  %v2333_v41 = vpop.f32.mrf.mxu0 }
 0x225   : > { %v2591_v7 = vpack.c.bf16 %v4268_v56, %v4268_v56 }
 0x226   : > { %v2145_v49 = vpop.f32.mrf.mxu2 }
 0x227   : > { %2624 = vst.msk [vmem:[%s4123_s14 + $0x2c] sm:$0xf] %vm2612_vm6, %v2591_v7  ;;  %v2146_v3 = vadd.f32 %v2145_v49, %v2057_v30 }
 0x228   : > { %v2058_v42 = vpop.f32.mrf.mxu1 }
 0x229   : > { %v2235_v29 = vadd.f32 %v4216_v45, %v2146_v3  ;;  %v2059_v15 = vadd.f32 %v2058_v42, %v4070_v18  ;;  %v1676_v45 = vsel %vm1446_vm4, %v3910_v16, %v1578_v40  ;;  %v2246_v18 = vpop.f32.mrf.mxu3 }
 0x22b   : > { %v4276_v47 = vadd.f32 %v2323_v20, %v2235_v29  ;;  %v1597_v20 = vsel %vm1446_vm4, %v1578_v40, %v1580_v27  ;;  %v2335_v8 = vpop.f32.mrf.mxu0 }
 0x22d   : > { %v2592_v61 = vpack.c.bf16 %v4276_v47, %v4276_v47 }
 0x22e   : > { %v2147_v4 = vpop.f32.mrf.mxu2 }
 0x22f   : > { %2625 = vst.msk [vmem:[%s4123_s14 + $0x30] sm:$0xf] %vm2612_vm6, %v2592_v61  ;;  %v2148_v48 = vadd.f32 %v2147_v4, %v2059_v15 }
 0x230   : > { %v2061_v28 = vpop.f32.mrf.mxu1 }
 0x231   : > { %v2237_v26 = vadd.f32 %v4230_v55, %v2148_v48  ;;  %v2062_v38 = vadd.f32 %v2061_v28, %v4081_v51  ;;  %v2249_v44 = vpop.f32.mrf.mxu3 }
 0x233   : > { %v4287_v32 = vadd.f32 %v2325_v11, %v2237_v26  ;;  %2100 = vmatmul.bf16.gmra.mxu1 %v1676_v45  ;;  %2189 = vmatmul.bf16.gmra.mxu2 %v1597_v20  ;;  %v2338_v34 = vpop.f32.mrf.mxu0 }
 0x235   : > { %v2593_v31 = vpack.c.bf16 %v4287_v32, %v4287_v32 }
 0x236   : > { %v2150_v21 = vpop.f32.mrf.mxu2 }
 0x237   : > { %2626 = vst.msk [vmem:[%s4123_s14 + $0x34] sm:$0xf] %vm2612_vm6, %v2593_v31  ;;  %v2151_v16 = vadd.f32 %v2150_v21, %v2062_v38 }
 0x238   : > { %v2063_v17 = vpop.f32.mrf.mxu1 }
 0x239   : > { %v2240_v19 = vadd.f32 %v2239_v24, %v2151_v16  ;;  %v2064_v2 = vadd.f32 %v2063_v17, %v4094_v63  ;;  %v2251_v3 = vpop.f32.mrf.mxu3 }
 0x23b   : > { %v4294_v55 = vadd.f32 %v2328_v59, %v2240_v19  ;;  %v2340_v29 = vpop.f32.mrf.mxu0 }
 0x23d   : > { %v2594_v11 = vpack.c.bf16 %v4294_v55, %v4294_v55 }
 0x23e   : > { %v2152_v9 = vpop.f32.mrf.mxu2 }
 0x23f   : > { %2627 = vst.msk [vmem:[%s4123_s14 + $0x38] sm:$0xf] %vm2612_vm6, %v2594_v11  ;;  %v2153_v51 = vadd.f32 %v2152_v9, %v2064_v2 }
 0x240   : > { %v2066_v50 = vpop.f32.mrf.mxu1 }
 0x241   : > { %v2242_v58 = vadd.f32 %v2241_v52, %v2153_v51  ;;  %v2067_v59 = vadd.f32 %v2066_v50, %v3993_v35  ;;  %v2254_v4 = vpop.f32.mrf.mxu3 }
 0x243   : > { %v4301_v7 = vadd.f32 %v2330_v33, %v2242_v58 }
 0x245   : > { %v2595_v24 = vpack.c.bf16 %v4301_v7, %v4301_v7 }
 0x246   : > { %v2155_v30 = vpop.f32.mrf.mxu2 }
 0x247   : > { %2628 = vst.msk [vmem:[%s4123_s14 + $0x3c] sm:$0xf] %vm2612_vm6, %v2595_v24  ;;  %v2156_v63 = vadd.f32 %v2155_v30, %v2067_v59 }
 0x248   : > { %v2068_v49 = vpop.f32.mrf.mxu1 }
 0x249   : > { %v2245_v42 = vadd.f32 %v2244_v62, %v2156_v63  ;;  %v2069_v33 = vadd.f32 %v2068_v49, %v4008_v60  ;;  %v2343_v62 = vpop.f32.mrf.mxu0 }
 0x24b   : > { %v4308_v61 = vadd.f32 %v2333_v41, %v2245_v42 }
 0x24d   : > { %v2596_v52 = vpack.c.bf16 %v4308_v61, %v4308_v61 }
 0x24e   : > { %v2157_v15 = vpop.f32.mrf.mxu2 }
 0x24f   : > { %2629 = vst.msk [vmem:[%s4123_s14 + $0x40] sm:$0xf] %vm2612_vm6, %v2596_v52  ;;  %v2158_v35 = vadd.f32 %v2157_v15, %v2069_v33 }
 0x250   : > { %v2071_v40 = vpop.f32.mrf.mxu1 }
 0x251   : > { %v2247_v27 = vadd.f32 %v2246_v18, %v2158_v35  ;;  %v2072_v28 = vadd.f32 %v2071_v40, %v4023_v25  ;;  %v2256_v18 = vpop.f32.mrf.mxu3  ;;  %v2345_v16 = vpop.f32.mrf.mxu0 }
 0x253   : > { %v4315_v48 = vadd.f32 %v2335_v8, %v2247_v27 }
 0x255   : > { %v2597_v41 = vpack.c.bf16 %v4315_v48, %v4315_v48 }
 0x256   : > { %v2160_v45 = vpop.f32.mrf.mxu2 }
 0x257   : > { %2630 = vst.msk [vmem:[%s4123_s14 + $0x44] sm:$0xf] %vm2612_vm6, %v2597_v41  ;;  %v2161_v60 = vadd.f32 %v2160_v45, %v2072_v28 }
 0x258   : > { %v2073_v20 = vpop.f32.mrf.mxu1 }
 0x259   : > { %v2250_v26 = vadd.f32 %v2249_v44, %v2161_v60  ;;  %v2074_v21 = vadd.f32 %v2073_v20, %v4040_v1  ;;  %v2259_v51 = vpop.f32.mrf.mxu3 }
 0x25b   : > { %v4322_v31 = vadd.f32 %v2338_v34, %v2250_v26  ;;  %v2348_v34 = vpop.f32.mrf.mxu0 }
 0x25d   : > { %v2598_v38 = vpack.c.bf16 %v4322_v31, %v4322_v31 }
 0x25e   : > { %v2162_v8 = vpop.f32.mrf.mxu2 }
 0x25f   : > { %2631 = vst.msk [vmem:[%s4123_s14 + $0x48] sm:$0xf] %vm2612_vm6, %v2598_v38  ;;  %v2163_v25 = vadd.f32 %v2162_v8, %v2074_v21 }
 0x260   : > { %v2076_v17 = vpop.f32.mrf.mxu1 }
 0x261   : > { %v2252_v19 = vadd.f32 %v2251_v3, %v2163_v25  ;;  %v2077_v9 = vadd.f32 %v2076_v17, %v4068_v57  ;;  %v2261_v3 = vpop.f32.mrf.mxu3  ;;  %v2374_v17 = vsel %vm1446_vm4, %v4136_v6, 0.0 }
 0x263   : > { %v4329_v11 = vadd.f32 %v2340_v29, %v2252_v19  ;;  %v2350_v29 = vpop.f32.mrf.mxu0 }
 0x265   : > { %v2599_v2 = vpack.c.bf16 %v4329_v11, %v4329_v11 }
 0x266   : > { %v2165_v44 = vpop.f32.mrf.mxu2 }
 0x267   : > { %2632 = vst.msk [vmem:[%s4123_s14 + $0x4c] sm:$0xf] %vm2612_vm6, %v2599_v2  ;;  %v2166_v1 = vadd.f32 %v2165_v44, %v2077_v9  ;;  %v2373_v2 = vsel %vm1446_vm4, %v4117_v22, 0.0  ;;  %v2376_v9 = vsel %vm1446_vm4, %v4149_v0, 0.0 }
 0x268   : > { %v2078_v50 = vpop.f32.mrf.mxu1 }
 0x269   : > { %v2255_v58 = vadd.f32 %v2254_v4, %v2166_v1  ;;  %v2079_v30 = vadd.f32 %v2078_v50, %v4079_v37  ;;  %v2264_v4 = vpop.f32.mrf.mxu3 }
 0x26b   : > { %v4336_v24 = vadd.f32 %v2343_v62, %v2255_v58  ;;  %v2353_v41 = vpop.f32.mrf.mxu0 }
 0x26d   : > { %v2600_v59 = vpack.c.bf16 %v4336_v24, %v4336_v24 }
 0x26e   : > { %v2167_v63 = vpop.f32.mrf.mxu2 }
 0x26f   : > { %2633 = vst.msk [vmem:[%s4123_s14 + $0x50] sm:$0xf] %vm2612_vm6, %v2600_v59  ;;  %v2168_v57 = vadd.f32 %v2167_v63, %v2079_v30 }
 0x270   : > { %v2081_v49 = vpop.f32.mrf.mxu1 }
 0x271   : > { %v2257_v42 = vadd.f32 %v2256_v18, %v2168_v57  ;;  %v2082_v15 = vadd.f32 %v2081_v49, %v4090_v14  ;;  %v2266_v38 = vpop.f32.mrf.mxu3  ;;  %v2382_v57 = vsel %vm1446_vm4, %v4189_v13, 0.0 }
 0x273   : > { %v4343_v52 = vadd.f32 %v2345_v16, %v2257_v42  ;;  %v2355_v25 = vpop.f32.mrf.mxu0 }
 0x275   : > { %v2601_v33 = vpack.c.bf16 %v4343_v52, %v4343_v52 }
 0x276   : > { %v2170_v35 = vpop.f32.mrf.mxu2 }
 0x277   : > { %2634 = vst.msk [vmem:[%s4123_s14 + $0x54] sm:$0xf] %vm2612_vm6, %v2601_v33  ;;  %v2171_v37 = vadd.f32 %v2170_v35, %v2082_v15  ;;  %v2384_v15 = vsel %vm1446_vm4, %v4203_v12, 0.0 }
 0x278   : > { %v2083_v40 = vpop.f32.mrf.mxu1 }
 0x279   : > { %v2260_v27 = vadd.f32 %v2259_v51, %v2171_v37  ;;  %v2084_v45 = vadd.f32 %v2083_v40, %v4105_v10  ;;  %v2375_v51 = vadd.f32 %v2374_v17, %v2373_v2  ;;  %v2269_v49 = vpop.f32.mrf.mxu3 }
 0x27b   : > { %v4350_v62 = vadd.f32 %v2348_v34, %v2260_v27  ;;  %v2377_v50 = vadd.f32 %v2376_v9, %v2375_v51  ;;  %v2380_v34 = vsel %vm1446_vm4, %v4175_v36, 0.0  ;;  %v2358_v33 = vpop.f32.mrf.mxu0 }
 0x27d   : > { %v2602_v28 = vpack.c.bf16 %v4350_v62, %v4350_v62 }
 0x27e   : > { %v2172_v60 = vpop.f32.mrf.mxu2 }
 0x27f   : > { %2635 = vst.msk [vmem:[%s4123_s14 + $0x58] sm:$0xf] %vm2612_vm6, %v2602_v28  ;;  %v2173_v14 = vadd.f32 %v2172_v60, %v2084_v45  ;;  %v4615_v28 = vld [vmem:[#allocation2_spill] sm:$0xff] }
 0x280   : > { %v2086_v20 = vpop.f32.mrf.mxu1 }
 0x281   : > { %v2262_v26 = vadd.f32 %v2261_v3, %v2173_v14  ;;  %v2087_v8 = vadd.f32 %v2086_v20, %v3944_v54  ;;  %v2378_v54 = vsel %vm1446_vm4, %v4162_v5, 0.0  ;;  %v2390_v20 = vsel %vm1446_vm4, %v4243_v23, 0.0 }
 0x282   : > { %v2379_v30 = vadd.f32 %v2378_v54, %v2377_v50  ;;  %v4616_v54 = vld [vmem:[#allocation3_spill] sm:$0xff] }
 0x283   : > { %v4357_v18 = vadd.f32 %v2350_v29, %v2262_v26 }
 0x284   : > { %v2381_v42 = vadd.f32 %v2380_v34, %v2379_v30 }
 0x285   : > { %v2603_v21 = vpack.c.bf16 %v4357_v18, %v4357_v18 }
 0x286   : > { %v2175_v16 = vpop.f32.mrf.mxu2  ;;  %v2383_v37 = vadd.f32 %v2382_v57, %v2381_v42 }
 0x287   : > { %2636 = vst.msk [vmem:[%s4123_s14 + $0x5c] sm:$0xf] %vm2612_vm6, %v2603_v21  ;;  %v2176_v10 = vadd.f32 %v2175_v16, %v2087_v8  ;;  %v2392_v8 = vsel %vm1446_vm4, %v4256_v53, 0.0  ;;  %v2271_v16 = vpop.f32.mrf.mxu3 }
 0x288   : > { %v2088_v19 = vpop.f32.mrf.mxu1  ;;  %v2385_v27 = vadd.f32 %v2384_v15, %v2383_v37 }
 0x289   : > { %v2265_v44 = vadd.f32 %v2264_v4, %v2176_v10  ;;  %v2089_v59 = vadd.f32 %v2088_v19, %v3951_v46  ;;  %v2386_v46 = vsel %vm1446_vm4, %v4218_v39, 0.0  ;;  %v2388_v4 = vsel %vm1446_vm4, %v4228_v43, 0.0  ;;  %v2360_v10 = vpop.f32.mrf.mxu0 }
 0x28a   : > { %v2387_v60 = vadd.f32 %v2386_v46, %v2385_v27  ;;  %v2394_v19 = vsel %vm1446_vm4, %v4268_v56, 0.0  ;;  %v2404_v46 = vsel %vm1446_vm4, %v4308_v61, 0.0 }
 0x28b   : > { %v4372_v1 = vadd.f32 %v2353_v41, %v2265_v44  ;;  %v2396_v44 = vsel %vm1446_vm4, %v4276_v47, 0.0 }
 0x28d   : > { %v2604_v58 = vpack.c.bf16 %v4372_v1, %v4372_v1 }
 0x28e   : > { %v2177_v63 = vpop.f32.mrf.mxu2 }
 0x28f   : > { %2637 = vst.msk [vmem:[%s4123_s14 + $0x60] sm:$0xf] %vm2612_vm6, %v2604_v58  ;;  %v2178_v3 = vadd.f32 %v2177_v63, %v2089_v59  ;;  %v2398_v59 = vsel %vm1446_vm4, %v4287_v32, 0.0 }
 0x290   : > { %v2091_v29 = vpop.f32.mrf.mxu1 }
 0x291   : > { %v2267_v35 = vadd.f32 %v2266_v38, %v2178_v3  ;;  %v2092_v45 = vadd.f32 %v2091_v29, %v4615_v28  ;;  %v2389_v38 = vadd.f32 %v2388_v4, %v2387_v60  ;;  %v2402_v29 = vsel %vm1446_vm4, %v4301_v7, 0.0  ;;  %v2363_v37 = vpop.f32.mrf.mxu0  ;;  %v4617_v4 = vld [vmem:[#allocation4_spill] sm:$0xff] }
 0x292   : > { %v2406_v60 = vsel %vm1446_vm4, %v4315_v48, 0.0 }
 0x293   : > { %v4387_v40 = vadd.f32 %v2355_v25, %v2267_v35  ;;  %v2391_v17 = vadd.f32 %v2390_v20, %v2389_v38  ;;  %v2408_v38 = vsel %vm1446_vm4, %v4322_v31, 0.0 }
 0x295   : > { %v2605_v41 = vpack.c.bf16 %v4387_v40, %v4387_v40  ;;  %v2393_v9 = vadd.f32 %v2392_v8, %v2391_v17 }
 0x296   : > { %v2180_v14 = vpop.f32.mrf.mxu2 }
 0x297   : > { %2638 = vst.msk [vmem:[%s4123_s14 + $0x64] sm:$0xf] %vm2612_vm6, %v2605_v41  ;;  %v2181_v26 = vadd.f32 %v2180_v14, %v2092_v45  ;;  %v2395_v34 = vadd.f32 %v2394_v19, %v2393_v9 }
 0x298   : > { %v2093_v21 = vpop.f32.mrf.mxu1 }
 0x299   : > { %v2270_v25 = vadd.f32 %v2269_v49, %v2181_v26  ;;  %v2094_v50 = vadd.f32 %v2093_v21, %v4616_v54  ;;  %v2397_v63 = vadd.f32 %v2396_v44, %v2395_v34  ;;  %v2400_v49 = vsel %vm1446_vm4, %v4294_v55, 0.0  ;;  %v4618_v44 = vld [vmem:[#allocation5_spill] sm:$0xff] }
 0x29b   : > { %v4402_v2 = vadd.f32 %v2358_v33, %v2270_v25  ;;  %v2399_v42 = vadd.f32 %v2398_v59, %v2397_v63  ;;  %v2274_v33 = vpop.f32.mrf.mxu3 }
 0x29d   : > { %v2606_v51 = vpack.c.bf16 %v4402_v2, %v4402_v2  ;;  %v2401_v35 = vadd.f32 %v2400_v49, %v2399_v42  ;;  %v2418_v42 = vsel %vm1446_vm4, %v4357_v18, 0.0 }
 0x29e   : > { %v2182_v58 = vpop.f32.mrf.mxu2 }
 0x29f   : > { %2639 = vst.msk [vmem:[%s4123_s14 + $0x68] sm:$0xf] %vm2612_vm6, %v2606_v51  ;;  %v2183_v30 = vadd.f32 %v2182_v58, %v2094_v50  ;;  %v2403_v28 = vadd.f32 %v2402_v29, %v2401_v35  ;;  %v2365_v50 = vpop.f32.mrf.mxu0  ;;  %v2414_v58 = vsel %vm1446_vm4, %v4343_v52, 0.0  ;;  %v2420_v35 = vsel %vm1446_vm4, %v4372_v1, 0.0 }
 0x2a0   : > { %v2096_v57 = vpop.f32.mrf.mxu1 }
 0x2a1   : > { %v2272_v3 = vadd.f32 %v2271_v16, %v2183_v30  ;;  %v2097_v41 = vadd.f32 %v2096_v57, %v4617_v4  ;;  %v2405_v20 = vadd.f32 %v2404_v46, %v2403_v28  ;;  %v2410_v16 = vsel %vm1446_vm4, %v4329_v11, 0.0  ;;  %v4619_v46 = vld [vmem:[#allocation6_spill] sm:$0xff] }
 0x2a2   : > { %v2416_v57 = vsel %vm1446_vm4, %v4350_v62, 0.0 }
 0x2a3   : > { %v4417_v15 = vadd.f32 %v2360_v10, %v2272_v3  ;;  %v2407_v8 = vadd.f32 %v2406_v60, %v2405_v20  ;;  %v2412_v10 = vsel %vm1446_vm4, %v4336_v24, 0.0  ;;  %v2276_v19 = vpop.f32.mrf.mxu3 }
 0x2a5   : > { %v2607_v27 = vpack.c.bf16 %v4417_v15, %v4417_v15  ;;  %v2409_v17 = vadd.f32 %v2408_v38, %v2407_v8 }
 0x2a6   : > { %v2185_v45 = vpop.f32.mrf.mxu2 }
 0x2a7   : > { %2640 = vst.msk [vmem:[%s4123_s14 + $0x6c] sm:$0xf] %vm2612_vm6, %v2607_v27  ;;  %v2186_v14 = vadd.f32 %v2185_v45, %v2097_v41  ;;  %v2411_v54 = vadd.f32 %v2410_v16, %v2409_v17  ;;  %v2422_v45 = vsel %vm1446_vm4, %v4387_v40, 0.0  ;;  %v2368_v20 = vpop.f32.mrf.mxu0  ;;  %v2426_v16 = vsel %vm1446_vm4, %v4417_v15, 0.0 }
 0x2a8   : > { %v2098_v26 = vpop.f32.mrf.mxu1 }
 0x2a9   : > { %v2275_v21 = vadd.f32 %v2274_v33, %v2186_v14  ;;  %v2099_v51 = vadd.f32 %v2098_v26, %v4618_v44  ;;  %v2413_v30 = vadd.f32 %v2412_v10, %v2411_v54  ;;  %v2424_v26 = vsel %vm1446_vm4, %v4402_v2, 0.0  ;;  %v4620_v44 = vld [vmem:[#allocation7_spill] sm:$0xff] }
 0x2ab   : > { %v4432_v25 = vadd.f32 %v2363_v37, %v2275_v21  ;;  %v2415_v3 = vadd.f32 %v2414_v58, %v2413_v30  ;;  %v2279_v41 = vpop.f32.mrf.mxu3 }
 0x2ad   : > { %v2608_v9 = vpack.c.bf16 %v4432_v25, %v4432_v25  ;;  %v2417_v33 = vadd.f32 %v2416_v57, %v2415_v3 }
 0x2ae   : > { %v2187_v34 = vpop.f32.mrf.mxu2 }
 0x2af   : > { %2641 = vst.msk [vmem:[%s4123_s14 + $0x70] sm:$0xf] %vm2612_vm6, %v2608_v9  ;;  %v2188_v59 = vadd.f32 %v2187_v34, %v2099_v51  ;;  %v2419_v4 = vadd.f32 %v2418_v42, %v2417_v33  ;;  %v2370_v3 = vpop.f32.mrf.mxu0 }
 0x2b0   : > { %v2101_v63 = vpop.f32.mrf.mxu1 }
 0x2b1   : > { %v2277_v49 = vadd.f32 %v2276_v19, %v2188_v59  ;;  %v2102_v27 = vadd.f32 %v2101_v63, %v4619_v46  ;;  %v2421_v14 = vadd.f32 %v2420_v35, %v2419_v4  ;;  %v2428_v19 = vsel %vm1446_vm4, %v4432_v25, 0.0 }
 0x2b3   : > { %v4447_v29 = vadd.f32 %v2365_v50, %v2277_v49  ;;  %v2423_v21 = vadd.f32 %v2422_v45, %v2421_v14  ;;  %v2281_v30 = vpop.f32.mrf.mxu3 }
 0x2b5   : > { %v2609_v37 = vpack.c.bf16 %v4447_v29, %v4447_v29  ;;  %v2425_v10 = vadd.f32 %v2424_v26, %v2423_v21  ;;  %v2430_v34 = vsel %vm1446_vm4, %v4447_v29, 0.0 }
 0x2b6   : > { %v2190_v28 = vpop.f32.mrf.mxu2 }
 0x2b7   : > { %2642 = vst.msk [vmem:[%s4123_s14 + $0x74] sm:$0xf] %vm2612_vm6, %v2609_v37  ;;  %v2191_v60 = vadd.f32 %v2190_v28, %v2102_v27  ;;  %v2427_v54 = vadd.f32 %v2426_v16, %v2425_v10 }
 0x2b8   : > { %v2103_v8 = vpop.f32.mrf.mxu1 }
 0x2b9   : > { %v2280_v38 = vadd.f32 %v2279_v41, %v2191_v60  ;;  %v2104_v51 = vadd.f32 %v2103_v8, %v4620_v44  ;;  %v2429_v59 = vadd.f32 %v2428_v19, %v2427_v54 }
 0x2bb   : > { %v4462_v17 = vadd.f32 %v2368_v20, %v2280_v38  ;;  %v2431_v49 = vadd.f32 %v2430_v34, %v2429_v59 }
 0x2bd   : > { %v2610_v9 = vpack.c.bf16 %v4462_v17, %v4462_v17  ;;  %v2432_v63 = vsel %vm1446_vm4, %v4462_v17, 0.0 }
 0x2be   : > { %v2192_v50 = vpop.f32.mrf.mxu2  ;;  %v2433_v33 = vadd.f32 %v2432_v63, %v2431_v49 }
 0x2bf   : > { %2643 = vst.msk [vmem:[%s4123_s14 + $0x78] sm:$0xf] %vm2612_vm6, %v2610_v9  ;;  %v2193_v58 = vadd.f32 %v2192_v50, %v2104_v51 }
 0x2c1   : > { %v2282_v57 = vadd.f32 %v2281_v30, %v2193_v58 }
 0x2c3   : > { %v4475_v42 = vadd.f32 %v2370_v3, %v2282_v57 }
 0x2c5   : > { %v2434_v35 = vsel %vm1446_vm4, %v4475_v42, 0.0  ;;  %v2611_v37 = vpack.c.bf16 %v4475_v42, %v4475_v42 }
 0x2c6   : > { %v2435_v46 = vadd.f32 %v2434_v35, %v2433_v33 }
 0x2c7   : > { %2644 = vst.msk [vmem:[%s4123_s14 + $0x7c] sm:$0xf] %vm2612_vm6, %v2611_v37 }
 0x2c8   : > { %v2436_v27 = vrot.slane %v2435_v46, 4 }
 0x2ca   : > { %v2437_v4 = vadd.f32 %v2436_v27, %v2435_v46 }
 0x2cc   : > { %v2438_v41 = vrot.slane %v2437_v4, 2 }
 0x2ce   : > { %v2439_v28 = vadd.f32 %v2438_v41, %v2437_v4 }
 0x2d0   : > { %v2440_v45 = vrot.slane %v2439_v28, 1 }
 0x2d2   : > { %v4483_v60 = vadd.f32 %v2440_v45, %v2439_v28 }
 0x2d4   : > { %v4486_v14 = vmul.f32 0.00390625, %v4483_v60 }
 0x2d6   : > { %v2443_v20 = vsub.f32 %v4117_v22, %v4486_v14  ;;  %v2444_v26 = vsub.f32 %v4136_v6, %v4486_v14  ;;  %v2445_v38 = vsub.f32 %v4149_v0, %v4486_v14  ;;  %v2446_v21 = vsub.f32 %v4162_v5, %v4486_v14 }
 0x2d7   : > { %v2447_v10 = vsub.f32 %v4175_v36, %v4486_v14  ;;  %v2448_v9 = vsub.f32 %v4189_v13, %v4486_v14  ;;  %v2449_v0 = vsub.f32 %v4203_v12, %v4486_v14  ;;  %v2450_v36 = vsub.f32 %v4218_v39, %v4486_v14 }
 0x2d8   : > { %v2475_v8 = vmul.f32 %v2443_v20, %v2443_v20  ;;  %v2476_v16 = vmul.f32 %v2444_v26, %v2444_v26  ;;  %v2477_v19 = vmul.f32 %v2445_v38, %v2445_v38  ;;  %v2478_v44 = vmul.f32 %v2446_v21, %v2446_v21 }
 0x2d9   : > { %v2479_v54 = vmul.f32 %v2447_v10, %v2447_v10  ;;  %v2480_v34 = vmul.f32 %v2448_v9, %v2448_v9  ;;  %v2451_v59 = vsub.f32 %v4228_v43, %v4486_v14  ;;  %v2481_v30 = vmul.f32 %v2449_v0, %v2449_v0 }
 0x2da   : > { %v2507_v22 = vsel %vm1446_vm4, %v2475_v8, 0.0  ;;  %v2508_v6 = vsel %vm1446_vm4, %v2476_v16, 0.0  ;;  %v2510_v5 = vsel %vm1446_vm4, %v2477_v19, 0.0  ;;  %v2512_v58 = vsel %vm1446_vm4, %v2478_v44, 0.0 }
 0x2db   : > { %v2509_v51 = vadd.f32 %v2508_v6, %v2507_v22  ;;  %v2514_v63 = vsel %vm1446_vm4, %v2479_v54, 0.0  ;;  %v2452_v12 = vsub.f32 %v4243_v23, %v4486_v14  ;;  %v2482_v49 = vmul.f32 %v2450_v36, %v2450_v36 }
 0x2dc   : > { %v2516_v3 = vsel %vm1446_vm4, %v2480_v34, 0.0  ;;  %v2453_v39 = vsub.f32 %v4256_v53, %v4486_v14  ;;  %v2483_v35 = vmul.f32 %v2451_v59, %v2451_v59  ;;  %v2518_v37 = vsel %vm1446_vm4, %v2481_v30, 0.0 }
 0x2dd   : > { %v2511_v50 = vadd.f32 %v2510_v5, %v2509_v51  ;;  %v2454_v43 = vsub.f32 %v4268_v56, %v4486_v14  ;;  %v2484_v27 = vmul.f32 %v2452_v12, %v2452_v12  ;;  %v2520_v4 = vsel %vm1446_vm4, %v2482_v49, 0.0 }
 0x2de   : > { %v2455_v23 = vsub.f32 %v4276_v47, %v4486_v14  ;;  %v2485_v28 = vmul.f32 %v2453_v39, %v2453_v39  ;;  %v2522_v45 = vsel %vm1446_vm4, %v2483_v35, 0.0  ;;  %v2456_v53 = vsub.f32 %v4287_v32, %v4486_v14 }
 0x2df   : > { %v2513_v13 = vadd.f32 %v2512_v58, %v2511_v50  ;;  %v2486_v26 = vmul.f32 %v2454_v43, %v2454_v43  ;;  %v2524_v38 = vsel %vm1446_vm4, %v2484_v27, 0.0  ;;  %v2457_v56 = vsub.f32 %v4294_v55, %v4486_v14 }
 0x2e0   : > { %v2487_v8 = vmul.f32 %v2455_v23, %v2455_v23  ;;  %v2526_v16 = vsel %vm1446_vm4, %v2485_v28, 0.0  ;;  %v2458_v47 = vsub.f32 %v4301_v7, %v4486_v14  ;;  %v2488_v19 = vmul.f32 %v2456_v53, %v2456_v53 }
 0x2e1   : > { %v2515_v57 = vadd.f32 %v2514_v63, %v2513_v13  ;;  %v2528_v9 = vsel %vm1446_vm4, %v2486_v26, 0.0  ;;  %v2459_v32 = vsub.f32 %v4308_v61, %v4486_v14  ;;  %v2489_v22 = vmul.f32 %v2457_v56, %v2457_v56 }
 0x2e2   : > { %v2530_v6 = vsel %vm1446_vm4, %v2487_v8, 0.0  ;;  %v2460_v55 = vsub.f32 %v4315_v48, %v4486_v14  ;;  %v2490_v0 = vmul.f32 %v2458_v47, %v2458_v47  ;;  %v2532_v54 = vsel %vm1446_vm4, %v2488_v19, 0.0 }
 0x2e3   : > { %v2517_v33 = vadd.f32 %v2516_v3, %v2515_v57  ;;  %v2461_v7 = vsub.f32 %v4322_v31, %v4486_v14  ;;  %v2491_v50 = vmul.f32 %v2459_v32, %v2459_v32  ;;  %v2534_v36 = vsel %vm1446_vm4, %v2489_v22, 0.0 }
 0x2e4   : > { %v2462_v61 = vsub.f32 %v4329_v11, %v4486_v14  ;;  %v2492_v58 = vmul.f32 %v2460_v55, %v2460_v55  ;;  %v2536_v13 = vsel %vm1446_vm4, %v2490_v0, 0.0  ;;  %v2463_v48 = vsub.f32 %v4336_v24, %v4486_v14 }
 0x2e5   : > { %v2519_v46 = vadd.f32 %v2518_v37, %v2517_v33  ;;  %v2493_v30 = vmul.f32 %v2461_v7, %v2461_v7  ;;  %v2538_v63 = vsel %vm1446_vm4, %v2491_v50, 0.0  ;;  %v2464_v31 = vsub.f32 %v4343_v52, %v4486_v14 }
 0x2e6   : > { %v2494_v12 = vmul.f32 %v2462_v61, %v2462_v61  ;;  %v2540_v49 = vsel %vm1446_vm4, %v2492_v58, 0.0  ;;  %v2465_v11 = vsub.f32 %v4350_v62, %v4486_v14  ;;  %v2495_v33 = vmul.f32 %v2463_v48, %v2463_v48 }
 0x2e7   : > { %v2521_v41 = vadd.f32 %v2520_v4, %v2519_v46  ;;  %v2542_v39 = vsel %vm1446_vm4, %v2493_v30, 0.0  ;;  %v2466_v24 = vsub.f32 %v4357_v18, %v4486_v14  ;;  %v2496_v37 = vmul.f32 %v2464_v31, %v2464_v31 }
 0x2e8   : > { %v2544_v46 = vsel %vm1446_vm4, %v2494_v12, 0.0  ;;  %v2467_v52 = vsub.f32 %v4372_v1, %v4486_v14  ;;  %v2497_v27 = vmul.f32 %v2465_v11, %v2465_v11  ;;  %v2546_v4 = vsel %vm1446_vm4, %v2495_v33, 0.0 }
 0x2e9   : > { %v2523_v20 = vadd.f32 %v2522_v45, %v2521_v41  ;;  %v2468_v62 = vsub.f32 %v4387_v40, %v4486_v14  ;;  %v2498_v23 = vmul.f32 %v2466_v24, %v2466_v24  ;;  %v2548_v28 = vsel %vm1446_vm4, %v2496_v37, 0.0 }
 0x2ea   : > { %v2469_v18 = vsub.f32 %v4402_v2, %v4486_v14  ;;  %v2550_v53 = vsel %vm1446_vm4, %v2497_v27, 0.0  ;;  %v2470_v1 = vsub.f32 %v4417_v15, %v4486_v14  ;;  %v2471_v40 = vsub.f32 %v4432_v25, %v4486_v14 }
 0x2eb   : > { %v2525_v21 = vadd.f32 %v2524_v38, %v2523_v20  ;;  %v2499_v20 = vmul.f32 %v2467_v52, %v2467_v52  ;;  %v2500_v38 = vmul.f32 %v2468_v62, %v2468_v62  ;;  %v2472_v2 = vsub.f32 %v4447_v29, %v4486_v14 }
 0x2ec   : > { %v2501_v8 = vmul.f32 %v2469_v18, %v2469_v18  ;;  %v2502_v47 = vmul.f32 %v2470_v1, %v2470_v1  ;;  %v2473_v15 = vsub.f32 %v4462_v17, %v4486_v14  ;;  %v2474_v25 = vsub.f32 %v4475_v42, %v4486_v14 }
 0x2ed   : > { %v2527_v10 = vadd.f32 %v2526_v16, %v2525_v21  ;;  %v2552_v21 = vsel %vm1446_vm4, %v2498_v23, 0.0  ;;  %v2554_v16 = vsel %vm1446_vm4, %v2499_v20, 0.0  ;;  %v2556_v19 = vsel %vm1446_vm4, %v2500_v38, 0.0 }
 0x2ee   : > { %v2558_v32 = vsel %vm1446_vm4, %v2501_v8, 0.0  ;;  %v2505_v29 = vmul.f32 %v2473_v15, %v2473_v15 }
 0x2ef   : > { %v2529_v44 = vadd.f32 %v2528_v9, %v2527_v10 }
 0x2f0   : > { %v2566_v50 = vsel %vm1446_vm4, %v2505_v29, 0.0 }
 0x2f1   : > { %v2531_v51 = vadd.f32 %v2530_v6, %v2529_v44  ;;  %v2503_v44 = vmul.f32 %v2471_v40, %v2471_v40  ;;  %v2504_v6 = vmul.f32 %v2472_v2, %v2472_v2 }
 0x2f3   : > { %v2533_v5 = vadd.f32 %v2532_v54, %v2531_v51  ;;  %v2560_v51 = vsel %vm1446_vm4, %v2502_v47, 0.0  ;;  %v2562_v0 = vsel %vm1446_vm4, %v2503_v44, 0.0  ;;  %v2564_v7 = vsel %vm1446_vm4, %v2504_v6, 0.0 }
 0x2f5   : > { %v2535_v34 = vadd.f32 %v2534_v36, %v2533_v5  ;;  %v2506_v5 = vmul.f32 %v2474_v25, %v2474_v25 }
 0x2f7   : > { %v2537_v59 = vadd.f32 %v2536_v13, %v2535_v34  ;;  %v2568_v34 = vsel %vm1446_vm4, %v2506_v5, 0.0 }
 0x2f9   : > { %v2539_v57 = vadd.f32 %v2538_v63, %v2537_v59 }
 0x2fb   : > { %v2541_v3 = vadd.f32 %v2540_v49, %v2539_v57 }
 0x2fd   : > { %v2543_v35 = vadd.f32 %v2542_v39, %v2541_v3 }
 0x2ff   : > { %v2545_v43 = vadd.f32 %v2544_v46, %v2543_v35 }
 0x301   : > { %v2547_v41 = vadd.f32 %v2546_v4, %v2545_v43 }
 0x303   : > { %v2549_v45 = vadd.f32 %v2548_v28, %v2547_v41 }
 0x305   : > { %v2551_v26 = vadd.f32 %v2550_v53, %v2549_v45 }
 0x307   : > { %v2553_v56 = vadd.f32 %v2552_v21, %v2551_v26 }
 0x309   : > { %v2555_v10 = vadd.f32 %v2554_v16, %v2553_v56 }
 0x30b   : > { %v2557_v9 = vadd.f32 %v2556_v19, %v2555_v10 }
 0x30d   : > { %v2559_v22 = vadd.f32 %v2558_v32, %v2557_v9 }
 0x30f   : > { %v2561_v55 = vadd.f32 %v2560_v51, %v2559_v22 }
 0x311   : > { %v2563_v54 = vadd.f32 %v2562_v0, %v2561_v55 }
 0x313   : > { %v2565_v17 = vadd.f32 %v2564_v7, %v2563_v54 }
 0x315   : > { %v2567_v36 = vadd.f32 %v2566_v50, %v2565_v17 }
 0x317   : > { %v2569_v61 = vadd.f32 %v2568_v34, %v2567_v36 }
 0x319   : > { %v2570_v42 = vrot.slane %v2569_v61, 4 }
 0x31b   : > { %v2571_v14 = vadd.f32 %v2570_v42, %v2569_v61 }
 0x31d   : > { %v2572_v58 = vrot.slane %v2571_v14, 2 }
 0x31f   : > { %v2573_v13 = vadd.f32 %v2572_v58, %v2571_v14 }
 0x321   : > { %v2574_v59 = vrot.slane %v2573_v13, 1 }
 0x323   : > { %v2575_v48 = vadd.f32 %v2574_v59, %v2573_v13 }
 0x325   : > { %v2577_v30 = vsel %vm991_vm0, %v4483_v60, %v2575_v48 }
 0x326   : > { %2579 = vst.msk [vmem:[%s465_s18] sm:$0x3] %vm2578_vm7, %v2577_v30 }
 0x327 PF: > { %s18_s26 = sadd.s32 1, %s3205_s26   ;;  %s4621_s24 = smov %s3201_s25 }
 0x328   : > { %p15_p5 = scmp.ge.s32.totalorder %s18_s26, 4   ;;  %s4622_s25 = smov %s4624_s27 }
 0x32a   :  { %17 = sbr.rel (!%p15_p5) target bundleno = 2 (0x2), region = 92 }

// kernel: encoder_forward.11
= control target key start
LH: loop header
LB: loop body
LE: loop exit
PB: predicated region body
PF: predicated region fallthrough
CT: control target
= control target key end

     0   :  { %s4258_s21 = smov 0   ;;  %s4260_s22 = smov 0   ;;  %s5659_s0 = inlined_call_operand.vmem [shape: bf16[2,16,16,64], index: 0, kind: input, shape index: {}, may-alias: {0,1,2}]   ;;  %s5660_s1 = inlined_call_operand.vmem [shape: bf16[2,16,16,64], index: 1, kind: input, shape index: {}, may-alias: {0,1,2}]   ;;  %s5661_s2 = inlined_call_operand.vmem [shape: bf16[2,16,16,64], index: 2, kind: input, shape index: {}, may-alias: {0,1,2}]   ;;  %s5662_s3 = inlined_call_operand.vmem [shape: bf16[2,16,16,3], index: 3, kind: input, shape index: {}, may-alias: {3,4,5}]   ;;  %s5663_s4 = inlined_call_operand.vmem [shape: bf16[2,16,16,3], index: 4, kind: input, shape index: {}, may-alias: {3,4,5}]   ;;  %s5664_s5 = inlined_call_operand.vmem [shape: bf16[2,16,16,3], index: 5, kind: input, shape index: {}, may-alias: {3,4,5}]   ;;  %s5665_s6 = inlined_call_operand.vmem [shape: bf16[1,603,64], index: 6, kind: input, shape index: {}]   ;;  %s5666_s7 = inlined_call_operand.vmem [shape: f32[1,64], index: 7, kind: input, shape index: {}]   ;;  %s5667_s8 = inlined_call_operand.vmem [shape: f32[1,64], index: 8, kind: input, shape index: {}]   ;;  %s5668_s9 = inlined_call_operand.vmem [shape: f32[1,64], index: 9, kind: input, shape index: {}]   ;;  %s5669_s10 = inlined_call_operand.vmem [shape: f32[1,64,3], index: 10, kind: input, shape index: {}]   ;;  %s5670_s11 = inlined_call_operand.vmem [shape: f32[1,3], index: 11, kind: input, shape index: {}]   ;;  %s5671_s12 = inlined_call_operand.vmem [shape: f32[2,16,16,3], index: 12, kind: output, shape index: {}]  }
   0x1   :  { %s4262_s23 = smov 0  }
   0x2 LB: > { %s34_s24 = sadd.s32 1, %s4180_s22  ;;  %p3665_p0 = scmp.ge.s32.totalorder %s4184_s23, 1  ;;  %s4184_s23 = sphi %s4262_s23, %s22_s23   ;;  %s4180_s22 = sphi %s4260_s22, %s5708_s22   ;;  %s4176_s21 = sphi %s4258_s21, %s5707_s21  }
   0x3   : > { %p36_p1 = scmp.ge.s32.totalorder %s34_s24, 2  ;;  %p530_p2 = scmp.lt.s32.totalorder %s4184_s23, 3 }
   0x5   : > { %s5710_s24 = smov (%p36_p1, %s34_s24), 0  ;;  %p531_p3 = pnand %p3665_p0, %p530_p2 }
   0x7   : > { %534 = sbr.rel (%p531_p3) target bundleno = 1268 (0x4f4), region = 68 }
   0xc   : > { %p648_p4 = scmp.lt.s32.totalorder %s4176_s21, 1  ;;  %s5675_s29 = smov 64   ;;  %v4318_v10 = vld [vmem:[%s5667_s8] ss:$0 sm:$0xff]  ;;  %vm780_vm0 = vcmask 523264   ;;  %vm1563_vm1 = vcmask 1040384  }
   0xd   : > { %v4323_v13 = vld [vmem:[%s5668_s9] ss:$0 sm:$0xff]  ;;  %vm1564_vm2 = vsmask.f32 256  ;;  %vm1678_vm4 = vsmask.f32 7424 }
   0xe   : > { %s5712_s21 = smov (!%p648_p4, %s4176_s21), 1  ;;  %vm4355_vm3 = vmand %vm1563_vm1, %vm1564_vm2  ;;  %vm1967_vm5 = vcmask 1046528   ;;  %s5672_s27 = smov 6   ;;  %vm2111_vm6 = vcmask 48128   ;;  %vm2058_vm7 = vcmask 547840   ;;  %vm2244_vm8 = vcmask 596992  }
   0xf   : > { %s4279_s25 = sshll.u32 %s5712_s21, 7  ;;  %s5674_s30 = smov 67   ;;  %vm2754_vm9 = vcmask 1044480   ;;  %vm2755_vm10 = vcmask 1045504   ;;  %vm2343_vm11 = vcmask 146432   ;;  %vm2705_vm12 = vcmask 744448  }
  0x10   : > { %s4285_s28 = scalar_lea.vmem %s5663_s4, %s4279_s25  ;;  %s701_s14 = scalar_lea.vmem %s5662_s3, %s4279_s25  ;;  %vm3427_vm13 = vcmask 23552  }
  0x11   : > { %v3974_v0 = vld [vmem:[%s4285_s28 + $0x50] sm:$0xff]  ;;  %v3972_v1 = vld [vmem:[%s4285_s28 + $0x40] sm:$0xff]  ;;  %v3971_v2 = vld [vmem:[%s4285_s28 + $0x38] sm:$0xff]  ;;  %s4312_s17 = scalar_lea.vmem %s5660_s1, %s4279_s25  ;;  %s656_s18 = scalar_lea.vmem %s5659_s0, %s4279_s25 }
  0x12   : > { %1189 = vrot.lane.b32.xlu1 %v3974_v0, %s5675_s29  ;;  %1185 = vrot.lane.b32.xlu0 %v3972_v1, %s5675_s29  ;;  %v3973_v3 = vld [vmem:[%s4285_s28 + $0x48] sm:$0xff]  ;;  %v3963_v4 = vld [vmem:[%s701_s14] sm:$0xff]  ;;  %s5678_s15 = smov 6   ;;  %s5686_s16 = smov 64  }
  0x13   : > { %1183 = vrot.lane.b32.xlu2 %v3971_v2, %s5675_s29  ;;  %v3975_v5 = vld [vmem:[%s4285_s28 + $0x58] sm:$0xff]  ;;  %v3964_v6 = vld [vmem:[%s4285_s28] sm:$0xff]  ;;  %v3965_v8 = vld [vmem:[%s4285_s28 + $0x8] sm:$0xff]  ;;  %s5693_s13 = smov 67  }
  0x14   : > { %v3976_v7 = vld [vmem:[%s4285_s28 + $0x60] sm:$0xff]  ;;  %v4099_v9 = vld [vmem:[%s4312_s17 + $0x38] sm:$0xff]   ;;  %v3977_v15 = vld [vmem:[%s4285_s28 + $0x68] sm:$0xff] }
  0x15   : > { %v4053_v11 = vunpack.c.l.bf16 %v4099_v9  ;;  %v4054_v12 = vunpack.c.h.bf16 %v4099_v9  ;;  %v4103_v17 = vld [vmem:[%s4312_s17 + $0x58] sm:$0xff]   ;;  %v4104_v26 = vld [vmem:[%s4312_s17 + $0x60] sm:$0xff]   ;;  %v4102_v36 = vld [vmem:[%s4312_s17 + $0x50] sm:$0xff]  }
  0x16   : > { %v4069_v20 = vunpack.c.l.bf16 %v4103_v17  ;;  %v4070_v21 = vunpack.c.h.bf16 %v4103_v17  ;;  %v4100_v27 = vld [vmem:[%s4312_s17 + $0x40] sm:$0xff]   ;;  %v4073_v29 = vunpack.c.l.bf16 %v4104_v26  ;;  %v4074_v33 = vunpack.c.h.bf16 %v4104_v26  ;;  %v4101_v56 = vld [vmem:[%s4312_s17 + $0x48] sm:$0xff]  }
  0x17   : > { %v863_v14 = vmul.f32 %v4318_v10, %v4053_v11  ;;  %v864_v16 = vmul.f32 %v4318_v10, %v4054_v12  ;;  %v4057_v34 = vunpack.c.l.bf16 %v4100_v27  ;;  %v4058_v42 = vunpack.c.h.bf16 %v4100_v27 }
  0x18   : > { %v871_v24 = vmul.f32 %v4318_v10, %v4069_v20  ;;  %v872_v25 = vmul.f32 %v4318_v10, %v4070_v21  ;;  %v873_v37 = vmul.f32 %v4318_v10, %v4073_v29  ;;  %v874_v41 = vmul.f32 %v4318_v10, %v4074_v33 }
  0x19   : > { %v895_v18 = vadd.f32 %v4323_v13, %v863_v14  ;;  %v896_v19 = vadd.f32 %v4323_v13, %v864_v16  ;;  %v865_v43 = vmul.f32 %v4318_v10, %v4057_v34  ;;  %v4065_v44 = vunpack.c.l.bf16 %v4102_v36 }
  0x1a   : > { %1187 = vrot.lane.b32.xlu0 %v3973_v3, %s5675_s29  ;;  %778 = vrot.lane.b32.xlu1 %v3963_v4, %s5675_s29  ;;  %v903_v31 = vadd.f32 %v4323_v13, %v871_v24  ;;  %v904_v32 = vadd.f32 %v4323_v13, %v872_v25  ;;  %v4066_v45 = vunpack.c.h.bf16 %v4102_v36  ;;  %v905_v46 = vadd.f32 %v4323_v13, %v873_v37 }
  0x1b   : > { %1191 = vrot.lane.b32.xlu2 %v3975_v5, %s5675_s29  ;;  %v927_v22 = vmax.f32 %v895_v18, 0.0  ;;  %v928_v23 = vmax.f32 %v896_v19, 0.0  ;;  %v906_v50 = vadd.f32 %v4323_v13, %v874_v41  ;;  %v866_v51 = vmul.f32 %v4318_v10, %v4058_v42 }
  0x1c   : > { %v935_v39 = vmax.f32 %v903_v31, 0.0  ;;  %v936_v40 = vmax.f32 %v904_v32, 0.0  ;;  %v897_v52 = vadd.f32 %v4323_v13, %v865_v43  ;;  %v869_v53 = vmul.f32 %v4318_v10, %v4065_v44 }
  0x1d   : > { %v959_v28 = vpack.c.bf16 %v927_v22, %v927_v22  ;;  %v960_v30 = vpack.c.bf16 %v928_v23, %v928_v23  ;;  %v870_v55 = vmul.f32 %v4318_v10, %v4066_v45  ;;  %v937_v57 = vmax.f32 %v905_v46, 0.0 }
  0x1e   : > { %v967_v48 = vpack.c.bf16 %v935_v39, %v935_v39  ;;  %v968_v49 = vpack.c.bf16 %v936_v40, %v936_v40  ;;  %v938_v61 = vmax.f32 %v906_v50, 0.0  ;;  %v898_v0 = vadd.f32 %v4323_v13, %v866_v51 }
  0x1f   : > { %v1055_v35 = vunpack.c.l.b16 %v959_v28  ;;  %v1056_v38 = vunpack.c.l.b16 %v960_v30  ;;  %v929_v1 = vmax.f32 %v897_v52, 0.0  ;;  %v901_v2 = vadd.f32 %v4323_v13, %v869_v53 }
  0x20   : > { %v1063_v59 = vunpack.c.l.b16 %v967_v48  ;;  %v1064_v60 = vunpack.c.l.b16 %v968_v49  ;;  %v4061_v3 = vunpack.c.l.bf16 %v4101_v56  ;;  %v4062_v4 = vunpack.c.h.bf16 %v4101_v56 }
  0x21   : > { %v1080_v47 = vpack.c.b16 %v1056_v38, %v1055_v35  ;;  %v970_v11 = vpack.c.bf16 %v938_v61, %v938_v61  ;;  %v961_v16 = vpack.c.bf16 %v929_v1, %v929_v1  ;;  %v933_v18 = vmax.f32 %v901_v2, 0.0 }
  0x22   : > { %1169 = vrot.lane.b32.xlu1 %v3964_v6, %s5675_s29  ;;  %v902_v6 = vadd.f32 %v4323_v13, %v870_v55  ;;  %v1084_v9 = vpack.c.b16 %v1064_v60, %v1063_v59  ;;  %v867_v19 = vmul.f32 %v4318_v10, %v4061_v3  ;;  %v868_v20 = vmul.f32 %v4318_v10, %v4062_v4  ;;  %v3978_v55 = vld [vmem:[%s4285_s28 + $0x70] sm:$0xff] }
  0x23   : > { %1193 = vrot.lane.b32.xlu2 %v3976_v7, %s5675_s29  ;;  %v969_v7 = vpack.c.bf16 %v937_v57, %v937_v57  ;;  %v1066_v29 = vunpack.c.l.b16 %v970_v11  ;;  %v965_v40 = vpack.c.bf16 %v933_v18, %v933_v18  ;;  %v1057_v46 = vunpack.c.l.b16 %v961_v16 }
  0x24   : > { %v934_v24 = vmax.f32 %v902_v6, 0.0  ;;  %v899_v36 = vadd.f32 %v4323_v13, %v867_v19  ;;  %v900_v37 = vadd.f32 %v4323_v13, %v868_v20 }
  0x25   : > { %v1065_v25 = vunpack.c.l.b16 %v969_v7  ;;  %v1061_v50 = vunpack.c.l.b16 %v965_v40 }
  0x26   : > { %v966_v41 = vpack.c.bf16 %v934_v24, %v934_v24  ;;  %v931_v48 = vmax.f32 %v899_v36, 0.0  ;;  %v932_v52 = vmax.f32 %v900_v37, 0.0 }
  0x27   : > { %v1085_v43 = vpack.c.b16 %v1066_v29, %v1065_v25 }
  0x28   : > { %v1062_v51 = vunpack.c.l.b16 %v966_v41  ;;  %v963_v60 = vpack.c.bf16 %v931_v48, %v931_v48  ;;  %v964_v1 = vpack.c.bf16 %v932_v52, %v932_v52 }
  0x2a   : > { %1171 = vrot.lane.b32.xlu1 %v3965_v8, %s5675_s29 }
  0x2b   : > { %1195 = vrot.lane.b32.xlu2 %v3977_v15, %s5675_s29  ;;  %v930_v15 = vmax.f32 %v898_v0, 0.0  ;;  %v3966_v0 = vld [vmem:[%s4285_s28 + $0x10] sm:$0xff] }
  0x2d   : > { %v962_v33 = vpack.c.bf16 %v930_v15, %v930_v15 }
  0x6d   : > { %v1184_v54 = vpop.permute.xlu2 %1183 }
  0x6e   : > { %v1224_v58 = vsel %vm780_vm0, %v1080_v47, %v1184_v54  ;;  %v1058_v47 = vunpack.c.l.b16 %v962_v33  ;;  %v4093_v54 = vld [vmem:[%s4312_s17 + $0x8] sm:$0xff]  }
  0x6f   : > { %v1458_v62 = vshrl.u32 %v1224_v58, 16  ;;  %v1461_v63 = vshll.u32 %v1224_v58, 16  ;;  %v4029_v61 = vunpack.c.l.bf16 %v4093_v54  ;;  %v4030_v2 = vunpack.c.h.bf16 %v4093_v54 }
  0x71   : > { %v1460_v5 = vrot.slane %v1458_v62, 7  ;;  %v1083_v62 = vpack.c.b16 %v1062_v51, %v1061_v50  ;;  %v852_v18 = vmul.f32 %v4318_v10, %v4030_v2 }
  0x73   : > { %v1463_v12 = vor.u32 %v1461_v63, %v1460_v5  ;;  %v1592_v14 = vsel %vm4355_vm3, %v1460_v5, 0  ;;  %v1081_v63 = vpack.c.b16 %v1058_v47, %v1057_v46  ;;  %v884_v29 = vadd.f32 %v4323_v13, %v852_v18 }
  0x74   : > { %v1783_v17 = vshll.u32 %v1592_v14, 16  ;;  %v1993_v23 = vrot.slane %v1592_v14, 1  ;;  %v851_v14 = vmul.f32 %v4318_v10, %v4029_v61 }
  0x75   : > { %v4365_v21 = vsel %vm4355_vm3, 0, %v1463_v12  ;;  %v1192_v22 = vpop.permute.xlu2 %1191  ;;  %v1059_v12 = vunpack.c.l.b16 %v963_v60  ;;  %v3967_v60 = vld [vmem:[%s4285_s28 + $0x18] sm:$0xff] }
  0x76   : > { %v1236_v26 = vsel %vm780_vm0, %v1084_v9, %v1192_v22  ;;  %v1776_v27 = vshrl.u32 %v4365_v21, 16  ;;  %v1778_v28 = vshll.u32 %v4365_v21, 16  ;;  %v1992_v32 = vrot.slane %v4365_v21, 1 }
  0x77   : > { %v1486_v30 = vshrl.u32 %v1236_v26, 16  ;;  %v1489_v31 = vshll.u32 %v1236_v26, 16  ;;  %v1785_v35 = vrot.slane %v1783_v17, 1  ;;  %v1060_v17 = vunpack.c.l.b16 %v964_v1 }
  0x78   : > { %v1780_v34 = vrot.slane %v1778_v28, 1  ;;  %v1994_v39 = vsel %vm1967_vm5, %v1992_v32, %v1993_v23 }
  0x79   : > { %v1488_v38 = vrot.slane %v1486_v30, 7  ;;  %2038 = vrot.lane.b32.xlu2 %v1994_v39, %s5672_s27  ;;  %v1082_v28 = vpack.c.b16 %v1060_v17, %v1059_v12 }
  0x7a   : > { %v1781_v42 = vor.u32 %v1780_v34, %v1776_v27  ;;  %v883_v27 = vadd.f32 %v4323_v13, %v851_v14 }
  0x7b   : > { %v1491_v44 = vor.u32 %v1489_v31, %v1488_v38  ;;  %v4387_v58 = vsel %vm4355_vm3, %v1488_v38, 0 }
  0x7c   : > { %v1786_v45 = vsel %vm1678_vm4, %v1781_v42, %v1785_v35  ;;  %v1831_v3 = vshll.u32 %v4387_v58, 16  ;;  %v915_v39 = vmax.f32 %v883_v27, 0.0 }
  0x7d   : > { %v4378_v49 = vsel %vm4355_vm3, 0, %v1491_v44  ;;  %1911 = vrot.lane.b32.xlu1 %v1786_v45, %s5674_s30  ;;  %v1194_v53 = vpop.permute.xlu2 %1193  ;;  %v3988_v44 = vld [vmem:[%s5665_s6 + $0x38] sm:$0xff] }
  0x7e   : > { %v1239_v56 = vsel %vm780_vm0, %v1085_v43, %v1194_v53  ;;  %v1826_v57 = vshll.u32 %v4378_v49, 16  ;;  %v1824_v4 = vshrl.u32 %v4378_v49, 16  ;;  %v1833_v22 = vrot.slane %v1831_v3, 1  ;;  %4108 = vmatpush.bf16.msra.mxu2 %v3988_v44  ;;  %2761 = vmatpush.bf16.msra.mxu0 %v3988_v44 }
  0x7f   : > { %v1493_v59 = vshrl.u32 %v1239_v56, 16  ;;  %v1496_v7 = vshll.u32 %v1239_v56, 16  ;;  %v916_v43 = vmax.f32 %v884_v29, 0.0 }
  0x80   : > { %v1828_v5 = vrot.slane %v1826_v57, 1 }
  0x81   : > { %1197 = vrot.lane.b32.xlu2 %v3978_v55, %s5675_s29  ;;  %v1495_v6 = vrot.slane %v1493_v59, 7  ;;  %v947_v55 = vpack.c.bf16 %v915_v39, %v915_v39  ;;  %v948_v61 = vpack.c.bf16 %v916_v43, %v916_v43 }
  0x82   : > { %v1829_v20 = vor.u32 %v1828_v5, %v1824_v4 }
  0x83   : > { %v1498_v23 = vor.u32 %v1496_v7, %v1495_v6  ;;  %v4421_v47 = vsel %vm4355_vm3, %v1495_v6, 0  ;;  %v1044_v14 = vunpack.c.l.b16 %v948_v61 }
  0x84   : > { %v1190_v9 = vpop.permute.xlu1 %1189  ;;  %v1186_v11 = vpop.permute.xlu0 %1185  ;;  %v1834_v32 = vsel %vm1678_vm4, %v1829_v20, %v1833_v22  ;;  %v1843_v56 = vshll.u32 %v4421_v47, 16 }
  0x85   : > { %v1233_v15 = vsel %vm780_vm0, %v1083_v62, %v1190_v9  ;;  %v1227_v16 = vsel %vm780_vm0, %v1081_v63, %v1186_v11  ;;  %1173 = vrot.lane.b32.xlu1 %v3966_v0, %s5675_s29  ;;  %v4405_v33 = vsel %vm4355_vm3, 0, %v1498_v23  ;;  %v3979_v9 = vld [vmem:[%s4285_s28 + $0x78] sm:$0xff]  ;;  %v1043_v11 = vunpack.c.l.b16 %v947_v55 }
  0x86   : > { %v1465_v19 = vshrl.u32 %v1227_v16, 16  ;;  %v1479_v24 = vshrl.u32 %v1233_v15, 16  ;;  %v1468_v26 = vshll.u32 %v1227_v16, 16  ;;  %v1482_v35 = vshll.u32 %v1233_v15, 16 }
  0x87   : > { %v1838_v48 = vshll.u32 %v4405_v33, 16  ;;  %v1836_v0 = vshrl.u32 %v4405_v33, 16  ;;  %v1845_v18 = vrot.slane %v1843_v56, 1 }
  0x88   : > { %v1467_v25 = vrot.slane %v1465_v19, 7  ;;  %v1481_v34 = vrot.slane %v1479_v24, 7  ;;  %v1074_v24 = vpack.c.b16 %v1044_v14, %v1043_v11  ;;  %v3982_v14 = vld [vmem:[%s5665_s6 + $0x8] sm:$0xff] }
  0x89   : > { %v1840_v1 = vrot.slane %v1838_v48, 1 }
  0x8a   : > { %v1470_v30 = vor.u32 %v1468_v26, %v1467_v25  ;;  %v1593_v31 = vsel %vm4355_vm3, %v1467_v25, 0  ;;  %v1484_v53 = vor.u32 %v1482_v35, %v1481_v34  ;;  %v1595_v19 = vsel %vm4355_vm3, %v1481_v34, 0  ;;  %v3987_v26 = vld [vmem:[%s5665_s6 + $0x30] sm:$0xff]  ;;  %v3986_v35 = vld [vmem:[%s5665_s6 + $0x28] sm:$0xff] }
  0x8b   : > { %v1996_v42 = vrot.slane %v1593_v31, 1  ;;  %v1795_v50 = vshll.u32 %v1593_v31, 16  ;;  %v1841_v17 = vor.u32 %v1840_v1, %v1836_v0  ;;  %v1819_v27 = vshll.u32 %v1595_v19, 16  ;;  %4109 = vmatpush.bf16.msra.mxu2 %v3987_v26  ;;  %2762 = vmatpush.bf16.msra.mxu0 %v3987_v26  ;;  %v3985_v0 = vld [vmem:[%s5665_s6 + $0x20] sm:$0xff]  ;;  %v3984_v1 = vld [vmem:[%s5665_s6 + $0x18] sm:$0xff] }
  0x8c   : > { %v4409_v36 = vsel %vm4355_vm3, 0, %v1470_v30  ;;  %v1188_v37 = vpop.permute.xlu0 %1187  ;;  %v4411_v38 = vpop.permute.xlu1 %778  ;;  %v4435_v5 = vsel %vm4355_vm3, 0, %v1484_v53 }
  0x8d   : > { %v1230_v40 = vsel %vm780_vm0, %v1082_v28, %v1188_v37  ;;  %1919 = vrot.lane.b32.xlu1 %v1834_v32, %s5674_s30  ;;  %v1995_v41 = vrot.slane %v4409_v36, 1  ;;  %v1790_v52 = vshll.u32 %v4409_v36, 16  ;;  %v1788_v57 = vshrl.u32 %v4409_v36, 16 }
  0x8e   : > { %v1472_v45 = vshrl.u32 %v1230_v40, 16  ;;  %v1475_v46 = vshll.u32 %v1230_v40, 16  ;;  %v1797_v4 = vrot.slane %v1795_v50, 1  ;;  %v1814_v23 = vshll.u32 %v4435_v5, 16 }
  0x8f   : > { %v1997_v51 = vsel %vm1967_vm5, %v1995_v41, %v1996_v42  ;;  %v1792_v59 = vrot.slane %v1790_v52, 1  ;;  %v1846_v28 = vsel %vm1678_vm4, %v1841_v17, %v1845_v18  ;;  %v1812_v29 = vshrl.u32 %v4435_v5, 16  ;;  %4110 = vmatpush.bf16.msra.mxu2 %v3986_v35  ;;  %2763 = vmatpush.bf16.msra.mxu0 %v3986_v35  ;;  %v3981_v18 = vld [vmem:[%s5665_s6] sm:$0xff] }
  0x90   : > { %v1474_v54 = vrot.slane %v1472_v45, 7  ;;  %2040 = vrot.lane.b32.xlu2 %v1997_v51, %s5672_s27  ;;  %v1816_v34 = vrot.slane %v1814_v23, 1  ;;  %v1821_v44 = vrot.slane %v1819_v27, 1  ;;  %v2001_v56 = vrot.slane %v4435_v5, 1 }
  0x91   : > { %v1793_v3 = vor.u32 %v1792_v59, %v1788_v57  ;;  %v2002_v57 = vrot.slane %v1595_v19, 1 }
  0x92   : > { %v1477_v62 = vor.u32 %v1475_v46, %v1474_v54  ;;  %v1594_v63 = vsel %vm4355_vm3, %v1474_v54, 0  ;;  %v1817_v43 = vor.u32 %v1816_v34, %v1812_v29  ;;  %v3968_v46 = vld [vmem:[%s4285_s28 + $0x20] sm:$0xff] }
  0x93   : > { %v1807_v2 = vshll.u32 %v1594_v63, 16  ;;  %v1798_v12 = vsel %vm1678_vm4, %v1793_v3, %v1797_v4  ;;  %v1999_v32 = vrot.slane %v1594_v63, 1  ;;  %4111 = vmatpush.bf16.msra.mxu2 %v3985_v0  ;;  %2764 = vmatpush.bf16.msra.mxu0 %v3985_v0 }
  0x94   : > { %v4439_v6 = vsel %vm4355_vm3, 0, %v1477_v62  ;;  %v4441_v7 = vpop.permute.xlu1 %1169  ;;  %1913 = vrot.lane.b32.xlu0 %v1798_v12, %s5674_s30  ;;  %v1822_v52 = vsel %vm1678_vm4, %v1817_v43, %v1821_v44  ;;  %v2003_v62 = vsel %vm1967_vm5, %v2001_v56, %v2002_v57 }
  0x95   : > { %1175 = vrot.lane.b32.xlu1 %v3967_v60, %s5675_s29  ;;  %v1800_v15 = vshrl.u32 %v4439_v6, 16  ;;  %v1802_v16 = vshll.u32 %v4439_v6, 16  ;;  %v1809_v22 = vrot.slane %v1807_v2, 1  ;;  %v1998_v31 = vrot.slane %v4439_v6, 1  ;;  %v4020_v2 = vld [vmem:[%s656_s18] sm:$0xff]  }
  0x96   : > { %v4021_v3 = vunpack.c.l.bf16 %v4020_v2  ;;  %v4022_v4 = vunpack.c.h.bf16 %v4020_v2 }
  0x97   : > { %v1804_v20 = vrot.slane %v1802_v16, 1  ;;  %v2000_v42 = vsel %vm1967_vm5, %v1998_v31, %v1999_v32  ;;  %4112 = vmatpush.bf16.msra.mxu2 %v3984_v1  ;;  %2765 = vmatpush.bf16.msra.mxu0 %v3984_v1 }
  0x98   : > { %1199 = vrot.lane.b32.xlu2 %v3979_v9, %s5675_s29  ;;  %v3983_v9 = vld [vmem:[%s5665_s6 + $0x10] sm:$0xff]  ;;  %v755_v11 = vmul.f32 %v4318_v10, %v4021_v3  ;;  %v756_v12 = vmul.f32 %v4318_v10, %v4022_v4 }
  0x99   : > { %v1805_v25 = vor.u32 %v1804_v20, %v1800_v15  ;;  %v4106_v15 = vld [vmem:[%s4312_s17 + $0x70] sm:$0xff]  }
  0x9a   : > { %v760_v16 = vadd.f32 %v4323_v13, %v755_v11  ;;  %v761_v17 = vadd.f32 %v4323_v13, %v756_v12  ;;  %v4081_v19 = vunpack.c.l.bf16 %v4106_v15  ;;  %v4082_v20 = vunpack.c.h.bf16 %v4106_v15 }
  0x9b   : > { %v1810_v30 = vsel %vm1678_vm4, %v1805_v25, %v1809_v22  ;;  %4113 = vmatpush.bf16.msra.mxu2 %v3983_v9  ;;  %2766 = vmatpush.bf16.msra.mxu0 %v3983_v9 }
  0x9c   : > { %v1172_v37 = vpop.permute.xlu1 %1171  ;;  %1915 = vrot.lane.b32.xlu0 %v1810_v30, %s5674_s30  ;;  %v762_v22 = vmax.f32 %v760_v16, 0.0  ;;  %v763_v23 = vmax.f32 %v761_v17, 0.0  ;;  %v877_v25 = vmul.f32 %v4318_v10, %v4081_v19  ;;  %v878_v26 = vmul.f32 %v4318_v10, %v4082_v20 }
  0x9d   : > { %v1206_v39 = vsel %vm780_vm0, %v1074_v24, %v1172_v37  ;;  %1921 = vrot.lane.b32.xlu1 %v1846_v28, %s5674_s30  ;;  %v4512_v24 = vpop.permute.xlu2 %1195  ;;  %v4094_v37 = vld [vmem:[%s4312_s17 + $0x10] sm:$0xff]  }
  0x9e   : > { %v1416_v40 = vshrl.u32 %v1206_v39, 16  ;;  %v1419_v41 = vshll.u32 %v1206_v39, 16  ;;  %v764_v27 = vpack.c.bf16 %v762_v22, %v762_v22  ;;  %v765_v28 = vpack.c.bf16 %v763_v23, %v763_v23 }
  0x9f   : > { %4114 = vmatpush.bf16.msra.mxu2 %v3982_v14  ;;  %2767 = vmatpush.bf16.msra.mxu0 %v3982_v14  ;;  %v909_v29 = vadd.f32 %v4323_v13, %v877_v25  ;;  %v910_v30 = vadd.f32 %v4323_v13, %v878_v26  ;;  %v4034_v43 = vunpack.c.h.bf16 %v4094_v37 }
  0xa0   : > { %v1418_v45 = vrot.slane %v1416_v40, 7  ;;  %2042 = vrot.lane.b32.xlu2 %v2000_v42, %s5672_s27  ;;  %v770_v31 = vunpack.c.l.b16 %v764_v27  ;;  %v771_v32 = vunpack.c.l.b16 %v765_v28  ;;  %v4107_v40 = vld [vmem:[%s4312_s17 + $0x78] sm:$0xff]   ;;  %v4033_v42 = vunpack.c.l.bf16 %v4094_v37 }
  0xa1   : > { %v941_v34 = vmax.f32 %v909_v29, 0.0  ;;  %v942_v35 = vmax.f32 %v910_v30, 0.0 }
  0xa2   : > { %v1421_v48 = vor.u32 %v1419_v41, %v1418_v45  ;;  %v4471_v50 = vsel %vm4355_vm3, %v1418_v45, 0  ;;  %v772_v41 = vpack.c.b16 %v771_v32, %v770_v31 }
  0xa3   : > { %v1711_v51 = vshll.u32 %v4471_v50, 16  ;;  %4115 = vmatpush.bf16.msra.mxu2 %v3981_v18  ;;  %2768 = vmatpush.bf16.msra.mxu0 %v3981_v18  ;;  %v973_v44 = vpack.c.bf16 %v941_v34, %v941_v34  ;;  %v974_v45 = vpack.c.bf16 %v942_v35, %v942_v35 }
  0xa4   : > { %v4477_v53 = vsel %vm4355_vm3, 0, %v1421_v48  ;;  %1917 = vrot.lane.b32.xlu0 %v1822_v52, %s5674_s30  ;;  %v4086_v48 = vunpack.c.h.bf16 %v4107_v40  ;;  %v4024_v52 = vld [vmem:[%s4312_s17] sm:$0xff]  }
  0xa5   : > { %1177 = vrot.lane.b32.xlu1 %v3968_v46, %s5675_s29  ;;  %v1704_v54 = vshrl.u32 %v4477_v53, 16  ;;  %v1706_v55 = vshll.u32 %v4477_v53, 16  ;;  %v1713_v60 = vrot.slane %v1711_v51, 1  ;;  %v4085_v46 = vunpack.c.l.bf16 %v4107_v40 }
  0xa6   : > { %v783_v51 = vsel %vm780_vm0, %v772_v41, %v4411_v38  ;;  %v1069_v56 = vunpack.c.l.b16 %v973_v44  ;;  %v1070_v57 = vunpack.c.l.b16 %v974_v45  ;;  %v4025_v1 = vunpack.c.l.bf16 %v4024_v52 }
  0xa7   : > { %v1708_v59 = vrot.slane %v1706_v55, 1  ;;  %v854_v55 = vmul.f32 %v4318_v10, %v4034_v43  ;;  %v1297_v0 = vunpack.c.h.bf16 %v783_v51  ;;  %v4026_v2 = vunpack.c.h.bf16 %v4024_v52 }
  0xa8   : > { %v1087_v9 = vpack.c.b16 %v1070_v57, %v1069_v56  ;;  %v849_v16 = vmul.f32 %v4318_v10, %v4025_v1  ;;  %v4105_v57 = vld [vmem:[%s4312_s17 + $0x68] sm:$0xff]  }
  0xa9   : > { %v1709_v61 = vor.u32 %v1708_v59, %v1704_v54  ;;  %v853_v54 = vmul.f32 %v4318_v10, %v4033_v42  ;;  %v879_v59 = vmul.f32 %v4318_v10, %v4085_v46  ;;  %v886_v4 = vadd.f32 %v4323_v13, %v854_v55 }
  0xaa   : > { %v850_v17 = vmul.f32 %v4318_v10, %v4026_v2  ;;  %v881_v27 = vadd.f32 %v4323_v13, %v849_v16  ;;  %v4096_v16 = vld [vmem:[%s4312_s17 + $0x20] sm:$0xff]  }
  0xab   : > { %v1714_v63 = vsel %vm1678_vm4, %v1709_v61, %v1713_v60  ;;  %v880_v60 = vmul.f32 %v4318_v10, %v4086_v48  ;;  %v4189_v61 = vmov 0.0   ;;  %v885_v38 = vadd.f32 %v4323_v13, %v853_v54 }
  0xac   : > { %1899 = vrot.lane.b32.xlu2 %v1714_v63, %s5674_s30  ;;  %v1296_v63 = vunpack.c.l.bf16 %v783_v51  ;;  %v911_v11 = vadd.f32 %v4323_v13, %v879_v59  ;;  %v918_v19 = vmax.f32 %v886_v4, 0.0  ;;  %v882_v28 = vadd.f32 %v4323_v13, %v850_v17 }
  0xad   : > { %2044 = vrot.lane.b32.xlu1 %v2003_v62, %s5672_s27  ;;  %v4527_v62 = vunpack.c.l.bf16 %v4189_v61  ;;  %v912_v12 = vadd.f32 %v4323_v13, %v880_v60  ;;  %v917_v18 = vmax.f32 %v885_v38, 0.0  ;;  %v913_v41 = vmax.f32 %v881_v27, 0.0  ;;  %s4190_s27 = smov 73  }
  0xae   : > { %v943_v22 = vmax.f32 %v911_v11, 0.0  ;;  %v950_v31 = vpack.c.bf16 %v918_v19, %v918_v19  ;;  %v914_v42 = vmax.f32 %v882_v28, 0.0  ;;  %v4041_v27 = vunpack.c.l.bf16 %v4096_v16 }
  0xaf   : > { %v1299_v14 = vmul.f32 %v4527_v62, %v1296_v63  ;;  %v1300_v15 = vmul.f32 %v4527_v62, %v1297_v0  ;;  %v944_v23 = vmax.f32 %v912_v12, 0.0  ;;  %v949_v30 = vpack.c.bf16 %v917_v18, %v917_v18 }
  0xb0   : > { %v975_v32 = vpack.c.bf16 %v943_v22, %v943_v22  ;;  %v1046_v48 = vunpack.c.l.b16 %v950_v31  ;;  %v945_v59 = vpack.c.bf16 %v913_v41, %v913_v41  ;;  %v946_v60 = vpack.c.bf16 %v914_v42, %v914_v42 }
  0xb1   : > { %v1301_v25 = vpack.c.bf16 %v1299_v14, %v1299_v14  ;;  %v1302_v26 = vpack.c.bf16 %v1300_v15, %v1300_v15  ;;  %v976_v34 = vpack.c.bf16 %v944_v23, %v944_v23  ;;  %v1045_v46 = vunpack.c.l.b16 %v949_v30 }
  0xb2   : > { %v1071_v54 = vunpack.c.l.b16 %v975_v32  ;;  %v4077_v63 = vunpack.c.l.bf16 %v4105_v57  ;;  %v1042_v38 = vunpack.c.l.b16 %v946_v60  ;;  %v4042_v30 = vunpack.c.h.bf16 %v4096_v16 }
  0xb3   : > { %v1379_v35 = vunpack.c.l.b16 %v1301_v25  ;;  %v1380_v37 = vunpack.c.l.b16 %v1302_v26  ;;  %v1072_v55 = vunpack.c.l.b16 %v976_v34  ;;  %v1075_v1 = vpack.c.b16 %v1046_v48, %v1045_v46 }
  0xb4   : > { %v875_v12 = vmul.f32 %v4318_v10, %v4077_v63 }
  0xb5   : > { %v1383_v56 = vpack.c.b16 %v1380_v37, %v1379_v35  ;;  %v1088_v0 = vpack.c.b16 %v1072_v55, %v1071_v54  ;;  %v857_v54 = vmul.f32 %v4318_v10, %v4041_v27 }
  0xb7   : > { %v1402_v2 = vshrl.u32 %v1383_v56, 16  ;;  %v1405_v11 = vshll.u32 %v1383_v56, 16 }
  0xd3   : > { %v2039_v39 = vpop.permute.xlu2 %2038 }
  0xdb   : > { %v1198_v3 = vpop.permute.xlu2 %1197 }
  0xdc   : > { %v1245_v20 = vsel %vm780_vm0, %v1087_v9, %v1198_v3  ;;  %v1041_v3 = vunpack.c.l.b16 %v945_v59  ;;  %v858_v59 = vmul.f32 %v4318_v10, %v4042_v30 }
  0xdd   : > { %v1507_v29 = vshrl.u32 %v1245_v20, 16  ;;  %v1510_v44 = vshll.u32 %v1245_v20, 16  ;;  %v1404_v20 = vrot.slane %v1402_v2, 7 }
  0xde   : > { %v1073_v28 = vpack.c.b16 %v1042_v38, %v1041_v3 }
  0xdf   : > { %v1509_v43 = vrot.slane %v1507_v29, 7  ;;  %v907_v29 = vadd.f32 %v4323_v13, %v875_v12  ;;  %v1407_v35 = vor.u32 %v1405_v11, %v1404_v20  ;;  %v889_v11 = vadd.f32 %v4323_v13, %v857_v54 }
  0xe0   : > { %v1203_v60 = vsel %vm780_vm0, %v1073_v28, %v4441_v7  ;;  %v890_v7 = vadd.f32 %v4323_v13, %v858_v59  ;;  %v4604_v16 = vsel %vm4355_vm3, %v1404_v20, 0  ;;  %v3970_v59 = vld [vmem:[%s4285_s28 + $0x30] sm:$0xff] }
  0xe1   : > { %v1512_v61 = vor.u32 %v1510_v44, %v1509_v43  ;;  %v4563_v23 = vsel %vm4355_vm3, %v1509_v43, 0 }
  0xe2   : > { %v1867_v37 = vshll.u32 %v4563_v23, 16  ;;  %v922_v30 = vmax.f32 %v890_v7, 0.0 }
  0xe4   : > { %v1869_v2 = vrot.slane %v1867_v37, 1  ;;  %v1687_v37 = vshll.u32 %v4604_v16, 16  ;;  %v954_v54 = vpack.c.bf16 %v922_v30, %v922_v30 }
  0xe6   : > { %v1050_v7 = vunpack.c.l.b16 %v954_v54 }
  0xea   : > { %v4540_v40 = vpop.permute.xlu2 %2040 }
  0xef   : > { %v1912_v45 = vpop.permute.xlu1 %1911 }
  0xf0   : > { %v4543_v51 = vsel %vm2111_vm6, %v1912_v45, %v2039_v39  ;;  %v4547_v52 = vsel %vm2058_vm7, %v4365_v21, %v1912_v45  ;;  %v4078_v39 = vunpack.c.h.bf16 %v4105_v57  ;;  %v4553_v21 = vsel %vm4355_vm3, 0, %v1512_v61 }
  0xf1   : > { %2809 = vmatmul.bf16.vlgmr.msra.gmra.mxu2 %v4547_v52  ;;  %v1862_v22 = vshll.u32 %v4553_v21, 16  ;;  %v1860_v42 = vshrl.u32 %v4553_v21, 16  ;;  %v4595_v61 = vsel %vm4355_vm3, 0, %v1407_v35 }
  0xf2   : > { %v1200_v4 = vpop.permute.xlu2 %1199  ;;  %v876_v17 = vmul.f32 %v4318_v10, %v4078_v39  ;;  %v939_v39 = vmax.f32 %v907_v29, 0.0  ;;  %v1682_v12 = vshll.u32 %v4595_v61, 16  ;;  %v1680_v28 = vshrl.u32 %v4595_v61, 16 }
  0xf3   : > { %v1248_v14 = vsel %vm780_vm0, %v1088_v0, %v1200_v4  ;;  %v1864_v43 = vrot.slane %v1862_v22, 1  ;;  %v1409_v4 = vshrl.u32 %v1203_v60, 16  ;;  %v921_v29 = vmax.f32 %v889_v11, 0.0 }
  0xf4   : > { %v1514_v25 = vshrl.u32 %v1248_v14, 16  ;;  %v908_v31 = vadd.f32 %v4323_v13, %v876_v17  ;;  %v1517_v45 = vshll.u32 %v1248_v14, 16  ;;  %v1412_v17 = vshll.u32 %v1203_v60, 16 }
  0xf5   : > { %v1684_v35 = vrot.slane %v1682_v12, 1 }
  0xf6   : > { %v1516_v44 = vrot.slane %v1514_v25, 7  ;;  %v940_v3 = vmax.f32 %v908_v31, 0.0  ;;  %v4095_v31 = vld [vmem:[%s4312_s17 + $0x18] sm:$0xff]  }
  0xf7   : > { %v1174_v9 = vpop.permute.xlu1 %1173  ;;  %v1685_v60 = vor.u32 %v1684_v35, %v1680_v28  ;;  %v2007_v28 = vrot.slane %v4405_v33, 1 }
  0xf8   : > { %v1209_v15 = vsel %vm780_vm0, %v1075_v1, %v1174_v9  ;;  %v1865_v1 = vor.u32 %v1864_v43, %v1860_v42  ;;  %v1519_v38 = vor.u32 %v1517_v45, %v1516_v44  ;;  %v4631_v43 = vsel %vm4355_vm3, %v1516_v44, 0 }
  0xf9   : > { %v1423_v18 = vshrl.u32 %v1209_v15, 16  ;;  %v1426_v19 = vshll.u32 %v1209_v15, 16  ;;  %v953_v45 = vpack.c.bf16 %v921_v29, %v921_v29 }
  0xfa   : > { %v1870_v15 = vsel %vm1678_vm4, %v1865_v1, %v1869_v2  ;;  %v4608_v22 = vsel %vm4355_vm3, 0, %v1519_v38  ;;  %v2043_v38 = vpop.permute.xlu2 %2042 }
  0xfb   : > { %v1425_v26 = vrot.slane %v1423_v18, 7  ;;  %v971_v18 = vpack.c.bf16 %v939_v39, %v939_v39  ;;  %v1872_v1 = vshrl.u32 %v4608_v22, 16  ;;  %v1049_v11 = vunpack.c.l.b16 %v953_v45 }
  0xfd   : > { %v1428_v32 = vor.u32 %v1426_v19, %v1425_v26  ;;  %v4569_v34 = vsel %vm4355_vm3, %v1425_v26, 0  ;;  %v972_v19 = vpack.c.bf16 %v940_v3, %v940_v3  ;;  %v1411_v26 = vrot.slane %v1409_v4, 7 }
  0xfe   : > { %v1723_v41 = vshll.u32 %v4569_v34, 16 }
  0xff   : > { %v4576_v46 = vsel %vm4355_vm3, 0, %v1428_v32  ;;  %v4578_v48 = vpop.permute.xlu1 %1919  ;;  %v1068_v42 = vunpack.c.l.b16 %v972_v19  ;;  %v1585_v29 = vsel %vm4355_vm3, %v1411_v26, 0 }
 0x100   : > { %v4584_v55 = vsel %vm2058_vm7, %v4378_v49, %v4578_v48  ;;  %v1716_v56 = vshrl.u32 %v4576_v46, 16  ;;  %v1718_v57 = vshll.u32 %v4576_v46, 16  ;;  %v1725_v0 = vrot.slane %v1723_v41, 1 }
 0x101   : > { %2224 = vrot.lane.b32.xlu2 %v4584_v55, %s4190_s27  ;;  %v1874_v41 = vshll.u32 %v4608_v22, 16 }
 0x102   : > { %v1720_v63 = vrot.slane %v1718_v57, 1  ;;  %v4038_v57 = vunpack.c.h.bf16 %v4095_v31 }
 0x103   : > { %v1876_v2 = vrot.slane %v1874_v41, 1 }
 0x104   : > { %v1721_v9 = vor.u32 %v1720_v63, %v1716_v56  ;;  %v1414_v56 = vor.u32 %v1412_v17, %v1411_v26  ;;  %v1689_v63 = vrot.slane %v1687_v37, 1 }
 0x106   : > { %v1726_v14 = vsel %vm1678_vm4, %v1721_v9, %v1725_v0  ;;  %v1914_v27 = vpop.permute.xlu0 %1913  ;;  %v1879_v0 = vshll.u32 %v4631_v43, 16  ;;  %v4646_v12 = vsel %vm4355_vm3, 0, %v1414_v56  ;;  %v1690_v17 = vsel %vm1678_vm4, %v1685_v60, %v1689_v63 }
 0x107   : > { %v4610_v25 = vpop.permute.xlu1 %1175  ;;  %1901 = vrot.lane.b32.xlu1 %v1726_v14, %s5674_s30  ;;  %v4616_v20 = vsel %vm2111_vm6, %v1914_v27, %v4540_v40  ;;  %v4621_v32 = vsel %vm2058_vm7, %v4409_v36, %v1914_v27  ;;  %v1067_v40 = vunpack.c.l.b16 %v971_v18  ;;  %v4037_v36 = vunpack.c.l.bf16 %v4095_v31 }
 0x108   : > { %2212 = vrot.lane.b32.xlu0 %v4621_v32, %s4190_s27  ;;  %2814 = vmatmul.bf16.gmra.mxu2 %v4621_v32  ;;  %v856_v14 = vmul.f32 %v4318_v10, %v4038_v57  ;;  %v1877_v18 = vor.u32 %v1876_v2, %v1872_v1  ;;  %v1881_v19 = vrot.slane %v1879_v0, 1  ;;  %v1077_v31 = vpack.c.b16 %v1050_v7, %v1049_v11 }
 0x109   : > { %1925 = vrot.lane.b32.xlu2 %v1870_v15, %s5674_s30  ;;  %v1086_v39 = vpack.c.b16 %v1068_v42, %v1067_v40  ;;  %v855_v44 = vmul.f32 %v4318_v10, %v4037_v36  ;;  %v2008_v10 = vrot.slane %v4421_v47, 1  ;;  %v1694_v35 = vshll.u32 %v4646_v12, 16 }
 0x10a   : > { %v888_v37 = vadd.f32 %v4323_v13, %v856_v14  ;;  %v1882_v40 = vsel %vm1678_vm4, %v1877_v18, %v1881_v19  ;;  %v1699_v42 = vshll.u32 %v1585_v29, 16  ;;  %v1692_v45 = vshrl.u32 %v4646_v12, 16 }
 0x10b   : > { %v1242_v27 = vsel %vm780_vm0, %v1086_v39, %v4512_v24  ;;  %v887_v30 = vadd.f32 %v4323_v13, %v855_v44  ;;  %v2009_v24 = vsel %vm1967_vm5, %v2007_v28, %v2008_v10  ;;  %v1696_v26 = vrot.slane %v1694_v35, 1 }
 0x10c   : > { %v1500_v41 = vshrl.u32 %v1242_v27, 16  ;;  %v920_v54 = vmax.f32 %v888_v37, 0.0  ;;  %v1503_v60 = vshll.u32 %v1242_v27, 16  ;;  %v1971_v0 = vrot.slane %v4646_v12, 1 }
 0x10d   : > { %v1972_v1 = vrot.slane %v1585_v29, 1  ;;  %v1697_v2 = vor.u32 %v1696_v26, %v1692_v45  ;;  %v1701_v39 = vrot.slane %v1699_v42, 1  ;;  %v1974_v37 = vrot.slane %v4477_v53, 1 }
 0x10e   : > { %v1916_v4 = vpop.permute.xlu0 %1915  ;;  %v1502_v13 = vrot.slane %v1500_v41, 7  ;;  %v1975_v41 = vrot.slane %v4471_v50, 1 }
 0x10f   : > { %v4636_v3 = vpop.permute.xlu1 %1921  ;;  %v4650_v15 = vsel %vm2111_vm6, %v1916_v4, %v2043_v38  ;;  %v1702_v10 = vsel %vm1678_vm4, %v1697_v2, %v1701_v39 }
 0x110   : > { %v4642_v9 = vsel %vm2058_vm7, %v4405_v33, %v4636_v3  ;;  %1895 = vrot.lane.b32.xlu0 %v1690_v17, %s5674_s30  ;;  %v919_v33 = vmax.f32 %v887_v30, 0.0  ;;  %v1505_v11 = vor.u32 %v1503_v60, %v1502_v13  ;;  %v1973_v17 = vsel %vm1967_vm5, %v1971_v0, %v1972_v1 }
 0x111   : > { %2228 = vrot.lane.b32.xlu1 %v4642_v9, %s4190_s27  ;;  %1181 = vrot.lane.b32.xlu2 %v3970_v59, %s5675_s29  ;;  %v4672_v59 = vsel %vm2058_vm7, %v4439_v6, %v1916_v4  ;;  %v952_v6 = vpack.c.bf16 %v920_v54, %v920_v54  ;;  %v1976_v45 = vsel %vm1967_vm5, %v1974_v37, %v1975_v41  ;;  %v4098_v37 = vld [vmem:[%s4312_s17 + $0x30] sm:$0xff]   ;;  %v3992_v41 = vld [vmem:[%s5665_s6 + $0x58] sm:$0xff] }
 0x112   : > { %v951_v38 = vpack.c.bf16 %v919_v33, %v919_v33  ;;  %v4696_v29 = vsel %vm4355_vm3, 0, %v1505_v11 }
 0x113   : > { %v1048_v28 = vunpack.c.l.b16 %v952_v6  ;;  %v1848_v54 = vshrl.u32 %v4696_v29, 16 }
 0x114   : > { %v1047_v27 = vunpack.c.l.b16 %v951_v38  ;;  %v3969_v38 = vld [vmem:[%s4285_s28 + $0x28] sm:$0xff] }
 0x116   : > { %v1076_v42 = vpack.c.b16 %v1048_v28, %v1047_v27 }
 0x117   : > { %v1178_v36 = vpop.permute.xlu1 %1177 }
 0x118   : > { %v1215_v47 = vsel %vm780_vm0, %v1077_v31, %v1178_v36  ;;  %2819 = vmatmul.bf16.gmra.mxu2 %v4672_v59  ;;  %2216 = vrot.lane.b32.xlu0 %v4672_v59, %s4190_s27  ;;  %v1850_v36 = vshll.u32 %v4696_v29, 16  ;;  %v1212_v50 = vsel %vm780_vm0, %v1076_v42, %v4610_v25  ;;  %v2014_v25 = vrot.slane %v4563_v23, 1 }
 0x119   : > { %v1437_v56 = vshrl.u32 %v1215_v47, 16  ;;  %v1440_v57 = vshll.u32 %v1215_v47, 16  ;;  %1927 = vrot.lane.b32.xlu1 %v1882_v40, %s5674_s30  ;;  %2048 = vrot.lane.b32.xlu2 %v2009_v24, %s5678_s15  ;;  %v4703_v40 = vsel %vm4355_vm3, %v1502_v13, 0  ;;  %v4706_v24 = vpop.permute.xlu0 %1917  ;;  %v2013_v13 = vrot.slane %v4553_v21, 1 }
 0x11a   : > { %v1855_v47 = vshll.u32 %v4703_v40, 16  ;;  %v4717_v26 = vsel %vm2058_vm7, %v4435_v5, %v4706_v24  ;;  %v1433_v0 = vshll.u32 %v1212_v50, 16  ;;  %v4049_v42 = vunpack.c.l.bf16 %v4098_v37 }
 0x11b   : > { %v1439_v63 = vrot.slane %v1437_v56, 7  ;;  %v1852_v56 = vrot.slane %v1850_v36, 1  ;;  %v2015_v1 = vsel %vm1967_vm5, %v2013_v13, %v2014_v25  ;;  %v4050_v36 = vunpack.c.h.bf16 %v4098_v37 }
 0x11d   : > { %v1442_v44 = vor.u32 %v1440_v57, %v1439_v63  ;;  %v4682_v4 = vsel %vm4355_vm3, %v1439_v63, 0  ;;  %v1430_v57 = vshrl.u32 %v1212_v50, 16  ;;  %v1853_v60 = vor.u32 %v1852_v56, %v1848_v54  ;;  %v3990_v56 = vld [vmem:[%s5665_s6 + $0x48] sm:$0xff] }
 0x11e   : > { %v1747_v7 = vshll.u32 %v4682_v4, 16  ;;  %v1857_v63 = vrot.slane %v1855_v47, 1  ;;  %v4770_v47 = vpop.permute.xlu2 %1899 }
 0x11f   : > { %v4687_v14 = vsel %vm4355_vm3, 0, %v1442_v44  ;;  %v1432_v5 = vrot.slane %v1430_v57, 7  ;;  %v3996_v44 = vld [vmem:[%s5665_s6 + $0x78] sm:$0xff]  ;;  %v4785_v57 = vld [vmem:[%s5668_s9] ss:$0 sm:$0xff] }
 0x120   : > { %v1740_v18 = vshrl.u32 %v4687_v14, 16  ;;  %v1742_v19 = vshll.u32 %v4687_v14, 16  ;;  %1897 = vrot.lane.b32.xlu0 %v1702_v10, %s5674_s30  ;;  %v1749_v31 = vrot.slane %v1747_v7, 1  ;;  %v1858_v2 = vsel %vm1678_vm4, %v1853_v60, %v1857_v63  ;;  %4116 = vmatpush.bf16.msra.mxu3 %v3996_v44  ;;  %v3989_v60 = vld [vmem:[%s5665_s6 + $0x40] sm:$0xff] }
 0x121   : > { %2024 = vrot.lane.b32.xlu1 %v1973_v17, %s5678_s15  ;;  %v1435_v39 = vor.u32 %v1433_v0, %v1432_v5  ;;  %v4743_v11 = vsel %vm4355_vm3, %v1432_v5, 0  ;;  %v2004_v7 = vrot.slane %v4378_v49, 1  ;;  %v2005_v17 = vrot.slane %v4387_v58, 1  ;;  %2850 = vmatpush.bf16.msra.mxu1 %v3996_v44 }
 0x122   : > { %v1744_v30 = vrot.slane %v1742_v19, 1  ;;  %v1735_v19 = vshll.u32 %v4743_v11, 16 }
 0x123   : > { %v4733_v6 = vsel %vm4355_vm3, 0, %v1435_v39  ;;  %v2006_v10 = vsel %vm1967_vm5, %v2004_v7, %v2005_v17  ;;  %v1977_v17 = vrot.slane %v4576_v46, 1 }
 0x124   : > { %v1745_v35 = vor.u32 %v1744_v30, %v1740_v18  ;;  %v1730_v23 = vshll.u32 %v4733_v6, 16  ;;  %v3995_v18 = vld [vmem:[%s5665_s6 + $0x70] sm:$0xff]  ;;  %v1728_v27 = vshrl.u32 %v4733_v6, 16  ;;  %v1737_v58 = vrot.slane %v1735_v19, 1  ;;  %v3994_v30 = vld [vmem:[%s5665_s6 + $0x68] sm:$0xff] }
 0x125   : > { %4117 = vmatpush.bf16.msra.mxu3 %v3995_v18  ;;  %2851 = vmatpush.bf16.msra.mxu1 %v3995_v18  ;;  %v1978_v18 = vrot.slane %v4569_v34, 1 }
 0x126   : > { %v1750_v33 = vsel %vm1678_vm4, %v1745_v35, %v1749_v31  ;;  %v1732_v28 = vrot.slane %v1730_v23, 1  ;;  %v3993_v35 = vld [vmem:[%s5665_s6 + $0x60] sm:$0xff] }
 0x127   : > { %1905 = vrot.lane.b32.xlu2 %v1750_v33, %s5674_s30  ;;  %v3991_v33 = vld [vmem:[%s5665_s6 + $0x50] sm:$0xff] }
 0x128   : > { %2824 = vmatmul.bf16.gmra.mxu2 %v4717_v26  ;;  %2220 = vrot.lane.b32.xlu0 %v4717_v26, %s4190_s27  ;;  %v1733_v49 = vor.u32 %v1732_v28, %v1728_v27  ;;  %v1979_v28 = vsel %vm1967_vm5, %v1977_v17, %v1978_v18 }
 0x129   : > { %2026 = vrot.lane.b32.xlu1 %v1976_v45, %s5678_s15  ;;  %4118 = vmatpush.bf16.msra.mxu3 %v3994_v30  ;;  %v4775_v45 = vld [vmem:[%s5667_s8] ss:$0 sm:$0xff] }
 0x12a   : > { %v1738_v31 = vsel %vm1678_vm4, %v1733_v49, %v1737_v58  ;;  %2852 = vmatpush.bf16.msra.mxu1 %v3994_v30  ;;  %v861_v50 = vmul.f32 %v4775_v45, %v4049_v42  ;;  %v862_v54 = vmul.f32 %v4775_v45, %v4050_v36 }
 0x12c   : > { %v893_v13 = vadd.f32 %v4785_v57, %v861_v50  ;;  %v894_v25 = vadd.f32 %v4785_v57, %v862_v54 }
 0x12d   : > { %4119 = vmatpush.bf16.msra.mxu3 %v3993_v35 }
 0x12e   : > { %2853 = vmatpush.bf16.msra.mxu1 %v3993_v35  ;;  %v925_v5 = vmax.f32 %v893_v13, 0.0  ;;  %v926_v0 = vmax.f32 %v894_v25, 0.0  ;;  %v4813_v35 = vpop.permute.xlu1 %2044  ;;  %v1980_v25 = vrot.slane %v4733_v6, 1 }
 0x130   : > { %1923 = vrot.lane.b32.xlu0 %v1858_v2, %s5674_s30  ;;  %v958_v2 = vpack.c.bf16 %v926_v0, %v926_v0 }
 0x131   : > { %2052 = vrot.lane.b32.xlu1 %v2015_v1, %s5678_s15  ;;  %4120 = vmatpush.bf16.msra.mxu3 %v3992_v41  ;;  %v957_v1 = vpack.c.bf16 %v925_v5, %v925_v5 }
 0x132   : > { %2854 = vmatpush.bf16.msra.mxu1 %v3992_v41  ;;  %v1054_v44 = vunpack.c.l.b16 %v958_v2 }
 0x133   : > { %v1053_v23 = vunpack.c.l.b16 %v957_v1 }
 0x135   : > { %4121 = vmatpush.bf16.msra.mxu3 %v3991_v33  ;;  %v1079_v7 = vpack.c.b16 %v1054_v44, %v1053_v23 }
 0x136   : > { %2855 = vmatpush.bf16.msra.mxu1 %v3991_v33 }
 0x138   : > { %2829 = vmatmul.bf16.gmra.mxu2 %v4584_v55  ;;  %1179 = vrot.lane.b32.xlu0 %v3969_v38, %s5675_s29  ;;  %s3957_s29 = sadd.s32 120, %s4279_s25 }
 0x139   : > { %4122 = vmatpush.bf16.msra.mxu3 %v3990_v56  ;;  %s729_s14 = scalar_lea.vmem %s5664_s5, %s3957_s29  ;;  %s684_s19 = scalar_lea.vmem %s5661_s2, %s3957_s29 }
 0x13a   : > { %2856 = vmatpush.bf16.msra.mxu1 %v3990_v56 }
 0x13d   : > { %4123 = vmatpush.bf16.msra.mxu3 %v3989_v60 }
 0x13e   : > { %2857 = vmatpush.bf16.msra.mxu1 %v3989_v60  ;;  %v1981_v60 = vrot.slane %v4743_v11, 1 }
 0x140   : > { %2046 = vrot.lane.b32.xlu0 %v2006_v10, %s5678_s15  ;;  %v1982_v5 = vsel %vm1967_vm5, %v1980_v25, %v1981_v60 }
 0x148   : > { %2834 = vmatmul.bf16.gmra.mxu2 %v4642_v9  ;;  %1903 = vrot.lane.b32.xlu0 %v1738_v31, %s5674_s30 }
 0x15b   : > { %v4792_v63 = vpop.permute.xlu2 %2224 }
 0x163   : > { %v4794_v39 = vpop.permute.xlu2 %1925 }
 0x164   : > { %v4799_v38 = vsel %vm2058_vm7, %v4553_v21, %v4794_v39 }
 0x165   : > { %2236 = vrot.lane.b32.xlu2 %v4799_v38, %s4190_s27 }
 0x16b   : > { %v1182_v19 = vpop.permute.xlu2 %1181 }
 0x16c   : > { %v1221_v27 = vsel %vm780_vm0, %v1079_v7, %v1182_v19  ;;  %v4097_v7 = vld [vmem:[%s4312_s17 + $0x28] sm:$0xff]   ;;  %s4191_s17 = smov 18  }
 0x16d   : > { %v1451_v10 = vshrl.u32 %v1221_v27, 16  ;;  %v1454_v49 = vshll.u32 %v1221_v27, 16  ;;  %2028 = vrot.lane.b32.xlu2 %v1979_v28, %s5678_s15  ;;  %v4045_v17 = vunpack.c.l.bf16 %v4097_v7  ;;  %v4046_v18 = vunpack.c.h.bf16 %v4097_v7 }
 0x16e   : > { %v2010_v7 = vrot.slane %v4696_v29, 1 }
 0x16f   : > { %v1453_v21 = vrot.slane %v1451_v10, 7  ;;  %v859_v10 = vmul.f32 %v4775_v45, %v4045_v17  ;;  %v2011_v17 = vrot.slane %v4703_v40, 1 }
 0x171   : > { %v1456_v58 = vor.u32 %v1454_v49, %v1453_v21  ;;  %v4810_v30 = vsel %vm4355_vm3, %v1453_v21, 0  ;;  %v860_v49 = vmul.f32 %v4775_v45, %v4046_v18  ;;  %v891_v21 = vadd.f32 %v4785_v57, %v859_v10 }
 0x172   : > { %v1771_v31 = vshll.u32 %v4810_v30, 16  ;;  %v4896_v18 = vsel %vm2111_vm6, %v4706_v24, %v4813_v35  ;;  %v2012_v40 = vsel %vm1967_vm5, %v2010_v7, %v2011_v17 }
 0x173   : > { %v4817_v34 = vsel %vm4355_vm3, 0, %v1456_v58  ;;  %v892_v58 = vadd.f32 %v4785_v57, %v860_v49  ;;  %v4908_v24 = vpop.permute.xlu2 %2048 }
 0x174   : > { %v1764_v37 = vshrl.u32 %v4817_v34, 16  ;;  %v1766_v41 = vshll.u32 %v4817_v34, 16  ;;  %v1773_v36 = vrot.slane %v1771_v31, 1 }
 0x176   : > { %v1768_v42 = vrot.slane %v1766_v41, 1 }
 0x178   : > { %v1769_v33 = vor.u32 %v1768_v42, %v1764_v37 }
 0x179   : > { %v4822_v54 = vpop.permute.xlu1 %1901 }
 0x17a   : > { %v1774_v50 = vsel %vm1678_vm4, %v1769_v33, %v1773_v36  ;;  %v4825_v56 = vpop.permute.xlu0 %2212  ;;  %v923_v36 = vmax.f32 %v891_v21, 0.0  ;;  %v924_v33 = vmax.f32 %v892_v58, 0.0  ;;  %v2069_v10 = vsel %vm2058_vm7, %v4576_v46, %v4822_v54 }
 0x17b   : > { %1909 = vrot.lane.b32.xlu1 %v1774_v50, %s5674_s30  ;;  %v2386_v13 = vsel %vm2244_vm8, %v4543_v51, %v4825_v56  ;;  %v1983_v50 = vrot.slane %v4687_v14, 1 }
 0x17c   : > { %2898 = vmatmul.bf16.vlgmr.msra.gmra.mxu3 %v2386_v13  ;;  %v1984_v13 = vrot.slane %v4682_v4, 1  ;;  %v955_v25 = vpack.c.bf16 %v923_v36, %v923_v36  ;;  %v956_v60 = vpack.c.bf16 %v924_v33, %v924_v33 }
 0x182   : > { %v4836_v1 = vpop.permute.xlu0 %1895 }
 0x183   : > { %v4833_v0 = vpop.permute.xlu1 %2228  ;;  %2030 = vrot.lane.b32.xlu1 %v1982_v5, %s5678_s15  ;;  %v2060_v2 = vsel %vm2058_vm7, %v4595_v61, %v4836_v1 }
 0x184   : > { %2769 = vmatmul.bf16.vlgmr.msra.gmra.mxu0 %v2060_v2  ;;  %v1985_v2 = vsel %vm1967_vm5, %v1983_v50, %v1984_v13  ;;  %v4918_v50 = vpop.permute.xlu2 %1905 }
 0x18a   : > { %v4843_v44 = vpop.permute.xlu0 %2216 }
 0x18b   : > { %v4841_v23 = vpop.permute.xlu1 %1927  ;;  %v2389_v11 = vsel %vm2244_vm8, %v4616_v20, %v4843_v44 }
 0x18c   : > { %2903 = vmatmul.bf16.gmra.mxu3 %v2389_v11  ;;  %v1052_v11 = vunpack.c.l.b16 %v956_v60 }
 0x192   : > { %v4851_v27 = vpop.permute.xlu0 %1897 }
 0x193   : > { %v4849_v19 = vpop.permute.xlu1 %2024  ;;  %v2063_v28 = vsel %vm2058_vm7, %v4646_v12, %v4851_v27  ;;  %v2066_v12 = vsel %vm2058_vm7, %v4477_v53, %v4770_v47 }
 0x194   : > { %2180 = vrot.lane.b32.xlu2 %v2063_v28, %s4190_s27  ;;  %2774 = vmatmul.bf16.gmra.mxu0 %v2063_v28 }
 0x19a   : > { %v4861_v37 = vpop.permute.xlu0 %2220 }
 0x19b   : > { %v2027_v31 = vpop.permute.xlu1 %2026  ;;  %v2392_v42 = vsel %vm2244_vm8, %v4650_v15, %v4861_v37 }
 0x19c   : > { %v4865_v41 = vsel %vm2111_vm6, %v4770_v47, %v2027_v31  ;;  %2279 = vrot.lane.b32.xlu2 %v2066_v12, %s4191_s17  ;;  %2908 = vmatmul.bf16.gmra.mxu3 %v2392_v42  ;;  %v1051_v47 = vunpack.c.l.b16 %v955_v25 }
 0x19d   : > { %2281 = vrot.lane.b32.xlu1 %v4865_v41, %s4191_s17 }
 0x19e   : > { %v1078_v4 = vpack.c.b16 %v1052_v11, %v1051_v47 }
 0x1a2   : > { %v4878_v5 = vpop.permute.xlu0 %1923 }
 0x1a3   : > { %v4885_v53 = vsel %vm2058_vm7, %v4696_v29, %v4878_v5  ;;  %v2395_v29 = vsel %vm2244_vm8, %v4896_v18, %v4792_v63 }
 0x1a4   : > { %2184 = vrot.lane.b32.xlu2 %v2066_v12, %s4190_s27  ;;  %2779 = vmatmul.bf16.gmra.mxu0 %v2066_v12 }
 0x1a5   : > { %2032 = vrot.lane.b32.xlu1 %v1985_v2, %s5678_s15  ;;  %2232 = vrot.lane.b32.xlu0 %v4885_v53, %s4190_s27 }
 0x1a6   : > { %2839 = vmatmul.bf16.gmra.mxu2 %v4885_v53 }
 0x1aa   : > { %v1180_v28 = vpop.permute.xlu0 %1179 }
 0x1ab   : > { %v1218_v49 = vsel %vm780_vm0, %v1078_v4, %v1180_v28 }
 0x1ac   : > { %v1444_v21 = vshrl.u32 %v1218_v49, 16  ;;  %2283 = vrot.lane.b32.xlu2 %v2069_v10, %s4191_s17  ;;  %2913 = vmatmul.bf16.gmra.mxu3 %v2395_v29  ;;  %v1447_v46 = vshll.u32 %v1218_v49, 16  ;;  %v1968_v29 = vrot.slane %v4595_v61, 1 }
 0x1ad   : > { %2188 = vrot.lane.b32.xlu1 %v2069_v10, %s4190_s27  ;;  %2050 = vrot.lane.b32.xlu0 %v2012_v40, %s5678_s15 }
 0x1ae   : > { %v1446_v35 = vrot.slane %v1444_v21, 7  ;;  %v1969_v21 = vrot.slane %v4604_v16, 1 }
 0x1b0   : > { %v1449_v58 = vor.u32 %v1447_v46, %v1446_v35  ;;  %v1590_v31 = vsel %vm4355_vm3, %v1446_v35, 0  ;;  %v1970_v40 = vsel %vm1967_vm5, %v1968_v29, %v1969_v21  ;;  %v2810_v46 = vpop.f32.mrf.mxu2  ;;  %v4001_v21 = vld [vmem:[%s5665_s6 + $0xa0] sm:$0xff] }
 0x1b1   : > { %v1759_v36 = vshll.u32 %v1590_v31, 16  ;;  %v1987_v16 = vrot.slane %v1590_v31, 1 }
 0x1b2   : > { %v4915_v12 = vsel %vm4355_vm3, 0, %v1449_v58  ;;  %v2047_v42 = vpop.permute.xlu0 %2046 }
 0x1b3   : > { %v1754_v33 = vshll.u32 %v4915_v12, 16  ;;  %v1752_v13 = vshrl.u32 %v4915_v12, 16  ;;  %v1761_v2 = vrot.slane %v1759_v36, 1  ;;  %v4924_v47 = vsel %vm2111_vm6, %v4578_v48, %v2047_v42 }
 0x1b4   : > { %2784 = vmatmul.bf16.gmra.mxu0 %v2069_v10  ;;  %v2398_v7 = vsel %vm2244_vm8, %v4924_v47, %v4833_v0  ;;  %v4939_v48 = vsel %vm2058_vm7, %v4608_v22, %v4841_v23  ;;  %v1986_v61 = vrot.slane %v4915_v12, 1  ;;  %v1989_v42 = vrot.slane %v4817_v34, 1 }
 0x1b5   : > { %v1756_v25 = vrot.slane %v1754_v33, 1  ;;  %v1990_v36 = vrot.slane %v4810_v30, 1  ;;  %v4989_v33 = vld [vmem:[%s5666_s7] ss:$0 sm:$0xff] }
 0x1b6   : > { %2844 = vmatmul.bf16.gmra.mxu2 %v4799_v38 }
 0x1b7   : > { %v1757_v60 = vor.u32 %v1756_v25, %v1752_v13  ;;  %v1991_v13 = vsel %vm1967_vm5, %v1989_v42, %v1990_v36  ;;  %v2811_v25 = vadd.f32 %v4989_v33, %v2810_v46  ;;  %v3999_v42 = vld [vmem:[%s5665_s6 + $0x90] sm:$0xff] }
 0x1b8   : > { %v4982_v31 = vpop.f32.mrf.mxu2 }
 0x1b9   : > { %v1762_v11 = vsel %vm1678_vm4, %v1757_v60, %v1761_v2  ;;  %v4004_v60 = vld [vmem:[%s5665_s6 + $0xb8] sm:$0xff] }
 0x1ba   : > { %1907 = vrot.lane.b32.xlu0 %v1762_v11, %s5674_s30  ;;  %v1904_v4 = vpop.permute.xlu0 %1903  ;;  %2939 = vmatpush.bf16.msrb.mxu2 %v4004_v60  ;;  %v4009_v60 = vld [vmem:[%s5665_s6 + $0xe0] sm:$0xff] }
 0x1bb   : > { %v2072_v17 = vsel %vm2058_vm7, %v4733_v6, %v1904_v4  ;;  %v4952_v6 = vsel %vm2111_vm6, %v4851_v27, %v4849_v19  ;;  %v4967_v19 = vpop.permute.xlu1 %2052  ;;  %v1988_v27 = vsel %vm1967_vm5, %v1986_v61, %v1987_v16  ;;  %v4000_v16 = vld [vmem:[%s5665_s6 + $0x98] sm:$0xff] }
 0x1bc   : > { %2918 = vmatmul.bf16.gmra.mxu3 %v2398_v7  ;;  %2287 = vrot.lane.b32.xlu1 %v2072_v17, %s4191_s17  ;;  %v4002_v7 = vld [vmem:[%s5665_s6 + $0xa8] sm:$0xff] }
 0x1bf   : > { %v4934_v28 = vpop.permute.xlu2 %2236 }
 0x1c0   : > { %v2815_v2 = vpop.f32.mrf.mxu2 }
 0x1c1   : > { %v2816_v61 = vadd.f32 %v4989_v33, %v2815_v2 }
 0x1c2   : > { %2240 = vrot.lane.b32.xlu0 %v4939_v48, %s4190_s27 }
 0x1c4   : > { %2789 = vmatmul.bf16.gmra.mxu0 %v2072_v17 }
 0x1c7   : > { %v2029_v10 = vpop.permute.xlu2 %2028 }
 0x1c8   : > { %v4945_v49 = vsel %vm2111_vm6, %v4822_v54, %v2029_v10  ;;  %v2075_v54 = vsel %vm2058_vm7, %v4687_v14, %v4918_v50  ;;  %v4012_v10 = vld [vmem:[%s5665_s6 + $0xf8] sm:$0xff]  ;;  %v5012_v29 = vpop.f32.mrf.mxu2 }
 0x1c9   : > { %2190 = vrot.lane.b32.xlu2 %v4945_v49, %s4190_s27  ;;  %3028 = vmatpush.bf16.msrb.mxu3 %v4012_v10 }
 0x1ca   : > { %2182 = vrot.lane.b32.xlu0 %v4952_v6, %s4190_s27 }
 0x1d0   : > { %v2820_v36 = vpop.f32.mrf.mxu2 }
 0x1d2   : > { %2022 = vrot.lane.b32.xlu0 %v1970_v40, %s5678_s15  ;;  %v4011_v40 = vld [vmem:[%s5665_s6 + $0xf0] sm:$0xff] }
 0x1d3   : > { %3029 = vmatpush.bf16.msrb.mxu3 %v4011_v40  ;;  %v3998_v40 = vld [vmem:[%s5665_s6 + $0x88] sm:$0xff] }
 0x1d4   : > { %2794 = vmatmul.bf16.gmra.mxu0 %v2075_v54 }
 0x1da   : > { %2186 = vrot.lane.b32.xlu0 %v4865_v41, %s4190_s27 }
 0x1e2   : > { %2285 = vrot.lane.b32.xlu0 %v4945_v49, %s4191_s17 }
 0x1ea   : > { %2034 = vrot.lane.b32.xlu0 %v1988_v27, %s5678_s15 }
 0x1ed   : > { %v4972_v35 = vpop.permute.xlu1 %1909 }
 0x1f2   : > { %2192 = vrot.lane.b32.xlu0 %v2072_v17, %s4190_s27 }
 0x1f5   : > { %v2031_v14 = vpop.permute.xlu1 %2030 }
 0x1f6   : > { %v4976_v58 = vsel %vm2111_vm6, %v1904_v4, %v2031_v14  ;;  %v4003_v4 = vld [vmem:[%s5665_s6 + $0xb0] sm:$0xff]  ;;  %v4010_v14 = vld [vmem:[%s5665_s6 + $0xe8] sm:$0xff] }
 0x1f7   : > { %2289 = vrot.lane.b32.xlu2 %v4976_v58, %s4191_s17  ;;  %2194 = vrot.lane.b32.xlu1 %v4976_v58, %s4190_s27 }
 0x1f8   : > { %2940 = vmatpush.bf16.msrb.mxu2 %v4003_v4  ;;  %3030 = vmatpush.bf16.msrb.mxu3 %v4010_v14 }
 0x1fa   : > { %2291 = vrot.lane.b32.xlu0 %v2075_v54, %s4191_s17 }
 0x1fc   : > { %2941 = vmatpush.bf16.msrb.mxu2 %v4002_v7  ;;  %3031 = vmatpush.bf16.msrb.mxu3 %v4009_v60  ;;  %v2821_v60 = vadd.f32 %v4989_v33, %v2820_v36  ;;  %v4015_v36 = vld [vmem:[%s5665_s6 + $0x110] sm:$0xff] }
 0x1ff   : > { %2036 = vrot.lane.b32.xlu2 %v1991_v13, %s5678_s15  ;;  %v2899_v11 = vpop.f32.mrf.mxu3  ;;  %v3902_v13 = vld [vmem:[%s5665_s6 + $0x128] sm:$0xf] }
 0x200   : > { %v4998_v30 = vadd.f32 %v2899_v11, %v2811_v25  ;;  %2942 = vmatpush.bf16.msrb.mxu2 %v4001_v21  ;;  %v4018_v25 = vld [vmem:[%s5665_s6 + $0x128] sm:$0x30]  ;;  %v4192_v11 = vmov 65535  }
 0x201   : > { %v3903_v2 = vor.u32 %v4018_v25, %v3902_v13  ;;  %v2756_v4 = vsel %vm2754_vm9, 4294967295, %v4192_v11  ;;  %v4007_v13 = vld [vmem:[%s5665_s6 + $0xd0] sm:$0xff]  ;;  %v5078_v25 = vpop.f32.mrf.mxu2 }
 0x202   : > { %v2757_v10 = vsel %vm2755_vm10, %v2756_v4, 0  ;;  %5680 = vst [vmem:[#allocation3_spill] sm:$0xff] %v5078_v25 }
 0x204   : > { %2943 = vmatpush.bf16.msrb.mxu2 %v4000_v16  ;;  %v5053_v16 = vsel %vm2111_vm6, %v4636_v3, %v4908_v24  ;;  %v4008_v3 = vld [vmem:[%s5665_s6 + $0xd8] sm:$0xff]  ;;  %v3997_v24 = vld [vmem:[%s5665_s6 + $0x80] sm:$0xff] }
 0x205   : > { %3032 = vmatpush.bf16.msrb.mxu3 %v4008_v3  ;;  %v4014_v3 = vld [vmem:[%s5665_s6 + $0x108] sm:$0xff] }
 0x207   : > { %2196 = vrot.lane.b32.xlu2 %v2075_v54, %s4190_s27  ;;  %v5007_v17 = vpop.f32.mrf.mxu3 }
 0x208   : > { %2944 = vmatpush.bf16.msrb.mxu2 %v3999_v42  ;;  %v4017_v42 = vld [vmem:[%s5665_s6 + $0x120] sm:$0xff] }
 0x209   : > { %3033 = vmatpush.bf16.msrb.mxu3 %v4007_v13 }
 0x20c   : > { %2945 = vmatpush.bf16.msrb.mxu2 %v3998_v40 }
 0x20f   : > { %v5020_v54 = vpop.permute.xlu1 %2281  ;;  %v2904_v27 = vpop.f32.mrf.mxu3 }
 0x210   : > { %v5026_v46 = vadd.f32 %v2904_v27, %v2816_v61  ;;  %v2759_v61 = vand.u32 %v3903_v2, %v2757_v10  ;;  %2946 = vmatpush.bf16.msrb.mxu2 %v3997_v24  ;;  %v4016_v2 = vld [vmem:[%s5665_s6 + $0x118] sm:$0xff]  ;;  %v2181_v10 = vpop.permute.xlu2 %2180  ;;  %v2825_v24 = vpop.f32.mrf.mxu2 }
 0x212   : > { %3119 = vmatpush.bf16.msrb.mxu0 %v2759_v61  ;;  %v4005_v61 = vld [vmem:[%s5665_s6 + $0xc0] sm:$0xff] }
 0x216   : > { %3120 = vmatpush.bf16.msrb.mxu0 %v4017_v42 }
 0x217   : > { %v2033_v7 = vpop.permute.xlu1 %2032  ;;  %v5055_v27 = vpop.permute.xlu0 %2232 }
 0x218   : > { %v5045_v21 = vsel %vm2111_vm6, %v4918_v50, %v2033_v7  ;;  %v5057_v14 = vpop.f32.mrf.mxu3  ;;  %v2401_v50 = vsel %vm2244_vm8, %v5053_v16, %v5055_v27  ;;  %v4006_v7 = vld [vmem:[%s5665_s6 + $0xc8] sm:$0xff] }
 0x219   : > { %5679 = vst [vmem:[#allocation2_spill] sm:$0xff] %v5057_v14  ;;  %2198 = vrot.lane.b32.xlu0 %v5045_v21, %s4190_s27  ;;  %2293 = vrot.lane.b32.xlu1 %v5045_v21, %s4191_s17  ;;  %v5142_v14 = vpop.f32.mrf.mxu0 }
 0x21a   : > { %2923 = vmatmul.bf16.gmra.mxu3 %v2401_v50  ;;  %3121 = vmatpush.bf16.msrb.mxu0 %v4016_v2 }
 0x21b   : > { %3034 = vmatpush.bf16.msrb.mxu3 %v4006_v7  ;;  %v2826_v7 = vadd.f32 %v4989_v33, %v2825_v24 }
 0x21e   : > { %3122 = vmatpush.bf16.msrb.mxu0 %v4015_v36 }
 0x21f   : > { %v2051_v40 = vpop.permute.xlu0 %2050  ;;  %3035 = vmatpush.bf16.msrb.mxu3 %v4005_v61  ;;  %v5117_v61 = vpop.f32.mrf.mxu2 }
 0x220   : > { %v2909_v11 = vpop.f32.mrf.mxu3  ;;  %v5097_v50 = vsel %vm2111_vm6, %v4878_v5, %v2051_v40  ;;  %v2280_v5 = vpop.permute.xlu2 %2279  ;;  %5684 = vst [vmem:[#allocation7_spill] sm:$0xff] %v5117_v61 }
 0x221   : > { %v5084_v4 = vadd.f32 %v2909_v11, %v2821_v60  ;;  %v2404_v13 = vsel %vm2244_vm8, %v5097_v50, %v4934_v28  ;;  %v4013_v60 = vld [vmem:[%s5665_s6 + $0x100] sm:$0xff] }
 0x222   : > { %3123 = vmatpush.bf16.msrb.mxu0 %v4014_v3 }
 0x223   : > { %5681 = vst [vmem:[#allocation4_spill] sm:$0xff] %v5084_v4 }
 0x226   : > { %3124 = vmatpush.bf16.msrb.mxu0 %v4013_v60  ;;  %v5124_v60 = vsel %vm2111_vm6, %v4794_v39, %v4967_v19 }
 0x228   : > { %v5102_v42 = vpop.f32.mrf.mxu3 }
 0x229   : > { %5682 = vst [vmem:[#allocation5_spill] sm:$0xff] %v5102_v42 }
 0x22a   : > { %2928 = vmatmul.bf16.gmra.mxu3 %v2404_v13  ;;  %v2185_v13 = vpop.permute.xlu2 %2184 }
 0x22c   : > { %v1908_v2 = vpop.permute.xlu0 %1907 }
 0x22d   : > { %v2078_v11 = vsel %vm2058_vm7, %v4915_v12, %v1908_v2 }
 0x22e   : > { %2200 = vrot.lane.b32.xlu0 %v2078_v11, %s4190_s27  ;;  %2295 = vrot.lane.b32.xlu1 %v2078_v11, %s4191_s17 }
 0x22f   : > { %2799 = vmatmul.bf16.gmra.mxu0 %v2078_v11  ;;  %v2830_v11 = vpop.f32.mrf.mxu2 }
 0x230   : > { %v2914_v40 = vpop.f32.mrf.mxu3  ;;  %v2831_v61 = vadd.f32 %v4989_v33, %v2830_v11 }
 0x231   : > { %v5115_v36 = vadd.f32 %v2914_v40, %v2826_v7 }
 0x232   : > { %v2284_v39 = vpop.permute.xlu2 %2283 }
 0x233   : > { %5683 = vst [vmem:[#allocation6_spill] sm:$0xff] %v5115_v36  ;;  %v2081_v36 = vsel %vm2058_vm7, %v4817_v34, %v4972_v35 }
 0x234   : > { %v5119_v3 = vpop.permute.xlu0 %2240 }
 0x235   : > { %v2407_v24 = vsel %vm2244_vm8, %v5124_v60, %v5119_v3 }
 0x238   : > { %v5126_v12 = vpop.f32.mrf.mxu3 }
 0x239   : > { %5685 = vst [vmem:[#allocation8_spill] sm:$0xff] %v5126_v12 }
 0x23a   : > { %2933 = vmatmul.bf16.gmra.mxu3 %v2407_v24  ;;  %v2191_v4 = vpop.permute.xlu2 %2190 }
 0x23c   : > { %v2183_v7 = vpop.permute.xlu0 %2182 }
 0x23d   : > { %v2245_v40 = vsel %vm2244_vm8, %v2181_v10, %v2183_v7  ;;  %v2412_v11 = vsel %vm2343_vm11, %v2183_v7, %v2280_v5 }
 0x23e   : > { %2947 = vmatmul.bf16.vlgmr.msrb.gmra.mxu2 %v2245_v40 }
 0x23f   : > { %2804 = vmatmul.bf16.gmra.mxu0 %v2081_v36 }
 0x240   : > { %v2919_v19 = vpop.f32.mrf.mxu3 }
 0x241   : > { %v5136_v12 = vadd.f32 %v2919_v19, %v2831_v61  ;;  %v2344_v61 = vsel %vm2343_vm11, %v2280_v5, %v5020_v54  ;;  %v2189_v54 = vpop.permute.xlu1 %2188 }
 0x244   : > { %v2023_v42 = vpop.permute.xlu0 %2022 }
 0x245   : > { %v2113_v24 = vsel %vm2111_vm6, %v4836_v1, %v2023_v42  ;;  %v5148_v42 = vpop.f32.mrf.mxu0 }
 0x246   : > { %v2362_v25 = vsel %vm2244_vm8, %v2113_v24, %v2181_v10 }
 0x247   : > { %2858 = vmatmul.bf16.vlgmr.msra.gmra.mxu1 %v2362_v25  ;;  %v2365_v25 = vsel %vm2244_vm8, %v4952_v6, %v2185_v13 }
 0x24a   : > { %3036 = vmatmul.bf16.vlgmr.msrb.gmra.mxu3 %v2412_v11  ;;  %v2247_v11 = vsel %vm2244_vm8, %v2189_v54, %v2191_v4 }
 0x24c   : > { %v2187_v34 = vpop.permute.xlu0 %2186 }
 0x24d   : > { %v2246_v40 = vsel %vm2244_vm8, %v2185_v13, %v2187_v34  ;;  %v2416_v19 = vsel %vm2343_vm11, %v2187_v34, %v2284_v39  ;;  %v2288_v13 = vpop.permute.xlu1 %2287 }
 0x24e   : > { %2952 = vmatmul.bf16.gmra.mxu2 %v2246_v40 }
 0x24f   : > { %3904 = vmatmul.msk.bf16.vlgmr.msrb.gmra.mxu0 %vm2705_vm12, %v2344_v61 }
 0x251   : > { %v2290_v1 = vpop.permute.xlu2 %2289 }
 0x254   : > { %v2286_v10 = vpop.permute.xlu0 %2285 }
 0x255   : > { %v2345_v6 = vsel %vm2343_vm11, %v2284_v39, %v2286_v10  ;;  %v2420_v39 = vsel %vm2343_vm11, %v2191_v4, %v2288_v13 }
 0x257   : > { %2863 = vmatmul.bf16.gmra.mxu1 %v2365_v25 }
 0x259   : > { %v2037_v7 = vpop.permute.xlu2 %2036 }
 0x25a   : > { %v5155_v24 = vsel %vm2111_vm6, %v4972_v35, %v2037_v7  ;;  %3041 = vmatmul.bf16.gmra.mxu3 %v2416_v19  ;;  %v5169_v35 = vpop.f32.mrf.mxu0  ;;  %v2346_v7 = vsel %vm2343_vm11, %v2288_v13, %v2290_v1 }
 0x25b   : > { %2301 = vrot.lane.b32.xlu0 %v5155_v24, %s4191_s17 }
 0x25c   : > { %v2035_v5 = vpop.permute.xlu0 %2034 }
 0x25d   : > { %v5161_v40 = vsel %vm2111_vm6, %v1908_v2, %v2035_v5  ;;  %v2368_v2 = vsel %vm2244_vm8, %v4865_v41, %v2189_v54 }
 0x25e   : > { %2957 = vmatmul.bf16.gmra.mxu2 %v2247_v11  ;;  %2202 = vrot.lane.b32.xlu1 %v5161_v40, %s4190_s27 }
 0x25f   : > { %3905 = vmatmul.msk.bf16.gmra.mxu0 %vm2705_vm12, %v2345_v6  ;;  %2297 = vrot.lane.b32.xlu2 %v5161_v40, %s4191_s17  ;;  %v5238_v6 = vpop.f32.mrf.mxu3 }
 0x262   : > { %v5180_v34 = vpop.f32.mrf.mxu0 }
 0x263   : > { %2303 = vrot.lane.b32.xlu0 %v4547_v52, %s4191_s17 }
 0x264   : > { %v2193_v10 = vpop.permute.xlu0 %2192 }
 0x266   : > { %2204 = vrot.lane.b32.xlu1 %v2081_v36, %s4190_s27 }
 0x267   : > { %2299 = vrot.lane.b32.xlu2 %v2081_v36, %s4191_s17  ;;  %2868 = vmatmul.bf16.gmra.mxu1 %v2368_v2  ;;  %v2371_v36 = vsel %vm2244_vm8, %v4945_v49, %v2193_v10 }
 0x269   : > { %v2195_v61 = vpop.permute.xlu1 %2194 }
 0x26a   : > { %3046 = vmatmul.bf16.gmra.mxu3 %v2420_v39  ;;  %v2248_v25 = vsel %vm2244_vm8, %v2193_v10, %v2195_v61  ;;  %v5191_v41 = vpop.f32.mrf.mxu0  ;;  %v2016_v10 = vrot.slane %v4608_v22, 1 }
 0x26b   : > { %2210 = vrot.lane.b32.xlu0 %v4543_v51, %s4190_s27 }
 0x26c   : > { %v2292_v4 = vpop.permute.xlu0 %2291 }
 0x26e   : > { %2305 = vrot.lane.b32.xlu1 %v4543_v51, %s4191_s17  ;;  %2962 = vmatmul.bf16.gmra.mxu2 %v2248_v25  ;;  %v2424_v51 = vsel %vm2343_vm11, %v2195_v61, %v2292_v4  ;;  %v2017_v25 = vrot.slane %v4631_v43, 1 }
 0x26f   : > { %3906 = vmatmul.msk.bf16.gmra.mxu0 %vm2705_vm12, %v2346_v7  ;;  %2206 = vrot.lane.b32.xlu2 %v5155_v24, %s4190_s27 }
 0x272   : > { %v5203_v1 = vpop.f32.mrf.mxu0 }
 0x273   : > { %2214 = vrot.lane.b32.xlu0 %v4616_v20, %s4190_s27 }
 0x276   : > { %2307 = vrot.lane.b32.xlu1 %v4621_v32, %s4191_s17  ;;  %v3980_v32 = vld [vmem:[%s729_s14] sm:$0xff]  ;;  %s3962_s14 = sshll.u32 %s5712_s21, 8 }
 0x277   : > { %2208 = vrot.lane.b32.xlu2 %v4547_v52, %s4190_s27  ;;  %2873 = vmatmul.bf16.gmra.mxu1 %v2371_v36  ;;  %v2197_v52 = vpop.permute.xlu2 %2196 }
 0x278   : > { %v2374_v49 = vsel %vm2244_vm8, %v4976_v58, %v2197_v52 }
 0x27a   : > { %3051 = vmatmul.bf16.gmra.mxu3 %v2424_v51 }
 0x27b   : > { %2313 = vrot.lane.b32.xlu0 %v4650_v15, %s4191_s17 }
 0x27e   : > { %2311 = vrot.lane.b32.xlu1 %v4672_v59, %s4191_s17  ;;  %v5223_v59 = vpop.f32.mrf.mxu0 }
 0x27f   : > { %2309 = vrot.lane.b32.xlu2 %v4616_v20, %s4191_s17  ;;  %v5221_v20 = vpop.f32.mrf.mxu2 }
 0x283   : > { %2317 = vrot.lane.b32.xlu0 %v4896_v18, %s4191_s17 }
 0x286   : > { %2218 = vrot.lane.b32.xlu1 %v4650_v15, %s4190_s27  ;;  %v5236_v58 = vpop.f32.mrf.mxu0 }
 0x287   : > { %1273 = vrot.lane.b32.xlu2 %v3980_v32, %s5686_s16  ;;  %2878 = vmatmul.bf16.gmra.mxu1 %v2374_v49  ;;  %v2835_v15 = vpop.f32.mrf.mxu2 }
 0x28b   : > { %v2294_v19 = vpop.permute.xlu1 %2293  ;;  %2321 = vrot.lane.b32.xlu0 %v4924_v47, %s4191_s17  ;;  %v2199_v54 = vpop.permute.xlu0 %2198 }
 0x28c   : > { %v2249_v5 = vsel %vm2244_vm8, %v2197_v52, %v2199_v54  ;;  %v2347_v11 = vsel %vm2343_vm11, %v2292_v4, %v2294_v19 }
 0x28d   : > { %2967 = vmatmul.bf16.gmra.mxu2 %v2249_v5  ;;  %3907 = vmatmul.msk.bf16.gmra.mxu0 %vm2705_vm12, %v2347_v11 }
 0x28e   : > { %2222 = vrot.lane.b32.xlu1 %v4896_v18, %s4190_s27  ;;  %v2836_v18 = vadd.f32 %v4989_v33, %v2835_v15  ;;  %v5249_v2 = vpop.f32.mrf.mxu0 }
 0x28f   : > { %2315 = vrot.lane.b32.xlu2 %v4717_v26, %s4191_s17  ;;  %v5247_v26 = vpop.f32.mrf.mxu2 }
 0x293   : > { %2325 = vrot.lane.b32.xlu0 %v5053_v16, %s4191_s17 }
 0x296   : > { %2226 = vrot.lane.b32.xlu1 %v4924_v47, %s4190_s27  ;;  %v5267_v4 = vpop.f32.mrf.mxu0 }
 0x297   : > { %2319 = vrot.lane.b32.xlu2 %v4584_v55, %s4191_s17 }
 0x29b   : > { %2327 = vrot.lane.b32.xlu0 %v4885_v53, %s4191_s17 }
 0x29d   : > { %v2924_v13 = vpop.f32.mrf.mxu3 }
 0x29e   : > { %v5251_v39 = vadd.f32 %v2924_v13, %v2836_v18  ;;  %2230 = vrot.lane.b32.xlu1 %v5053_v16, %s4190_s27  ;;  %v2840_v16 = vpop.f32.mrf.mxu2  ;;  %v5279_v43 = vpop.f32.mrf.mxu0 }
 0x29f   : > { %2323 = vrot.lane.b32.xlu2 %v4642_v9, %s4191_s17  ;;  %v2018_v9 = vsel %vm1967_vm5, %v2016_v10, %v2017_v25 }
 0x2a0   : > { %v2296_v47 = vpop.permute.xlu1 %2295  ;;  %v2201_v55 = vpop.permute.xlu0 %2200 }
 0x2a1   : > { %v2377_v53 = vsel %vm2244_vm8, %v5045_v21, %v2201_v55  ;;  %v2428_v61 = vsel %vm2343_vm11, %v2199_v54, %v2296_v47  ;;  %v2841_v21 = vadd.f32 %v4989_v33, %v2840_v16 }
 0x2a2   : > { %2883 = vmatmul.bf16.gmra.mxu1 %v2377_v53  ;;  %3056 = vmatmul.bf16.gmra.mxu3 %v2428_v61 }
 0x2a3   : > { %2234 = vrot.lane.b32.xlu0 %v5097_v50, %s4190_s27 }
 0x2a5   : > { %v5264_v7 = vpop.f32.mrf.mxu3 }
 0x2a6   : > { %v5275_v22 = vpop.f32.mrf.mxu2  ;;  %v5287_v5 = vpop.f32.mrf.mxu0 }
 0x2a7   : > { %2054 = vrot.lane.b32.xlu2 %v2018_v9, %s5678_s15  ;;  %5688 = vst [vmem:[#allocation10_spill] sm:$0xff] %v5275_v22 }
 0x2ab   : > { %2333 = vrot.lane.b32.xlu0 %v5124_v60, %s4191_s17 }
 0x2ad   : > { %v2929_v36 = vpop.f32.mrf.mxu3 }
 0x2ae   : > { %v5273_v51 = vadd.f32 %v2929_v36, %v2841_v21  ;;  %v2845_v32 = vpop.f32.mrf.mxu2  ;;  %v5299_v18 = vpop.f32.mrf.mxu0  ;;  %v3212_v21 = vld [vmem:[%s5669_s10 + $0x30] sm:$0xff] }
 0x2af   : > { %2329 = vrot.lane.b32.xlu2 %v5097_v50, %s4191_s17  ;;  %v2846_v54 = vadd.f32 %v4989_v33, %v2845_v32  ;;  %v4088_v50 = vld [vmem:[%s684_s19] sm:$0xff]   ;;  %v3211_v32 = vld [vmem:[%s5669_s10 + $0x28] sm:$0xff]  ;;  %s5488_s19 = scalar_lea.vmem %s5671_s12, %s3962_s14 }
 0x2b0   : > { %5687 = vst [vmem:[#allocation9_spill] sm:$0xff] %v5273_v51  ;;  %v4089_v13 = vunpack.c.l.bf16 %v4088_v50 }
 0x2b2   : > { %v1253_v61 = vmul.f32 %v4775_v45, %v4089_v13 }
 0x2b4   : > { %v1255_v36 = vadd.f32 %v4785_v57, %v1253_v61 }
 0x2b5   : > { %v5281_v52 = vpop.f32.mrf.mxu3 }
 0x2b6   : > { %5689 = vst [vmem:[#allocation11_spill] sm:$0xff] %v5281_v52  ;;  %v5307_v9 = vpop.f32.mrf.mxu0 }
 0x2b7   : > { %2331 = vrot.lane.b32.xlu2 %v4799_v38, %s4191_s17 }
 0x2b9   : > { %v2298_v49 = vpop.permute.xlu2 %2297 }
 0x2ba   : > { %v2348_v19 = vsel %vm2343_vm11, %v2296_v47, %v2298_v49  ;;  %v4090_v47 = vunpack.c.h.bf16 %v4088_v50  ;;  %v3210_v50 = vld [vmem:[%s5669_s10 + $0x20] sm:$0xff] }
 0x2bb   : > { %3908 = vmatmul.msk.bf16.gmra.mxu0 %vm2705_vm12, %v2348_v19 }
 0x2bc   : > { %v1254_v10 = vmul.f32 %v4775_v45, %v4090_v47  ;;  %v3209_v47 = vld [vmem:[%s5669_s10 + $0x18] sm:$0xff] }
 0x2bd   : > { %v2934_v11 = vpop.f32.mrf.mxu3 }
 0x2be   : > { %v5290_v15 = vadd.f32 %v2934_v11, %v2846_v54  ;;  %v1256_v45 = vadd.f32 %v4785_v57, %v1254_v10  ;;  %v1257_v57 = vmax.f32 %v1255_v36, 0.0  ;;  %v5331_v10 = vpop.f32.mrf.mxu0 }
 0x2bf   : > { %2335 = vrot.lane.b32.xlu2 %v4939_v48, %s4191_s17  ;;  %v3213_v48 = vld [vmem:[%s5669_s10 + $0x38] sm:$0xff] }
 0x2c0   : > { %5690 = vst [vmem:[#allocation12_spill] sm:$0xff] %v5290_v15  ;;  %3322 = vmatpush.msrb.mxu1 %v3213_v48  ;;  %v1258_v13 = vmax.f32 %v1256_v45, 0.0  ;;  %v1259_v61 = vpack.c.bf16 %v1257_v57, %v1257_v57  ;;  %v3206_v45 = vld [vmem:[%s5669_s10] sm:$0xff] }
 0x2c1   : > { %v2300_v38 = vpop.permute.xlu2 %2299 }
 0x2c2   : > { %3323 = vmatpush.msrb.mxu1 %v3212_v21 }
 0x2c4   : > { %3324 = vmatpush.msrb.mxu1 %v3211_v32  ;;  %v5343_v32 = vpop.f32.mrf.mxu2 }
 0x2c5   : > { %5692 = vst [vmem:[#allocation14_spill] sm:$0xff] %v5343_v32 }
 0x2c6   : > { %3325 = vmatpush.msrb.mxu1 %v3210_v50 }
 0x2c8   : > { %3326 = vmatpush.msrb.mxu1 %v3209_v47  ;;  %v5345_v47 = vpop.f32.mrf.mxu0 }
 0x2c9   : > { %v2207_v53 = vpop.permute.xlu2 %2206 }
 0x2cc   : > { %v2948_v15 = vpop.f32.mrf.mxu2 }
 0x2cd   : > { %v2302_v25 = vpop.permute.xlu0 %2301 }
 0x2ce   : > { %v2349_v16 = vsel %vm2343_vm11, %v2300_v38, %v2302_v25  ;;  %v3207_v25 = vld [vmem:[%s5669_s10 + $0x8] sm:$0xff] }
 0x2cf   : > { %3909 = vmatmul.msk.bf16.gmra.mxu0 %vm2705_vm12, %v2349_v16  ;;  %v5336_v16 = vpop.f32.mrf.mxu3 }
 0x2d0   : > { %v2203_v49 = vpop.permute.xlu1 %2202  ;;  %5691 = vst [vmem:[#allocation13_spill] sm:$0xff] %v5336_v16 }
 0x2d1   : > { %v5318_v19 = vpop.permute.xlu2 %2208  ;;  %v2250_v54 = vsel %vm2244_vm8, %v2201_v55, %v2203_v49  ;;  %v2432_v11 = vsel %vm2343_vm11, %v2203_v49, %v2300_v38  ;;  %v3208_v55 = vld [vmem:[%s5669_s10 + $0x10] sm:$0xff]  ;;  %v1260_v38 = vpack.c.bf16 %v1258_v13, %v1258_v13  ;;  %v1265_v49 = vunpack.c.l.b16 %v1259_v61 }
 0x2d2   : > { %2972 = vmatmul.bf16.gmra.mxu2 %v2250_v54  ;;  %3061 = vmatmul.bf16.gmra.mxu3 %v2432_v11  ;;  %v2859_v11 = vpop.f32.mrf.mxu1 }
 0x2d3   : > { %3327 = vmatpush.msrb.mxu1 %v3208_v55  ;;  %v1266_v54 = vunpack.c.l.b16 %v1260_v38 }
 0x2d5   : > { %3328 = vmatpush.msrb.mxu1 %v3207_v25  ;;  %v2304_v50 = vpop.permute.xlu0 %2303  ;;  %v1267_v57 = vpack.c.b16 %v1266_v54, %v1265_v49 }
 0x2d6   : > { %v2436_v16 = vsel %vm2343_vm11, %v2207_v53, %v2304_v50 }
 0x2d7   : > { %3329 = vmatpush.msrb.mxu1 %v3206_v45  ;;  %v3037_v61 = vpop.f32.mrf.mxu3 }
 0x2d8   : > { %v2205_v48 = vpop.permute.xlu1 %2204 }
 0x2d9   : > { %v2310_v21 = vpop.permute.xlu2 %2309  ;;  %v2380_v36 = vsel %vm2244_vm8, %v5161_v40, %v2205_v48  ;;  %v2251_v25 = vsel %vm2244_vm8, %v2205_v48, %v2207_v53 }
 0x2da   : > { %2888 = vmatmul.bf16.gmra.mxu1 %v2380_v36  ;;  %v2861_v52 = vpop.f32.mrf.mxu1 }
 0x2e0   : > { %v2306_v13 = vpop.permute.xlu1 %2305 }
 0x2e1   : > { %v2350_v55 = vsel %vm2343_vm11, %v2304_v50, %v2306_v13  ;;  %v1274_v40 = vpop.permute.xlu2 %1273  ;;  %v3126_v50 = vpop.f32.mrf.mxu0 }
 0x2e2   : > { %v1277_v32 = vsel %vm780_vm0, %v1267_v57, %v1274_v40  ;;  %2977 = vmatmul.bf16.gmra.mxu2 %v2251_v25  ;;  %3066 = vmatmul.bf16.gmra.mxu3 %v2436_v16  ;;  %v2383_v16 = vsel %vm2244_vm8, %v5155_v24, %v5318_v19  ;;  %v2771_v57 = vadd.f32 %v4989_v33, %v5142_v14  ;;  %v3039_v40 = vpop.f32.mrf.mxu3 }
 0x2e3   : > { %v1320_v38 = vunpack.c.l.bf16 %v1277_v32  ;;  %v1321_v36 = vunpack.c.h.bf16 %v1277_v32  ;;  %3910 = vmatmul.msk.bf16.gmra.mxu0 %vm2705_vm12, %v2350_v55  ;;  %v2950_v55 = vpop.f32.mrf.mxu2 }
 0x2e4   : > { %v2860_v25 = vadd.f32 %v2859_v11, %v2771_v57 }
 0x2e5   : > { %v1323_v45 = vmul.f32 %v1320_v38, %v4527_v62  ;;  %v1324_v49 = vmul.f32 %v1321_v36, %v4527_v62  ;;  %v2211_v38 = vpop.permute.xlu0 %2210 }
 0x2e6   : > { %v2949_v14 = vadd.f32 %v2948_v15, %v2860_v25 }
 0x2e7   : > { %v1325_v54 = vpack.c.bf16 %v1323_v45, %v1323_v45  ;;  %v1326_v13 = vpack.c.bf16 %v1324_v49, %v1324_v49 }
 0x2e8   : > { %v2308_v36 = vpop.permute.xlu1 %2307 }
 0x2e9   : > { %v1381_v48 = vunpack.c.l.b16 %v1325_v54  ;;  %v1382_v22 = vunpack.c.l.b16 %v1326_v13  ;;  %v5354_v53 = vpop.permute.xlu2 %2315  ;;  %v2252_v13 = vsel %vm2244_vm8, %v5318_v19, %v2211_v38  ;;  %v2440_v24 = vsel %vm2343_vm11, %v2211_v38, %v2308_v36 }
 0x2ea   : > { %2893 = vmatmul.bf16.gmra.mxu1 %v2383_v16  ;;  %v2351_v51 = vsel %vm2343_vm11, %v2308_v36, %v2310_v21  ;;  %v2773_v38 = vadd.f32 %v4989_v33, %v5148_v42 }
 0x2eb   : > { %v1400_v32 = vpack.c.b16 %v1382_v22, %v1381_v48  ;;  %v2864_v48 = vpop.f32.mrf.mxu1  ;;  %v2953_v15 = vpop.f32.mrf.mxu2 }
 0x2ed   : > { %v1521_v62 = vshrl.u32 %v1400_v32, 16  ;;  %v1524_v45 = vshll.u32 %v1400_v32, 16  ;;  %v3038_v32 = vadd.f32 %v3037_v61, %v2949_v14  ;;  %v2776_v14 = vadd.f32 %v4989_v33, %v5169_v35 }
 0x2ef   : > { %v1523_v49 = vrot.slane %v1521_v62, 7  ;;  %v3128_v62 = vpop.f32.mrf.mxu0  ;;  %v3127_v36 = vadd.f32 %v3126_v50, %v3038_v32 }
 0x2f0   : > { %v2312_v50 = vpop.permute.xlu1 %2311 }
 0x2f1   : > { %v5361_v54 = vpop.permute.xlu2 %2319  ;;  %v1526_v16 = vor.u32 %v1524_v45, %v1523_v49  ;;  %v1601_v22 = vsel %vm4355_vm3, %v1523_v49, 0  ;;  %v2862_v45 = vadd.f32 %v2861_v52, %v2773_v38  ;;  %v3042_v49 = vpop.f32.mrf.mxu3  ;;  %v2865_v38 = vadd.f32 %v2864_v48, %v2776_v14 }
 0x2f2   : > { %2982 = vmatmul.bf16.gmra.mxu2 %v2252_v13  ;;  %3071 = vmatmul.bf16.gmra.mxu3 %v2440_v24  ;;  %v1891_v57 = vshll.u32 %v1601_v22, 16 }
 0x2f3   : > { %3911 = vmatmul.msk.bf16.gmra.mxu0 %vm2705_vm12, %v2351_v51  ;;  %v5372_v11 = vsel %vm4355_vm3, 0, %v1526_v16  ;;  %v2215_v51 = vpop.permute.xlu0 %2214  ;;  %v2951_v16 = vadd.f32 %v2950_v55, %v2862_v45  ;;  %v2866_v42 = vpop.f32.mrf.mxu1 }
 0x2f4   : > { %v1886_v19 = vshll.u32 %v5372_v11, 16  ;;  %v1884_v25 = vshrl.u32 %v5372_v11, 16  ;;  %v1893_v8 = vrot.slane %v1891_v57, 1  ;;  %v2019_v52 = vrot.slane %v5372_v11, 1  ;;  %v2955_v57 = vpop.f32.mrf.mxu2 }
 0x2f6   : > { %v1888_v21 = vrot.slane %v1886_v19, 1  ;;  %v3040_v19 = vadd.f32 %v3039_v40, %v2951_v16 }
 0x2f7   : > { %v3131_v32 = vpop.f32.mrf.mxu0 }
 0x2f8   : > { %v1889_v13 = vor.u32 %v1888_v21, %v1884_v25  ;;  %v2020_v25 = vrot.slane %v1601_v22, 1  ;;  %v2954_v22 = vadd.f32 %v2953_v15, %v2865_v38  ;;  %v2781_v15 = vadd.f32 %v4989_v33, %v5191_v41  ;;  %v2219_v38 = vpop.permute.xlu1 %2218 }
 0x2f9   : > { %v5378_v24 = vpop.permute.xlu2 %2323  ;;  %v3044_v55 = vpop.f32.mrf.mxu3 }
 0x2fa   : > { %v1894_v61 = vsel %vm1678_vm4, %v1889_v13, %v1893_v8  ;;  %3920 = vmatmul.msk.f32.vlgmr.msrb.gmra.mxu1 %vm780_vm0, %v3127_v36  ;;  %v2253_v13 = vsel %vm2244_vm8, %v4825_v56, %v2215_v51  ;;  %v2444_v36 = vsel %vm2343_vm11, %v2215_v51, %v2312_v50  ;;  %v3129_v8 = vadd.f32 %v3128_v62, %v3040_v19 }
 0x2fb   : > { %1929 = vrot.lane.b32.xlu1 %v1894_v61, %s5693_s13  ;;  %v2314_v45 = vpop.permute.xlu0 %2313  ;;  %v2021_v61 = vsel %vm1967_vm5, %v2019_v52, %v2020_v25  ;;  %v2778_v56 = vadd.f32 %v4989_v33, %v5180_v34  ;;  %v3043_v48 = vadd.f32 %v3042_v49, %v2954_v22  ;;  %v2869_v62 = vpop.f32.mrf.mxu1 }
 0x2fc   : > { %v2352_v40 = vsel %vm2343_vm11, %v2312_v50, %v2314_v45  ;;  %v2958_v14 = vpop.f32.mrf.mxu2  ;;  %v2870_v25 = vadd.f32 %v2869_v62, %v2781_v15 }
 0x2fd   : > { %v2867_v51 = vadd.f32 %v2866_v42, %v2778_v56  ;;  %v3132_v16 = vadd.f32 %v3131_v32, %v3043_v48  ;;  %v2254_v42 = vsel %vm2244_vm8, %v4843_v44, %v2219_v38  ;;  %v2448_v32 = vsel %vm2343_vm11, %v2219_v38, %v5354_v53 }
 0x2fe   : > { %v2783_v44 = vadd.f32 %v4989_v33, %v5203_v1  ;;  %v2786_v48 = vadd.f32 %v4989_v33, %v5223_v59 }
 0x2ff   : > { %v2956_v19 = vadd.f32 %v2955_v57, %v2867_v51 }
 0x300   : > { %v2223_v56 = vpop.permute.xlu1 %2222 }
 0x301   : > { %v2055_v21 = vpop.permute.xlu2 %2054  ;;  %v3047_v50 = vpop.f32.mrf.mxu3  ;;  %v3045_v52 = vadd.f32 %v3044_v55, %v2956_v19  ;;  %v2255_v1 = vsel %vm2244_vm8, %v4861_v37, %v2223_v56  ;;  %v2788_v37 = vadd.f32 %v4989_v33, %v5236_v58 }
 0x302   : > { %v2145_v35 = vsel %vm2111_vm6, %v4841_v23, %v2055_v21  ;;  %2987 = vmatmul.bf16.gmra.mxu2 %v2253_v13  ;;  %3076 = vmatmul.bf16.gmra.mxu3 %v2444_v36  ;;  %v3133_v23 = vpop.f32.mrf.mxu0  ;;  %v2959_v13 = vadd.f32 %v2958_v14, %v2870_v25 }
 0x303   : > { %2056 = vrot.lane.b32.xlu1 %v2021_v61, %s5678_s15  ;;  %2337 = vrot.lane.b32.xlu0 %v2145_v35, %s4191_s17  ;;  %v2871_v34 = vpop.f32.mrf.mxu1  ;;  %v2318_v49 = vpop.permute.xlu0 %2317  ;;  %v3134_v21 = vadd.f32 %v3133_v23, %v3045_v52  ;;  %v2452_v23 = vsel %vm2343_vm11, %v2223_v56, %v5361_v54 }
 0x304   : > { %3912 = vmatmul.msk.bf16.gmra.mxu0 %vm2705_vm12, %v2352_v40  ;;  %3921 = vmatmul.msk.f32.gmra.mxu1 %vm780_vm0, %v3129_v8  ;;  %v2353_v57 = vsel %vm2343_vm11, %v5354_v53, %v2318_v49  ;;  %v2960_v41 = vpop.f32.mrf.mxu2  ;;  %v3048_v36 = vadd.f32 %v3047_v50, %v2959_v13  ;;  %v2872_v55 = vadd.f32 %v2871_v34, %v2783_v44 }
 0x305   : > { %v2791_v13 = vadd.f32 %v4989_v33, %v5249_v2 }
 0x306   : > { %v2961_v40 = vadd.f32 %v2960_v41, %v2872_v55 }
 0x309   : > { %v3049_v8 = vpop.f32.mrf.mxu3 }
 0x30b   : > { %2238 = vrot.lane.b32.xlu1 %v5124_v60, %s4190_s27  ;;  %v3136_v60 = vpop.f32.mrf.mxu0  ;;  %v2874_v61 = vpop.f32.mrf.mxu1 }
 0x30c   : > { %3922 = vmatmul.msk.f32.gmra.mxu1 %vm780_vm0, %v3132_v16  ;;  %v3137_v45 = vadd.f32 %v3136_v60, %v3048_v36  ;;  %v2963_v22 = vpop.f32.mrf.mxu2  ;;  %v2322_v51 = vpop.permute.xlu0 %2321  ;;  %v2875_v14 = vadd.f32 %v2874_v61, %v2786_v48 }
 0x30d   : > { %v2354_v19 = vsel %vm2343_vm11, %v5361_v54, %v2322_v51  ;;  %v2227_v54 = vpop.permute.xlu1 %2226 }
 0x30e   : > { %v2964_v15 = vadd.f32 %v2963_v22, %v2875_v14  ;;  %v2256_v58 = vsel %vm2244_vm8, %v4792_v63, %v2227_v54  ;;  %v2456_v44 = vsel %vm2343_vm11, %v2227_v54, %v5378_v24  ;;  %v2793_v63 = vadd.f32 %v4989_v33, %v5267_v4 }
 0x311   : > { %v3052_v62 = vpop.f32.mrf.mxu3 }
 0x312   : > { %2992 = vmatmul.bf16.gmra.mxu2 %v2254_v42  ;;  %3081 = vmatmul.bf16.gmra.mxu3 %v2448_v32  ;;  %v3053_v38 = vadd.f32 %v3052_v62, %v2964_v15 }
 0x313   : > { %2242 = vrot.lane.b32.xlu1 %v2145_v35, %s4190_s27  ;;  %v3138_v53 = vpop.f32.mrf.mxu0  ;;  %v3050_v35 = vadd.f32 %v3049_v8, %v2961_v40  ;;  %v2876_v50 = vpop.f32.mrf.mxu1 }
 0x314   : > { %3913 = vmatmul.msk.bf16.gmra.mxu0 %vm2705_vm12, %v2353_v57  ;;  %3923 = vmatmul.msk.f32.gmra.mxu1 %vm780_vm0, %v3134_v21  ;;  %v2965_v52 = vpop.f32.mrf.mxu2  ;;  %v2877_v25 = vadd.f32 %v2876_v50, %v2788_v37  ;;  %v2326_v57 = vpop.permute.xlu0 %2325 }
 0x315   : > { %v3139_v16 = vadd.f32 %v3138_v53, %v3050_v35  ;;  %v2330_v50 = vpop.permute.xlu2 %2329 }
 0x316   : > { %v2966_v42 = vadd.f32 %v2965_v52, %v2877_v25 }
 0x319   : > { %v3054_v34 = vpop.f32.mrf.mxu3 }
 0x31a   : > { %v3055_v60 = vadd.f32 %v3054_v34, %v2966_v42 }
 0x31b   : > { %v3141_v59 = vpop.f32.mrf.mxu0  ;;  %v2879_v32 = vpop.f32.mrf.mxu1 }
 0x31c   : > { %3924 = vmatmul.msk.f32.gmra.mxu1 %vm780_vm0, %v3137_v45  ;;  %v3142_v49 = vadd.f32 %v3141_v59, %v3053_v38  ;;  %v2968_v41 = vpop.f32.mrf.mxu2  ;;  %v2880_v55 = vadd.f32 %v2879_v32, %v2791_v13  ;;  %v2355_v45 = vsel %vm2343_vm11, %v5378_v24, %v2326_v57  ;;  %v2328_v48 = vpop.permute.xlu0 %2327 }
 0x31d   : > { %v2231_v24 = vpop.permute.xlu1 %2230  ;;  %v2356_v4 = vsel %vm2343_vm11, %v2328_v48, %v2330_v50  ;;  %v2332_v38 = vpop.permute.xlu2 %2331 }
 0x31e   : > { %v2969_v61 = vadd.f32 %v2968_v41, %v2880_v55  ;;  %v2257_v14 = vsel %vm2244_vm8, %v4833_v0, %v2231_v24 }
 0x322   : > { %2997 = vmatmul.bf16.gmra.mxu2 %v2255_v1  ;;  %3086 = vmatmul.bf16.gmra.mxu3 %v2452_v23 }
 0x323   : > { %v3143_v21 = vpop.f32.mrf.mxu0  ;;  %v2881_v40 = vpop.f32.mrf.mxu1 }
 0x324   : > { %3914 = vmatmul.msk.bf16.gmra.mxu0 %vm2705_vm12, %v2354_v19  ;;  %3925 = vmatmul.msk.f32.gmra.mxu1 %vm780_vm0, %v3139_v16  ;;  %v3144_v36 = vadd.f32 %v3143_v21, %v3055_v60  ;;  %v2970_v35 = vpop.f32.mrf.mxu2  ;;  %v2882_v56 = vadd.f32 %v2881_v40, %v2793_v63  ;;  %v2460_v19 = vsel %vm2343_vm11, %v2231_v24, %v2328_v48  ;;  %v2235_v15 = vpop.permute.xlu0 %2234 }
 0x325   : > { %v3057_v8 = vpop.f32.mrf.mxu3  ;;  %v2258_v0 = vsel %vm2244_vm8, %v5055_v27, %v2235_v15  ;;  %v2464_v34 = vsel %vm2343_vm11, %v2235_v15, %v2332_v38  ;;  %v5458_v27 = vld [vmem:[%s5666_s7] ss:$0 sm:$0xff]  ;;  %v2336_v15 = vpop.permute.xlu2 %2335 }
 0x326   : > { %v3058_v2 = vadd.f32 %v3057_v8, %v2969_v61  ;;  %v2971_v51 = vadd.f32 %v2970_v35, %v2882_v56 }
 0x32b   : > { %v2884_v59 = vpop.f32.mrf.mxu1 }
 0x32c   : > { %3926 = vmatmul.msk.f32.gmra.mxu1 %vm780_vm0, %v3142_v49  ;;  %v2334_v25 = vpop.permute.xlu0 %2333  ;;  %v2796_v49 = vadd.f32 %v4989_v33, %v5279_v43  ;;  %v2798_v33 = vadd.f32 %v5458_v27, %v5287_v5 }
 0x32d   : > { %v3059_v62 = vpop.f32.mrf.mxu3  ;;  %v2357_v42 = vsel %vm2343_vm11, %v2332_v38, %v2334_v25 }
 0x32e   : > { %v3060_v1 = vadd.f32 %v3059_v62, %v2971_v51  ;;  %v2885_v32 = vadd.f32 %v2884_v59, %v2796_v49  ;;  %v2803_v62 = vadd.f32 %v5458_v27, %v5307_v9  ;;  %v2806_v9 = vadd.f32 %v5458_v27, %v5331_v10 }
 0x332   : > { %3002 = vmatmul.bf16.gmra.mxu2 %v2256_v58  ;;  %3091 = vmatmul.bf16.gmra.mxu3 %v2456_v44 }
 0x333   : > { %v2886_v52 = vpop.f32.mrf.mxu1 }
 0x334   : > { %3915 = vmatmul.msk.bf16.gmra.mxu0 %vm2705_vm12, %v2355_v45  ;;  %3927 = vmatmul.msk.f32.gmra.mxu1 %vm780_vm0, %v3144_v36  ;;  %v2887_v58 = vadd.f32 %v2886_v52, %v2798_v33 }
 0x338   : > { %v3146_v53 = vpop.f32.mrf.mxu0 }
 0x339   : > { %v3147_v22 = vadd.f32 %v3146_v53, %v3058_v2  ;;  %v2801_v2 = vadd.f32 %v5458_v27, %v5299_v18 }
 0x33c   : > { %3928 = vmatmul.msk.f32.gmra.mxu1 %vm780_vm0, %v3147_v22 }
 0x340   : > { %v3148_v23 = vpop.f32.mrf.mxu0 }
 0x341   : > { %v3149_v16 = vadd.f32 %v3148_v23, %v3060_v1 }
 0x342   : > { %3007 = vmatmul.bf16.gmra.mxu2 %v2257_v14  ;;  %3096 = vmatmul.bf16.gmra.mxu3 %v2460_v19 }
 0x344   : > { %3916 = vmatmul.msk.bf16.gmra.mxu0 %vm2705_vm12, %v2356_v4  ;;  %3929 = vmatmul.msk.f32.gmra.mxu1 %vm780_vm0, %v3149_v16 }
 0x34c   : > { %v3151_v37 = vpop.f32.mrf.mxu0 }
 0x352   : > { %3012 = vmatmul.bf16.gmra.mxu2 %v2258_v0  ;;  %3101 = vmatmul.bf16.gmra.mxu3 %v2464_v34 }
 0x354   : > { %3917 = vmatmul.msk.bf16.gmra.mxu0 %vm2705_vm12, %v2357_v42  ;;  %v3153_v41 = vpop.f32.mrf.mxu0 }
 0x355   : > { %v2973_v54 = vpop.f32.mrf.mxu2  ;;  %v3062_v21 = vpop.f32.mrf.mxu3 }
 0x356   : > { %v2974_v60 = vadd.f32 %v2973_v54, %v2885_v32 }
 0x357   : > { %v2889_v57 = vpop.f32.mrf.mxu1 }
 0x358   : > { %v3063_v13 = vadd.f32 %v3062_v21, %v2974_v60  ;;  %v2890_v53 = vadd.f32 %v2889_v57, %v2801_v2  ;;  %v2808_v60 = vadd.f32 %v5458_v27, %v5345_v47 }
 0x35a   : > { %v3152_v43 = vadd.f32 %v3151_v37, %v3063_v13  ;;  %v5479_v37 = vld [vmem:[%s5670_s11] ss:$0 sm:$0xff] }
 0x35c   : > { %3930 = vmatmul.msk.f32.gmra.mxu1 %vm780_vm0, %v3152_v43 }
 0x35d   : > { %v2975_v44 = vpop.f32.mrf.mxu2  ;;  %v3064_v36 = vpop.f32.mrf.mxu3 }
 0x35e   : > { %v2976_v8 = vadd.f32 %v2975_v44, %v2887_v58 }
 0x35f   : > { %v2891_v55 = vpop.f32.mrf.mxu1 }
 0x360   : > { %v3065_v45 = vadd.f32 %v3064_v36, %v2976_v8  ;;  %v3156_v61 = vpop.f32.mrf.mxu0  ;;  %v2892_v24 = vadd.f32 %v2891_v55, %v2803_v62 }
 0x362   : > { %v3154_v40 = vadd.f32 %v3153_v41, %v3065_v45 }
 0x364   : > { %3931 = vmatmul.msk.f32.gmra.mxu1 %vm780_vm0, %v3154_v40 }
 0x365   : > { %v2978_v63 = vpop.f32.mrf.mxu2  ;;  %v3067_v22 = vpop.f32.mrf.mxu3 }
 0x366   : > { %v2979_v5 = vadd.f32 %v2978_v63, %v2890_v53 }
 0x367   : > { %v2894_v35 = vpop.f32.mrf.mxu1 }
 0x368   : > { %v3068_v56 = vadd.f32 %v3067_v22, %v2979_v5  ;;  %v3158_v48 = vpop.f32.mrf.mxu0  ;;  %v2895_v52 = vadd.f32 %v2894_v35, %v2806_v9  ;;  %v2813_v35 = vadd.f32 %v5458_v27, %v4982_v31 }
 0x36a   : > { %v3157_v51 = vadd.f32 %v3156_v61, %v3068_v56  ;;  %v2902_v62 = vadd.f32 %v5007_v17, %v2813_v35 }
 0x36c   : > { %3932 = vmatmul.msk.f32.gmra.mxu1 %vm780_vm0, %v3157_v51 }
 0x36d   : > { %v1930_v1 = vpop.permute.xlu1 %1929  ;;  %v2980_v18 = vpop.f32.mrf.mxu2 }
 0x36e   : > { %v2981_v23 = vadd.f32 %v2980_v18, %v2892_v24  ;;  %v3069_v16 = vpop.f32.mrf.mxu3  ;;  %v2110_v14 = vsel %vm2058_vm7, %v5372_v11, %v1930_v1 }
 0x36f   : > { %2339 = vrot.lane.b32.xlu2 %v2110_v14, %s4191_s17  ;;  %v2896_v19 = vpop.f32.mrf.mxu1 }
 0x370   : > { %v3070_v50 = vadd.f32 %v3069_v16, %v2981_v23  ;;  %v3161_v4 = vpop.f32.mrf.mxu0  ;;  %v2897_v41 = vadd.f32 %v2896_v19, %v2808_v60 }
 0x372   : > { %v3159_v59 = vadd.f32 %v3158_v48, %v3070_v50 }
 0x374   : > { %3933 = vmatmul.msk.f32.gmra.mxu1 %vm780_vm0, %v3159_v59 }
 0x375   : > { %v2057_v11 = vpop.permute.xlu1 %2056  ;;  %v2338_v38 = vpop.permute.xlu0 %2337 }
 0x376   : > { %v2358_v25 = vsel %vm2343_vm11, %v2336_v15, %v2338_v38  ;;  %v2983_v0 = vpop.f32.mrf.mxu2  ;;  %v3072_v34 = vpop.f32.mrf.mxu3  ;;  %v2147_v49 = vsel %vm2111_vm6, %v1930_v1, %v2057_v11  ;;  %v5694_v11 = vld [vmem:[#allocation2_spill] sm:$0xff] }
 0x377   : > { %v2984_v42 = vadd.f32 %v2983_v0, %v2895_v52  ;;  %2341 = vrot.lane.b32.xlu0 %v2147_v49, %s4191_s17  ;;  %3918 = vmatmul.msk.bf16.gmra.mxu0 %vm2705_vm12, %v2358_v25  ;;  %v3331_v10 = vpop.f32.mrf.mxu1 }
 0x378   : > { %v3163_v32 = vpop.f32.mrf.mxu0  ;;  %v3332_v54 = vadd.f32 %v5479_v37, %v3331_v10 }
 0x379   : > { %v3073_v21 = vadd.f32 %v3072_v34, %v2984_v42 }
 0x37a   : > { %3428 = vst.msk [vmem:[%s5488_s19] sm:$0xff] %vm3427_vm13, %v3332_v54 }
 0x37b   : > { %v3162_v57 = vadd.f32 %v3161_v4, %v3073_v21  ;;  %v5695_v21 = vld [vmem:[#allocation4_spill] sm:$0xff] }
 0x37d   : > { %v2239_v13 = vpop.permute.xlu1 %2238  ;;  %3934 = vmatmul.msk.f32.gmra.mxu1 %vm780_vm0, %v3162_v57 }
 0x37e   : > { %v2985_v33 = vpop.f32.mrf.mxu2  ;;  %v3074_v43 = vpop.f32.mrf.mxu3  ;;  %v2259_v58 = vsel %vm2244_vm8, %v4934_v28, %v2239_v13  ;;  %v2468_v44 = vsel %vm2343_vm11, %v2239_v13, %v2336_v15  ;;  %v2818_v15 = vadd.f32 %v5458_v27, %v5012_v29 }
 0x37f   : > { %v2986_v36 = vadd.f32 %v2985_v33, %v2897_v41  ;;  %3017 = vmatmul.bf16.gmra.mxu2 %v2259_v58  ;;  %3106 = vmatmul.bf16.gmra.mxu3 %v2468_v44 }
 0x380   : > { %v2907_v38 = vadd.f32 %v5694_v11, %v2818_v15 }
 0x381   : > { %v3075_v8 = vadd.f32 %v3074_v43, %v2986_v36  ;;  %v3166_v55 = vpop.f32.mrf.mxu0  ;;  %v3334_v47 = vpop.f32.mrf.mxu1  ;;  %v5696_v43 = vld [vmem:[#allocation3_spill] sm:$0xff]  ;;  %v5697_v36 = vld [vmem:[#allocation5_spill] sm:$0xff] }
 0x382   : > { %v3335_v45 = vadd.f32 %v5479_v37, %v3334_v47  ;;  %v2823_v58 = vadd.f32 %v5458_v27, %v5696_v43 }
 0x383   : > { %v3164_v61 = vadd.f32 %v3163_v32, %v3075_v8 }
 0x384   : > { %3429 = vst.msk [vmem:[%s5488_s19 + $0x8] sm:$0xff] %vm3427_vm13, %v3335_v45  ;;  %v2912_v8 = vadd.f32 %v5697_v36, %v2823_v58 }
 0x385   : > { %3935 = vmatmul.msk.f32.gmra.mxu1 %vm780_vm0, %v3164_v61  ;;  %v5507_v56 = vpop.permute.xlu1 %2242 }
 0x386   : > { %v2988_v2 = vpop.f32.mrf.mxu2  ;;  %v3077_v40 = vpop.f32.mrf.mxu3  ;;  %v2260_v24 = vsel %vm2244_vm8, %v5119_v3, %v5507_v56 }
 0x387   : > { %v2989_v28 = vadd.f32 %v2988_v2, %v4998_v30 }
 0x389   : > { %v3078_v53 = vadd.f32 %v3077_v40, %v2989_v28  ;;  %v3168_v63 = vpop.f32.mrf.mxu0  ;;  %v3337_v22 = vpop.f32.mrf.mxu1 }
 0x38a   : > { %v3338_v5 = vadd.f32 %v5479_v37, %v3337_v22 }
 0x38b   : > { %v3167_v48 = vadd.f32 %v3166_v55, %v3078_v53 }
 0x38c   : > { %3430 = vst.msk [vmem:[%s5488_s19 + $0x10] sm:$0xff] %vm3427_vm13, %v3338_v5  ;;  %v5698_v5 = vld [vmem:[#allocation6_spill] sm:$0xff] }
 0x38d   : > { %3936 = vmatmul.msk.f32.gmra.mxu1 %vm780_vm0, %v3167_v48 }
 0x38e   : > { %v2990_v51 = vpop.f32.mrf.mxu2  ;;  %v3079_v30 = vpop.f32.mrf.mxu3 }
 0x38f   : > { %v2991_v1 = vadd.f32 %v2990_v51, %v2902_v62  ;;  %3022 = vmatmul.bf16.gmra.mxu2 %v2260_v24  ;;  %v5699_v24 = vld [vmem:[#allocation7_spill] sm:$0xff] }
 0x391   : > { %v3080_v18 = vadd.f32 %v3079_v30, %v2991_v1  ;;  %v3171_v31 = vpop.f32.mrf.mxu0  ;;  %v3340_v23 = vpop.f32.mrf.mxu1  ;;  %v2828_v1 = vadd.f32 %v5458_v27, %v5699_v24  ;;  %v5702_v24 = vld [vmem:[#allocation10_spill] sm:$0xff] }
 0x392   : > { %v3341_v16 = vadd.f32 %v5479_v37, %v3340_v23 }
 0x393   : > { %v3169_v14 = vadd.f32 %v3168_v63, %v3080_v18 }
 0x394   : > { %3431 = vst.msk [vmem:[%s5488_s19 + $0x18] sm:$0xff] %vm3427_vm13, %v3341_v16 }
 0x395   : > { %3937 = vmatmul.msk.f32.gmra.mxu1 %vm780_vm0, %v3169_v14 }
 0x396   : > { %v2993_v17 = vpop.f32.mrf.mxu2  ;;  %v3082_v19 = vpop.f32.mrf.mxu3 }
 0x397   : > { %v2994_v50 = vadd.f32 %v2993_v17, %v5026_v46 }
 0x399   : > { %v3083_v4 = vadd.f32 %v3082_v19, %v2994_v50  ;;  %v3173_v59 = vpop.f32.mrf.mxu0  ;;  %v3343_v3 = vpop.f32.mrf.mxu1 }
 0x39a   : > { %v3344_v9 = vadd.f32 %v5479_v37, %v3343_v3 }
 0x39b   : > { %v3172_v52 = vadd.f32 %v3171_v31, %v3083_v4  ;;  %v5700_v31 = vld [vmem:[#allocation8_spill] sm:$0xff] }
 0x39c   : > { %3432 = vst.msk [vmem:[%s5488_s19 + $0x20] sm:$0xff] %vm3427_vm13, %v3344_v9  ;;  %v2917_v23 = vadd.f32 %v5700_v31, %v2828_v1  ;;  %v2843_v1 = vadd.f32 %v5458_v27, %v5702_v24  ;;  %v5703_v31 = vld [vmem:[#allocation11_spill] sm:$0xff] }
 0x39d   : > { %3938 = vmatmul.msk.f32.gmra.mxu1 %vm780_vm0, %v3172_v52 }
 0x39e   : > { %v2995_v25 = vpop.f32.mrf.mxu2  ;;  %v3084_v0 = vpop.f32.mrf.mxu3 }
 0x39f   : > { %v2996_v34 = vadd.f32 %v2995_v25, %v2907_v38 }
 0x3a1   : > { %v3085_v46 = vadd.f32 %v3084_v0, %v2996_v34  ;;  %v3176_v49 = vpop.f32.mrf.mxu0  ;;  %v3346_v42 = vpop.f32.mrf.mxu1  ;;  %v2833_v0 = vadd.f32 %v5458_v27, %v5221_v20 }
 0x3a2   : > { %v3347_v10 = vadd.f32 %v5479_v37, %v3346_v42 }
 0x3a3   : > { %v3174_v32 = vadd.f32 %v3173_v59, %v3085_v46  ;;  %v2922_v46 = vadd.f32 %v5238_v6, %v2833_v0 }
 0x3a4   : > { %3433 = vst.msk [vmem:[%s5488_s19 + $0x28] sm:$0xff] %vm3427_vm13, %v3347_v10 }
 0x3a5   : > { %3939 = vmatmul.msk.f32.gmra.mxu1 %vm780_vm0, %v3174_v32 }
 0x3a6   : > { %v2998_v29 = vpop.f32.mrf.mxu2  ;;  %v3087_v54 = vpop.f32.mrf.mxu3 }
 0x3a7   : > { %v2999_v60 = vadd.f32 %v2998_v29, %v5695_v21 }
 0x3a9   : > { %v3088_v57 = vadd.f32 %v3087_v54, %v2999_v60  ;;  %v3178_v41 = vpop.f32.mrf.mxu0  ;;  %v3349_v13 = vpop.f32.mrf.mxu1 }
 0x3aa   : > { %v3350_v33 = vadd.f32 %v5479_v37, %v3349_v13 }
 0x3ab   : > { %v3177_v44 = vadd.f32 %v3176_v49, %v3088_v57 }
 0x3ac   : > { %3434 = vst.msk [vmem:[%s5488_s19 + $0x30] sm:$0xff] %vm3427_vm13, %v3350_v33 }
 0x3ad   : > { %3940 = vmatmul.msk.f32.gmra.mxu1 %vm780_vm0, %v3177_v44 }
 0x3ae   : > { %v3000_v55 = vpop.f32.mrf.mxu2  ;;  %v3089_v47 = vpop.f32.mrf.mxu3 }
 0x3af   : > { %v3001_v45 = vadd.f32 %v3000_v55, %v2912_v8 }
 0x3b1   : > { %v3090_v61 = vadd.f32 %v3089_v47, %v3001_v45  ;;  %v3181_v2 = vpop.f32.mrf.mxu0  ;;  %v3352_v40 = vpop.f32.mrf.mxu1 }
 0x3b2   : > { %v3353_v28 = vadd.f32 %v5479_v37, %v3352_v40 }
 0x3b3   : > { %v3179_v53 = vadd.f32 %v3178_v41, %v3090_v61  ;;  %v2838_v41 = vadd.f32 %v5458_v27, %v5247_v26 }
 0x3b4   : > { %3435 = vst.msk [vmem:[%s5488_s19 + $0x38] sm:$0xff] %vm3427_vm13, %v3353_v28 }
 0x3b5   : > { %3941 = vmatmul.msk.f32.gmra.mxu1 %vm780_vm0, %v3179_v53  ;;  %v2927_v33 = vadd.f32 %v5264_v7, %v2838_v41 }
 0x3b6   : > { %v3003_v63 = vpop.f32.mrf.mxu2  ;;  %v3092_v22 = vpop.f32.mrf.mxu3 }
 0x3b7   : > { %v3004_v35 = vadd.f32 %v3003_v63, %v5698_v5  ;;  %v5701_v5 = vld [vmem:[#allocation9_spill] sm:$0xff] }
 0x3b9   : > { %v3093_v48 = vadd.f32 %v3092_v22, %v3004_v35  ;;  %v3183_v62 = vpop.f32.mrf.mxu0  ;;  %v3355_v51 = vpop.f32.mrf.mxu1 }
 0x3ba   : > { %v3356_v30 = vadd.f32 %v5479_v37, %v3355_v51 }
 0x3bb   : > { %v3182_v18 = vadd.f32 %v3181_v2, %v3093_v48 }
 0x3bc   : > { %3436 = vst.msk [vmem:[%s5488_s19 + $0x40] sm:$0xff] %vm3427_vm13, %v3356_v30 }
 0x3bd   : > { %3942 = vmatmul.msk.f32.gmra.mxu1 %vm780_vm0, %v3182_v18 }
 0x3be   : > { %v3005_v16 = vpop.f32.mrf.mxu2  ;;  %v3094_v14 = vpop.f32.mrf.mxu3 }
 0x3bf   : > { %v3006_v17 = vadd.f32 %v3005_v16, %v2917_v23  ;;  %v2932_v23 = vadd.f32 %v5703_v31, %v2843_v1 }
 0x3c1   : > { %v3095_v19 = vadd.f32 %v3094_v14, %v3006_v17  ;;  %v3358_v50 = vpop.f32.mrf.mxu1  ;;  %v3186_v3 = vpop.f32.mrf.mxu0 }
 0x3c2   : > { %v3359_v4 = vadd.f32 %v5479_v37, %v3358_v50 }
 0x3c3   : > { %v3184_v59 = vadd.f32 %v3183_v62, %v3095_v19 }
 0x3c4   : > { %3437 = vst.msk [vmem:[%s5488_s19 + $0x48] sm:$0xff] %vm3427_vm13, %v3359_v4 }
 0x3c5   : > { %3943 = vmatmul.msk.f32.gmra.mxu1 %vm780_vm0, %v3184_v59 }
 0x3c6   : > { %v3008_v9 = vpop.f32.mrf.mxu2  ;;  %v3097_v15 = vpop.f32.mrf.mxu3 }
 0x3c7   : > { %v3009_v52 = vadd.f32 %v3008_v9, %v5136_v12 }
 0x3c9   : > { %v3098_v11 = vadd.f32 %v3097_v15, %v3009_v52  ;;  %v2340_v38 = vpop.permute.xlu2 %2339  ;;  %v3188_v49 = vpop.f32.mrf.mxu0 }
 0x3ca   : > { %v2472_v25 = vsel %vm2343_vm11, %v5507_v56, %v2340_v38 }
 0x3cb   : > { %v3187_v34 = vadd.f32 %v3186_v3, %v3098_v11  ;;  %3111 = vmatmul.bf16.gmra.mxu3 %v2472_v25 }
 0x3cd   : > { %3944 = vmatmul.msk.f32.gmra.mxu1 %vm780_vm0, %v3187_v34 }
 0x3ce   : > { %v3010_v42 = vpop.f32.mrf.mxu2  ;;  %v3099_v10 = vpop.f32.mrf.mxu3 }
 0x3cf   : > { %v3011_v32 = vadd.f32 %v3010_v42, %v2922_v46 }
 0x3d1   : > { %v3100_v12 = vadd.f32 %v3099_v10, %v3011_v32  ;;  %v3191_v20 = vpop.f32.mrf.mxu0 }
 0x3d3   : > { %v3189_v29 = vadd.f32 %v3188_v49, %v3100_v12 }
 0x3d5   : > { %3945 = vmatmul.msk.f32.gmra.mxu1 %vm780_vm0, %v3189_v29 }
 0x3d6   : > { %v3013_v54 = vpop.f32.mrf.mxu2  ;;  %v3102_v56 = vpop.f32.mrf.mxu3 }
 0x3d7   : > { %v3014_v21 = vadd.f32 %v3013_v54, %v5251_v39 }
 0x3d9   : > { %v3103_v60 = vadd.f32 %v3102_v56, %v3014_v21  ;;  %v3361_v57 = vpop.f32.mrf.mxu1  ;;  %v3193_v8 = vpop.f32.mrf.mxu0 }
 0x3da   : > { %v3362_v6 = vadd.f32 %v5479_v37, %v3361_v57 }
 0x3db   : > { %v3192_v13 = vadd.f32 %v3191_v20, %v3103_v60 }
 0x3dc   : > { %3438 = vst.msk [vmem:[%s5488_s19 + $0x50] sm:$0xff] %vm3427_vm13, %v3362_v6 }
 0x3dd   : > { %3946 = vmatmul.msk.f32.gmra.mxu1 %vm780_vm0, %v3192_v13 }
 0x3de   : > { %v3015_v43 = vpop.f32.mrf.mxu2  ;;  %v3104_v39 = vpop.f32.mrf.mxu3 }
 0x3df   : > { %v3016_v58 = vadd.f32 %v3015_v43, %v2927_v33  ;;  %v5704_v33 = vld [vmem:[#allocation12_spill] sm:$0xff] }
 0x3e1   : > { %v3105_v44 = vadd.f32 %v3104_v39, %v3016_v58  ;;  %v3364_v36 = vpop.f32.mrf.mxu1 }
 0x3e2   : > { %v3365_v55 = vadd.f32 %v5479_v37, %v3364_v36 }
 0x3e3   : > { %v3194_v47 = vadd.f32 %v3193_v8, %v3105_v44  ;;  %v5705_v44 = vld [vmem:[#allocation14_spill] sm:$0xff] }
 0x3e4   : > { %3439 = vst.msk [vmem:[%s5488_s19 + $0x58] sm:$0xff] %vm3427_vm13, %v3365_v55  ;;  %v2848_v36 = vadd.f32 %v5458_v27, %v5705_v44 }
 0x3e5   : > { %3947 = vmatmul.msk.f32.gmra.mxu1 %vm780_vm0, %v3194_v47  ;;  %v5706_v47 = vld [vmem:[#allocation13_spill] sm:$0xff] }
 0x3e9   : > { %v2342_v26 = vpop.permute.xlu0 %2341  ;;  %v3367_v7 = vpop.f32.mrf.mxu1 }
 0x3ea   : > { %v2359_v45 = vsel %vm2343_vm11, %v2340_v38, %v2342_v26  ;;  %v3368_v61 = vadd.f32 %v5479_v37, %v3367_v7  ;;  %v2937_v26 = vadd.f32 %v5706_v47, %v2848_v36 }
 0x3eb   : > { %3919 = vmatmul.msk.bf16.gmra.mxu0 %vm2705_vm12, %v2359_v45 }
 0x3ec   : > { %3440 = vst.msk [vmem:[%s5488_s19 + $0x60] sm:$0xff] %vm3427_vm13, %v3368_v61 }
 0x3f1   : > { %v3370_v2 = vpop.f32.mrf.mxu1 }
 0x3f2   : > { %v3371_v40 = vadd.f32 %v5479_v37, %v3370_v2 }
 0x3f4   : > { %3441 = vst.msk [vmem:[%s5488_s19 + $0x68] sm:$0xff] %vm3427_vm13, %v3371_v40  ;;  %v3196_v62 = vpop.f32.mrf.mxu0 }
 0x3fa   : > { %v3373_v28 = vpop.f32.mrf.mxu1 }
 0x3fb   : > { %v3374_v53 = vadd.f32 %v5479_v37, %v3373_v28 }
 0x3fc   : > { %v3198_v59 = vpop.f32.mrf.mxu0 }
 0x3fd   : > { %3442 = vst.msk [vmem:[%s5488_s19 + $0x70] sm:$0xff] %vm3427_vm13, %v3374_v53 }
 0x402   : > { %v3018_v63 = vpop.f32.mrf.mxu2  ;;  %v3107_v22 = vpop.f32.mrf.mxu3 }
 0x403   : > { %v3019_v35 = vadd.f32 %v3018_v63, %v5701_v5  ;;  %v3376_v48 = vpop.f32.mrf.mxu1 }
 0x404   : > { %v3377_v51 = vadd.f32 %v5479_v37, %v3376_v48 }
 0x405   : > { %v3108_v30 = vadd.f32 %v3107_v22, %v3019_v35 }
 0x406   : > { %3443 = vst.msk [vmem:[%s5488_s19 + $0x78] sm:$0xff] %vm3427_vm13, %v3377_v51 }
 0x407   : > { %v3197_v18 = vadd.f32 %v3196_v62, %v3108_v30 }
 0x409   : > { %3948 = vmatmul.msk.f32.gmra.mxu1 %vm780_vm0, %v3197_v18 }
 0x40a   : > { %v3020_v16 = vpop.f32.mrf.mxu2  ;;  %v3109_v19 = vpop.f32.mrf.mxu3 }
 0x40b   : > { %v3021_v14 = vadd.f32 %v3020_v16, %v2932_v23  ;;  %v3379_v17 = vpop.f32.mrf.mxu1 }
 0x40c   : > { %v3380_v50 = vadd.f32 %v5479_v37, %v3379_v17 }
 0x40d   : > { %v3110_v4 = vadd.f32 %v3109_v19, %v3021_v14 }
 0x40e   : > { %3444 = vst.msk [vmem:[%s5488_s19 + $0x80] sm:$0xff] %vm3427_vm13, %v3380_v50 }
 0x40f   : > { %v3199_v3 = vadd.f32 %v3198_v59, %v3110_v4 }
 0x411   : > { %3949 = vmatmul.msk.f32.gmra.mxu1 %vm780_vm0, %v3199_v3 }
 0x412   : > { %v3023_v57 = vpop.f32.mrf.mxu2 }
 0x413   : > { %v3382_v9 = vpop.f32.mrf.mxu1  ;;  %v3024_v43 = vadd.f32 %v3023_v57, %v5704_v33 }
 0x414   : > { %v3383_v15 = vadd.f32 %v5479_v37, %v3382_v9 }
 0x416   : > { %3445 = vst.msk [vmem:[%s5488_s19 + $0x88] sm:$0xff] %vm3427_vm13, %v3383_v15 }
 0x41a   : > { %v3025_v55 = vpop.f32.mrf.mxu2 }
 0x41b   : > { %v3385_v52 = vpop.f32.mrf.mxu1  ;;  %v3026_v45 = vadd.f32 %v3025_v55, %v2937_v26 }
 0x41c   : > { %v3386_v11 = vadd.f32 %v5479_v37, %v3385_v52 }
 0x41e   : > { %3446 = vst.msk [vmem:[%s5488_s19 + $0x90] sm:$0xff] %vm3427_vm13, %v3386_v11 }
 0x423   : > { %v3388_v38 = vpop.f32.mrf.mxu1 }
 0x424   : > { %v3389_v25 = vadd.f32 %v5479_v37, %v3388_v38 }
 0x426   : > { %3447 = vst.msk [vmem:[%s5488_s19 + $0x98] sm:$0xff] %vm3427_vm13, %v3389_v25 }
 0x42b   : > { %v3391_v0 = vpop.f32.mrf.mxu1 }
 0x42c   : > { %v3392_v34 = vadd.f32 %v5479_v37, %v3391_v0 }
 0x42e   : > { %3448 = vst.msk [vmem:[%s5488_s19 + $0xa0] sm:$0xff] %vm3427_vm13, %v3392_v34 }
 0x433   : > { %v3394_v46 = vpop.f32.mrf.mxu1 }
 0x434   : > { %v3395_v49 = vadd.f32 %v5479_v37, %v3394_v46 }
 0x436   : > { %3449 = vst.msk [vmem:[%s5488_s19 + $0xa8] sm:$0xff] %vm3427_vm13, %v3395_v49 }
 0x43b   : > { %v3397_v42 = vpop.f32.mrf.mxu1 }
 0x43c   : > { %v3398_v10 = vadd.f32 %v5479_v37, %v3397_v42 }
 0x43e   : > { %3450 = vst.msk [vmem:[%s5488_s19 + $0xb0] sm:$0xff] %vm3427_vm13, %v3398_v10 }
 0x443   : > { %v3400_v32 = vpop.f32.mrf.mxu1 }
 0x444   : > { %v3401_v12 = vadd.f32 %v5479_v37, %v3400_v32 }
 0x446   : > { %3451 = vst.msk [vmem:[%s5488_s19 + $0xb8] sm:$0xff] %vm3427_vm13, %v3401_v12 }
 0x44b   : > { %v3403_v29 = vpop.f32.mrf.mxu1 }
 0x44c   : > { %v3404_v54 = vadd.f32 %v5479_v37, %v3403_v29 }
 0x44e   : > { %3452 = vst.msk [vmem:[%s5488_s19 + $0xc0] sm:$0xff] %vm3427_vm13, %v3404_v54  ;;  %v3112_v6 = vpop.f32.mrf.mxu3 }
 0x44f   : > { %v3113_v58 = vadd.f32 %v3112_v6, %v3024_v43 }
 0x453   : > { %v3406_v56 = vpop.f32.mrf.mxu1 }
 0x454   : > { %v3407_v21 = vadd.f32 %v5479_v37, %v3406_v56 }
 0x456   : > { %3453 = vst.msk [vmem:[%s5488_s19 + $0xc8] sm:$0xff] %vm3427_vm13, %v3407_v21  ;;  %v3114_v7 = vpop.f32.mrf.mxu3 }
 0x457   : > { %v3115_v61 = vadd.f32 %v3114_v7, %v3026_v45 }
 0x45b   : > { %v3409_v20 = vpop.f32.mrf.mxu1 }
 0x45c   : > { %v3410_v60 = vadd.f32 %v5479_v37, %v3409_v20 }
 0x45e   : > { %3454 = vst.msk [vmem:[%s5488_s19 + $0xd0] sm:$0xff] %vm3427_vm13, %v3410_v60 }
 0x463   : > { %v3412_v41 = vpop.f32.mrf.mxu1 }
 0x464   : > { %v3413_v13 = vadd.f32 %v5479_v37, %v3412_v41 }
 0x466   : > { %3455 = vst.msk [vmem:[%s5488_s19 + $0xd8] sm:$0xff] %vm3427_vm13, %v3413_v13 }
 0x468   : > { %v3201_v39 = vpop.f32.mrf.mxu0 }
 0x469   : > { %v3202_v8 = vadd.f32 %v3201_v39, %v3113_v58 }
 0x46b   : > { %3950 = vmatmul.msk.f32.gmra.mxu1 %vm780_vm0, %v3202_v8 }
 0x470   : > { %v3203_v2 = vpop.f32.mrf.mxu0 }
 0x471   : > { %v3204_v40 = vadd.f32 %v3203_v2, %v3115_v61 }
 0x473   : > { %3951 = vmatmul.msk.f32.gmra.mxu1 %vm780_vm0, %v3204_v40 }
 0x486   : > { %v3415_v28 = vpop.f32.mrf.mxu1 }
 0x487   : > { %v3416_v53 = vadd.f32 %v5479_v37, %v3415_v28 }
 0x489   : > { %3456 = vst.msk [vmem:[%s5488_s19 + $0xe0] sm:$0xff] %vm3427_vm13, %v3416_v53 }
 0x48e   : > { %v3418_v27 = vpop.f32.mrf.mxu1 }
 0x48f   : > { %v3419_v63 = vadd.f32 %v5479_v37, %v3418_v27 }
 0x491   : > { %3457 = vst.msk [vmem:[%s5488_s19 + $0xe8] sm:$0xff] %vm3427_vm13, %v3419_v63 }
 0x4e8   : > { %v3421_v22 = vpop.f32.mrf.mxu1 }
 0x4e9   : > { %v3422_v5 = vadd.f32 %v5479_v37, %v3421_v22 }
 0x4eb   : > { %3458 = vst.msk [vmem:[%s5488_s19 + $0xf0] sm:$0xff] %vm3427_vm13, %v3422_v5 }
 0x4f0   : > { %v3424_v35 = vpop.f32.mrf.mxu1 }
 0x4f1   : > { %v3425_v48 = vadd.f32 %v5479_v37, %v3424_v35 }
 0x4f3   : > { %3459 = vst.msk [vmem:[%s5488_s19 + $0xf8] sm:$0xff] %vm3427_vm13, %v3425_v48 }
 0x4f4 PF: > { %s22_s23 = sadd.s32 1, %s4184_s23   ;;  %s5707_s21 = smov %s4180_s22 }
 0x4f5   : > { %p19_p5 = scmp.ge.s32.totalorder %s22_s23, 4   ;;  %s5708_s22 = smov %s5710_s24 }
 0x4f7   :  { %21 = sbr.rel (!%p19_p5) target bundleno = 2 (0x2), region = 113 }

</bundles_post_ra>
